<compile_context>
chip_gen: v5e
topology: v5e:2x2
jax: 0.10.0
libtpu: 0.0.40
codegen_flags: <defaults>
</compile_context>

<pallas_src>
import functools

import jax
import jax.numpy as jnp
from jax.experimental import pallas as pl
from jax.experimental.pallas import tpu as pltpu


TA = 128  # flat-position tile (M dim of every MXU matmul); <= 16 f32 acc vregs


def _round_up(x, m):
    return ((x + m - 1) // m) * m


def _flowhead_kernel(x3_ref, mask_ref, w1_ref, b1_ref, w2_ref, b2_ref,
                     w3_ref, b3_ref, o_ref, buf1, buf2,
                     *, RS, FRONT, L_pad, PBUF, NT):
    """Fused Conv-BN-ReLU x2 + Conv for one image.

    Flat layout: pixel (r, c) of a zero-padded activation lives at flat index
    FRONT + (r + 1) * RS + OFF + c with RS = W + 8, OFF = 8, so every 3x3 tap of
    a conv is one contiguous pl.ds load of TA positions feeding the MXU
    directly.  The layer-1 input (x3_ref) additionally has the dx = -1/0/+1
    shifts folded into the channel dim (3 * C0 wide), so layer 1 needs only the
    3 dy taps.
    """
    J0 = FRONT + RS                      # flat index of the first output position
    tail = PBUF - J0 - L_pad

    # Zero the halo regions of the intermediate buffers once per image; the
    # (pad-masked) body stores cover [J0, J0 + L_pad) exactly.
    for buf in (buf1, buf2):
        buf[pl.ds(0, J0), :] = jnp.zeros((J0, buf.shape[1]), buf.dtype)
        if tail > 0:
            buf[pl.ds(J0 + L_pad, tail), :] = jnp.zeros((tail, buf.shape[1]),
                                                        buf.dtype)

    def tile_base(t):
        if isinstance(t, int):
            return t * TA
        return pl.multiple_of(t * TA, TA)

    def foreach_tile(body):
        # Short trip counts: full unroll (LLO scheduler visibility).  Large trip
        # counts: scf.for so code size / vreg live ranges stay bounded.
        if NT <= 16:
            for t in range(NT):
                body(t)
        else:
            @pl.loop(0, NT)
            def _(t):
                body(t)

    def taps3(base):
        """Layer 1: 3 dy taps, dx folded into the contraction dim (K = 3*C0)."""
        cout = w1_ref.shape[2]
        acc = jnp.zeros((TA, cout), jnp.float32)
        for dy in range(3):
            s = FRONT + dy * RS + base
            acc = acc + jnp.dot(x3_ref[0, pl.ds(s, TA), :], w1_ref[dy],
                                preferred_element_type=jnp.float32)
        return acc

    def taps9(src, w_ref, base):
        """Layers 2/3: unbroken 9-tap f32 accumulation chain."""
        cout = w_ref.shape[3]
        acc = jnp.zeros((TA, cout), jnp.float32)
        for dy in range(3):
            for dx in range(3):
                s = FRONT + dy * RS + (dx - 1) + base
                acc = acc + jnp.dot(src[pl.ds(s, TA), :], w_ref[dy, dx],
                                    preferred_element_type=jnp.float32)
        return acc

    # ---- layer 1: Cin -> 128 (BN folded) + ReLU ------------------------------
    def layer1(t):
        base = tile_base(t)
        acc = taps3(base)
        y = jnp.maximum(acc + b1_ref[...], 0.0) * mask_ref[pl.ds(base, TA), :]
        buf1[pl.ds(J0 + base, TA), :] = y.astype(buf1.dtype)

    foreach_tile(layer1)

    # ---- layer 2: 128 -> 64 (BN folded) + ReLU -------------------------------
    def layer2(t):
        base = tile_base(t)
        acc = taps9(buf1, w2_ref, base)
        y = jnp.maximum(acc + b2_ref[...], 0.0) * mask_ref[pl.ds(base, TA), :]
        buf2[pl.ds(J0 + base, TA), :] = y.astype(buf2.dtype)

    foreach_tile(layer2)

    # ---- layer 3: 64 -> 2, lane-dense transposed store -----------------------
    def layer3(t):
        base = tile_base(t)
        acc = taps9(buf2, w3_ref, base) + b3_ref[...]
        # (TA, 2) -> (2, TA): last dim of the store is TA = 128 (unmasked vst).
        o_ref[0, :, pl.ds(base, TA)] = jnp.transpose(acc).astype(o_ref.dtype)

    foreach_tile(layer3)


def fold_batchnorm(w_hwio, bias, gamma, beta, mean, var, eps=1e-5):
    """Fold an eval-mode BatchNorm2d into the preceding conv (exact)."""
    scale = gamma / jnp.sqrt(var + eps)          # (Cout,)
    w_folded = w_hwio * scale[None, None, None, :]
    b_folded = (bias - mean) * scale + beta
    return w_folded, b_folded


def flowhead_forward(x_nchw, params, batch_norm=True):
    """FlowHead forward. x_nchw: (N, Cin, H, W) f32 -> (N, 2, H, W) f32 (NCHW)."""
    N, C0, H, W = x_nchw.shape
    OFF = 8                   # in-row left padding (doubles as right halo of prev row)
    FRONT = 8                 # front padding so every tap offset is >= 0
    RS = W + OFF              # flat row stride
    L = H * RS                # flat conv-output positions (real ones)
    L_pad = _round_up(max(L, TA), TA)
    PBUF = _round_up(FRONT + 2 * RS + L_pad + 1, 8)
    J0 = FRONT + RS
    NT = L_pad // TA

    # ---- fold BN (eval mode) and cast weights once ---------------------------
    ws, bs = [], []
    for i, layer in enumerate(params):
        w, b = layer["w"], layer["b"]
        if batch_norm and i < 2:
            w, b = fold_batchnorm(w, b, layer["gamma"], layer["beta"],
                                  layer["mean"], layer["var"])
        ws.append(w.astype(jnp.bfloat16))
        bs.append(b.reshape(1, -1).astype(jnp.float32))
    w1, w2, w3 = ws
    b1, b2, b3 = bs
    c1, c2, c3 = w1.shape[-1], w2.shape[-1], w3.shape[-1]   # 128, 64, 2
    # dx-fold for layer 1: (3, 3, C0, c1) -> (3, 3*C0, c1); group g multiplies x[p-1+g].
    w1f = w1.reshape(3, 3 * C0, c1)

    # ---- padded flat input with the dx shifts folded into channels (XLA) -----
    xb = x_nchw.astype(jnp.bfloat16)
    x_rows = jnp.transpose(xb, (0, 2, 3, 1))                       # (N, H, W, C0)
    x_rows = jnp.pad(x_rows, ((0, 0), (0, 0), (OFF, 0), (0, 0)))   # rows of length RS
    x_flat = x_rows.reshape(N, L, C0)                              # (r,c) -> r*RS+OFF+c
    x_pad = jnp.pad(x_flat, ((0, 0), (J0, PBUF - J0 - L), (0, 0)))  # (N, PBUF, C0)
    zrow = jnp.zeros((N, 1, C0), x_pad.dtype)
    x3 = jnp.concatenate(
        [jnp.concatenate([zrow, x_pad[:, :-1, :]], axis=1),   # x[p-1]
         x_pad,                                               # x[p]
         jnp.concatenate([x_pad[:, 1:, :], zrow], axis=1)],   # x[p+1]
        axis=2)                                               # (N, PBUF, 3*C0)

    # Multiplicative pad mask over flat output positions: 1 for real pixels,
    # 0 for in-row padding slots and for the [L, L_pad) tail.
    pos = jnp.arange(L_pad)
    mask = ((pos < L) & (pos % RS >= OFF)).astype(jnp.float32).reshape(L_pad, 1)

    kernel = functools.partial(_flowhead_kernel, RS=RS, FRONT=FRONT,
                               L_pad=L_pad, PBUF=PBUF, NT=NT)

    # VMEM budget: double-buffered input/output/mask blocks + weights + scratch.
    vmem_est = (2 * PBUF * 3 * C0 * 2 + 2 * c3 * L_pad * 4 + 2 * L_pad * 4
                + PBUF * (c1 + c2) * 2
                + 2 * 2 * 9 * (C0 * c1 + c1 * c2 + c2 * c3)
                + 2 * 4 * (c1 + c2 + c3))
    vmem_limit = int(min(64 << 20, max(16 << 20, 2 * vmem_est)))

    out_flat = pl.pallas_call(
        kernel,
        out_shape=jax.ShapeDtypeStruct((N, c3, L_pad), jnp.float32),
        grid_spec=pltpu.PrefetchScalarGridSpec(
            num_scalar_prefetch=0,
            grid=(N,),
            in_specs=[
                pl.BlockSpec((1, PBUF, 3 * C0), lambda n: (n, 0, 0)),
                pl.BlockSpec((L_pad, 1), lambda n: (0, 0)),
                pl.BlockSpec((3, 3 * C0, c1), lambda n: (0, 0, 0)),
                pl.BlockSpec((1, c1), lambda n: (0, 0)),
                pl.BlockSpec((3, 3, c1, c2), lambda n: (0, 0, 0, 0)),
                pl.BlockSpec((1, c2), lambda n: (0, 0)),
                pl.BlockSpec((3, 3, c2, c3), lambda n: (0, 0, 0, 0)),
                pl.BlockSpec((1, c3), lambda n: (0, 0)),
            ],
            out_specs=pl.BlockSpec((1, c3, L_pad), lambda n: (n, 0, 0)),
            scratch_shapes=[
                pltpu.VMEM((PBUF, c1), jnp.bfloat16),   # padded layer-2 input
                pltpu.VMEM((PBUF, c2), jnp.bfloat16),   # padded layer-3 input
            ],
        ),
        compiler_params=pltpu.CompilerParams(
            dimension_semantics=("parallel",),
            vmem_limit_bytes=vmem_limit,
        ),
    )(x3, mask, w1f, b1, w2, b2, w3, b3)

    # (N, 2, L_pad) lane-dense slab -> NCHW (N, 2, H, W): drop padding columns.
    out = out_flat[:, :, :L].reshape(N, c3, H, RS)[:, :, :, OFF:OFF + W]
    return out


def init_flowhead_params(key, input_dim, batch_norm=True):
    """Deterministic parameter init (shapes follow the PyTorch module)."""
    dims = [(input_dim, 128), (128, 64), (64, 2)]
    params = []
    for i, (cin, cout) in enumerate(dims):
        key, kw, kb, kg, kbt, km, kv = jax.random.split(key, 7)
        w = jax.random.normal(kw, (3, 3, cin, cout), jnp.float32) * 0.05
        b = jax.random.normal(kb, (cout,), jnp.float32) * 0.05
        layer = {"w": w, "b": b}
        if batch_norm and i < 2:  # BN only after the first two convs
            layer["gamma"] = 1.0 + 0.1 * jax.random.normal(kg, (cout,), jnp.float32)
            layer["beta"] = 0.1 * jax.random.normal(kbt, (cout,), jnp.float32)
            layer["mean"] = 0.1 * jax.random.normal(km, (cout,), jnp.float32)
            layer["var"] = jnp.abs(jax.random.normal(kv, (cout,), jnp.float32)) + 0.5
        params.append(layer)
    return params


def _reference_forward(x_nchw, params, batch_norm=True):
    """Plain-JAX reference (lax.conv), with the same bf16 quantization points."""
    dn = ("NCHW", "HWIO", "NCHW")
    h = x_nchw.astype(jnp.bfloat16)
    n_layers = len(params)
    for i, layer in enumerate(params):
        w, b = layer["w"], layer["b"]
        if batch_norm and i < 2:
            w, b = fold_batchnorm(w, b, layer["gamma"], layer["beta"],
                                  layer["mean"], layer["var"])
        y = jax.lax.conv_general_dilated(
            h, w.astype(jnp.bfloat16), window_strides=(1, 1), padding="SAME",
            dimension_numbers=dn, preferred_element_type=jnp.float32)
        y = y + b.astype(jnp.float32)[None, :, None, None]
        if i < n_layers - 1:
            y = jnp.maximum(y, 0.0)
            h = y.astype(jnp.bfloat16)
        else:
            h = y
    return h


if __name__ == "__main__":
    key = jax.random.PRNGKey(0)
    k_in, k_par = jax.random.split(key)

    # Small shapes consistent with the module (inner channels 128/64/2 are fixed
    # by the module definition; input_dim kept small for the test).
    N, input_dim, H, W = 2, 32, 16, 16

    x_nchw = jax.random.normal(k_in, (N, input_dim, H, W), jnp.float32)
    params = init_flowhead_params(k_par, input_dim, batch_norm=True)

    out = jax.block_until_ready(flowhead_forward(x_nchw, params, batch_norm=True))
    assert out.shape == (N, 2, H, W), out.shape

    ref = jax.block_until_ready(_reference_forward(x_nchw, params, batch_norm=True))
    max_err = float(jnp.max(jnp.abs(out - ref)))
    assert jnp.allclose(out, ref, atol=1e-2, rtol=1e-2), max_err

    print("KERNEL_OK")
</pallas_src>

<mosaic_0001>
module attributes {stable_mosaic.version = 11 : i64} {
  func.func @_flowhead_kernel(%arg0: i32, %arg1: memref<1x448x96xbf16, #tpu.memory_space<vmem>>, %arg2: memref<384x1xf32, #tpu.memory_space<vmem>>, %arg3: memref<3x96x128xbf16, #tpu.memory_space<vmem>>, %arg4: memref<1x128xf32, #tpu.memory_space<vmem>>, %arg5: memref<3x3x128x64xbf16, #tpu.memory_space<vmem>>, %arg6: memref<1x64xf32, #tpu.memory_space<vmem>>, %arg7: memref<3x3x64x2xbf16, #tpu.memory_space<vmem>>, %arg8: memref<1x2xf32, #tpu.memory_space<vmem>>, %arg9: memref<1x2x384xf32, #tpu.memory_space<vmem>>, %arg10: memref<448x128xbf16, #tpu.memory_space<vmem>>, %arg11: memref<448x64xbf16, #tpu.memory_space<vmem>>) attributes {dimension_semantics = [#tpu.dimension_semantics<parallel>], iteration_bounds = array<i64: 2>, scalar_prefetch = 0 : i64, scratch_operands = 2 : i64, tpu.core_type = #tpu.core_type<tc>, window_params = [{transform_indices = @transform_0, window_bounds = array<i64: 1, 448, 96>}, {pipeline_mode = #tpu.pipeline_mode<synchronous>, transform_indices = @transform_1, window_bounds = array<i64: 384, 1>}, {pipeline_mode = #tpu.pipeline_mode<synchronous>, transform_indices = @transform_2, window_bounds = array<i64: 3, 96, 128>}, {pipeline_mode = #tpu.pipeline_mode<synchronous>, transform_indices = @transform_3, window_bounds = array<i64: 1, 128>}, {pipeline_mode = #tpu.pipeline_mode<synchronous>, transform_indices = @transform_4, window_bounds = array<i64: 3, 3, 128, 64>}, {pipeline_mode = #tpu.pipeline_mode<synchronous>, transform_indices = @transform_5, window_bounds = array<i64: 1, 64>}, {pipeline_mode = #tpu.pipeline_mode<synchronous>, transform_indices = @transform_6, window_bounds = array<i64: 3, 3, 64, 2>}, {pipeline_mode = #tpu.pipeline_mode<synchronous>, transform_indices = @transform_7, window_bounds = array<i64: 1, 2>}, {transform_indices = @transform_8, window_bounds = array<i64: 1, 2, 384>}]} {
    %cst = arith.constant 0.000000e+00 : bf16
    %0 = vector.broadcast %cst : bf16 to vector<32x128xbf16>
    %c0 = arith.constant 0 : index
    %c0_0 = arith.constant 0 : index
    %1 = vector.load %arg10[%c0, %c0_0] : memref<448x128xbf16, #tpu.memory_space<vmem>>, vector<32x128xbf16>
    tpu.vector_store %arg10[%c0, %c0_0], %0 {strides = array<i32>} : memref<448x128xbf16, #tpu.memory_space<vmem>>, vector<32x128xbf16>,
    %cst_1 = arith.constant 0.000000e+00 : bf16
    %2 = vector.broadcast %cst_1 : bf16 to vector<32x128xbf16>
    %c416 = arith.constant 416 : index
    %c0_2 = arith.constant 0 : index
    %3 = vector.load %arg10[%c416, %c0_2] : memref<448x128xbf16, #tpu.memory_space<vmem>>, vector<32x128xbf16>
    tpu.vector_store %arg10[%c416, %c0_2], %2 {strides = array<i32>} : memref<448x128xbf16, #tpu.memory_space<vmem>>, vector<32x128xbf16>,
    %cst_3 = arith.constant 0.000000e+00 : bf16
    %4 = vector.broadcast %cst_3 : bf16 to vector<32x64xbf16>
    %c0_4 = arith.constant 0 : index
    %c0_5 = arith.constant 0 : index
    %5 = vector.load %arg11[%c0_4, %c0_5] : memref<448x64xbf16, #tpu.memory_space<vmem>>, vector<32x64xbf16>
    tpu.vector_store %arg11[%c0_4, %c0_5], %4 {strides = array<i32>} : memref<448x64xbf16, #tpu.memory_space<vmem>>, vector<32x64xbf16>,
    %cst_6 = arith.constant 0.000000e+00 : bf16
    %6 = vector.broadcast %cst_6 : bf16 to vector<32x64xbf16>
    %c416_7 = arith.constant 416 : index
    %c0_8 = arith.constant 0 : index
    %7 = vector.load %arg11[%c416_7, %c0_8] : memref<448x64xbf16, #tpu.memory_space<vmem>>, vector<32x64xbf16>
    tpu.vector_store %arg11[%c416_7, %c0_8], %6 {strides = array<i32>} : memref<448x64xbf16, #tpu.memory_space<vmem>>, vector<32x64xbf16>,
    %cst_9 = arith.constant 0.000000e+00 : f32
    %8 = vector.broadcast %cst_9 : f32 to vector<128x128xf32>
    %c0_10 = arith.constant 0 : index
    %c8 = arith.constant 8 : index
    %c0_11 = arith.constant 0 : index
    %9 = vector.load %arg1[%c0_10, %c8, %c0_11] : memref<1x448x96xbf16, #tpu.memory_space<vmem>>, vector<1x128x96xbf16>
    %10 = vector.shape_cast %9 : vector<1x128x96xbf16> to vector<128x96xbf16>
    %c0_12 = arith.constant 0 : index
    %c0_13 = arith.constant 0 : index
    %c0_14 = arith.constant 0 : index
    %11 = vector.load %arg3[%c0_12, %c0_13, %c0_14] : memref<3x96x128xbf16, #tpu.memory_space<vmem>>, vector<1x96x128xbf16>
    %12 = vector.shape_cast %11 : vector<1x96x128xbf16> to vector<96x128xbf16>
    %cst_15 = arith.constant dense<0.000000e+00> : vector<128x128xf32>
    %13 = tpu.matmul %10, %12, %cst_15 {dimension_numbers = #tpu.dot_dimension_numbers<[1], [0], [0], [1], [0, 0, 1, 1], [], []>} : vector<128x96xbf16>, vector<96x128xbf16>, vector<128x128xf32> -> vector<128x128xf32>
    %14 = arith.addf %8, %13 : vector<128x128xf32>
    %c0_16 = arith.constant 0 : index
    %c32 = arith.constant 32 : index
    %c0_17 = arith.constant 0 : index
    %15 = vector.load %arg1[%c0_16, %c32, %c0_17] : memref<1x448x96xbf16, #tpu.memory_space<vmem>>, vector<1x128x96xbf16>
    %16 = vector.shape_cast %15 : vector<1x128x96xbf16> to vector<128x96xbf16>
    %c1 = arith.constant 1 : index
    %c0_18 = arith.constant 0 : index
    %c0_19 = arith.constant 0 : index
    %17 = vector.load %arg3[%c1, %c0_18, %c0_19] : memref<3x96x128xbf16, #tpu.memory_space<vmem>>, vector<1x96x128xbf16>
    %18 = vector.shape_cast %17 : vector<1x96x128xbf16> to vector<96x128xbf16>
    %cst_20 = arith.constant dense<0.000000e+00> : vector<128x128xf32>
    %19 = tpu.matmul %16, %18, %cst_20 {dimension_numbers = #tpu.dot_dimension_numbers<[1], [0], [0], [1], [0, 0, 1, 1], [], []>} : vector<128x96xbf16>, vector<96x128xbf16>, vector<128x128xf32> -> vector<128x128xf32>
    %20 = arith.addf %14, %19 : vector<128x128xf32>
    %c0_21 = arith.constant 0 : index
    %c56 = arith.constant 56 : index
    %c0_22 = arith.constant 0 : index
    %21 = vector.load %arg1[%c0_21, %c56, %c0_22] : memref<1x448x96xbf16, #tpu.memory_space<vmem>>, vector<1x128x96xbf16>
    %22 = vector.shape_cast %21 : vector<1x128x96xbf16> to vector<128x96xbf16>
    %c2 = arith.constant 2 : index
    %c0_23 = arith.constant 0 : index
    %c0_24 = arith.constant 0 : index
    %23 = vector.load %arg3[%c2, %c0_23, %c0_24] : memref<3x96x128xbf16, #tpu.memory_space<vmem>>, vector<1x96x128xbf16>
    %24 = vector.shape_cast %23 : vector<1x96x128xbf16> to vector<96x128xbf16>
    %cst_25 = arith.constant dense<0.000000e+00> : vector<128x128xf32>
    %25 = tpu.matmul %22, %24, %cst_25 {dimension_numbers = #tpu.dot_dimension_numbers<[1], [0], [0], [1], [0, 0, 1, 1], [], []>} : vector<128x96xbf16>, vector<96x128xbf16>, vector<128x128xf32> -> vector<128x128xf32>
    %26 = arith.addf %20, %25 : vector<128x128xf32>
    %c0_26 = arith.constant 0 : index
    %c0_27 = arith.constant 0 : index
    %27 = vector.load %arg4[%c0_26, %c0_27] : memref<1x128xf32, #tpu.memory_space<vmem>>, vector<1x128xf32>
    %28 = vector.broadcast %27 : vector<1x128xf32> to vector<128x128xf32>
    %29 = arith.addf %26, %28 : vector<128x128xf32>
    %cst_28 = arith.constant 0.000000e+00 : f32
    %30 = vector.broadcast %cst_28 : f32 to vector<128x128xf32>
    %31 = arith.maximumf %29, %30 : vector<128x128xf32>
    %c0_29 = arith.constant 0 : index
    %c0_30 = arith.constant 0 : index
    %32 = vector.load %arg2[%c0_29, %c0_30] : memref<384x1xf32, #tpu.memory_space<vmem>>, vector<128x1xf32>
    %33 = vector.broadcast %32 : vector<128x1xf32> to vector<128x128xf32>
    %34 = arith.mulf %31, %33 : vector<128x128xf32>
    %35 = arith.truncf %34 : vector<128x128xf32> to vector<128x128xbf16>
    %c32_31 = arith.constant 32 : index
    %c0_32 = arith.constant 0 : index
    %36 = vector.load %arg10[%c32_31, %c0_32] : memref<448x128xbf16, #tpu.memory_space<vmem>>, vector<128x128xbf16>
    tpu.vector_store %arg10[%c32_31, %c0_32], %35 {strides = array<i32>} : memref<448x128xbf16, #tpu.memory_space<vmem>>, vector<128x128xbf16>,
    %cst_33 = arith.constant 0.000000e+00 : f32
    %37 = vector.broadcast %cst_33 : f32 to vector<128x128xf32>
    %c0_34 = arith.constant 0 : index
    %c136 = arith.constant 136 : index
    %c0_35 = arith.constant 0 : index
    %38 = vector.load %arg1[%c0_34, %c136, %c0_35] : memref<1x448x96xbf16, #tpu.memory_space<vmem>>, vector<1x128x96xbf16>
    %39 = vector.shape_cast %38 : vector<1x128x96xbf16> to vector<128x96xbf16>
    %c0_36 = arith.constant 0 : index
    %c0_37 = arith.constant 0 : index
    %c0_38 = arith.constant 0 : index
    %40 = vector.load %arg3[%c0_36, %c0_37, %c0_38] : memref<3x96x128xbf16, #tpu.memory_space<vmem>>, vector<1x96x128xbf16>
    %41 = vector.shape_cast %40 : vector<1x96x128xbf16> to vector<96x128xbf16>
    %cst_39 = arith.constant dense<0.000000e+00> : vector<128x128xf32>
    %42 = tpu.matmul %39, %41, %cst_39 {dimension_numbers = #tpu.dot_dimension_numbers<[1], [0], [0], [1], [0, 0, 1, 1], [], []>} : vector<128x96xbf16>, vector<96x128xbf16>, vector<128x128xf32> -> vector<128x128xf32>
    %43 = arith.addf %37, %42 : vector<128x128xf32>
    %c0_40 = arith.constant 0 : index
    %c160 = arith.constant 160 : index
    %c0_41 = arith.constant 0 : index
    %44 = vector.load %arg1[%c0_40, %c160, %c0_41] : memref<1x448x96xbf16, #tpu.memory_space<vmem>>, vector<1x128x96xbf16>
    %45 = vector.shape_cast %44 : vector<1x128x96xbf16> to vector<128x96xbf16>
    %c1_42 = arith.constant 1 : index
    %c0_43 = arith.constant 0 : index
    %c0_44 = arith.constant 0 : index
    %46 = vector.load %arg3[%c1_42, %c0_43, %c0_44] : memref<3x96x128xbf16, #tpu.memory_space<vmem>>, vector<1x96x128xbf16>
    %47 = vector.shape_cast %46 : vector<1x96x128xbf16> to vector<96x128xbf16>
    %cst_45 = arith.constant dense<0.000000e+00> : vector<128x128xf32>
    %48 = tpu.matmul %45, %47, %cst_45 {dimension_numbers = #tpu.dot_dimension_numbers<[1], [0], [0], [1], [0, 0, 1, 1], [], []>} : vector<128x96xbf16>, vector<96x128xbf16>, vector<128x128xf32> -> vector<128x128xf32>
    %49 = arith.addf %43, %48 : vector<128x128xf32>
    %c0_46 = arith.constant 0 : index
    %c184 = arith.constant 184 : index
    %c0_47 = arith.constant 0 : index
    %50 = vector.load %arg1[%c0_46, %c184, %c0_47] : memref<1x448x96xbf16, #tpu.memory_space<vmem>>, vector<1x128x96xbf16>
    %51 = vector.shape_cast %50 : vector<1x128x96xbf16> to vector<128x96xbf16>
    %c2_48 = arith.constant 2 : index
    %c0_49 = arith.constant 0 : index
    %c0_50 = arith.constant 0 : index
    %52 = vector.load %arg3[%c2_48, %c0_49, %c0_50] : memref<3x96x128xbf16, #tpu.memory_space<vmem>>, vector<1x96x128xbf16>
    %53 = vector.shape_cast %52 : vector<1x96x128xbf16> to vector<96x128xbf16>
    %cst_51 = arith.constant dense<0.000000e+00> : vector<128x128xf32>
    %54 = tpu.matmul %51, %53, %cst_51 {dimension_numbers = #tpu.dot_dimension_numbers<[1], [0], [0], [1], [0, 0, 1, 1], [], []>} : vector<128x96xbf16>, vector<96x128xbf16>, vector<128x128xf32> -> vector<128x128xf32>
    %55 = arith.addf %49, %54 : vector<128x128xf32>
    %c0_52 = arith.constant 0 : index
    %c0_53 = arith.constant 0 : index
    %56 = vector.load %arg4[%c0_52, %c0_53] : memref<1x128xf32, #tpu.memory_space<vmem>>, vector<1x128xf32>
    %57 = vector.broadcast %56 : vector<1x128xf32> to vector<128x128xf32>
    %58 = arith.addf %55, %57 : vector<128x128xf32>
    %cst_54 = arith.constant 0.000000e+00 : f32
    %59 = vector.broadcast %cst_54 : f32 to vector<128x128xf32>
    %60 = arith.maximumf %58, %59 : vector<128x128xf32>
    %c128 = arith.constant 128 : index
    %c0_55 = arith.constant 0 : index
    %61 = vector.load %arg2[%c128, %c0_55] : memref<384x1xf32, #tpu.memory_space<vmem>>, vector<128x1xf32>
    %62 = vector.broadcast %61 : vector<128x1xf32> to vector<128x128xf32>
    %63 = arith.mulf %60, %62 : vector<128x128xf32>
    %64 = arith.truncf %63 : vector<128x128xf32> to vector<128x128xbf16>
    %c160_56 = arith.constant 160 : index
    %c0_57 = arith.constant 0 : index
    %65 = vector.load %arg10[%c160_56, %c0_57] : memref<448x128xbf16, #tpu.memory_space<vmem>>, vector<128x128xbf16>
    tpu.vector_store %arg10[%c160_56, %c0_57], %64 {strides = array<i32>} : memref<448x128xbf16, #tpu.memory_space<vmem>>, vector<128x128xbf16>,
    %cst_58 = arith.constant 0.000000e+00 : f32
    %66 = vector.broadcast %cst_58 : f32 to vector<128x128xf32>
    %c0_59 = arith.constant 0 : index
    %c264 = arith.constant 264 : index
    %c0_60 = arith.constant 0 : index
    %67 = vector.load %arg1[%c0_59, %c264, %c0_60] : memref<1x448x96xbf16, #tpu.memory_space<vmem>>, vector<1x128x96xbf16>
    %68 = vector.shape_cast %67 : vector<1x128x96xbf16> to vector<128x96xbf16>
    %c0_61 = arith.constant 0 : index
    %c0_62 = arith.constant 0 : index
    %c0_63 = arith.constant 0 : index
    %69 = vector.load %arg3[%c0_61, %c0_62, %c0_63] : memref<3x96x128xbf16, #tpu.memory_space<vmem>>, vector<1x96x128xbf16>
    %70 = vector.shape_cast %69 : vector<1x96x128xbf16> to vector<96x128xbf16>
    %cst_64 = arith.constant dense<0.000000e+00> : vector<128x128xf32>
    %71 = tpu.matmul %68, %70, %cst_64 {dimension_numbers = #tpu.dot_dimension_numbers<[1], [0], [0], [1], [0, 0, 1, 1], [], []>} : vector<128x96xbf16>, vector<96x128xbf16>, vector<128x128xf32> -> vector<128x128xf32>
    %72 = arith.addf %66, %71 : vector<128x128xf32>
    %c0_65 = arith.constant 0 : index
    %c288 = arith.constant 288 : index
    %c0_66 = arith.constant 0 : index
    %73 = vector.load %arg1[%c0_65, %c288, %c0_66] : memref<1x448x96xbf16, #tpu.memory_space<vmem>>, vector<1x128x96xbf16>
    %74 = vector.shape_cast %73 : vector<1x128x96xbf16> to vector<128x96xbf16>
    %c1_67 = arith.constant 1 : index
    %c0_68 = arith.constant 0 : index
    %c0_69 = arith.constant 0 : index
    %75 = vector.load %arg3[%c1_67, %c0_68, %c0_69] : memref<3x96x128xbf16, #tpu.memory_space<vmem>>, vector<1x96x128xbf16>
    %76 = vector.shape_cast %75 : vector<1x96x128xbf16> to vector<96x128xbf16>
    %cst_70 = arith.constant dense<0.000000e+00> : vector<128x128xf32>
    %77 = tpu.matmul %74, %76, %cst_70 {dimension_numbers = #tpu.dot_dimension_numbers<[1], [0], [0], [1], [0, 0, 1, 1], [], []>} : vector<128x96xbf16>, vector<96x128xbf16>, vector<128x128xf32> -> vector<128x128xf32>
    %78 = arith.addf %72, %77 : vector<128x128xf32>
    %c0_71 = arith.constant 0 : index
    %c312 = arith.constant 312 : index
    %c0_72 = arith.constant 0 : index
    %79 = vector.load %arg1[%c0_71, %c312, %c0_72] : memref<1x448x96xbf16, #tpu.memory_space<vmem>>, vector<1x128x96xbf16>
    %80 = vector.shape_cast %79 : vector<1x128x96xbf16> to vector<128x96xbf16>
    %c2_73 = arith.constant 2 : index
    %c0_74 = arith.constant 0 : index
    %c0_75 = arith.constant 0 : index
    %81 = vector.load %arg3[%c2_73, %c0_74, %c0_75] : memref<3x96x128xbf16, #tpu.memory_space<vmem>>, vector<1x96x128xbf16>
    %82 = vector.shape_cast %81 : vector<1x96x128xbf16> to vector<96x128xbf16>
    %cst_76 = arith.constant dense<0.000000e+00> : vector<128x128xf32>
    %83 = tpu.matmul %80, %82, %cst_76 {dimension_numbers = #tpu.dot_dimension_numbers<[1], [0], [0], [1], [0, 0, 1, 1], [], []>} : vector<128x96xbf16>, vector<96x128xbf16>, vector<128x128xf32> -> vector<128x128xf32>
    %84 = arith.addf %78, %83 : vector<128x128xf32>
    %c0_77 = arith.constant 0 : index
    %c0_78 = arith.constant 0 : index
    %85 = vector.load %arg4[%c0_77, %c0_78] : memref<1x128xf32, #tpu.memory_space<vmem>>, vector<1x128xf32>
    %86 = vector.broadcast %85 : vector<1x128xf32> to vector<128x128xf32>
    %87 = arith.addf %84, %86 : vector<128x128xf32>
    %cst_79 = arith.constant 0.000000e+00 : f32
    %88 = vector.broadcast %cst_79 : f32 to vector<128x128xf32>
    %89 = arith.maximumf %87, %88 : vector<128x128xf32>
    %c256 = arith.constant 256 : index
    %c0_80 = arith.constant 0 : index
    %90 = vector.load %arg2[%c256, %c0_80] : memref<384x1xf32, #tpu.memory_space<vmem>>, vector<128x1xf32>
    %91 = vector.broadcast %90 : vector<128x1xf32> to vector<128x128xf32>
    %92 = arith.mulf %89, %91 : vector<128x128xf32>
    %93 = arith.truncf %92 : vector<128x128xf32> to vector<128x128xbf16>
    %c288_81 = arith.constant 288 : index
    %c0_82 = arith.constant 0 : index
    %94 = vector.load %arg10[%c288_81, %c0_82] : memref<448x128xbf16, #tpu.memory_space<vmem>>, vector<128x128xbf16>
    tpu.vector_store %arg10[%c288_81, %c0_82], %93 {strides = array<i32>} : memref<448x128xbf16, #tpu.memory_space<vmem>>, vector<128x128xbf16>,
    %cst_83 = arith.constant 0.000000e+00 : f32
    %95 = vector.broadcast %cst_83 : f32 to vector<128x64xf32>
    %c7 = arith.constant 7 : index
    %c0_84 = arith.constant 0 : index
    %96 = vector.load %arg10[%c7, %c0_84] : memref<448x128xbf16, #tpu.memory_space<vmem>>, vector<128x128xbf16>
    %c0_85 = arith.constant 0 : index
    %c0_86 = arith.constant 0 : index
    %c0_87 = arith.constant 0 : index
    %c0_88 = arith.constant 0 : index
    %97 = vector.load %arg5[%c0_85, %c0_86, %c0_87, %c0_88] : memref<3x3x128x64xbf16, #tpu.memory_space<vmem>>, vector<1x1x128x64xbf16>
    %98 = vector.shape_cast %97 : vector<1x1x128x64xbf16> to vector<128x64xbf16>
    %cst_89 = arith.constant dense<0.000000e+00> : vector<128x64xf32>
    %99 = tpu.matmul %96, %98, %cst_89 {dimension_numbers = #tpu.dot_dimension_numbers<[1], [0], [0], [1], [0, 0, 1, 1], [], []>} : vector<128x128xbf16>, vector<128x64xbf16>, vector<128x64xf32> -> vector<128x64xf32>
    %100 = arith.addf %95, %99 : vector<128x64xf32>
    %c8_90 = arith.constant 8 : index
    %c0_91 = arith.constant 0 : index
    %101 = vector.load %arg10[%c8_90, %c0_91] : memref<448x128xbf16, #tpu.memory_space<vmem>>, vector<128x128xbf16>
    %c0_92 = arith.constant 0 : index
    %c1_93 = arith.constant 1 : index
    %c0_94 = arith.constant 0 : index
    %c0_95 = arith.constant 0 : index
    %102 = vector.load %arg5[%c0_92, %c1_93, %c0_94, %c0_95] : memref<3x3x128x64xbf16, #tpu.memory_space<vmem>>, vector<1x1x128x64xbf16>
    %103 = vector.shape_cast %102 : vector<1x1x128x64xbf16> to vector<128x64xbf16>
    %cst_96 = arith.constant dense<0.000000e+00> : vector<128x64xf32>
    %104 = tpu.matmul %101, %103, %cst_96 {dimension_numbers = #tpu.dot_dimension_numbers<[1], [0], [0], [1], [0, 0, 1, 1], [], []>} : vector<128x128xbf16>, vector<128x64xbf16>, vector<128x64xf32> -> vector<128x64xf32>
    %105 = arith.addf %100, %104 : vector<128x64xf32>
    %c9 = arith.constant 9 : index
    %c0_97 = arith.constant 0 : index
    %106 = vector.load %arg10[%c9, %c0_97] : memref<448x128xbf16, #tpu.memory_space<vmem>>, vector<128x128xbf16>
    %c0_98 = arith.constant 0 : index
    %c2_99 = arith.constant 2 : index
    %c0_100 = arith.constant 0 : index
    %c0_101 = arith.constant 0 : index
    %107 = vector.load %arg5[%c0_98, %c2_99, %c0_100, %c0_101] : memref<3x3x128x64xbf16, #tpu.memory_space<vmem>>, vector<1x1x128x64xbf16>
    %108 = vector.shape_cast %107 : vector<1x1x128x64xbf16> to vector<128x64xbf16>
    %cst_102 = arith.constant dense<0.000000e+00> : vector<128x64xf32>
    %109 = tpu.matmul %106, %108, %cst_102 {dimension_numbers = #tpu.dot_dimension_numbers<[1], [0], [0], [1], [0, 0, 1, 1], [], []>} : vector<128x128xbf16>, vector<128x64xbf16>, vector<128x64xf32> -> vector<128x64xf32>
    %110 = arith.addf %105, %109 : vector<128x64xf32>
    %c31 = arith.constant 31 : index
    %c0_103 = arith.constant 0 : index
    %111 = vector.load %arg10[%c31, %c0_103] : memref<448x128xbf16, #tpu.memory_space<vmem>>, vector<128x128xbf16>
    %c1_104 = arith.constant 1 : index
    %c0_105 = arith.constant 0 : index
    %c0_106 = arith.constant 0 : index
    %c0_107 = arith.constant 0 : index
    %112 = vector.load %arg5[%c1_104, %c0_105, %c0_106, %c0_107] : memref<3x3x128x64xbf16, #tpu.memory_space<vmem>>, vector<1x1x128x64xbf16>
    %113 = vector.shape_cast %112 : vector<1x1x128x64xbf16> to vector<128x64xbf16>
    %cst_108 = arith.constant dense<0.000000e+00> : vector<128x64xf32>
    %114 = tpu.matmul %111, %113, %cst_108 {dimension_numbers = #tpu.dot_dimension_numbers<[1], [0], [0], [1], [0, 0, 1, 1], [], []>} : vector<128x128xbf16>, vector<128x64xbf16>, vector<128x64xf32> -> vector<128x64xf32>
    %115 = arith.addf %110, %114 : vector<128x64xf32>
    %c32_109 = arith.constant 32 : index
    %c0_110 = arith.constant 0 : index
    %116 = vector.load %arg10[%c32_109, %c0_110] : memref<448x128xbf16, #tpu.memory_space<vmem>>, vector<128x128xbf16>
    %c1_111 = arith.constant 1 : index
    %c1_112 = arith.constant 1 : index
    %c0_113 = arith.constant 0 : index
    %c0_114 = arith.constant 0 : index
    %117 = vector.load %arg5[%c1_111, %c1_112, %c0_113, %c0_114] : memref<3x3x128x64xbf16, #tpu.memory_space<vmem>>, vector<1x1x128x64xbf16>
    %118 = vector.shape_cast %117 : vector<1x1x128x64xbf16> to vector<128x64xbf16>
    %cst_115 = arith.constant dense<0.000000e+00> : vector<128x64xf32>
    %119 = tpu.matmul %116, %118, %cst_115 {dimension_numbers = #tpu.dot_dimension_numbers<[1], [0], [0], [1], [0, 0, 1, 1], [], []>} : vector<128x128xbf16>, vector<128x64xbf16>, vector<128x64xf32> -> vector<128x64xf32>
    %120 = arith.addf %115, %119 : vector<128x64xf32>
    %c33 = arith.constant 33 : index
    %c0_116 = arith.constant 0 : index
    %121 = vector.load %arg10[%c33, %c0_116] : memref<448x128xbf16, #tpu.memory_space<vmem>>, vector<128x128xbf16>
    %c1_117 = arith.constant 1 : index
    %c2_118 = arith.constant 2 : index
    %c0_119 = arith.constant 0 : index
    %c0_120 = arith.constant 0 : index
    %122 = vector.load %arg5[%c1_117, %c2_118, %c0_119, %c0_120] : memref<3x3x128x64xbf16, #tpu.memory_space<vmem>>, vector<1x1x128x64xbf16>
    %123 = vector.shape_cast %122 : vector<1x1x128x64xbf16> to vector<128x64xbf16>
    %cst_121 = arith.constant dense<0.000000e+00> : vector<128x64xf32>
    %124 = tpu.matmul %121, %123, %cst_121 {dimension_numbers = #tpu.dot_dimension_numbers<[1], [0], [0], [1], [0, 0, 1, 1], [], []>} : vector<128x128xbf16>, vector<128x64xbf16>, vector<128x64xf32> -> vector<128x64xf32>
    %125 = arith.addf %120, %124 : vector<128x64xf32>
    %c55 = arith.constant 55 : index
    %c0_122 = arith.constant 0 : index
    %126 = vector.load %arg10[%c55, %c0_122] : memref<448x128xbf16, #tpu.memory_space<vmem>>, vector<128x128xbf16>
    %c2_123 = arith.constant 2 : index
    %c0_124 = arith.constant 0 : index
    %c0_125 = arith.constant 0 : index
    %c0_126 = arith.constant 0 : index
    %127 = vector.load %arg5[%c2_123, %c0_124, %c0_125, %c0_126] : memref<3x3x128x64xbf16, #tpu.memory_space<vmem>>, vector<1x1x128x64xbf16>
    %128 = vector.shape_cast %127 : vector<1x1x128x64xbf16> to vector<128x64xbf16>
    %cst_127 = arith.constant dense<0.000000e+00> : vector<128x64xf32>
    %129 = tpu.matmul %126, %128, %cst_127 {dimension_numbers = #tpu.dot_dimension_numbers<[1], [0], [0], [1], [0, 0, 1, 1], [], []>} : vector<128x128xbf16>, vector<128x64xbf16>, vector<128x64xf32> -> vector<128x64xf32>
    %130 = arith.addf %125, %129 : vector<128x64xf32>
    %c56_128 = arith.constant 56 : index
    %c0_129 = arith.constant 0 : index
    %131 = vector.load %arg10[%c56_128, %c0_129] : memref<448x128xbf16, #tpu.memory_space<vmem>>, vector<128x128xbf16>
    %c2_130 = arith.constant 2 : index
    %c1_131 = arith.constant 1 : index
    %c0_132 = arith.constant 0 : index
    %c0_133 = arith.constant 0 : index
    %132 = vector.load %arg5[%c2_130, %c1_131, %c0_132, %c0_133] : memref<3x3x128x64xbf16, #tpu.memory_space<vmem>>, vector<1x1x128x64xbf16>
    %133 = vector.shape_cast %132 : vector<1x1x128x64xbf16> to vector<128x64xbf16>
    %cst_134 = arith.constant dense<0.000000e+00> : vector<128x64xf32>
    %134 = tpu.matmul %131, %133, %cst_134 {dimension_numbers = #tpu.dot_dimension_numbers<[1], [0], [0], [1], [0, 0, 1, 1], [], []>} : vector<128x128xbf16>, vector<128x64xbf16>, vector<128x64xf32> -> vector<128x64xf32>
    %135 = arith.addf %130, %134 : vector<128x64xf32>
    %c57 = arith.constant 57 : index
    %c0_135 = arith.constant 0 : index
    %136 = vector.load %arg10[%c57, %c0_135] : memref<448x128xbf16, #tpu.memory_space<vmem>>, vector<128x128xbf16>
    %c2_136 = arith.constant 2 : index
    %c2_137 = arith.constant 2 : index
    %c0_138 = arith.constant 0 : index
    %c0_139 = arith.constant 0 : index
    %137 = vector.load %arg5[%c2_136, %c2_137, %c0_138, %c0_139] : memref<3x3x128x64xbf16, #tpu.memory_space<vmem>>, vector<1x1x128x64xbf16>
    %138 = vector.shape_cast %137 : vector<1x1x128x64xbf16> to vector<128x64xbf16>
    %cst_140 = arith.constant dense<0.000000e+00> : vector<128x64xf32>
    %139 = tpu.matmul %136, %138, %cst_140 {dimension_numbers = #tpu.dot_dimension_numbers<[1], [0], [0], [1], [0, 0, 1, 1], [], []>} : vector<128x128xbf16>, vector<128x64xbf16>, vector<128x64xf32> -> vector<128x64xf32>
    %140 = arith.addf %135, %139 : vector<128x64xf32>
    %c0_141 = arith.constant 0 : index
    %c0_142 = arith.constant 0 : index
    %141 = vector.load %arg6[%c0_141, %c0_142] : memref<1x64xf32, #tpu.memory_space<vmem>>, vector<1x64xf32>
    %142 = vector.broadcast %141 : vector<1x64xf32> to vector<128x64xf32>
    %143 = arith.addf %140, %142 : vector<128x64xf32>
    %cst_143 = arith.constant 0.000000e+00 : f32
    %144 = vector.broadcast %cst_143 : f32 to vector<128x64xf32>
    %145 = arith.maximumf %143, %144 : vector<128x64xf32>
    %c0_144 = arith.constant 0 : index
    %c0_145 = arith.constant 0 : index
    %146 = vector.load %arg2[%c0_144, %c0_145] : memref<384x1xf32, #tpu.memory_space<vmem>>, vector<128x1xf32>
    %147 = vector.broadcast %146 : vector<128x1xf32> to vector<128x64xf32>
    %148 = arith.mulf %145, %147 : vector<128x64xf32>
    %149 = arith.truncf %148 : vector<128x64xf32> to vector<128x64xbf16>
    %c32_146 = arith.constant 32 : index
    %c0_147 = arith.constant 0 : index
    %150 = vector.load %arg11[%c32_146, %c0_147] : memref<448x64xbf16, #tpu.memory_space<vmem>>, vector<128x64xbf16>
    tpu.vector_store %arg11[%c32_146, %c0_147], %149 {strides = array<i32>} : memref<448x64xbf16, #tpu.memory_space<vmem>>, vector<128x64xbf16>,
    %cst_148 = arith.constant 0.000000e+00 : f32
    %151 = vector.broadcast %cst_148 : f32 to vector<128x64xf32>
    %c135 = arith.constant 135 : index
    %c0_149 = arith.constant 0 : index
    %152 = vector.load %arg10[%c135, %c0_149] : memref<448x128xbf16, #tpu.memory_space<vmem>>, vector<128x128xbf16>
    %c0_150 = arith.constant 0 : index
    %c0_151 = arith.constant 0 : index
    %c0_152 = arith.constant 0 : index
    %c0_153 = arith.constant 0 : index
    %153 = vector.load %arg5[%c0_150, %c0_151, %c0_152, %c0_153] : memref<3x3x128x64xbf16, #tpu.memory_space<vmem>>, vector<1x1x128x64xbf16>
    %154 = vector.shape_cast %153 : vector<1x1x128x64xbf16> to vector<128x64xbf16>
    %cst_154 = arith.constant dense<0.000000e+00> : vector<128x64xf32>
    %155 = tpu.matmul %152, %154, %cst_154 {dimension_numbers = #tpu.dot_dimension_numbers<[1], [0], [0], [1], [0, 0, 1, 1], [], []>} : vector<128x128xbf16>, vector<128x64xbf16>, vector<128x64xf32> -> vector<128x64xf32>
    %156 = arith.addf %151, %155 : vector<128x64xf32>
    %c136_155 = arith.constant 136 : index
    %c0_156 = arith.constant 0 : index
    %157 = vector.load %arg10[%c136_155, %c0_156] : memref<448x128xbf16, #tpu.memory_space<vmem>>, vector<128x128xbf16>
    %c0_157 = arith.constant 0 : index
    %c1_158 = arith.constant 1 : index
    %c0_159 = arith.constant 0 : index
    %c0_160 = arith.constant 0 : index
    %158 = vector.load %arg5[%c0_157, %c1_158, %c0_159, %c0_160] : memref<3x3x128x64xbf16, #tpu.memory_space<vmem>>, vector<1x1x128x64xbf16>
    %159 = vector.shape_cast %158 : vector<1x1x128x64xbf16> to vector<128x64xbf16>
    %cst_161 = arith.constant dense<0.000000e+00> : vector<128x64xf32>
    %160 = tpu.matmul %157, %159, %cst_161 {dimension_numbers = #tpu.dot_dimension_numbers<[1], [0], [0], [1], [0, 0, 1, 1], [], []>} : vector<128x128xbf16>, vector<128x64xbf16>, vector<128x64xf32> -> vector<128x64xf32>
    %161 = arith.addf %156, %160 : vector<128x64xf32>
    %c137 = arith.constant 137 : index
    %c0_162 = arith.constant 0 : index
    %162 = vector.load %arg10[%c137, %c0_162] : memref<448x128xbf16, #tpu.memory_space<vmem>>, vector<128x128xbf16>
    %c0_163 = arith.constant 0 : index
    %c2_164 = arith.constant 2 : index
    %c0_165 = arith.constant 0 : index
    %c0_166 = arith.constant 0 : index
    %163 = vector.load %arg5[%c0_163, %c2_164, %c0_165, %c0_166] : memref<3x3x128x64xbf16, #tpu.memory_space<vmem>>, vector<1x1x128x64xbf16>
    %164 = vector.shape_cast %163 : vector<1x1x128x64xbf16> to vector<128x64xbf16>
    %cst_167 = arith.constant dense<0.000000e+00> : vector<128x64xf32>
    %165 = tpu.matmul %162, %164, %cst_167 {dimension_numbers = #tpu.dot_dimension_numbers<[1], [0], [0], [1], [0, 0, 1, 1], [], []>} : vector<128x128xbf16>, vector<128x64xbf16>, vector<128x64xf32> -> vector<128x64xf32>
    %166 = arith.addf %161, %165 : vector<128x64xf32>
    %c159 = arith.constant 159 : index
    %c0_168 = arith.constant 0 : index
    %167 = vector.load %arg10[%c159, %c0_168] : memref<448x128xbf16, #tpu.memory_space<vmem>>, vector<128x128xbf16>
    %c1_169 = arith.constant 1 : index
    %c0_170 = arith.constant 0 : index
    %c0_171 = arith.constant 0 : index
    %c0_172 = arith.constant 0 : index
    %168 = vector.load %arg5[%c1_169, %c0_170, %c0_171, %c0_172] : memref<3x3x128x64xbf16, #tpu.memory_space<vmem>>, vector<1x1x128x64xbf16>
    %169 = vector.shape_cast %168 : vector<1x1x128x64xbf16> to vector<128x64xbf16>
    %cst_173 = arith.constant dense<0.000000e+00> : vector<128x64xf32>
    %170 = tpu.matmul %167, %169, %cst_173 {dimension_numbers = #tpu.dot_dimension_numbers<[1], [0], [0], [1], [0, 0, 1, 1], [], []>} : vector<128x128xbf16>, vector<128x64xbf16>, vector<128x64xf32> -> vector<128x64xf32>
    %171 = arith.addf %166, %170 : vector<128x64xf32>
    %c160_174 = arith.constant 160 : index
    %c0_175 = arith.constant 0 : index
    %172 = vector.load %arg10[%c160_174, %c0_175] : memref<448x128xbf16, #tpu.memory_space<vmem>>, vector<128x128xbf16>
    %c1_176 = arith.constant 1 : index
    %c1_177 = arith.constant 1 : index
    %c0_178 = arith.constant 0 : index
    %c0_179 = arith.constant 0 : index
    %173 = vector.load %arg5[%c1_176, %c1_177, %c0_178, %c0_179] : memref<3x3x128x64xbf16, #tpu.memory_space<vmem>>, vector<1x1x128x64xbf16>
    %174 = vector.shape_cast %173 : vector<1x1x128x64xbf16> to vector<128x64xbf16>
    %cst_180 = arith.constant dense<0.000000e+00> : vector<128x64xf32>
    %175 = tpu.matmul %172, %174, %cst_180 {dimension_numbers = #tpu.dot_dimension_numbers<[1], [0], [0], [1], [0, 0, 1, 1], [], []>} : vector<128x128xbf16>, vector<128x64xbf16>, vector<128x64xf32> -> vector<128x64xf32>
    %176 = arith.addf %171, %175 : vector<128x64xf32>
    %c161 = arith.constant 161 : index
    %c0_181 = arith.constant 0 : index
    %177 = vector.load %arg10[%c161, %c0_181] : memref<448x128xbf16, #tpu.memory_space<vmem>>, vector<128x128xbf16>
    %c1_182 = arith.constant 1 : index
    %c2_183 = arith.constant 2 : index
    %c0_184 = arith.constant 0 : index
    %c0_185 = arith.constant 0 : index
    %178 = vector.load %arg5[%c1_182, %c2_183, %c0_184, %c0_185] : memref<3x3x128x64xbf16, #tpu.memory_space<vmem>>, vector<1x1x128x64xbf16>
    %179 = vector.shape_cast %178 : vector<1x1x128x64xbf16> to vector<128x64xbf16>
    %cst_186 = arith.constant dense<0.000000e+00> : vector<128x64xf32>
    %180 = tpu.matmul %177, %179, %cst_186 {dimension_numbers = #tpu.dot_dimension_numbers<[1], [0], [0], [1], [0, 0, 1, 1], [], []>} : vector<128x128xbf16>, vector<128x64xbf16>, vector<128x64xf32> -> vector<128x64xf32>
    %181 = arith.addf %176, %180 : vector<128x64xf32>
    %c183 = arith.constant 183 : index
    %c0_187 = arith.constant 0 : index
    %182 = vector.load %arg10[%c183, %c0_187] : memref<448x128xbf16, #tpu.memory_space<vmem>>, vector<128x128xbf16>
    %c2_188 = arith.constant 2 : index
    %c0_189 = arith.constant 0 : index
    %c0_190 = arith.constant 0 : index
    %c0_191 = arith.constant 0 : index
    %183 = vector.load %arg5[%c2_188, %c0_189, %c0_190, %c0_191] : memref<3x3x128x64xbf16, #tpu.memory_space<vmem>>, vector<1x1x128x64xbf16>
    %184 = vector.shape_cast %183 : vector<1x1x128x64xbf16> to vector<128x64xbf16>
    %cst_192 = arith.constant dense<0.000000e+00> : vector<128x64xf32>
    %185 = tpu.matmul %182, %184, %cst_192 {dimension_numbers = #tpu.dot_dimension_numbers<[1], [0], [0], [1], [0, 0, 1, 1], [], []>} : vector<128x128xbf16>, vector<128x64xbf16>, vector<128x64xf32> -> vector<128x64xf32>
    %186 = arith.addf %181, %185 : vector<128x64xf32>
    %c184_193 = arith.constant 184 : index
    %c0_194 = arith.constant 0 : index
    %187 = vector.load %arg10[%c184_193, %c0_194] : memref<448x128xbf16, #tpu.memory_space<vmem>>, vector<128x128xbf16>
    %c2_195 = arith.constant 2 : index
    %c1_196 = arith.constant 1 : index
    %c0_197 = arith.constant 0 : index
    %c0_198 = arith.constant 0 : index
    %188 = vector.load %arg5[%c2_195, %c1_196, %c0_197, %c0_198] : memref<3x3x128x64xbf16, #tpu.memory_space<vmem>>, vector<1x1x128x64xbf16>
    %189 = vector.shape_cast %188 : vector<1x1x128x64xbf16> to vector<128x64xbf16>
    %cst_199 = arith.constant dense<0.000000e+00> : vector<128x64xf32>
    %190 = tpu.matmul %187, %189, %cst_199 {dimension_numbers = #tpu.dot_dimension_numbers<[1], [0], [0], [1], [0, 0, 1, 1], [], []>} : vector<128x128xbf16>, vector<128x64xbf16>, vector<128x64xf32> -> vector<128x64xf32>
    %191 = arith.addf %186, %190 : vector<128x64xf32>
    %c185 = arith.constant 185 : index
    %c0_200 = arith.constant 0 : index
    %192 = vector.load %arg10[%c185, %c0_200] : memref<448x128xbf16, #tpu.memory_space<vmem>>, vector<128x128xbf16>
    %c2_201 = arith.constant 2 : index
    %c2_202 = arith.constant 2 : index
    %c0_203 = arith.constant 0 : index
    %c0_204 = arith.constant 0 : index
    %193 = vector.load %arg5[%c2_201, %c2_202, %c0_203, %c0_204] : memref<3x3x128x64xbf16, #tpu.memory_space<vmem>>, vector<1x1x128x64xbf16>
    %194 = vector.shape_cast %193 : vector<1x1x128x64xbf16> to vector<128x64xbf16>
    %cst_205 = arith.constant dense<0.000000e+00> : vector<128x64xf32>
    %195 = tpu.matmul %192, %194, %cst_205 {dimension_numbers = #tpu.dot_dimension_numbers<[1], [0], [0], [1], [0, 0, 1, 1], [], []>} : vector<128x128xbf16>, vector<128x64xbf16>, vector<128x64xf32> -> vector<128x64xf32>
    %196 = arith.addf %191, %195 : vector<128x64xf32>
    %c0_206 = arith.constant 0 : index
    %c0_207 = arith.constant 0 : index
    %197 = vector.load %arg6[%c0_206, %c0_207] : memref<1x64xf32, #tpu.memory_space<vmem>>, vector<1x64xf32>
    %198 = vector.broadcast %197 : vector<1x64xf32> to vector<128x64xf32>
    %199 = arith.addf %196, %198 : vector<128x64xf32>
    %cst_208 = arith.constant 0.000000e+00 : f32
    %200 = vector.broadcast %cst_208 : f32 to vector<128x64xf32>
    %201 = arith.maximumf %199, %200 : vector<128x64xf32>
    %c128_209 = arith.constant 128 : index
    %c0_210 = arith.constant 0 : index
    %202 = vector.load %arg2[%c128_209, %c0_210] : memref<384x1xf32, #tpu.memory_space<vmem>>, vector<128x1xf32>
    %203 = vector.broadcast %202 : vector<128x1xf32> to vector<128x64xf32>
    %204 = arith.mulf %201, %203 : vector<128x64xf32>
    %205 = arith.truncf %204 : vector<128x64xf32> to vector<128x64xbf16>
    %c160_211 = arith.constant 160 : index
    %c0_212 = arith.constant 0 : index
    %206 = vector.load %arg11[%c160_211, %c0_212] : memref<448x64xbf16, #tpu.memory_space<vmem>>, vector<128x64xbf16>
    tpu.vector_store %arg11[%c160_211, %c0_212], %205 {strides = array<i32>} : memref<448x64xbf16, #tpu.memory_space<vmem>>, vector<128x64xbf16>,
    %cst_213 = arith.constant 0.000000e+00 : f32
    %207 = vector.broadcast %cst_213 : f32 to vector<128x64xf32>
    %c263 = arith.constant 263 : index
    %c0_214 = arith.constant 0 : index
    %208 = vector.load %arg10[%c263, %c0_214] : memref<448x128xbf16, #tpu.memory_space<vmem>>, vector<128x128xbf16>
    %c0_215 = arith.constant 0 : index
    %c0_216 = arith.constant 0 : index
    %c0_217 = arith.constant 0 : index
    %c0_218 = arith.constant 0 : index
    %209 = vector.load %arg5[%c0_215, %c0_216, %c0_217, %c0_218] : memref<3x3x128x64xbf16, #tpu.memory_space<vmem>>, vector<1x1x128x64xbf16>
    %210 = vector.shape_cast %209 : vector<1x1x128x64xbf16> to vector<128x64xbf16>
    %cst_219 = arith.constant dense<0.000000e+00> : vector<128x64xf32>
    %211 = tpu.matmul %208, %210, %cst_219 {dimension_numbers = #tpu.dot_dimension_numbers<[1], [0], [0], [1], [0, 0, 1, 1], [], []>} : vector<128x128xbf16>, vector<128x64xbf16>, vector<128x64xf32> -> vector<128x64xf32>
    %212 = arith.addf %207, %211 : vector<128x64xf32>
    %c264_220 = arith.constant 264 : index
    %c0_221 = arith.constant 0 : index
    %213 = vector.load %arg10[%c264_220, %c0_221] : memref<448x128xbf16, #tpu.memory_space<vmem>>, vector<128x128xbf16>
    %c0_222 = arith.constant 0 : index
    %c1_223 = arith.constant 1 : index
    %c0_224 = arith.constant 0 : index
    %c0_225 = arith.constant 0 : index
    %214 = vector.load %arg5[%c0_222, %c1_223, %c0_224, %c0_225] : memref<3x3x128x64xbf16, #tpu.memory_space<vmem>>, vector<1x1x128x64xbf16>
    %215 = vector.shape_cast %214 : vector<1x1x128x64xbf16> to vector<128x64xbf16>
    %cst_226 = arith.constant dense<0.000000e+00> : vector<128x64xf32>
    %216 = tpu.matmul %213, %215, %cst_226 {dimension_numbers = #tpu.dot_dimension_numbers<[1], [0], [0], [1], [0, 0, 1, 1], [], []>} : vector<128x128xbf16>, vector<128x64xbf16>, vector<128x64xf32> -> vector<128x64xf32>
    %217 = arith.addf %212, %216 : vector<128x64xf32>
    %c265 = arith.constant 265 : index
    %c0_227 = arith.constant 0 : index
    %218 = vector.load %arg10[%c265, %c0_227] : memref<448x128xbf16, #tpu.memory_space<vmem>>, vector<128x128xbf16>
    %c0_228 = arith.constant 0 : index
    %c2_229 = arith.constant 2 : index
    %c0_230 = arith.constant 0 : index
    %c0_231 = arith.constant 0 : index
    %219 = vector.load %arg5[%c0_228, %c2_229, %c0_230, %c0_231] : memref<3x3x128x64xbf16, #tpu.memory_space<vmem>>, vector<1x1x128x64xbf16>
    %220 = vector.shape_cast %219 : vector<1x1x128x64xbf16> to vector<128x64xbf16>
    %cst_232 = arith.constant dense<0.000000e+00> : vector<128x64xf32>
    %221 = tpu.matmul %218, %220, %cst_232 {dimension_numbers = #tpu.dot_dimension_numbers<[1], [0], [0], [1], [0, 0, 1, 1], [], []>} : vector<128x128xbf16>, vector<128x64xbf16>, vector<128x64xf32> -> vector<128x64xf32>
    %222 = arith.addf %217, %221 : vector<128x64xf32>
    %c287 = arith.constant 287 : index
    %c0_233 = arith.constant 0 : index
    %223 = vector.load %arg10[%c287, %c0_233] : memref<448x128xbf16, #tpu.memory_space<vmem>>, vector<128x128xbf16>
    %c1_234 = arith.constant 1 : index
    %c0_235 = arith.constant 0 : index
    %c0_236 = arith.constant 0 : index
    %c0_237 = arith.constant 0 : index
    %224 = vector.load %arg5[%c1_234, %c0_235, %c0_236, %c0_237] : memref<3x3x128x64xbf16, #tpu.memory_space<vmem>>, vector<1x1x128x64xbf16>
    %225 = vector.shape_cast %224 : vector<1x1x128x64xbf16> to vector<128x64xbf16>
    %cst_238 = arith.constant dense<0.000000e+00> : vector<128x64xf32>
    %226 = tpu.matmul %223, %225, %cst_238 {dimension_numbers = #tpu.dot_dimension_numbers<[1], [0], [0], [1], [0, 0, 1, 1], [], []>} : vector<128x128xbf16>, vector<128x64xbf16>, vector<128x64xf32> -> vector<128x64xf32>
    %227 = arith.addf %222, %226 : vector<128x64xf32>
    %c288_239 = arith.constant 288 : index
    %c0_240 = arith.constant 0 : index
    %228 = vector.load %arg10[%c288_239, %c0_240] : memref<448x128xbf16, #tpu.memory_space<vmem>>, vector<128x128xbf16>
    %c1_241 = arith.constant 1 : index
    %c1_242 = arith.constant 1 : index
    %c0_243 = arith.constant 0 : index
    %c0_244 = arith.constant 0 : index
    %229 = vector.load %arg5[%c1_241, %c1_242, %c0_243, %c0_244] : memref<3x3x128x64xbf16, #tpu.memory_space<vmem>>, vector<1x1x128x64xbf16>
    %230 = vector.shape_cast %229 : vector<1x1x128x64xbf16> to vector<128x64xbf16>
    %cst_245 = arith.constant dense<0.000000e+00> : vector<128x64xf32>
    %231 = tpu.matmul %228, %230, %cst_245 {dimension_numbers = #tpu.dot_dimension_numbers<[1], [0], [0], [1], [0, 0, 1, 1], [], []>} : vector<128x128xbf16>, vector<128x64xbf16>, vector<128x64xf32> -> vector<128x64xf32>
    %232 = arith.addf %227, %231 : vector<128x64xf32>
    %c289 = arith.constant 289 : index
    %c0_246 = arith.constant 0 : index
    %233 = vector.load %arg10[%c289, %c0_246] : memref<448x128xbf16, #tpu.memory_space<vmem>>, vector<128x128xbf16>
    %c1_247 = arith.constant 1 : index
    %c2_248 = arith.constant 2 : index
    %c0_249 = arith.constant 0 : index
    %c0_250 = arith.constant 0 : index
    %234 = vector.load %arg5[%c1_247, %c2_248, %c0_249, %c0_250] : memref<3x3x128x64xbf16, #tpu.memory_space<vmem>>, vector<1x1x128x64xbf16>
    %235 = vector.shape_cast %234 : vector<1x1x128x64xbf16> to vector<128x64xbf16>
    %cst_251 = arith.constant dense<0.000000e+00> : vector<128x64xf32>
    %236 = tpu.matmul %233, %235, %cst_251 {dimension_numbers = #tpu.dot_dimension_numbers<[1], [0], [0], [1], [0, 0, 1, 1], [], []>} : vector<128x128xbf16>, vector<128x64xbf16>, vector<128x64xf32> -> vector<128x64xf32>
    %237 = arith.addf %232, %236 : vector<128x64xf32>
    %c311 = arith.constant 311 : index
    %c0_252 = arith.constant 0 : index
    %238 = vector.load %arg10[%c311, %c0_252] : memref<448x128xbf16, #tpu.memory_space<vmem>>, vector<128x128xbf16>
    %c2_253 = arith.constant 2 : index
    %c0_254 = arith.constant 0 : index
    %c0_255 = arith.constant 0 : index
    %c0_256 = arith.constant 0 : index
    %239 = vector.load %arg5[%c2_253, %c0_254, %c0_255, %c0_256] : memref<3x3x128x64xbf16, #tpu.memory_space<vmem>>, vector<1x1x128x64xbf16>
    %240 = vector.shape_cast %239 : vector<1x1x128x64xbf16> to vector<128x64xbf16>
    %cst_257 = arith.constant dense<0.000000e+00> : vector<128x64xf32>
    %241 = tpu.matmul %238, %240, %cst_257 {dimension_numbers = #tpu.dot_dimension_numbers<[1], [0], [0], [1], [0, 0, 1, 1], [], []>} : vector<128x128xbf16>, vector<128x64xbf16>, vector<128x64xf32> -> vector<128x64xf32>
    %242 = arith.addf %237, %241 : vector<128x64xf32>
    %c312_258 = arith.constant 312 : index
    %c0_259 = arith.constant 0 : index
    %243 = vector.load %arg10[%c312_258, %c0_259] : memref<448x128xbf16, #tpu.memory_space<vmem>>, vector<128x128xbf16>
    %c2_260 = arith.constant 2 : index
    %c1_261 = arith.constant 1 : index
    %c0_262 = arith.constant 0 : index
    %c0_263 = arith.constant 0 : index
    %244 = vector.load %arg5[%c2_260, %c1_261, %c0_262, %c0_263] : memref<3x3x128x64xbf16, #tpu.memory_space<vmem>>, vector<1x1x128x64xbf16>
    %245 = vector.shape_cast %244 : vector<1x1x128x64xbf16> to vector<128x64xbf16>
    %cst_264 = arith.constant dense<0.000000e+00> : vector<128x64xf32>
    %246 = tpu.matmul %243, %245, %cst_264 {dimension_numbers = #tpu.dot_dimension_numbers<[1], [0], [0], [1], [0, 0, 1, 1], [], []>} : vector<128x128xbf16>, vector<128x64xbf16>, vector<128x64xf32> -> vector<128x64xf32>
    %247 = arith.addf %242, %246 : vector<128x64xf32>
    %c313 = arith.constant 313 : index
    %c0_265 = arith.constant 0 : index
    %248 = vector.load %arg10[%c313, %c0_265] : memref<448x128xbf16, #tpu.memory_space<vmem>>, vector<128x128xbf16>
    %c2_266 = arith.constant 2 : index
    %c2_267 = arith.constant 2 : index
    %c0_268 = arith.constant 0 : index
    %c0_269 = arith.constant 0 : index
    %249 = vector.load %arg5[%c2_266, %c2_267, %c0_268, %c0_269] : memref<3x3x128x64xbf16, #tpu.memory_space<vmem>>, vector<1x1x128x64xbf16>
    %250 = vector.shape_cast %249 : vector<1x1x128x64xbf16> to vector<128x64xbf16>
    %cst_270 = arith.constant dense<0.000000e+00> : vector<128x64xf32>
    %251 = tpu.matmul %248, %250, %cst_270 {dimension_numbers = #tpu.dot_dimension_numbers<[1], [0], [0], [1], [0, 0, 1, 1], [], []>} : vector<128x128xbf16>, vector<128x64xbf16>, vector<128x64xf32> -> vector<128x64xf32>
    %252 = arith.addf %247, %251 : vector<128x64xf32>
    %c0_271 = arith.constant 0 : index
    %c0_272 = arith.constant 0 : index
    %253 = vector.load %arg6[%c0_271, %c0_272] : memref<1x64xf32, #tpu.memory_space<vmem>>, vector<1x64xf32>
    %254 = vector.broadcast %253 : vector<1x64xf32> to vector<128x64xf32>
    %255 = arith.addf %252, %254 : vector<128x64xf32>
    %cst_273 = arith.constant 0.000000e+00 : f32
    %256 = vector.broadcast %cst_273 : f32 to vector<128x64xf32>
    %257 = arith.maximumf %255, %256 : vector<128x64xf32>
    %c256_274 = arith.constant 256 : index
    %c0_275 = arith.constant 0 : index
    %258 = vector.load %arg2[%c256_274, %c0_275] : memref<384x1xf32, #tpu.memory_space<vmem>>, vector<128x1xf32>
    %259 = vector.broadcast %258 : vector<128x1xf32> to vector<128x64xf32>
    %260 = arith.mulf %257, %259 : vector<128x64xf32>
    %261 = arith.truncf %260 : vector<128x64xf32> to vector<128x64xbf16>
    %c288_276 = arith.constant 288 : index
    %c0_277 = arith.constant 0 : index
    %262 = vector.load %arg11[%c288_276, %c0_277] : memref<448x64xbf16, #tpu.memory_space<vmem>>, vector<128x64xbf16>
    tpu.vector_store %arg11[%c288_276, %c0_277], %261 {strides = array<i32>} : memref<448x64xbf16, #tpu.memory_space<vmem>>, vector<128x64xbf16>,
    %cst_278 = arith.constant 0.000000e+00 : f32
    %263 = vector.broadcast %cst_278 : f32 to vector<128x2xf32>
    %c7_279 = arith.constant 7 : index
    %c0_280 = arith.constant 0 : index
    %264 = vector.load %arg11[%c7_279, %c0_280] : memref<448x64xbf16, #tpu.memory_space<vmem>>, vector<128x64xbf16>
    %c0_281 = arith.constant 0 : index
    %c0_282 = arith.constant 0 : index
    %c0_283 = arith.constant 0 : index
    %c0_284 = arith.constant 0 : index
    %265 = vector.load %arg7[%c0_281, %c0_282, %c0_283, %c0_284] : memref<3x3x64x2xbf16, #tpu.memory_space<vmem>>, vector<1x1x64x2xbf16>
    %266 = vector.shape_cast %265 : vector<1x1x64x2xbf16> to vector<64x2xbf16>
    %cst_285 = arith.constant dense<0.000000e+00> : vector<128x2xf32>
    %267 = tpu.matmul %264, %266, %cst_285 {dimension_numbers = #tpu.dot_dimension_numbers<[1], [0], [0], [1], [0, 0, 1, 1], [], []>} : vector<128x64xbf16>, vector<64x2xbf16>, vector<128x2xf32> -> vector<128x2xf32>
    %268 = arith.addf %263, %267 : vector<128x2xf32>
    %c8_286 = arith.constant 8 : index
    %c0_287 = arith.constant 0 : index
    %269 = vector.load %arg11[%c8_286, %c0_287] : memref<448x64xbf16, #tpu.memory_space<vmem>>, vector<128x64xbf16>
    %c0_288 = arith.constant 0 : index
    %c1_289 = arith.constant 1 : index
    %c0_290 = arith.constant 0 : index
    %c0_291 = arith.constant 0 : index
    %270 = vector.load %arg7[%c0_288, %c1_289, %c0_290, %c0_291] : memref<3x3x64x2xbf16, #tpu.memory_space<vmem>>, vector<1x1x64x2xbf16>
    %271 = vector.shape_cast %270 : vector<1x1x64x2xbf16> to vector<64x2xbf16>
    %cst_292 = arith.constant dense<0.000000e+00> : vector<128x2xf32>
    %272 = tpu.matmul %269, %271, %cst_292 {dimension_numbers = #tpu.dot_dimension_numbers<[1], [0], [0], [1], [0, 0, 1, 1], [], []>} : vector<128x64xbf16>, vector<64x2xbf16>, vector<128x2xf32> -> vector<128x2xf32>
    %273 = arith.addf %268, %272 : vector<128x2xf32>
    %c9_293 = arith.constant 9 : index
    %c0_294 = arith.constant 0 : index
    %274 = vector.load %arg11[%c9_293, %c0_294] : memref<448x64xbf16, #tpu.memory_space<vmem>>, vector<128x64xbf16>
    %c0_295 = arith.constant 0 : index
    %c2_296 = arith.constant 2 : index
    %c0_297 = arith.constant 0 : index
    %c0_298 = arith.constant 0 : index
    %275 = vector.load %arg7[%c0_295, %c2_296, %c0_297, %c0_298] : memref<3x3x64x2xbf16, #tpu.memory_space<vmem>>, vector<1x1x64x2xbf16>
    %276 = vector.shape_cast %275 : vector<1x1x64x2xbf16> to vector<64x2xbf16>
    %cst_299 = arith.constant dense<0.000000e+00> : vector<128x2xf32>
    %277 = tpu.matmul %274, %276, %cst_299 {dimension_numbers = #tpu.dot_dimension_numbers<[1], [0], [0], [1], [0, 0, 1, 1], [], []>} : vector<128x64xbf16>, vector<64x2xbf16>, vector<128x2xf32> -> vector<128x2xf32>
    %278 = arith.addf %273, %277 : vector<128x2xf32>
    %c31_300 = arith.constant 31 : index
    %c0_301 = arith.constant 0 : index
    %279 = vector.load %arg11[%c31_300, %c0_301] : memref<448x64xbf16, #tpu.memory_space<vmem>>, vector<128x64xbf16>
    %c1_302 = arith.constant 1 : index
    %c0_303 = arith.constant 0 : index
    %c0_304 = arith.constant 0 : index
    %c0_305 = arith.constant 0 : index
    %280 = vector.load %arg7[%c1_302, %c0_303, %c0_304, %c0_305] : memref<3x3x64x2xbf16, #tpu.memory_space<vmem>>, vector<1x1x64x2xbf16>
    %281 = vector.shape_cast %280 : vector<1x1x64x2xbf16> to vector<64x2xbf16>
    %cst_306 = arith.constant dense<0.000000e+00> : vector<128x2xf32>
    %282 = tpu.matmul %279, %281, %cst_306 {dimension_numbers = #tpu.dot_dimension_numbers<[1], [0], [0], [1], [0, 0, 1, 1], [], []>} : vector<128x64xbf16>, vector<64x2xbf16>, vector<128x2xf32> -> vector<128x2xf32>
    %283 = arith.addf %278, %282 : vector<128x2xf32>
    %c32_307 = arith.constant 32 : index
    %c0_308 = arith.constant 0 : index
    %284 = vector.load %arg11[%c32_307, %c0_308] : memref<448x64xbf16, #tpu.memory_space<vmem>>, vector<128x64xbf16>
    %c1_309 = arith.constant 1 : index
    %c1_310 = arith.constant 1 : index
    %c0_311 = arith.constant 0 : index
    %c0_312 = arith.constant 0 : index
    %285 = vector.load %arg7[%c1_309, %c1_310, %c0_311, %c0_312] : memref<3x3x64x2xbf16, #tpu.memory_space<vmem>>, vector<1x1x64x2xbf16>
    %286 = vector.shape_cast %285 : vector<1x1x64x2xbf16> to vector<64x2xbf16>
    %cst_313 = arith.constant dense<0.000000e+00> : vector<128x2xf32>
    %287 = tpu.matmul %284, %286, %cst_313 {dimension_numbers = #tpu.dot_dimension_numbers<[1], [0], [0], [1], [0, 0, 1, 1], [], []>} : vector<128x64xbf16>, vector<64x2xbf16>, vector<128x2xf32> -> vector<128x2xf32>
    %288 = arith.addf %283, %287 : vector<128x2xf32>
    %c33_314 = arith.constant 33 : index
    %c0_315 = arith.constant 0 : index
    %289 = vector.load %arg11[%c33_314, %c0_315] : memref<448x64xbf16, #tpu.memory_space<vmem>>, vector<128x64xbf16>
    %c1_316 = arith.constant 1 : index
    %c2_317 = arith.constant 2 : index
    %c0_318 = arith.constant 0 : index
    %c0_319 = arith.constant 0 : index
    %290 = vector.load %arg7[%c1_316, %c2_317, %c0_318, %c0_319] : memref<3x3x64x2xbf16, #tpu.memory_space<vmem>>, vector<1x1x64x2xbf16>
    %291 = vector.shape_cast %290 : vector<1x1x64x2xbf16> to vector<64x2xbf16>
    %cst_320 = arith.constant dense<0.000000e+00> : vector<128x2xf32>
    %292 = tpu.matmul %289, %291, %cst_320 {dimension_numbers = #tpu.dot_dimension_numbers<[1], [0], [0], [1], [0, 0, 1, 1], [], []>} : vector<128x64xbf16>, vector<64x2xbf16>, vector<128x2xf32> -> vector<128x2xf32>
    %293 = arith.addf %288, %292 : vector<128x2xf32>
    %c55_321 = arith.constant 55 : index
    %c0_322 = arith.constant 0 : index
    %294 = vector.load %arg11[%c55_321, %c0_322] : memref<448x64xbf16, #tpu.memory_space<vmem>>, vector<128x64xbf16>
    %c2_323 = arith.constant 2 : index
    %c0_324 = arith.constant 0 : index
    %c0_325 = arith.constant 0 : index
    %c0_326 = arith.constant 0 : index
    %295 = vector.load %arg7[%c2_323, %c0_324, %c0_325, %c0_326] : memref<3x3x64x2xbf16, #tpu.memory_space<vmem>>, vector<1x1x64x2xbf16>
    %296 = vector.shape_cast %295 : vector<1x1x64x2xbf16> to vector<64x2xbf16>
    %cst_327 = arith.constant dense<0.000000e+00> : vector<128x2xf32>
    %297 = tpu.matmul %294, %296, %cst_327 {dimension_numbers = #tpu.dot_dimension_numbers<[1], [0], [0], [1], [0, 0, 1, 1], [], []>} : vector<128x64xbf16>, vector<64x2xbf16>, vector<128x2xf32> -> vector<128x2xf32>
    %298 = arith.addf %293, %297 : vector<128x2xf32>
    %c56_328 = arith.constant 56 : index
    %c0_329 = arith.constant 0 : index
    %299 = vector.load %arg11[%c56_328, %c0_329] : memref<448x64xbf16, #tpu.memory_space<vmem>>, vector<128x64xbf16>
    %c2_330 = arith.constant 2 : index
    %c1_331 = arith.constant 1 : index
    %c0_332 = arith.constant 0 : index
    %c0_333 = arith.constant 0 : index
    %300 = vector.load %arg7[%c2_330, %c1_331, %c0_332, %c0_333] : memref<3x3x64x2xbf16, #tpu.memory_space<vmem>>, vector<1x1x64x2xbf16>
    %301 = vector.shape_cast %300 : vector<1x1x64x2xbf16> to vector<64x2xbf16>
    %cst_334 = arith.constant dense<0.000000e+00> : vector<128x2xf32>
    %302 = tpu.matmul %299, %301, %cst_334 {dimension_numbers = #tpu.dot_dimension_numbers<[1], [0], [0], [1], [0, 0, 1, 1], [], []>} : vector<128x64xbf16>, vector<64x2xbf16>, vector<128x2xf32> -> vector<128x2xf32>
    %303 = arith.addf %298, %302 : vector<128x2xf32>
    %c57_335 = arith.constant 57 : index
    %c0_336 = arith.constant 0 : index
    %304 = vector.load %arg11[%c57_335, %c0_336] : memref<448x64xbf16, #tpu.memory_space<vmem>>, vector<128x64xbf16>
    %c2_337 = arith.constant 2 : index
    %c2_338 = arith.constant 2 : index
    %c0_339 = arith.constant 0 : index
    %c0_340 = arith.constant 0 : index
    %305 = vector.load %arg7[%c2_337, %c2_338, %c0_339, %c0_340] : memref<3x3x64x2xbf16, #tpu.memory_space<vmem>>, vector<1x1x64x2xbf16>
    %306 = vector.shape_cast %305 : vector<1x1x64x2xbf16> to vector<64x2xbf16>
    %cst_341 = arith.constant dense<0.000000e+00> : vector<128x2xf32>
    %307 = tpu.matmul %304, %306, %cst_341 {dimension_numbers = #tpu.dot_dimension_numbers<[1], [0], [0], [1], [0, 0, 1, 1], [], []>} : vector<128x64xbf16>, vector<64x2xbf16>, vector<128x2xf32> -> vector<128x2xf32>
    %308 = arith.addf %303, %307 : vector<128x2xf32>
    %c0_342 = arith.constant 0 : index
    %c0_343 = arith.constant 0 : index
    %309 = vector.load %arg8[%c0_342, %c0_343] : memref<1x2xf32, #tpu.memory_space<vmem>>, vector<1x2xf32>
    %310 = vector.broadcast %309 : vector<1x2xf32> to vector<128x2xf32>
    %311 = arith.addf %308, %310 : vector<128x2xf32>
    %312 = tpu.transpose %311, [1, 0] : vector<128x2xf32> -> vector<2x128xf32>
    %c0_344 = arith.constant 0 : index
    %c0_345 = arith.constant 0 : index
    %c0_346 = arith.constant 0 : index
    %313 = vector.load %arg9[%c0_344, %c0_345, %c0_346] : memref<1x2x384xf32, #tpu.memory_space<vmem>>, vector<1x2x128xf32>
    %314 = vector.shape_cast %313 : vector<1x2x128xf32> to vector<2x128xf32>
    %315 = vector.shape_cast %312 : vector<2x128xf32> to vector<1x2x128xf32>
    tpu.vector_store %arg9[%c0_344, %c0_345, %c0_346], %315 {strides = array<i32>} : memref<1x2x384xf32, #tpu.memory_space<vmem>>, vector<1x2x128xf32>,
    %cst_347 = arith.constant 0.000000e+00 : f32
    %316 = vector.broadcast %cst_347 : f32 to vector<128x2xf32>
    %c135_348 = arith.constant 135 : index
    %c0_349 = arith.constant 0 : index
    %317 = vector.load %arg11[%c135_348, %c0_349] : memref<448x64xbf16, #tpu.memory_space<vmem>>, vector<128x64xbf16>
    %c0_350 = arith.constant 0 : index
    %c0_351 = arith.constant 0 : index
    %c0_352 = arith.constant 0 : index
    %c0_353 = arith.constant 0 : index
    %318 = vector.load %arg7[%c0_350, %c0_351, %c0_352, %c0_353] : memref<3x3x64x2xbf16, #tpu.memory_space<vmem>>, vector<1x1x64x2xbf16>
    %319 = vector.shape_cast %318 : vector<1x1x64x2xbf16> to vector<64x2xbf16>
    %cst_354 = arith.constant dense<0.000000e+00> : vector<128x2xf32>
    %320 = tpu.matmul %317, %319, %cst_354 {dimension_numbers = #tpu.dot_dimension_numbers<[1], [0], [0], [1], [0, 0, 1, 1], [], []>} : vector<128x64xbf16>, vector<64x2xbf16>, vector<128x2xf32> -> vector<128x2xf32>
    %321 = arith.addf %316, %320 : vector<128x2xf32>
    %c136_355 = arith.constant 136 : index
    %c0_356 = arith.constant 0 : index
    %322 = vector.load %arg11[%c136_355, %c0_356] : memref<448x64xbf16, #tpu.memory_space<vmem>>, vector<128x64xbf16>
    %c0_357 = arith.constant 0 : index
    %c1_358 = arith.constant 1 : index
    %c0_359 = arith.constant 0 : index
    %c0_360 = arith.constant 0 : index
    %323 = vector.load %arg7[%c0_357, %c1_358, %c0_359, %c0_360] : memref<3x3x64x2xbf16, #tpu.memory_space<vmem>>, vector<1x1x64x2xbf16>
    %324 = vector.shape_cast %323 : vector<1x1x64x2xbf16> to vector<64x2xbf16>
    %cst_361 = arith.constant dense<0.000000e+00> : vector<128x2xf32>
    %325 = tpu.matmul %322, %324, %cst_361 {dimension_numbers = #tpu.dot_dimension_numbers<[1], [0], [0], [1], [0, 0, 1, 1], [], []>} : vector<128x64xbf16>, vector<64x2xbf16>, vector<128x2xf32> -> vector<128x2xf32>
    %326 = arith.addf %321, %325 : vector<128x2xf32>
    %c137_362 = arith.constant 137 : index
    %c0_363 = arith.constant 0 : index
    %327 = vector.load %arg11[%c137_362, %c0_363] : memref<448x64xbf16, #tpu.memory_space<vmem>>, vector<128x64xbf16>
    %c0_364 = arith.constant 0 : index
    %c2_365 = arith.constant 2 : index
    %c0_366 = arith.constant 0 : index
    %c0_367 = arith.constant 0 : index
    %328 = vector.load %arg7[%c0_364, %c2_365, %c0_366, %c0_367] : memref<3x3x64x2xbf16, #tpu.memory_space<vmem>>, vector<1x1x64x2xbf16>
    %329 = vector.shape_cast %328 : vector<1x1x64x2xbf16> to vector<64x2xbf16>
    %cst_368 = arith.constant dense<0.000000e+00> : vector<128x2xf32>
    %330 = tpu.matmul %327, %329, %cst_368 {dimension_numbers = #tpu.dot_dimension_numbers<[1], [0], [0], [1], [0, 0, 1, 1], [], []>} : vector<128x64xbf16>, vector<64x2xbf16>, vector<128x2xf32> -> vector<128x2xf32>
    %331 = arith.addf %326, %330 : vector<128x2xf32>
    %c159_369 = arith.constant 159 : index
    %c0_370 = arith.constant 0 : index
    %332 = vector.load %arg11[%c159_369, %c0_370] : memref<448x64xbf16, #tpu.memory_space<vmem>>, vector<128x64xbf16>
    %c1_371 = arith.constant 1 : index
    %c0_372 = arith.constant 0 : index
    %c0_373 = arith.constant 0 : index
    %c0_374 = arith.constant 0 : index
    %333 = vector.load %arg7[%c1_371, %c0_372, %c0_373, %c0_374] : memref<3x3x64x2xbf16, #tpu.memory_space<vmem>>, vector<1x1x64x2xbf16>
    %334 = vector.shape_cast %333 : vector<1x1x64x2xbf16> to vector<64x2xbf16>
    %cst_375 = arith.constant dense<0.000000e+00> : vector<128x2xf32>
    %335 = tpu.matmul %332, %334, %cst_375 {dimension_numbers = #tpu.dot_dimension_numbers<[1], [0], [0], [1], [0, 0, 1, 1], [], []>} : vector<128x64xbf16>, vector<64x2xbf16>, vector<128x2xf32> -> vector<128x2xf32>
    %336 = arith.addf %331, %335 : vector<128x2xf32>
    %c160_376 = arith.constant 160 : index
    %c0_377 = arith.constant 0 : index
    %337 = vector.load %arg11[%c160_376, %c0_377] : memref<448x64xbf16, #tpu.memory_space<vmem>>, vector<128x64xbf16>
    %c1_378 = arith.constant 1 : index
    %c1_379 = arith.constant 1 : index
    %c0_380 = arith.constant 0 : index
    %c0_381 = arith.constant 0 : index
    %338 = vector.load %arg7[%c1_378, %c1_379, %c0_380, %c0_381] : memref<3x3x64x2xbf16, #tpu.memory_space<vmem>>, vector<1x1x64x2xbf16>
    %339 = vector.shape_cast %338 : vector<1x1x64x2xbf16> to vector<64x2xbf16>
    %cst_382 = arith.constant dense<0.000000e+00> : vector<128x2xf32>
    %340 = tpu.matmul %337, %339, %cst_382 {dimension_numbers = #tpu.dot_dimension_numbers<[1], [0], [0], [1], [0, 0, 1, 1], [], []>} : vector<128x64xbf16>, vector<64x2xbf16>, vector<128x2xf32> -> vector<128x2xf32>
    %341 = arith.addf %336, %340 : vector<128x2xf32>
    %c161_383 = arith.constant 161 : index
    %c0_384 = arith.constant 0 : index
    %342 = vector.load %arg11[%c161_383, %c0_384] : memref<448x64xbf16, #tpu.memory_space<vmem>>, vector<128x64xbf16>
    %c1_385 = arith.constant 1 : index
    %c2_386 = arith.constant 2 : index
    %c0_387 = arith.constant 0 : index
    %c0_388 = arith.constant 0 : index
    %343 = vector.load %arg7[%c1_385, %c2_386, %c0_387, %c0_388] : memref<3x3x64x2xbf16, #tpu.memory_space<vmem>>, vector<1x1x64x2xbf16>
    %344 = vector.shape_cast %343 : vector<1x1x64x2xbf16> to vector<64x2xbf16>
    %cst_389 = arith.constant dense<0.000000e+00> : vector<128x2xf32>
    %345 = tpu.matmul %342, %344, %cst_389 {dimension_numbers = #tpu.dot_dimension_numbers<[1], [0], [0], [1], [0, 0, 1, 1], [], []>} : vector<128x64xbf16>, vector<64x2xbf16>, vector<128x2xf32> -> vector<128x2xf32>
    %346 = arith.addf %341, %345 : vector<128x2xf32>
    %c183_390 = arith.constant 183 : index
    %c0_391 = arith.constant 0 : index
    %347 = vector.load %arg11[%c183_390, %c0_391] : memref<448x64xbf16, #tpu.memory_space<vmem>>, vector<128x64xbf16>
    %c2_392 = arith.constant 2 : index
    %c0_393 = arith.constant 0 : index
    %c0_394 = arith.constant 0 : index
    %c0_395 = arith.constant 0 : index
    %348 = vector.load %arg7[%c2_392, %c0_393, %c0_394, %c0_395] : memref<3x3x64x2xbf16, #tpu.memory_space<vmem>>, vector<1x1x64x2xbf16>
    %349 = vector.shape_cast %348 : vector<1x1x64x2xbf16> to vector<64x2xbf16>
    %cst_396 = arith.constant dense<0.000000e+00> : vector<128x2xf32>
    %350 = tpu.matmul %347, %349, %cst_396 {dimension_numbers = #tpu.dot_dimension_numbers<[1], [0], [0], [1], [0, 0, 1, 1], [], []>} : vector<128x64xbf16>, vector<64x2xbf16>, vector<128x2xf32> -> vector<128x2xf32>
    %351 = arith.addf %346, %350 : vector<128x2xf32>
    %c184_397 = arith.constant 184 : index
    %c0_398 = arith.constant 0 : index
    %352 = vector.load %arg11[%c184_397, %c0_398] : memref<448x64xbf16, #tpu.memory_space<vmem>>, vector<128x64xbf16>
    %c2_399 = arith.constant 2 : index
    %c1_400 = arith.constant 1 : index
    %c0_401 = arith.constant 0 : index
    %c0_402 = arith.constant 0 : index
    %353 = vector.load %arg7[%c2_399, %c1_400, %c0_401, %c0_402] : memref<3x3x64x2xbf16, #tpu.memory_space<vmem>>, vector<1x1x64x2xbf16>
    %354 = vector.shape_cast %353 : vector<1x1x64x2xbf16> to vector<64x2xbf16>
    %cst_403 = arith.constant dense<0.000000e+00> : vector<128x2xf32>
    %355 = tpu.matmul %352, %354, %cst_403 {dimension_numbers = #tpu.dot_dimension_numbers<[1], [0], [0], [1], [0, 0, 1, 1], [], []>} : vector<128x64xbf16>, vector<64x2xbf16>, vector<128x2xf32> -> vector<128x2xf32>
    %356 = arith.addf %351, %355 : vector<128x2xf32>
    %c185_404 = arith.constant 185 : index
    %c0_405 = arith.constant 0 : index
    %357 = vector.load %arg11[%c185_404, %c0_405] : memref<448x64xbf16, #tpu.memory_space<vmem>>, vector<128x64xbf16>
    %c2_406 = arith.constant 2 : index
    %c2_407 = arith.constant 2 : index
    %c0_408 = arith.constant 0 : index
    %c0_409 = arith.constant 0 : index
    %358 = vector.load %arg7[%c2_406, %c2_407, %c0_408, %c0_409] : memref<3x3x64x2xbf16, #tpu.memory_space<vmem>>, vector<1x1x64x2xbf16>
    %359 = vector.shape_cast %358 : vector<1x1x64x2xbf16> to vector<64x2xbf16>
    %cst_410 = arith.constant dense<0.000000e+00> : vector<128x2xf32>
    %360 = tpu.matmul %357, %359, %cst_410 {dimension_numbers = #tpu.dot_dimension_numbers<[1], [0], [0], [1], [0, 0, 1, 1], [], []>} : vector<128x64xbf16>, vector<64x2xbf16>, vector<128x2xf32> -> vector<128x2xf32>
    %361 = arith.addf %356, %360 : vector<128x2xf32>
    %c0_411 = arith.constant 0 : index
    %c0_412 = arith.constant 0 : index
    %362 = vector.load %arg8[%c0_411, %c0_412] : memref<1x2xf32, #tpu.memory_space<vmem>>, vector<1x2xf32>
    %363 = vector.broadcast %362 : vector<1x2xf32> to vector<128x2xf32>
    %364 = arith.addf %361, %363 : vector<128x2xf32>
    %365 = tpu.transpose %364, [1, 0] : vector<128x2xf32> -> vector<2x128xf32>
    %c0_413 = arith.constant 0 : index
    %c0_414 = arith.constant 0 : index
    %c128_415 = arith.constant 128 : index
    %366 = vector.load %arg9[%c0_413, %c0_414, %c128_415] : memref<1x2x384xf32, #tpu.memory_space<vmem>>, vector<1x2x128xf32>
    %367 = vector.shape_cast %366 : vector<1x2x128xf32> to vector<2x128xf32>
    %368 = vector.shape_cast %365 : vector<2x128xf32> to vector<1x2x128xf32>
    tpu.vector_store %arg9[%c0_413, %c0_414, %c128_415], %368 {strides = array<i32>} : memref<1x2x384xf32, #tpu.memory_space<vmem>>, vector<1x2x128xf32>,
    %cst_416 = arith.constant 0.000000e+00 : f32
    %369 = vector.broadcast %cst_416 : f32 to vector<128x2xf32>
    %c263_417 = arith.constant 263 : index
    %c0_418 = arith.constant 0 : index
    %370 = vector.load %arg11[%c263_417, %c0_418] : memref<448x64xbf16, #tpu.memory_space<vmem>>, vector<128x64xbf16>
    %c0_419 = arith.constant 0 : index
    %c0_420 = arith.constant 0 : index
    %c0_421 = arith.constant 0 : index
    %c0_422 = arith.constant 0 : index
    %371 = vector.load %arg7[%c0_419, %c0_420, %c0_421, %c0_422] : memref<3x3x64x2xbf16, #tpu.memory_space<vmem>>, vector<1x1x64x2xbf16>
    %372 = vector.shape_cast %371 : vector<1x1x64x2xbf16> to vector<64x2xbf16>
    %cst_423 = arith.constant dense<0.000000e+00> : vector<128x2xf32>
    %373 = tpu.matmul %370, %372, %cst_423 {dimension_numbers = #tpu.dot_dimension_numbers<[1], [0], [0], [1], [0, 0, 1, 1], [], []>} : vector<128x64xbf16>, vector<64x2xbf16>, vector<128x2xf32> -> vector<128x2xf32>
    %374 = arith.addf %369, %373 : vector<128x2xf32>
    %c264_424 = arith.constant 264 : index
    %c0_425 = arith.constant 0 : index
    %375 = vector.load %arg11[%c264_424, %c0_425] : memref<448x64xbf16, #tpu.memory_space<vmem>>, vector<128x64xbf16>
    %c0_426 = arith.constant 0 : index
    %c1_427 = arith.constant 1 : index
    %c0_428 = arith.constant 0 : index
    %c0_429 = arith.constant 0 : index
    %376 = vector.load %arg7[%c0_426, %c1_427, %c0_428, %c0_429] : memref<3x3x64x2xbf16, #tpu.memory_space<vmem>>, vector<1x1x64x2xbf16>
    %377 = vector.shape_cast %376 : vector<1x1x64x2xbf16> to vector<64x2xbf16>
    %cst_430 = arith.constant dense<0.000000e+00> : vector<128x2xf32>
    %378 = tpu.matmul %375, %377, %cst_430 {dimension_numbers = #tpu.dot_dimension_numbers<[1], [0], [0], [1], [0, 0, 1, 1], [], []>} : vector<128x64xbf16>, vector<64x2xbf16>, vector<128x2xf32> -> vector<128x2xf32>
    %379 = arith.addf %374, %378 : vector<128x2xf32>
    %c265_431 = arith.constant 265 : index
    %c0_432 = arith.constant 0 : index
    %380 = vector.load %arg11[%c265_431, %c0_432] : memref<448x64xbf16, #tpu.memory_space<vmem>>, vector<128x64xbf16>
    %c0_433 = arith.constant 0 : index
    %c2_434 = arith.constant 2 : index
    %c0_435 = arith.constant 0 : index
    %c0_436 = arith.constant 0 : index
    %381 = vector.load %arg7[%c0_433, %c2_434, %c0_435, %c0_436] : memref<3x3x64x2xbf16, #tpu.memory_space<vmem>>, vector<1x1x64x2xbf16>
    %382 = vector.shape_cast %381 : vector<1x1x64x2xbf16> to vector<64x2xbf16>
    %cst_437 = arith.constant dense<0.000000e+00> : vector<128x2xf32>
    %383 = tpu.matmul %380, %382, %cst_437 {dimension_numbers = #tpu.dot_dimension_numbers<[1], [0], [0], [1], [0, 0, 1, 1], [], []>} : vector<128x64xbf16>, vector<64x2xbf16>, vector<128x2xf32> -> vector<128x2xf32>
    %384 = arith.addf %379, %383 : vector<128x2xf32>
    %c287_438 = arith.constant 287 : index
    %c0_439 = arith.constant 0 : index
    %385 = vector.load %arg11[%c287_438, %c0_439] : memref<448x64xbf16, #tpu.memory_space<vmem>>, vector<128x64xbf16>
    %c1_440 = arith.constant 1 : index
    %c0_441 = arith.constant 0 : index
    %c0_442 = arith.constant 0 : index
    %c0_443 = arith.constant 0 : index
    %386 = vector.load %arg7[%c1_440, %c0_441, %c0_442, %c0_443] : memref<3x3x64x2xbf16, #tpu.memory_space<vmem>>, vector<1x1x64x2xbf16>
    %387 = vector.shape_cast %386 : vector<1x1x64x2xbf16> to vector<64x2xbf16>
    %cst_444 = arith.constant dense<0.000000e+00> : vector<128x2xf32>
    %388 = tpu.matmul %385, %387, %cst_444 {dimension_numbers = #tpu.dot_dimension_numbers<[1], [0], [0], [1], [0, 0, 1, 1], [], []>} : vector<128x64xbf16>, vector<64x2xbf16>, vector<128x2xf32> -> vector<128x2xf32>
    %389 = arith.addf %384, %388 : vector<128x2xf32>
    %c288_445 = arith.constant 288 : index
    %c0_446 = arith.constant 0 : index
    %390 = vector.load %arg11[%c288_445, %c0_446] : memref<448x64xbf16, #tpu.memory_space<vmem>>, vector<128x64xbf16>
    %c1_447 = arith.constant 1 : index
    %c1_448 = arith.constant 1 : index
    %c0_449 = arith.constant 0 : index
    %c0_450 = arith.constant 0 : index
    %391 = vector.load %arg7[%c1_447, %c1_448, %c0_449, %c0_450] : memref<3x3x64x2xbf16, #tpu.memory_space<vmem>>, vector<1x1x64x2xbf16>
    %392 = vector.shape_cast %391 : vector<1x1x64x2xbf16> to vector<64x2xbf16>
    %cst_451 = arith.constant dense<0.000000e+00> : vector<128x2xf32>
    %393 = tpu.matmul %390, %392, %cst_451 {dimension_numbers = #tpu.dot_dimension_numbers<[1], [0], [0], [1], [0, 0, 1, 1], [], []>} : vector<128x64xbf16>, vector<64x2xbf16>, vector<128x2xf32> -> vector<128x2xf32>
    %394 = arith.addf %389, %393 : vector<128x2xf32>
    %c289_452 = arith.constant 289 : index
    %c0_453 = arith.constant 0 : index
    %395 = vector.load %arg11[%c289_452, %c0_453] : memref<448x64xbf16, #tpu.memory_space<vmem>>, vector<128x64xbf16>
    %c1_454 = arith.constant 1 : index
    %c2_455 = arith.constant 2 : index
    %c0_456 = arith.constant 0 : index
    %c0_457 = arith.constant 0 : index
    %396 = vector.load %arg7[%c1_454, %c2_455, %c0_456, %c0_457] : memref<3x3x64x2xbf16, #tpu.memory_space<vmem>>, vector<1x1x64x2xbf16>
    %397 = vector.shape_cast %396 : vector<1x1x64x2xbf16> to vector<64x2xbf16>
    %cst_458 = arith.constant dense<0.000000e+00> : vector<128x2xf32>
    %398 = tpu.matmul %395, %397, %cst_458 {dimension_numbers = #tpu.dot_dimension_numbers<[1], [0], [0], [1], [0, 0, 1, 1], [], []>} : vector<128x64xbf16>, vector<64x2xbf16>, vector<128x2xf32> -> vector<128x2xf32>
    %399 = arith.addf %394, %398 : vector<128x2xf32>
    %c311_459 = arith.constant 311 : index
    %c0_460 = arith.constant 0 : index
    %400 = vector.load %arg11[%c311_459, %c0_460] : memref<448x64xbf16, #tpu.memory_space<vmem>>, vector<128x64xbf16>
    %c2_461 = arith.constant 2 : index
    %c0_462 = arith.constant 0 : index
    %c0_463 = arith.constant 0 : index
    %c0_464 = arith.constant 0 : index
    %401 = vector.load %arg7[%c2_461, %c0_462, %c0_463, %c0_464] : memref<3x3x64x2xbf16, #tpu.memory_space<vmem>>, vector<1x1x64x2xbf16>
    %402 = vector.shape_cast %401 : vector<1x1x64x2xbf16> to vector<64x2xbf16>
    %cst_465 = arith.constant dense<0.000000e+00> : vector<128x2xf32>
    %403 = tpu.matmul %400, %402, %cst_465 {dimension_numbers = #tpu.dot_dimension_numbers<[1], [0], [0], [1], [0, 0, 1, 1], [], []>} : vector<128x64xbf16>, vector<64x2xbf16>, vector<128x2xf32> -> vector<128x2xf32>
    %404 = arith.addf %399, %403 : vector<128x2xf32>
    %c312_466 = arith.constant 312 : index
    %c0_467 = arith.constant 0 : index
    %405 = vector.load %arg11[%c312_466, %c0_467] : memref<448x64xbf16, #tpu.memory_space<vmem>>, vector<128x64xbf16>
    %c2_468 = arith.constant 2 : index
    %c1_469 = arith.constant 1 : index
    %c0_470 = arith.constant 0 : index
    %c0_471 = arith.constant 0 : index
    %406 = vector.load %arg7[%c2_468, %c1_469, %c0_470, %c0_471] : memref<3x3x64x2xbf16, #tpu.memory_space<vmem>>, vector<1x1x64x2xbf16>
    %407 = vector.shape_cast %406 : vector<1x1x64x2xbf16> to vector<64x2xbf16>
    %cst_472 = arith.constant dense<0.000000e+00> : vector<128x2xf32>
    %408 = tpu.matmul %405, %407, %cst_472 {dimension_numbers = #tpu.dot_dimension_numbers<[1], [0], [0], [1], [0, 0, 1, 1], [], []>} : vector<128x64xbf16>, vector<64x2xbf16>, vector<128x2xf32> -> vector<128x2xf32>
    %409 = arith.addf %404, %408 : vector<128x2xf32>
    %c313_473 = arith.constant 313 : index
    %c0_474 = arith.constant 0 : index
    %410 = vector.load %arg11[%c313_473, %c0_474] : memref<448x64xbf16, #tpu.memory_space<vmem>>, vector<128x64xbf16>
    %c2_475 = arith.constant 2 : index
    %c2_476 = arith.constant 2 : index
    %c0_477 = arith.constant 0 : index
    %c0_478 = arith.constant 0 : index
    %411 = vector.load %arg7[%c2_475, %c2_476, %c0_477, %c0_478] : memref<3x3x64x2xbf16, #tpu.memory_space<vmem>>, vector<1x1x64x2xbf16>
    %412 = vector.shape_cast %411 : vector<1x1x64x2xbf16> to vector<64x2xbf16>
    %cst_479 = arith.constant dense<0.000000e+00> : vector<128x2xf32>
    %413 = tpu.matmul %410, %412, %cst_479 {dimension_numbers = #tpu.dot_dimension_numbers<[1], [0], [0], [1], [0, 0, 1, 1], [], []>} : vector<128x64xbf16>, vector<64x2xbf16>, vector<128x2xf32> -> vector<128x2xf32>
    %414 = arith.addf %409, %413 : vector<128x2xf32>
    %c0_480 = arith.constant 0 : index
    %c0_481 = arith.constant 0 : index
    %415 = vector.load %arg8[%c0_480, %c0_481] : memref<1x2xf32, #tpu.memory_space<vmem>>, vector<1x2xf32>
    %416 = vector.broadcast %415 : vector<1x2xf32> to vector<128x2xf32>
    %417 = arith.addf %414, %416 : vector<128x2xf32>
    %418 = tpu.transpose %417, [1, 0] : vector<128x2xf32> -> vector<2x128xf32>
    %c0_482 = arith.constant 0 : index
    %c0_483 = arith.constant 0 : index
    %c256_484 = arith.constant 256 : index
    %419 = vector.load %arg9[%c0_482, %c0_483, %c256_484] : memref<1x2x384xf32, #tpu.memory_space<vmem>>, vector<1x2x128xf32>
    %420 = vector.shape_cast %419 : vector<1x2x128xf32> to vector<2x128xf32>
    %421 = vector.shape_cast %418 : vector<2x128xf32> to vector<1x2x128xf32>
    tpu.vector_store %arg9[%c0_482, %c0_483, %c256_484], %421 {strides = array<i32>} : memref<1x2x384xf32, #tpu.memory_space<vmem>>, vector<1x2x128xf32>,
    return
  }
  func.func @transform_0(%arg0: i32) -> (i32, i32, i32) {
    %c0_i32 = arith.constant 0 : i32
    %c0_i32_0 = arith.constant 0 : i32
    %c0_i32_1 = arith.constant 0 : i32
    return %arg0, %c0_i32, %c0_i32_0 : i32, i32, i32
  }
  func.func @transform_1(%arg0: i32) -> (i32, i32) {
    %c0_i32 = arith.constant 0 : i32
    %c0_i32_0 = arith.constant 0 : i32
    %c0_i32_1 = arith.constant 0 : i32
    return %c0_i32, %c0_i32_0 : i32, i32
  }
  func.func @transform_2(%arg0: i32) -> (i32, i32, i32) {
    %c0_i32 = arith.constant 0 : i32
    %c0_i32_0 = arith.constant 0 : i32
    %c0_i32_1 = arith.constant 0 : i32
    %c0_i32_2 = arith.constant 0 : i32
    return %c0_i32, %c0_i32_0, %c0_i32_1 : i32, i32, i32
  }
  func.func @transform_3(%arg0: i32) -> (i32, i32) {
    %c0_i32 = arith.constant 0 : i32
    %c0_i32_0 = arith.constant 0 : i32
    %c0_i32_1 = arith.constant 0 : i32
    return %c0_i32, %c0_i32_0 : i32, i32
  }
  func.func @transform_4(%arg0: i32) -> (i32, i32, i32, i32) {
    %c0_i32 = arith.constant 0 : i32
    %c0_i32_0 = arith.constant 0 : i32
    %c0_i32_1 = arith.constant 0 : i32
    %c0_i32_2 = arith.constant 0 : i32
    %c0_i32_3 = arith.constant 0 : i32
    return %c0_i32, %c0_i32_0, %c0_i32_1, %c0_i32_2 : i32, i32, i32, i32
  }
  func.func @transform_5(%arg0: i32) -> (i32, i32) {
    %c0_i32 = arith.constant 0 : i32
    %c0_i32_0 = arith.constant 0 : i32
    %c0_i32_1 = arith.constant 0 : i32
    return %c0_i32, %c0_i32_0 : i32, i32
  }
  func.func @transform_6(%arg0: i32) -> (i32, i32, i32, i32) {
    %c0_i32 = arith.constant 0 : i32
    %c0_i32_0 = arith.constant 0 : i32
    %c0_i32_1 = arith.constant 0 : i32
    %c0_i32_2 = arith.constant 0 : i32
    %c0_i32_3 = arith.constant 0 : i32
    return %c0_i32, %c0_i32_0, %c0_i32_1, %c0_i32_2 : i32, i32, i32, i32
  }
  func.func @transform_7(%arg0: i32) -> (i32, i32) {
    %c0_i32 = arith.constant 0 : i32
    %c0_i32_0 = arith.constant 0 : i32
    %c0_i32_1 = arith.constant 0 : i32
    return %c0_i32, %c0_i32_0 : i32, i32
  }
  func.func @transform_8(%arg0: i32) -> (i32, i32, i32) {
    %c0_i32 = arith.constant 0 : i32
    %c0_i32_0 = arith.constant 0 : i32
    %c0_i32_1 = arith.constant 0 : i32
    return %arg0, %c0_i32, %c0_i32_0 : i32, i32, i32
  }
}

</mosaic_0001>

<bundles_post_ra>
// kernel: tpu_custom_call.1
= control target key start
LH: loop header
LB: loop body
LE: loop exit
PB: predicated region body
PF: predicated region fallthrough
CT: control target
= control target key end

     0   :  { %13 = vsyncpa [#allocation5], 0  ;;  %s25015_s0 = inlined_call_operand.vmem [shape: bf16[2,448,96], index: 0, kind: input, shape index: {}]   ;;  %s25016_s1 = inlined_call_operand.vmem [shape: f32[384,1], index: 1, kind: input, shape index: {}]   ;;  %s25017_s2 = inlined_call_operand.vmem [shape: bf16[3,96,128], index: 2, kind: input, shape index: {}]   ;;  %s25018_s3 = inlined_call_operand.vmem [shape: f32[1,128], index: 3, kind: input, shape index: {}]   ;;  %s25019_s4 = inlined_call_operand.vmem [shape: bf16[3,3,128,64], index: 4, kind: input, shape index: {}]   ;;  %s25020_s5 = inlined_call_operand.vmem [shape: f32[1,64], index: 5, kind: input, shape index: {}]   ;;  %s25021_s6 = inlined_call_operand.vmem [shape: bf16[3,3,64,2], index: 6, kind: input, shape index: {}]   ;;  %s25022_s7 = inlined_call_operand.vmem [shape: f32[1,2], index: 7, kind: input, shape index: {}]   ;;  %s25023_s8 = inlined_call_operand.hbm [shape: f32[2,2,384], index: 8, kind: output, shape index: {}]  }
   0x1   :  { %15 = vsyncpa [#allocation5 + $0x1], 0  ;;  %s20677_s27 = smov 0   ;;  %s20679_s28 = smov 0  }
   0x2   :  { %s20681_s29 = smov 0   ;;  %s20683_s30 = smov 0  }
   0x3 LB: > { %s20698_s9 = sadd.s32 4294967295, %s20629_s30   ;;  %s14925_s10 = sadd.s32 4294967294, %s20629_s30   ;;  %s20629_s30 = sphi %s20683_s30, %s25029_s30   ;;  %s20625_s29 = sphi %s20681_s29, %s25028_s29   ;;  %s20621_s28 = sphi %s20679_s28, %s25027_s28   ;;  %s20617_s27 = sphi %s20677_s27, %s25026_s27  }
   0x4   : > { %s20702_s11 = sadd.s32 1, %s20629_s30   ;;  %s201_s12 = sadd.s32 1, %s20625_s29 }
   0x5   : > { %s198_s13 = ssub.s32 %s20629_s30, %s20702_s11  ;;  %p211_p0 = scmp.ne.s32.totalorder %s20625_s29, %s20621_s28 }
   0x6   : > { %p199_p1 = scmp.eq.s32.totalorder %s198_s13, 0  ;;  %p212_p2 = scmp.eq.s32.totalorder %s20698_s9, 1 }
   0x7   : > { %p217_p3 = scmp.ne.s32.totalorder %s20621_s28, %s20617_s27  ;;  %p218_p4 = scmp.eq.s32.totalorder %s14925_s10, 1 }
   0x8   : > { %s20713_s14 = scalar_select %p199_p1, %s20625_s29, %s201_s12  }
   0x9   : > { %p20715_p5 = por %p212_p2, %p211_p0  ;;  %p20719_p6 = por %p218_p4, %p217_p3 }
   0xa   : > { %p14928_p7 = scmp.ge.s32.totalorder %s20629_s30, 1  ;;  %p265_p8 = scmp.lt.s32.totalorder %s20629_s30, 3 }
   0xc   : > { %p266_p9 = pnand %p14928_p7, %p265_p8 }
   0xd   : > { %p299_p10 = scmp.lt.s32.totalorder (!%p266_p9), %s20698_s9, 1  ;;  %s296_s22 = sand.u32 (!%p266_p9), 1, %s20621_s28  }
   0xe   : > { %269 = sbr.rel (%p266_p9) target bundleno = 2235 (0x8bb), region = 52  ;;  %s14850_s18 = scalar_lea.sflag (!%p266_p9), [#allocation5], %s296_s22 }
   0xf   : > { %s20491_s26 = smul.u32 (!%p266_p9), 6, %s20698_s9 }
  0x11   : > { %s14861_s17 = scalar_lea.hbm (!%p266_p9), %s25023_s8, %s20491_s26 }
  0x13   : > { %v20728_v0 = vld [vmem:[%s25016_s1 + $0x20] sm:$0xff]  ;;  %v20733_v1 = vld [vmem:[%s25016_s1 + $0x10] sm:$0xff]  ;;  %v20631_v3 = vmov 0   ;;  %v18090_v4 = vld [vmem:[%s25017_s2 + $0x58] sm:$0xff]  ;;  %s300_s23 = scalar_select %p299_p10, %s20698_s9, 1  ;;  %vm442_vm0 = vcmask 785408  }
  0x14   : > { %v20738_v2 = vld [vmem:[%s25016_s1] sm:$0xff]  ;;  %20534 = vset.pattern.permute.xlu2 %v20631_v3  ;;  %305 = vst [vmem:[#allocation2] sm:$0xf] %v20631_v3  ;;  %20533 = vset.pattern.permute.xlu1 %v20631_v3  ;;  %v20749_v5 = vld [vmem:[%s25017_s2 + $0x28] sm:$0xff]  ;;  %v18089_v7 = vld [vmem:[%s25017_s2 + $0x50] sm:$0xff]  ;;  %vm313_vm3 = vcmask 519168  }
  0x15   : > { %v20754_v6 = vld [vmem:[%s25017_s2 + $0x88] sm:$0xff]  ;;  %306 = vst [vmem:[#allocation2 + $0x4] sm:$0xf] %v20631_v3  ;;  %20532 = vset.pattern.permute.xlu0 %v20631_v3  ;;  %907 = vperm.xlu2 %20534, %v20728_v0   ;;  %v20772_v8 = vld [vmem:[%s25017_s2 + $0x20] sm:$0xff]  ;;  %v20790_v11 = vld [vmem:[%s25016_s1 + $0x18] sm:$0xff]  ;;  %s20490_s12 = smul.u32 224, %s300_s23 }
  0x16   : > { %307 = vst [vmem:[#allocation2 + $0x8] sm:$0xf] %v20631_v3  ;;  %897 = vperm.xlu1 %20533, %v20733_v1   ;;  %887 = vperm.xlu0 %20532, %v20738_v2   ;;  %v20777_v9 = vld [vmem:[%s25017_s2 + $0x80] sm:$0xff]  ;;  %v20784_v10 = vld [vmem:[%s25016_s1 + $0x28] sm:$0xff]  ;;  %v20806_v14 = vld [vmem:[%s25017_s2 + $0x18] sm:$0xff]  ;;  %vm9124_vm4 = vcmask 523264  }
  0x17   : > { %308 = vst [vmem:[#allocation2 + $0xc] sm:$0xf] %v20631_v3  ;;  %469 = vmatpush.bf16.msra.mxu0 %v18090_v4  ;;  %20309 = vmatpush.bf16.msra.mxu3 %v18090_v4  ;;  %v20795_v12 = vld [vmem:[%s25016_s1 + $0x8] sm:$0xff]  ;;  %v20811_v15 = vld [vmem:[%s25017_s2 + $0x78] sm:$0xff]  ;;  %v18087_v16 = vld [vmem:[%s25017_s2 + $0x40] sm:$0xff]  ;;  %s20883_s24 = scalar_lea.vmem %s25015_s0, %s20490_s12  ;;  %s14865_s12 = sshll.u32 %s14861_s17, 4  ;;  %s14866_s12 = int_to_ptr.hbm [resolvable:$true] %s14865_s12 }
  0x18   : > { %309 = vst [vmem:[#allocation2 + $0xd0] sm:$0xf] %v20631_v3  ;;  %20315 = vmatpush.bf16.msra.mxu1 %v20749_v5  ;;  %20321 = vmatpush.bf16.msra.mxu2 %v20754_v6  ;;  %v18088_v13 = vld [vmem:[%s25017_s2 + $0x48] sm:$0xff]  ;;  %v20825_v17 = vld [vmem:[%s25017_s2 + $0x10] sm:$0xff]  ;;  %v20835_v19 = vld [vmem:[%s25016_s1 + $0x40] sm:$0xff]  ;;  %s20570_s19 = sshra.s32 %s14866_s12, 4  ;;  %s20571_s19 = int_to_ptr.hbm [resolvable:$true] %s20570_s19 }
  0x19   : > { %310 = vst [vmem:[#allocation2 + $0xd4] sm:$0xf] %v20631_v3  ;;  %v20830_v18 = vld [vmem:[%s25017_s2 + $0x70] sm:$0xff]  ;;  %v20840_v20 = vld [vmem:[%s25016_s1 + $0x38] sm:$0xff]  ;;  %v20853_v23 = vld [vmem:[%s25017_s2 + $0x8] sm:$0xff]  ;;  %s20572_s20 = scalar_lea.hbm %s20571_s19, 6  ;;  %p20577_p0 = scmp.lt.s32.totalorder %s20571_s19, %s25023_s8 }
  0x1a   : > { %311 = vst [vmem:[#allocation2 + $0xd8] sm:$0xf] %v20631_v3  ;;  %v20845_v21 = vld [vmem:[%s25016_s1 + $0x30] sm:$0xff]  ;;  %v18086_v22 = vld [vmem:[%s25017_s2 + $0x38] sm:$0xff]  ;;  %v20858_v24 = vld [vmem:[%s25017_s2 + $0x68] sm:$0xff]  ;;  %p20573_p11 = scmp.ne.s32.totalorder %s20571_s19, %s20572_s20 }
  0x1b   : > { %312 = vst [vmem:[#allocation2 + $0xdc] sm:$0xf] %v20631_v3  ;;  %470 = vmatpush.bf16.msra.mxu0 %v18089_v7  ;;  %20310 = vmatpush.bf16.msra.mxu3 %v18089_v7  ;;  %v18085_v25 = vld [vmem:[%s25017_s2 + $0x30] sm:$0xff]  ;;  %v20873_v26 = vld [vmem:[%s25017_s2] sm:$0xff]  ;;  %v18118_v28 = vld [vmem:[%s25017_s2 + $0x58] sm:$0xff] }
  0x1c   : > { %20316 = vmatpush.bf16.msra.mxu1 %v20772_v8  ;;  %20322 = vmatpush.bf16.msra.mxu2 %v20777_v9  ;;  %v20878_v27 = vld [vmem:[%s25017_s2 + $0x60] sm:$0xff]  ;;  %v20891_v29 = vld [vmem:[%s25016_s1 + $0x58] sm:$0xff]  ;;  %v20896_v30 = vld [vmem:[%s25016_s1 + $0x50] sm:$0xff]  ;;  %vm2595_vm1 = vsmask.f32 4352  ;;  %p20574_p12 = pnand %p20573_p11, %p20715_p5 }
  0x1d   : > { %912 = vperm.xlu2 %20534, %v20784_v10   ;;  %v20901_v31 = vld [vmem:[%s25016_s1 + $0x48] sm:$0xff]  ;;  %v19349_v32 = vld [vmem:[%s20883_s24 + $0x10] sm:$0xff]   ;;  %v19351_v33 = vld [vmem:[%s20883_s24 + $0x20] sm:$0xff]   ;;  %vm2858_vm2 = vsmask.f32 7424 }
  0x1e   : > { %902 = vperm.xlu1 %20533, %v20790_v11   ;;  %892 = vperm.xlu0 %20532, %v20795_v12   ;;  %v19793_v34 = vld [vmem:[%s20883_s24 + $0x14] sm:$0xff]   ;;  %v18093_v35 = vld [vmem:[%s20883_s24 + $0x2c] sm:$0xff]  ;;  %v20939_v41 = vld [vmem:[%s25016_s1 + $0x60] sm:$0xff]  ;;  %314 = vst.msk [vmem:[#allocation3] sm:$0xf] %vm313_vm3, %v20631_v3  ;;  %p20575_p13 = pneg %p20574_p12 }
  0x1f   : > { %471 = vmatpush.bf16.msra.mxu0 %v18088_v13  ;;  %20311 = vmatpush.bf16.msra.mxu3 %v18088_v13  ;;  %v18146_v36 = vld [vmem:[%s25017_s2 + $0x58] sm:$0xff]  ;;  %v18132_v37 = vld [vmem:[%s25017_s2 + $0x88] sm:$0xff]  ;;  %v18117_v38 = vld [vmem:[%s25017_s2 + $0x50] sm:$0xff]  ;;  %315 = vst.msk [vmem:[#allocation3 + $0x4] sm:$0xf] %vm313_vm3, %v20631_v3 }
  0x20   : > { %20317 = vmatpush.bf16.msra.mxu1 %v20806_v14  ;;  %20323 = vmatpush.bf16.msra.mxu2 %v20811_v15  ;;  %v20929_v39 = vld [vmem:[%s25016_s1 + $0x70] sm:$0xff]  ;;  %v20934_v40 = vld [vmem:[%s25016_s1 + $0x68] sm:$0xff]  ;;  %v18131_v43 = vld [vmem:[%s25017_s2 + $0x80] sm:$0xff]  ;;  %316 = vst.msk [vmem:[#allocation3 + $0x8] sm:$0xf] %vm313_vm3, %v20631_v3 }
  0x21   : > { %v18145_v42 = vld [vmem:[%s25017_s2 + $0x50] sm:$0xff]  ;;  %v18116_v44 = vld [vmem:[%s25017_s2 + $0x48] sm:$0xff]  ;;  %v18130_v46 = vld [vmem:[%s25017_s2 + $0x78] sm:$0xff]  ;;  %317 = vst.msk [vmem:[#allocation3 + $0xc] sm:$0xf] %vm313_vm3, %v20631_v3 }
  0x22   : > { %v18144_v45 = vld [vmem:[%s25017_s2 + $0x48] sm:$0xff]  ;;  %v18115_v47 = vld [vmem:[%s25017_s2 + $0x40] sm:$0xff]  ;;  %v20977_v50 = vld [vmem:[%s25016_s1 + $0x78] sm:$0xff]  ;;  %318 = vst.msk [vmem:[#allocation3 + $0xd0] sm:$0xf] %vm313_vm3, %v20631_v3 }
  0x23   : > { %472 = vmatpush.bf16.msra.mxu0 %v18087_v16  ;;  %20312 = vmatpush.bf16.msra.mxu3 %v18087_v16  ;;  %v20967_v48 = vld [vmem:[%s25016_s1 + $0x88] sm:$0xff]  ;;  %v20972_v49 = vld [vmem:[%s25016_s1 + $0x80] sm:$0xff]  ;;  %v19350_v51 = vld [vmem:[%s20883_s24 + $0x18] sm:$0xff]   ;;  %319 = vst.msk [vmem:[#allocation3 + $0xd4] sm:$0xf] %vm313_vm3, %v20631_v3 }
  0x24   : > { %20318 = vmatpush.bf16.msra.mxu1 %v20825_v17  ;;  %20324 = vmatpush.bf16.msra.mxu2 %v20830_v18  ;;  %v19352_v52 = vld [vmem:[%s20883_s24 + $0x28] sm:$0xff]   ;;  %v19795_v53 = vld [vmem:[%s20883_s24 + $0x1c] sm:$0xff]   ;;  %v18094_v54 = vld [vmem:[%s20883_s24 + $0x34] sm:$0xff]  ;;  %320 = vst.msk [vmem:[#allocation3 + $0xd8] sm:$0xf] %vm313_vm3, %v20631_v3 }
  0x25   : > { %927 = vperm.xlu2 %20534, %v20835_v19   ;;  %v18143_v55 = vld [vmem:[%s25017_s2 + $0x40] sm:$0xff]  ;;  %v21003_v57 = vld [vmem:[%s25016_s1 + $0x98] sm:$0xff]  ;;  %v21008_v58 = vld [vmem:[%s25016_s1 + $0x90] sm:$0xff]  ;;  %321 = vst.msk [vmem:[#allocation3 + $0xdc] sm:$0xf] %vm313_vm3, %v20631_v3 }
  0x26   : > { %922 = vperm.xlu1 %20533, %v20840_v20   ;;  %917 = vperm.xlu0 %20532, %v20845_v21   ;;  %v20998_v56 = vld [vmem:[%s25016_s1 + $0xa0] sm:$0xff]  ;;  %v18129_v59 = vld [vmem:[%s25017_s2 + $0x70] sm:$0xff]  ;;  %v18114_v60 = vld [vmem:[%s25017_s2 + $0x38] sm:$0xff] }
  0x27   : > { %473 = vmatpush.bf16.msra.mxu0 %v18086_v22  ;;  %20313 = vmatpush.bf16.msra.mxu3 %v18086_v22  ;;  %v21024_v61 = vld [vmem:[%s25016_s1 + $0xb8] sm:$0xff]  ;;  %v21029_v62 = vld [vmem:[%s25016_s1 + $0xb0] sm:$0xff]  ;;  %v21034_v63 = vld [vmem:[%s25016_s1 + $0xa8] sm:$0xff] }
  0x28   : > { %20319 = vmatpush.bf16.msra.mxu1 %v20853_v23  ;;  %20325 = vmatpush.bf16.msra.mxu2 %v20858_v24  ;;  %v18077_v4 = vld [vmem:[%s20883_s24 + $0x4] sm:$0xff]  ;;  %v18095_v7 = vld [vmem:[%s20883_s24 + $0x3c] sm:$0xff]  ;;  %v18113_v16 = vld [vmem:[%s25017_s2 + $0x30] sm:$0xff] }
  0x29   : > { %v21060_v13 = vld [vmem:[%s25016_s1 + $0xc8] sm:$0xff]  ;;  %v21091_v22 = vld [vmem:[%s25016_s1 + $0xd8] sm:$0xff] }
  0x2b   : > { %474 = vmatpush.bf16.msra.mxu0 %v18085_v25  ;;  %20314 = vmatpush.bf16.msra.mxu3 %v18085_v25  ;;  %v19354_v25 = vld [vmem:[%s20883_s24 + $0x38] sm:$0xff]  }
  0x2c   : > { %20320 = vmatpush.bf16.msra.mxu1 %v20873_v26  ;;  %20326 = vmatpush.bf16.msra.mxu2 %v20878_v27 }
  0x2d   : > { %942 = vperm.xlu2 %20534, %v20891_v29  }
  0x2e   : > { %937 = vperm.xlu1 %20533, %v20896_v30   ;;  %932 = vperm.xlu0 %20532, %v20901_v31  }
  0x2f   : > { %1158 = vmatpush.bf16.msrb.mxu3 %v18118_v28  ;;  %14970 = vmatmul.msk.bf16.vlgmr.msra.gmra.mxu0 %vm442_vm0, %v19349_v32  ;;  %v18096_v28 = vld [vmem:[%s20883_s24 + $0x44] sm:$0xff] }
  0x30   : > { %14972 = vmatmul.msk.bf16.vlgmr.msra.gmra.mxu3 %vm442_vm0, %v19351_v33  ;;  %15008 = vmatmul.msk.bf16.vlgmr.msra.gmra.mxu1 %vm442_vm0, %v19793_v34  ;;  %v18111_v32 = vld [vmem:[%s25017_s2 + $0x28] sm:$0xff]  ;;  %v18110_v33 = vld [vmem:[%s25017_s2 + $0x20] sm:$0xff] }
  0x31   : > { %15084 = vmatmul.msk.bf16.vlgmr.msra.gmra.mxu2 %vm442_vm0, %v18093_v35  ;;  %592 = vmatpush.bf16.msrb.mxu0 %v20749_v5  ;;  %v19353_v5 = vld [vmem:[%s20883_s24 + $0x30] sm:$0xff]   ;;  %v21120_v34 = vld [vmem:[%s25016_s1 + $0x100] sm:$0xff]  ;;  %v21125_v35 = vld [vmem:[%s25016_s1 + $0xf8] sm:$0xff] }
  0x32   : > { %1846 = vmatpush.bf16.msrb.mxu2 %v18146_v36  ;;  %1458 = vmatpush.bf16.msrb.mxu1 %v18132_v37  ;;  %v21130_v36 = vld [vmem:[%s25016_s1 + $0xf0] sm:$0xff]  ;;  %v337_v37 = vld [vmem:[%s20883_s24 + $0x40] sm:$0xff]  }
  0x33   : > { %1159 = vmatpush.bf16.msrb.mxu3 %v18117_v38  ;;  %v20605_v38 = vld [vmem:[%s20883_s24 + $0x3c] sm:$0xf0]  }
  0x35   : > { %957 = vperm.xlu2 %20534, %v20929_v39   ;;  %593 = vmatpush.bf16.msrb.mxu0 %v20772_v8  ;;  %v18142_v8 = vld [vmem:[%s25017_s2 + $0x38] sm:$0xff] }
  0x36   : > { %952 = vperm.xlu1 %20533, %v20934_v40   ;;  %947 = vperm.xlu0 %20532, %v20939_v41  }
  0x37   : > { %1847 = vmatpush.bf16.msrb.mxu2 %v18145_v42  ;;  %1459 = vmatpush.bf16.msrb.mxu1 %v18131_v43  ;;  %v18109_v42 = vld [vmem:[%s25017_s2 + $0x18] sm:$0xff]  ;;  %v18127_v43 = vld [vmem:[%s25017_s2 + $0x60] sm:$0xff] }
  0x38   : > { %1160 = vmatpush.bf16.msrb.mxu3 %v18116_v44  ;;  %v18108_v44 = vld [vmem:[%s25017_s2 + $0x10] sm:$0xff] }
  0x39   : > { %594 = vmatpush.bf16.msrb.mxu0 %v20806_v14  ;;  %v21065_v14 = vld [vmem:[%s25016_s1 + $0xc0] sm:$0xff] }
  0x3b   : > { %1848 = vmatpush.bf16.msrb.mxu2 %v18144_v45  ;;  %1460 = vmatpush.bf16.msrb.mxu1 %v18130_v46  ;;  %v21149_v45 = vld [vmem:[%s25016_s1 + $0x118] sm:$0xff]  ;;  %v21154_v46 = vld [vmem:[%s25016_s1 + $0x110] sm:$0xff] }
  0x3c   : > { %1161 = vmatpush.bf16.msrb.mxu3 %v18115_v47  ;;  %v21159_v47 = vld [vmem:[%s25016_s1 + $0x108] sm:$0xff] }
  0x3d   : > { %1580 = vperm.xlu2 %20534, %v20967_v48   ;;  %595 = vmatpush.bf16.msrb.mxu0 %v20825_v17  ;;  %v21081_v17 = vld [vmem:[%s25016_s1 + $0xe8] sm:$0xff] }
  0x3e   : > { %1575 = vperm.xlu1 %20533, %v20972_v49   ;;  %962 = vperm.xlu0 %20532, %v20977_v50  }
  0x3f   : > { %14971 = vmatmul.msk.bf16.gmra.mxu0 %vm442_vm0, %v19350_v51  ;;  %1849 = vmatpush.bf16.msrb.mxu2 %v18143_v55  ;;  %v18091_v51 = vld [vmem:[%s20883_s24 + $0x1c] sm:$0xff]  ;;  %v18139_v55 = vld [vmem:[%s25017_s2 + $0x28] sm:$0xff] }
  0x40   : > { %14973 = vmatmul.msk.bf16.gmra.mxu3 %vm442_vm0, %v19352_v52  ;;  %15009 = vmatmul.msk.bf16.gmra.mxu1 %vm442_vm0, %v19795_v53  ;;  %v19800_v52 = vld [vmem:[%s20883_s24 + $0x34] sm:$0xff]   ;;  %v18097_v53 = vld [vmem:[%s20883_s24 + $0x4c] sm:$0xff] }
  0x41   : > { %15085 = vmatmul.msk.bf16.gmra.mxu2 %vm442_vm0, %v18094_v54  ;;  %596 = vmatpush.bf16.msrb.mxu0 %v20853_v23  ;;  %v19791_v23 = vld [vmem:[%s20883_s24 + $0xc] sm:$0xff]  }
  0x42   : > { %1461 = vmatpush.bf16.msrb.mxu1 %v18129_v59  ;;  %1162 = vmatpush.bf16.msrb.mxu3 %v18114_v60  ;;  %v18107_v54 = vld [vmem:[%s25017_s2 + $0x8] sm:$0xff]  ;;  %v18168_v59 = vld [vmem:[%s25019_s4 + $0x38] sm:$0xff]  ;;  %v18106_v60 = vld [vmem:[%s25017_s2] sm:$0xff] }
  0x43   : > { %1850 = vmatpush.bf16.msrb.mxu2 %v18142_v8  ;;  %v18176_v8 = vld [vmem:[%s25019_s4 + $0x78] sm:$0xff] }
  0x45   : > { %1595 = vperm.xlu2 %20534, %v20998_v56   ;;  %597 = vmatpush.bf16.msrb.mxu0 %v20873_v26  ;;  %v21096_v26 = vld [vmem:[%s20883_s24 + $0x3c] sm:$0xf] }
  0x46   : > { %1590 = vperm.xlu1 %20533, %v21003_v57   ;;  %1585 = vperm.xlu0 %20532, %v21008_v58  }
  0x47   : > { %1163 = vmatpush.bf16.msrb.mxu3 %v18113_v16  ;;  %v21215_v16 = vld [vmem:[%s25016_s1 + $0x140] sm:$0xff] }
  0x49   : > { %770 = vmatpush.bf16.msra.mxu0 %v20754_v6  ;;  %v19797_v6 = vld [vmem:[%s20883_s24 + $0x24] sm:$0xff]  }
  0x4b   : > { %1969 = vmatpush.bf16.msra.mxu3 %v18139_v55  ;;  %v19435_v55 = vld [vmem:[%s20883_s24 + $0x90] sm:$0xff]  }
  0x4d   : > { %771 = vmatpush.bf16.msra.mxu0 %v20777_v9  ;;  %1610 = vperm.xlu2 %20534, %v21024_v61   ;;  %v21055_v9 = vld [vmem:[%s25016_s1 + $0xd0] sm:$0xff] }
  0x4e   : > { %1605 = vperm.xlu1 %20533, %v21029_v62   ;;  %1600 = vperm.xlu0 %20532, %v21034_v63  }
  0x4f   : > { %15006 = vmatmul.msk.bf16.vlgmr.msrb.gmra.mxu0 %vm442_vm0, %v18077_v4  ;;  %v21186_v4 = vld [vmem:[%s25016_s1 + $0x130] sm:$0xff] }
  0x50   : > { %14974 = vmatmul.msk.bf16.gmra.mxu3 %vm442_vm0, %v19353_v5  ;;  %15010 = vmatmul.msk.bf16.gmra.mxu1 %vm442_vm0, %v19797_v6  ;;  %v21191_v5 = vld [vmem:[%s25016_s1 + $0x128] sm:$0xff]  ;;  %v21196_v6 = vld [vmem:[%s25016_s1 + $0x120] sm:$0xff] }
  0x51   : > { %15086 = vmatmul.msk.bf16.gmra.mxu2 %vm442_vm0, %v18095_v7  ;;  %772 = vmatpush.bf16.msra.mxu0 %v20811_v15  ;;  %v18128_v15 = vld [vmem:[%s25017_s2 + $0x68] sm:$0xff] }
  0x52   : > { %1462 = vmatpush.bf16.msrb.mxu1 %v18128_v15  ;;  %v18160_v7 = vld [vmem:[%s25017_s2 + $0x88] sm:$0xff] }
  0x53   : > { %v21210_v15 = vld [vmem:[%s25016_s1 + $0x148] sm:$0xff] }
  0x55   : > { %1625 = vperm.xlu2 %20534, %v21055_v9   ;;  %773 = vmatpush.bf16.msra.mxu0 %v20830_v18  ;;  %v21086_v18 = vld [vmem:[%s25016_s1 + $0xe0] sm:$0xff] }
  0x56   : > { %1620 = vperm.xlu1 %20533, %v21060_v13   ;;  %1615 = vperm.xlu0 %20532, %v21065_v14  }
  0x57   : > { %1463 = vmatpush.bf16.msrb.mxu1 %v18127_v43  ;;  %v2260_v43 = vld [vmem:[%s25016_s1 + $0x178] sm:$0xff] }
  0x59   : > { %774 = vmatpush.bf16.msra.mxu0 %v20858_v24  ;;  %v19799_v24 = vld [vmem:[%s20883_s24 + $0x2c] sm:$0xff]  }
  0x5b   : > { %2535 = vmatpush.bf16.msra.mxu1 %v18176_v8  ;;  %v19393_v8 = vld [vmem:[%s20883_s24 + $0x58] sm:$0xff]  }
  0x5d   : > { %1640 = vperm.xlu2 %20534, %v21081_v17   ;;  %775 = vmatpush.bf16.msra.mxu0 %v20878_v27  ;;  %v18141_v27 = vld [vmem:[%s25017_s2 + $0x30] sm:$0xff] }
  0x5e   : > { %1635 = vperm.xlu1 %20533, %v21086_v18   ;;  %1630 = vperm.xlu0 %20532, %v21091_v22  }
  0x5f   : > { %15007 = vmatmul.msk.bf16.gmra.mxu0 %vm442_vm0, %v19791_v23  ;;  %1851 = vmatpush.bf16.msrb.mxu2 %v18141_v27  ;;  %v21220_v23 = vld [vmem:[%s25016_s1 + $0x138] sm:$0xff]  ;;  %v18167_v27 = vld [vmem:[%s25019_s4 + $0x30] sm:$0xff] }
  0x60   : > { %14975 = vmatmul.msk.bf16.gmra.mxu3 %vm442_vm0, %v19354_v25  ;;  %15011 = vmatmul.msk.bf16.gmra.mxu1 %vm442_vm0, %v19799_v24  ;;  %v18084_v25 = vld [vmem:[%s20883_s24 + $0x48] sm:$0xff] }
  0x61   : > { %15087 = vmatmul.msk.bf16.gmra.mxu2 %vm442_vm0, %v18096_v28  ;;  %1281 = vmatpush.bf16.msrb.mxu0 %v18111_v32  ;;  %v18092_v24 = vld [vmem:[%s20883_s24 + $0x24] sm:$0xff]  ;;  %v20550_v28 = vor.u32 %v20605_v38, %v21096_v26  ;;  %v18098_v32 = vld [vmem:[%s20883_s24 + $0x54] sm:$0xff] }
  0x62   : > { %v18138_v26 = vld [vmem:[%s25017_s2 + $0x20] sm:$0xff]  ;;  %v21252_v38 = vld [vmem:[%s25016_s1 + $0x150] sm:$0xff] }
  0x63   : > { %2732 = vmatpush.bf16.msra.mxu2 %v18168_v59  ;;  %1970 = vmatpush.bf16.msra.mxu3 %v18138_v26  ;;  %v18159_v59 = vld [vmem:[%s25017_s2 + $0x80] sm:$0xff] }
  0x65   : > { %2263 = vperm.xlu2 %20534, %v21120_v34   ;;  %1282 = vmatpush.bf16.msrb.mxu0 %v18110_v33  ;;  %v21242_v33 = vld [vmem:[%s25016_s1 + $0x160] sm:$0xff] }
  0x66   : > { %1650 = vperm.xlu1 %20533, %v21125_v35   ;;  %1645 = vperm.xlu0 %20532, %v21130_v36  }
  0x67   : > { %2733 = vmatpush.bf16.msra.mxu2 %v18167_v27 }
  0x69   : > { %1283 = vmatpush.bf16.msrb.mxu0 %v18109_v42  ;;  %v18175_v42 = vld [vmem:[%s25019_s4 + $0x70] sm:$0xff] }
  0x6a   : > { %2536 = vmatpush.bf16.msra.mxu1 %v18175_v42 }
  0x6d   : > { %2278 = vperm.xlu2 %20534, %v21149_v45   ;;  %1284 = vmatpush.bf16.msrb.mxu0 %v18108_v44  ;;  %v2259_v44 = vld [vmem:[%s25016_s1 + $0x170] sm:$0xff] }
  0x6e   : > { %2273 = vperm.xlu1 %20533, %v21154_v46   ;;  %2268 = vperm.xlu0 %20532, %v21159_v47  }
  0x6f   : > { %15082 = vmatmul.msk.bf16.vlgmr.msra.gmra.mxu0 %vm442_vm0, %v18091_v51  ;;  %v2258_v51 = vld [vmem:[%s25016_s1 + $0x168] sm:$0xff] }
  0x70   : > { %14976 = vmatmul.msk.bf16.gmra.mxu3 %vm442_vm0, %v337_v37  ;;  %15012 = vmatmul.msk.bf16.gmra.mxu1 %vm442_vm0, %v19800_v52  ;;  %v21247_v37 = vld [vmem:[%s25016_s1 + $0x158] sm:$0xff]  ;;  %v18105_v52 = vld [vmem:[%s20883_s24 + $0x44] sm:$0xff] }
  0x71   : > { %15088 = vmatmul.msk.bf16.gmra.mxu2 %vm442_vm0, %v18097_v53  ;;  %1285 = vmatpush.bf16.msrb.mxu0 %v18107_v54  ;;  %v19392_v53 = vld [vmem:[%s20883_s24 + $0x50] sm:$0xff]   ;;  %v18119_v54 = vld [vmem:[%s20883_s24 + $0x5c] sm:$0xff] }
  0x75   : > { %2293 = vperm.xlu2 %20534, %v21186_v4   ;;  %1286 = vmatpush.bf16.msrb.mxu0 %v18106_v60  ;;  %v19802_v60 = vld [vmem:[%s20883_s24 + $0x4c] sm:$0xff]  }
  0x76   : > { %2288 = vperm.xlu1 %20533, %v21191_v5   ;;  %2283 = vperm.xlu0 %20532, %v21196_v6  }
  0x79   : > { %2146 = vmatpush.bf16.msra.mxu0 %v18160_v7  ;;  %v18166_v7 = vld [vmem:[%s25019_s4 + $0x28] sm:$0xff] }
  0x7a   : > { %2734 = vmatpush.bf16.msra.mxu2 %v18166_v7 }
  0x7d   : > { %2308 = vperm.xlu2 %20534, %v21210_v15   ;;  %2147 = vmatpush.bf16.msra.mxu0 %v18159_v59  ;;  %v19395_v59 = vld [vmem:[%s20883_s24 + $0x68] sm:$0xff]  }
  0x7e   : > { %2303 = vperm.xlu1 %20533, %v21215_v16   ;;  %2298 = vperm.xlu0 %20532, %v21220_v23  }
  0x7f   : > { %15083 = vmatmul.msk.bf16.gmra.mxu0 %vm442_vm0, %v18092_v24  ;;  %v19436_v24 = vld [vmem:[%s20883_s24 + $0x98] sm:$0xff]  }
  0x80   : > { %14977 = vmatmul.msk.bf16.gmra.mxu3 %vm442_vm0, %v18084_v25  ;;  %15013 = vmatmul.msk.bf16.gmra.mxu1 %vm442_vm0, %v20550_v28  ;;  %v18120_v25 = vld [vmem:[%s20883_s24 + $0x64] sm:$0xff]  ;;  %v18121_v28 = vld [vmem:[%s20883_s24 + $0x6c] sm:$0xff] }
  0x81   : > { %15089 = vmatmul.msk.bf16.gmra.mxu2 %vm442_vm0, %v18098_v32 }
  0x85   : > { %2323 = vperm.xlu2 %20534, %v21242_v33  }
  0x86   : > { %2318 = vperm.xlu1 %20533, %v21247_v37   ;;  %2313 = vperm.xlu0 %20532, %v21252_v38  }
  0x88   : > { %v21350_v7 = vpop.permute.xlu1 %897 }
  0x8d   : > { %2338 = vperm.xlu2 %20534, %v2260_v43  }
  0x8e   : > { %2333 = vperm.xlu1 %20533, %v2259_v44   ;;  %2328 = vperm.xlu0 %20532, %v2258_v51   ;;  %v18136_v44 = vld [vmem:[%s25017_s2 + $0x10] sm:$0xff]  ;;  %v908_v51 = vpop.permute.xlu2 %907 }
  0x8f   : > { %15166 = vmatmul.msk.bf16.vlgmr.msrb.gmra.mxu0 %vm442_vm0, %v18105_v52 }
  0x90   : > { %15130 = vmatmul.msk.bf16.vlgmr.msrb.gmra.mxu3 %vm442_vm0, %v19392_v53  ;;  %15242 = vmatmul.msk.bf16.vlgmr.msrb.gmra.mxu1 %vm442_vm0, %v18119_v54  ;;  %v19806_v54 = vld [vmem:[%s20883_s24 + $0x5c] sm:$0xff]  }
  0x91   : > { %15290 = vmatmul.msk.bf16.vlgmr.msrb.gmra.mxu2 %vm442_vm0, %v19435_v55 }
  0x95   : > { %4492 = vperm.xlu2 %20534, %v20733_v1   ;;  %v18174_v1 = vld [vmem:[%s25019_s4 + $0x68] sm:$0xff] }
  0x96   : > { %4487 = vperm.xlu1 %20533, %v20795_v12   ;;  %4482 = vperm.xlu0 %20532, %v20738_v2   ;;  %v19804_v2 = vld [vmem:[%s20883_s24 + $0x54] sm:$0xff]   ;;  %v19394_v12 = vld [vmem:[%s20883_s24 + $0x60] sm:$0xff]  }
  0x97   : > { %2537 = vmatpush.bf16.msra.mxu1 %v18174_v1  ;;  %v18157_v1 = vld [vmem:[%s25017_s2 + $0x70] sm:$0xff] }
  0x9d   : > { %4507 = vperm.xlu2 %20534, %v20784_v10   ;;  %v18158_v10 = vld [vmem:[%s25017_s2 + $0x78] sm:$0xff] }
  0x9e   : > { %4502 = vperm.xlu1 %20533, %v20728_v0   ;;  %4497 = vperm.xlu0 %20532, %v20790_v11   ;;  %v18137_v0 = vld [vmem:[%s25017_s2 + $0x18] sm:$0xff] }
  0x9f   : > { %15167 = vmatmul.msk.bf16.gmra.mxu0 %vm442_vm0, %v19802_v60  ;;  %1971 = vmatpush.bf16.msra.mxu3 %v18137_v0  ;;  %v18122_v60 = vld [vmem:[%s20883_s24 + $0x74] sm:$0xff] }
  0xa0   : > { %15131 = vmatmul.msk.bf16.gmra.mxu3 %vm442_vm0, %v19393_v8  ;;  %15243 = vmatmul.msk.bf16.gmra.mxu1 %vm442_vm0, %v18120_v25  ;;  %v18172_v0 = vld [vmem:[%s25019_s4 + $0x58] sm:$0xff] }
  0xa1   : > { %15291 = vmatmul.msk.bf16.gmra.mxu2 %vm442_vm0, %v19436_v24  ;;  %2148 = vmatpush.bf16.msra.mxu0 %v18158_v10  ;;  %v19438_v24 = vld [vmem:[%s20883_s24 + $0xa8] sm:$0xff]  }
  0xa3   : > { %1972 = vmatpush.bf16.msra.mxu3 %v18136_v44 }
  0xa5   : > { %4522 = vperm.xlu2 %20534, %v20835_v19   ;;  %v19437_v19 = vld [vmem:[%s20883_s24 + $0xa0] sm:$0xff]   ;;  %2149 = vmatpush.bf16.msra.mxu0 %v18157_v1  ;;  %v19439_v1 = vld [vmem:[%s20883_s24 + $0xb0] sm:$0xff]  }
  0xa6   : > { %4517 = vperm.xlu1 %20533, %v20840_v20   ;;  %4512 = vperm.xlu0 %20532, %v20845_v21   ;;  %v18165_v20 = vld [vmem:[%s25019_s4 + $0x20] sm:$0xff] }
  0xa7   : > { %v18173_v21 = vld [vmem:[%s25019_s4 + $0x60] sm:$0xff]  ;;  %2735 = vmatpush.bf16.msra.mxu2 %v18165_v20 }
  0xa8   : > { %2538 = vmatpush.bf16.msra.mxu1 %v18173_v21 }
  0xac   : > { %v21310_v11 = vpop.f32.mrf.mxu0  ;;  %2539 = vmatpush.bf16.msra.mxu1 %v18172_v0  ;;  %v18163_v0 = vld [vmem:[%s25019_s4 + $0x10] sm:$0xff] }
  0xad   : > { %v609_v32 = vpop.f32.mrf.mxu1  ;;  %4537 = vperm.xlu2 %20534, %v20891_v29  }
  0xae   : > { %4532 = vperm.xlu1 %20533, %v20896_v30   ;;  %4527 = vperm.xlu0 %20532, %v20901_v31   ;;  %v21336_v31 = vld [vmem:[%s25018_s3] ss:$0 sm:$0xff] }
  0xaf   : > { %15168 = vmatmul.msk.bf16.gmra.mxu0 %vm442_vm0, %v19804_v2  ;;  %v21360_v2 = vpop.permute.xlu0 %887 }
  0xb0   : > { %15132 = vmatmul.msk.bf16.gmra.mxu3 %vm442_vm0, %v19394_v12  ;;  %15244 = vmatmul.msk.bf16.gmra.mxu1 %vm442_vm0, %v18121_v28  ;;  %v913_v28 = vpop.permute.xlu2 %912 }
  0xb1   : > { %15292 = vmatmul.msk.bf16.gmra.mxu2 %vm442_vm0, %v19437_v19 }
  0xb3   : > { %v486_v29 = vpop.f32.mrf.mxu3 }
  0xb4   : > { %v610_v26 = vadd.f32 %v609_v32, %v486_v29  ;;  %v787_v27 = vpop.f32.mrf.mxu2  ;;  %v21328_v42 = vpop.f32.mrf.mxu0 }
  0xb5   : > { %v611_v43 = vpop.f32.mrf.mxu1  ;;  %4552 = vperm.xlu2 %20534, %v20929_v39  }
  0xb6   : > { %4547 = vperm.xlu1 %20533, %v20934_v40   ;;  %4542 = vperm.xlu0 %20532, %v20939_v41   ;;  %v821_v30 = vadd.f32 %v787_v27, %v610_v26  ;;  %v18164_v41 = vld [vmem:[%s25019_s4 + $0x18] sm:$0xff] }
  0xb7   : > { %2736 = vmatpush.bf16.msra.mxu2 %v18164_v41  ;;  %v21375_v27 = vld [vmem:[%s20883_s24 + $0xb8] sm:$0xff]   ;;  %v18135_v41 = vld [vmem:[%s25017_s2 + $0x8] sm:$0xff] }
  0xb8   : > { %v841_v39 = vadd.f32 %v21336_v31, %v821_v30  ;;  %v21380_v30 = vpop.permute.xlu1 %902  ;;  %1973 = vmatpush.bf16.msra.mxu3 %v18135_v41  ;;  %v19810_v41 = vld [vmem:[%s20883_s24 + $0x6c] sm:$0xff]  }
  0xba   : > { %v857_v10 = vmax.f32 %v841_v39, 0.0 }
  0xbb   : > { %v488_v52 = vpop.f32.mrf.mxu3  ;;  %2737 = vmatpush.bf16.msra.mxu2 %v18163_v0  ;;  %v18162_v0 = vld [vmem:[%s25019_s4 + $0x8] sm:$0xff] }
  0xbc   : > { %v612_v53 = vadd.f32 %v611_v43, %v488_v52  ;;  %v789_v40 = vpop.f32.mrf.mxu2  ;;  %v21346_v55 = vpop.f32.mrf.mxu0  ;;  %v21378_v43 = vld [vmem:[%s20883_s24 + $0xbc] sm:$0xf]  ;;  %v21386_v52 = vld [vmem:[%s20883_s24 + $0xbc] sm:$0xf0]  }
  0xbd   : > { %v614_v25 = vpop.f32.mrf.mxu1  ;;  %6696 = vperm.xlu2 %20534, %v20967_v48  }
  0xbe   : > { %v822_v8 = vadd.f32 %v789_v40, %v612_v53  ;;  %6691 = vperm.xlu1 %20533, %v20972_v49   ;;  %4557 = vperm.xlu0 %20532, %v20977_v50   ;;  %v969_v50 = vmul.f32 %v908_v51, %v857_v10  ;;  %v21383_v51 = vld [vmem:[%s20883_s24 + $0xc0] sm:$0xff]   ;;  %v18171_v10 = vld [vmem:[%s25019_s4 + $0x50] sm:$0xff] }
  0xbf   : > { %15169 = vmatmul.msk.bf16.gmra.mxu0 %vm442_vm0, %v19806_v54  ;;  %v19808_v54 = vld [vmem:[%s20883_s24 + $0x64] sm:$0xff]   ;;  %2540 = vmatpush.bf16.msra.mxu1 %v18171_v10 }
  0xc0   : > { %v842_v12 = vadd.f32 %v21336_v31, %v822_v8  ;;  %15133 = vmatmul.msk.bf16.gmra.mxu3 %vm442_vm0, %v19395_v59  ;;  %15245 = vmatmul.msk.bf16.gmra.mxu1 %vm442_vm0, %v18122_v60  ;;  %v19396_v60 = vld [vmem:[%s20883_s24 + $0x70] sm:$0xff]   ;;  %v18123_v8 = vld [vmem:[%s20883_s24 + $0x7c] sm:$0xff] }
  0xc1   : > { %15293 = vmatmul.msk.bf16.gmra.mxu2 %vm442_vm0, %v19438_v24 }
  0xc2   : > { %v858_v48 = vmax.f32 %v842_v12, 0.0  ;;  %2738 = vmatpush.bf16.msra.mxu2 %v18162_v0 }
  0xc3   : > { %v491_v49 = vpop.f32.mrf.mxu3 }
  0xc4   : > { %v970_v32 = vmul.f32 %v913_v28, %v858_v48  ;;  %v615_v19 = vadd.f32 %v614_v25, %v491_v49  ;;  %v792_v20 = vpop.f32.mrf.mxu2  ;;  %v21369_v21 = vpop.f32.mrf.mxu0 }
  0xc5   : > { %v616_v26 = vpop.f32.mrf.mxu1  ;;  %6711 = vperm.xlu2 %20534, %v20998_v56   ;;  %v21388_v56 = vpop.permute.xlu0 %892 }
  0xc6   : > { %v18666_v29 = vpack.c.bf16 %v970_v32, %v969_v50  ;;  %6706 = vperm.xlu1 %20533, %v21003_v57   ;;  %6701 = vperm.xlu0 %20532, %v21008_v58   ;;  %v823_v44 = vadd.f32 %v792_v20, %v615_v19  ;;  %v20610_v58 = vor.u32 %v21386_v52, %v21378_v43 }
  0xc8   : > { %19386 = vst [vmem:[#allocation2 + $0x20] sm:$0xff] %v18666_v29   ;;  %v843_v39 = vadd.f32 %v21336_v31, %v823_v44 }
  0xca   : > { %v859_v12 = vmax.f32 %v843_v39, 0.0 }
  0xcb   : > { %v493_v57 = vpop.f32.mrf.mxu3 }
  0xcc   : > { %v617_v53 = vadd.f32 %v616_v26, %v493_v57  ;;  %v794_v40 = vpop.f32.mrf.mxu2  ;;  %v21397_v59 = vpop.f32.mrf.mxu0  ;;  %v18156_v57 = vld [vmem:[%s25017_s2 + $0x68] sm:$0xff] }
  0xcd   : > { %v619_v24 = vpop.f32.mrf.mxu1  ;;  %6726 = vperm.xlu2 %20534, %v21024_v61   ;;  %v923_v61 = vpop.permute.xlu1 %922  ;;  %2150 = vmatpush.bf16.msra.mxu0 %v18156_v57 }
  0xce   : > { %v824_v25 = vadd.f32 %v794_v40, %v617_v53  ;;  %6721 = vperm.xlu1 %20533, %v21029_v62   ;;  %6716 = vperm.xlu0 %20532, %v21034_v63   ;;  %v918_v49 = vpop.permute.xlu0 %917 }
  0xcf   : > { %15170 = vmatmul.msk.bf16.gmra.mxu0 %vm442_vm0, %v19808_v54  ;;  %v971_v62 = vmul.f32 %v918_v49, %v859_v12 }
  0xd0   : > { %v844_v48 = vadd.f32 %v21336_v31, %v824_v25  ;;  %15134 = vmatmul.msk.bf16.gmra.mxu3 %vm442_vm0, %v19396_v60  ;;  %15246 = vmatmul.msk.bf16.gmra.mxu1 %vm442_vm0, %v18123_v8  ;;  %v21430_v8 = vld [vmem:[%s20883_s24 + $0x7c] sm:$0xf] }
  0xd1   : > { %15294 = vmatmul.msk.bf16.gmra.mxu2 %vm442_vm0, %v19439_v1 }
  0xd2   : > { %v860_v28 = vmax.f32 %v844_v48, 0.0 }
  0xd3   : > { %v496_v50 = vpop.f32.mrf.mxu3 }
  0xd4   : > { %v972_v32 = vmul.f32 %v923_v61, %v860_v28  ;;  %v620_v63 = vadd.f32 %v619_v24, %v496_v50  ;;  %v797_v19 = vpop.f32.mrf.mxu2  ;;  %v21416_v20 = vpop.f32.mrf.mxu0  ;;  %v1028_v50 = vld [vmem:[%s20883_s24 + $0x80] sm:$0xff]  }
  0xd5   : > { %v621_v26 = vpop.f32.mrf.mxu1  ;;  %6741 = vperm.xlu2 %20534, %v21055_v9   ;;  %v19397_v9 = vld [vmem:[%s20883_s24 + $0x78] sm:$0xff]  }
  0xd6   : > { %v18671_v29 = vpack.c.bf16 %v972_v32, %v971_v62  ;;  %6736 = vperm.xlu1 %20533, %v21060_v13   ;;  %6731 = vperm.xlu0 %20532, %v21065_v14   ;;  %v825_v44 = vadd.f32 %v797_v19, %v620_v63  ;;  %v18124_v13 = vld [vmem:[%s20883_s24 + $0x84] sm:$0xff]  ;;  %v933_v10 = vpop.permute.xlu0 %932  ;;  %v21450_v62 = vld [vmem:[%s20883_s24 + $0x7c] sm:$0xf0]  }
  0xd8   : > { %19387 = vst [vmem:[#allocation2 + $0x28] sm:$0xff] %v18671_v29   ;;  %v845_v53 = vadd.f32 %v21336_v31, %v825_v44  ;;  %v18134_v29 = vld [vmem:[%s25017_s2] sm:$0xff] }
  0xd9   : > { %1974 = vmatpush.bf16.msra.mxu3 %v18134_v29 }
  0xda   : > { %v861_v24 = vmax.f32 %v845_v53, 0.0  ;;  %v19811_v53 = vld [vmem:[%s20883_s24 + $0x74] sm:$0xff]  }
  0xdb   : > { %v498_v39 = vpop.f32.mrf.mxu3 }
  0xdc   : > { %v622_v40 = vadd.f32 %v621_v26, %v498_v39  ;;  %v799_v54 = vpop.f32.mrf.mxu2  ;;  %v21426_v60 = vpop.f32.mrf.mxu0 }
  0xdd   : > { %v624_v25 = vpop.f32.mrf.mxu1  ;;  %6756 = vperm.xlu2 %20534, %v21081_v17   ;;  %v18170_v17 = vld [vmem:[%s25019_s4 + $0x48] sm:$0xff] }
  0xde   : > { %v826_v14 = vadd.f32 %v799_v54, %v622_v40  ;;  %6751 = vperm.xlu1 %20533, %v21086_v18   ;;  %6746 = vperm.xlu0 %20532, %v21091_v22   ;;  %v928_v18 = vpop.permute.xlu2 %927  ;;  %v18125_v40 = vld [vmem:[%s20883_s24 + $0x8c] sm:$0xff] }
  0xdf   : > { %15171 = vmatmul.msk.bf16.gmra.mxu0 %vm442_vm0, %v19810_v41  ;;  %2541 = vmatpush.bf16.msra.mxu1 %v18170_v17  ;;  %v973_v48 = vmul.f32 %v928_v18, %v861_v24 }
  0xe0   : > { %v846_v1 = vadd.f32 %v21336_v31, %v826_v14  ;;  %15135 = vmatmul.msk.bf16.gmra.mxu3 %vm442_vm0, %v19397_v9  ;;  %15247 = vmatmul.msk.bf16.gmra.mxu1 %vm442_vm0, %v18124_v13  ;;  %v18161_v9 = vld [vmem:[%s25019_s4] sm:$0xff] }
  0xe1   : > { %15295 = vmatmul.msk.bf16.gmra.mxu2 %vm442_vm0, %v21375_v27  ;;  %v18169_v13 = vld [vmem:[%s25019_s4 + $0x40] sm:$0xff] }
  0xe2   : > { %v862_v22 = vmax.f32 %v846_v1, 0.0  ;;  %2739 = vmatpush.bf16.msra.mxu2 %v18161_v9  ;;  %v19478_v9 = vld [vmem:[#allocation2 + $0x8] sm:$0xff]  }
  0xe3   : > { %v501_v12 = vpop.f32.mrf.mxu3  ;;  %2542 = vmatpush.bf16.msra.mxu1 %v18169_v13 }
  0xe4   : > { %v974_v61 = vmul.f32 %v933_v10, %v862_v22  ;;  %v625_v28 = vadd.f32 %v624_v25, %v501_v12  ;;  %v802_v49 = vpop.f32.mrf.mxu2  ;;  %v21452_v32 = vpop.f32.mrf.mxu0 }
  0xe5   : > { %v626_v19 = vpop.f32.mrf.mxu1  ;;  %8900 = vperm.xlu2 %20534, %v21120_v34   ;;  %v18155_v34 = vld [vmem:[%s25017_s2 + $0x60] sm:$0xff] }
  0xe6   : > { %v18676_v63 = vpack.c.bf16 %v974_v61, %v973_v48  ;;  %6766 = vperm.xlu1 %20533, %v21125_v35   ;;  %6761 = vperm.xlu0 %20532, %v21130_v36   ;;  %v827_v27 = vadd.f32 %v802_v49, %v625_v28  ;;  %v600_v36 = vadd.f32 %v21397_v59, %v21310_v11 }
  0xe7   : > { %2151 = vmatpush.bf16.msra.mxu0 %v18155_v34  ;;  %v605_v34 = vadd.f32 %v21426_v60, %v21346_v55  ;;  %v18208_v55 = vld [vmem:[%s25019_s4 + $0x138] sm:$0xff] }
  0xe8   : > { %19388 = vst [vmem:[#allocation2 + $0x30] sm:$0xff] %v18676_v63   ;;  %v847_v44 = vadd.f32 %v21336_v31, %v827_v27  ;;  %3407 = vmatpush.bf16.msrb.mxu1 %v18208_v55 }
  0xea   : > { %v863_v14 = vmax.f32 %v847_v44, 0.0 }
  0xeb   : > { %v503_v26 = vpop.f32.mrf.mxu3 }
  0xec   : > { %v627_v57 = vadd.f32 %v626_v19, %v503_v26  ;;  %v804_v39 = vpop.f32.mrf.mxu2  ;;  %v777_v35 = vpop.f32.mrf.mxu0 }
  0xed   : > { %v629_v41 = vpop.f32.mrf.mxu1  ;;  %8915 = vperm.xlu2 %20534, %v21149_v45   ;;  %v817_v59 = vadd.f32 %v777_v35, %v600_v36  ;;  %v943_v45 = vpop.permute.xlu2 %942 }
  0xee   : > { %v828_v54 = vadd.f32 %v804_v39, %v627_v57  ;;  %8910 = vperm.xlu1 %20533, %v21154_v46   ;;  %8905 = vperm.xlu0 %20532, %v21159_v47   ;;  %v938_v46 = vpop.permute.xlu1 %937  ;;  %v602_v47 = vadd.f32 %v21416_v20, %v21328_v42  ;;  %v2389_v42 = vld [vmem:[#allocation2] sm:$0x8]  ;;  %v18112_v39 = vld [vmem:[%s20883_s24 + $0x88] sm:$0xff] }
  0xef   : > { %15172 = vmatmul.msk.bf16.gmra.mxu0 %vm442_vm0, %v19811_v53  ;;  %v975_v1 = vmul.f32 %v938_v46, %v863_v14  ;;  %v837_v17 = vadd.f32 %v21336_v31, %v817_v59  ;;  %v18224_v53 = vld [vmem:[%s25019_s4 + $0x178] sm:$0xff]  ;;  %v607_v59 = vadd.f32 %v21452_v32, %v21369_v21  ;;  %v2608_v46 = vshll.u32 %v19478_v9, 16 }
  0xf0   : > { %v848_v11 = vadd.f32 %v21336_v31, %v828_v54  ;;  %15136 = vmatmul.msk.bf16.gmra.mxu3 %vm442_vm0, %v1028_v50  ;;  %15248 = vmatmul.msk.bf16.gmra.mxu1 %vm442_vm0, %v18125_v40  ;;  %v18192_v50 = vld [vmem:[%s25019_s4 + $0xb8] sm:$0xff] }
  0xf1   : > { %15296 = vmatmul.msk.bf16.gmra.mxu2 %vm442_vm0, %v21383_v51  ;;  %v21489_v51 = vld [vmem:[#allocation2 + $0x4] sm:$0xf]  ;;  %v853_v20 = vmax.f32 %v837_v17, 0.0  ;;  %2983 = vmatpush.bf16.msrb.mxu3 %v18192_v50  ;;  %v18126_v40 = vld [vmem:[%s20883_s24 + $0x94] sm:$0xff]  ;;  %v2610_v32 = vrot.slane %v2608_v46, 4 }
  0xf2   : > { %v864_v25 = vmax.f32 %v848_v11, 0.0  ;;  %3673 = vmatpush.bf16.msrb.mxu2 %v18224_v53  ;;  %v18200_v54 = vld [vmem:[%s25019_s4 + $0xf8] sm:$0xff] }
  0xf3   : > { %v506_v24 = vpop.f32.mrf.mxu3  ;;  %v965_v27 = vmul.f32 %v21360_v2, %v853_v20  ;;  %3261 = vmatpush.bf16.msrb.mxu0 %v18200_v54  ;;  %v18207_v54 = vld [vmem:[%s25019_s4 + $0x130] sm:$0xff] }
  0xf4   : > { %v976_v0 = vmul.f32 %v943_v45, %v864_v25  ;;  %v630_v18 = vadd.f32 %v629_v41, %v506_v24  ;;  %v807_v22 = vpop.f32.mrf.mxu2  ;;  %v779_v10 = vpop.f32.mrf.mxu0  ;;  %v2605_v25 = vshrl.u32 %v19478_v9, 16  ;;  %3408 = vmatpush.bf16.msrb.mxu1 %v18207_v54 }
  0xf5   : > { %v631_v48 = vpop.f32.mrf.mxu1  ;;  %v818_v61 = vadd.f32 %v779_v10, %v602_v47  ;;  %8930 = vperm.xlu2 %20534, %v21186_v4   ;;  %v2455_v4 = vunpack.c.l.b16 %v21489_v51 }
  0xf6   : > { %v18681_v12 = vpack.c.bf16 %v976_v0, %v975_v1  ;;  %8925 = vperm.xlu1 %20533, %v21191_v5   ;;  %8920 = vperm.xlu0 %20532, %v21196_v6   ;;  %v829_v28 = vadd.f32 %v807_v22, %v630_v18  ;;  %v2585_v5 = vunpack.c.l.b16 %v2389_v42  ;;  %v20555_v6 = vor.u32 %v21450_v62, %v21430_v8  ;;  %v18140_v8 = vld [vmem:[%s20883_s24 + $0xc8] sm:$0xff]  ;;  %v953_v13 = vpop.permute.xlu1 %952 }
  0xf7   : > { %v838_v49 = vadd.f32 %v21336_v31, %v818_v61  ;;  %v2607_v21 = vrot.slane %v2605_v25, 3 }
  0xf8   : > { %19389 = vst [vmem:[#allocation2 + $0x38] sm:$0xff] %v18681_v12   ;;  %v849_v29 = vadd.f32 %v21336_v31, %v829_v28 }
  0xf9   : > { %v854_v63 = vmax.f32 %v838_v49, 0.0  ;;  %v18191_v49 = vld [vmem:[%s25019_s4 + $0xb0] sm:$0xff] }
  0xfa   : > { %v865_v60 = vmax.f32 %v849_v29, 0.0  ;;  %2984 = vmatpush.bf16.msrb.mxu3 %v18191_v49  ;;  %v18206_v49 = vld [vmem:[%s25019_s4 + $0x128] sm:$0xff] }
  0xfb   : > { %v508_v19 = vpop.f32.mrf.mxu3  ;;  %v966_v26 = vmul.f32 %v21388_v56, %v854_v63  ;;  %v2586_v56 = vpack.c.b16 %v2455_v4, %v2585_v5  ;;  %3409 = vmatpush.bf16.msrb.mxu1 %v18206_v49  ;;  %v18150_v49 = vld [vmem:[%s20883_s24 + $0xb4] sm:$0xff] }
  0xfc   : > { %v632_v44 = vadd.f32 %v631_v48, %v508_v19  ;;  %v809_v57 = vpop.f32.mrf.mxu2  ;;  %v782_v35 = vpop.f32.mrf.mxu0  ;;  %v21543_v19 = vor.u32 %v2610_v32, %v2607_v21 }
  0xfd   : > { %v21509_v62 = vpack.c.bf16 %v966_v26, %v965_v27  ;;  %v634_v36 = vpop.f32.mrf.mxu1  ;;  %8945 = vperm.xlu2 %20534, %v21210_v15   ;;  %v819_v41 = vadd.f32 %v782_v35, %v605_v34  ;;  %v2600_v11 = vshll.u32 %v2586_v56, 16  ;;  %v8896_v34 = vld [vmem:[%s25016_s1 + $0x170] sm:$0xff]  ;;  %v8895_v35 = vld [vmem:[%s25016_s1 + $0x168] sm:$0xff] }
  0xfe   : > { %v830_v2 = vadd.f32 %v809_v57, %v632_v44  ;;  %8940 = vperm.xlu1 %20533, %v21215_v16   ;;  %8935 = vperm.xlu0 %20532, %v21220_v23   ;;  %v2597_v16 = vshrl.u32 %v2586_v56, 16  ;;  %v948_v23 = vpop.permute.xlu0 %947  ;;  %v18199_v56 = vld [vmem:[%s25019_s4 + $0xf0] sm:$0xff] }
  0xff   : > { %19384 = vst [vmem:[#allocation2 + $0x10] sm:$0xff] %v21509_v62   ;;  %15173 = vmatmul.msk.bf16.gmra.mxu0 %vm442_vm0, %v20555_v6  ;;  %v977_v47 = vmul.f32 %v948_v23, %v865_v60  ;;  %v839_v1 = vadd.f32 %v21336_v31, %v819_v41  ;;  %v2602_v61 = vrot.slane %v2600_v11, 4  ;;  %v18147_v6 = vld [vmem:[%s20883_s24 + $0x9c] sm:$0xff]  ;;  %v2614_v27 = vshrl.u32 %v21509_v62, 16 }
 0x100   : > { %v850_v15 = vadd.f32 %v21336_v31, %v830_v2  ;;  %15137 = vmatmul.msk.bf16.gmra.mxu3 %vm442_vm0, %v18112_v39  ;;  %15249 = vmatmul.msk.bf16.gmra.mxu1 %vm442_vm0, %v18126_v40  ;;  %v2599_v48 = vrot.slane %v2597_v16, 3  ;;  %v2617_v29 = vshll.u32 %v21509_v62, 16  ;;  %v18223_v40 = vld [vmem:[%s25019_s4 + $0x170] sm:$0xff] }
 0x101   : > { %15297 = vmatmul.msk.bf16.gmra.mxu2 %vm442_vm0, %v18140_v8  ;;  %v855_v42 = vmax.f32 %v839_v1, 0.0  ;;  %v2616_v51 = vrot.slane %v2614_v27, 3  ;;  %3262 = vmatpush.bf16.msrb.mxu0 %v18199_v56 }
 0x102   : > { %v866_v14 = vmax.f32 %v850_v15, 0.0  ;;  %v2603_v63 = vor.u32 %v2602_v61, %v2599_v48  ;;  %3674 = vmatpush.bf16.msrb.mxu2 %v18223_v40  ;;  %v19813_v48 = vld [vmem:[%s20883_s24 + $0x8c] sm:$0xff]   ;;  %v18148_v61 = vld [vmem:[%s20883_s24 + $0xa4] sm:$0xff] }
 0x103   : > { %v511_v45 = vpop.f32.mrf.mxu3  ;;  %v967_v26 = vmul.f32 %v21350_v7, %v855_v42 }
 0x104   : > { %v978_v24 = vmul.f32 %v953_v13, %v866_v14  ;;  %v635_v0 = vadd.f32 %v634_v36, %v511_v45  ;;  %v812_v17 = vpop.f32.mrf.mxu2  ;;  %v784_v18 = vpop.f32.mrf.mxu0  ;;  %v2612_v36 = vsel %vm2595_vm1, %v2603_v63, %v21543_v19 }
 0x105   : > { %v636_v10 = vpop.f32.mrf.mxu1  ;;  %v820_v12 = vadd.f32 %v784_v18, %v607_v59  ;;  %8960 = vperm.xlu2 %20534, %v21242_v33   ;;  %v18823_v33 = vunpack.c.l.b16 %v19478_v9  ;;  %v958_v9 = vpop.permute.xlu2 %957 }
 0x106   : > { %v18686_v22 = vpack.c.bf16 %v978_v24, %v977_v47  ;;  %8955 = vperm.xlu1 %20533, %v21247_v37   ;;  %8950 = vperm.xlu0 %20532, %v21252_v38   ;;  %v831_v20 = vadd.f32 %v812_v17, %v635_v0  ;;  %v8897_v37 = vld [vmem:[%s25016_s1 + $0x178] sm:$0xff]  ;;  %v18133_v38 = vld [vmem:[%s20883_s24 + $0x84] sm:$0xff]  ;;  %v963_v11 = vpop.permute.xlu0 %962 }
 0x107   : > { %v840_v28 = vadd.f32 %v21336_v31, %v820_v12  ;;  %v2471_v7 = vpack.c.b16 %v18823_v33, %v2455_v4  ;;  %v2619_v4 = vrot.slane %v2617_v29, 4 }
 0x108   : > { %19390 = vst [vmem:[#allocation2 + $0x40] sm:$0xff] %v18686_v22   ;;  %v851_v44 = vadd.f32 %v21336_v31, %v831_v20  ;;  %v21583_v22 = vld [vmem:[%s25018_s3] ss:$0 sm:$0xff]  ;;  %v18222_v20 = vld [vmem:[%s25019_s4 + $0x168] sm:$0xff] }
 0x109   : > { %v856_v50 = vmax.f32 %v840_v28, 0.0  ;;  %v2620_v59 = vor.u32 %v2619_v4, %v2616_v51  ;;  %v18198_v28 = vld [vmem:[%s25019_s4 + $0xe8] sm:$0xff]  ;;  %3675 = vmatpush.bf16.msrb.mxu2 %v18222_v20  ;;  %v18221_v51 = vld [vmem:[%s25019_s4 + $0x160] sm:$0xff] }
 0x10a   : > { %v867_v55 = vmax.f32 %v851_v44, 0.0  ;;  %3263 = vmatpush.bf16.msrb.mxu0 %v18198_v28  ;;  %v18197_v4 = vld [vmem:[%s25019_s4 + $0xe0] sm:$0xff] }
 0x10b   : > { %v513_v5 = vpop.f32.mrf.mxu3  ;;  %v968_v57 = vmul.f32 %v21380_v30, %v856_v50  ;;  %v19817_v28 = vld [vmem:[%s20883_s24 + $0x9c] sm:$0xff]  }
 0x10c   : > { %v637_v39 = vadd.f32 %v636_v10, %v513_v5  ;;  %v814_v53 = vpop.f32.mrf.mxu2  ;;  %v1288_v8 = vpop.f32.mrf.mxu0  ;;  %v979_v45 = vmul.f32 %v958_v9, %v867_v55  ;;  %v18190_v10 = vld [vmem:[%s25019_s4 + $0xa8] sm:$0xff]  ;;  %v18205_v55 = vld [vmem:[%s25019_s4 + $0x120] sm:$0xff] }
 0x10d   : > { %v18661_v30 = vpack.c.bf16 %v968_v57, %v967_v26  ;;  %v1465_v2 = vpop.f32.mrf.mxu1  ;;  %8975 = vperm.xlu2 %20534, %v8897_v37   ;;  %2985 = vmatpush.bf16.msrb.mxu3 %v18190_v10  ;;  %v20329_v5 = vld [vmem:[#allocation2 + $0xc] sm:$0xff]   ;;  %v1581_v27 = vpop.permute.xlu2 %1580 }
 0x10e   : > { %v832_v62 = vadd.f32 %v814_v53, %v637_v39  ;;  %8970 = vperm.xlu1 %20533, %v8896_v34   ;;  %8965 = vperm.xlu0 %20532, %v8895_v35   ;;  %v1576_v26 = vpop.permute.xlu1 %1575 }
 0x10f   : > { %19385 = vst [vmem:[#allocation2 + $0x18] sm:$0xff] %v18661_v30   ;;  %15402 = vmatmul.msk.bf16.vlgmr.msra.gmra.mxu0 %vm442_vm0, %v18147_v6  ;;  %v2623_v15 = vshrl.u32 %v18661_v30, 16  ;;  %v2626_v41 = vshll.u32 %v18661_v30, 16  ;;  %v2621_v6 = vsel %vm2595_vm1, %v21543_v19, %v2620_v59  ;;  %v18189_v19 = vld [vmem:[%s25019_s4 + $0xa0] sm:$0xff]  ;;  %3676 = vmatpush.bf16.msrb.mxu2 %v18221_v51 }
 0x110   : > { %v852_v60 = vadd.f32 %v21336_v31, %v832_v62  ;;  %15326 = vmatmul.msk.bf16.vlgmr.msra.gmra.mxu3 %vm442_vm0, %v18133_v38  ;;  %2543 = vmatmul.bf16.vlgmr.msra.gmra.mxu1 %v2471_v7  ;;  %v19815_v62 = vld [vmem:[%s20883_s24 + $0x94] sm:$0xff]  }
 0x111   : > { %2740 = vmatmul.bf16.vlgmr.msra.gmra.mxu2 %v2612_v36  ;;  %v2625_v14 = vrot.slane %v2623_v15, 3  ;;  %v2628_v16 = vrot.slane %v2626_v41, 4  ;;  %2986 = vmatpush.bf16.msrb.mxu3 %v18189_v19 }
 0x112   : > { %v868_v13 = vmax.f32 %v852_v60, 0.0  ;;  %3264 = vmatpush.bf16.msrb.mxu0 %v18197_v4  ;;  %3410 = vmatpush.bf16.msrb.mxu1 %v18205_v55 }
 0x113   : > { %v1165_v23 = vpop.f32.mrf.mxu3  ;;  %v21574_v47 = vor.u32 %v2628_v16, %v2625_v14 }
 0x114   : > { %v980_v31 = vmul.f32 %v963_v11, %v868_v13  ;;  %v1289_v25 = vadd.f32 %v1288_v8, %v1165_v23  ;;  %v21572_v46 = vpop.f32.mrf.mxu2  ;;  %v1290_v24 = vpop.f32.mrf.mxu0 }
 0x115   : > { %v1467_v0 = vpop.f32.mrf.mxu1  ;;  %v21578_v17 = vsel %vm2595_vm1, %v2620_v59, %v21574_v47  ;;  %v1586_v23 = vpop.permute.xlu0 %1585 }
 0x116   : > { %v18691_v1 = vpack.c.bf16 %v980_v31, %v979_v45  ;;  %v1505_v18 = vadd.f32 %v1465_v2, %v1289_v25  ;;  %v18149_v2 = vld [vmem:[%s20883_s24 + $0xac] sm:$0xff]  ;;  %v20331_v9 = vld [vmem:[#allocation2 + $0x14] sm:$0xff]   ;;  %v1591_v16 = vpop.permute.xlu1 %1590  ;;  %v21630_v45 = vld [vmem:[#allocation2 + $0x20] sm:$0xff]  }
 0x118   : > { %19391 = vst [vmem:[#allocation2 + $0x48] sm:$0xff] %v18691_v1   ;;  %v1525_v21 = vadd.f32 %v21583_v22, %v1505_v18 }
 0x11a   : > { %v1541_v37 = vmax.f32 %v1525_v21, 0.0 }
 0x11b   : > { %v1167_v12 = vpop.f32.mrf.mxu3 }
 0x11c   : > { %v1291_v32 = vadd.f32 %v1290_v24, %v1167_v12  ;;  %v21591_v42 = vpop.f32.mrf.mxu2  ;;  %v1293_v33 = vpop.f32.mrf.mxu0  ;;  %v1653_v57 = vmul.f32 %v1576_v26, %v1541_v37  ;;  %v2632_v12 = vshrl.u32 %v21630_v45, 16  ;;  %v18196_v37 = vld [vmem:[%s25019_s4 + $0xd8] sm:$0xff] }
 0x11d   : > { %v1470_v63 = vpop.f32.mrf.mxu1  ;;  %3265 = vmatpush.bf16.msrb.mxu0 %v18196_v37 }
 0x11e   : > { %v1506_v50 = vadd.f32 %v1467_v0, %v1291_v32  ;;  %v2634_v21 = vrot.slane %v2632_v12, 3 }
 0x11f   : > { %15403 = vmatmul.msk.bf16.gmra.mxu0 %vm442_vm0, %v18148_v61  ;;  %v18188_v61 = vld [vmem:[%s25019_s4 + $0x98] sm:$0xff] }
 0x120   : > { %v1526_v38 = vadd.f32 %v21583_v22, %v1506_v50  ;;  %15327 = vmatmul.msk.bf16.gmra.mxu3 %vm442_vm0, %v19813_v48  ;;  %2548 = vmatmul.bf16.gmra.mxu1 %v20329_v5  ;;  %v18220_v5 = vld [vmem:[%s25019_s4 + $0x158] sm:$0xff] }
 0x121   : > { %2745 = vmatmul.bf16.gmra.mxu2 %v2621_v6  ;;  %2987 = vmatpush.bf16.msrb.mxu3 %v18188_v61 }
 0x122   : > { %v1542_v29 = vmax.f32 %v1526_v38, 0.0  ;;  %v18204_v38 = vld [vmem:[%s25019_s4 + $0x118] sm:$0xff]  ;;  %3677 = vmatpush.bf16.msrb.mxu2 %v18220_v5 }
 0x123   : > { %v1170_v44 = vpop.f32.mrf.mxu3  ;;  %3411 = vmatpush.bf16.msrb.mxu1 %v18204_v38 }
 0x124   : > { %v1654_v39 = vmul.f32 %v1581_v27, %v1542_v29  ;;  %v1294_v53 = vadd.f32 %v1293_v33, %v1170_v44  ;;  %v21607_v34 = vpop.f32.mrf.mxu2  ;;  %v1295_v35 = vpop.f32.mrf.mxu0  ;;  %v20333_v44 = vld [vmem:[#allocation2 + $0x1c] sm:$0xff]  }
 0x125   : > { %v1472_v8 = vpop.f32.mrf.mxu1 }
 0x126   : > { %v18720_v40 = vpack.c.bf16 %v1654_v39, %v1653_v57  ;;  %v1507_v7 = vadd.f32 %v1470_v63, %v1294_v53 }
 0x128   : > { %19427 = vst [vmem:[#allocation2 + $0x50] sm:$0xff] %v18720_v40   ;;  %v1527_v36 = vadd.f32 %v21583_v22, %v1507_v7  ;;  %v1596_v40 = vpop.permute.xlu2 %1595  ;;  %v1601_v7 = vpop.permute.xlu0 %1600 }
 0x12a   : > { %v1543_v13 = vmax.f32 %v1527_v36, 0.0 }
 0x12b   : > { %v1172_v30 = vpop.f32.mrf.mxu3 }
 0x12c   : > { %v1296_v56 = vadd.f32 %v1295_v35, %v1172_v30  ;;  %v21615_v54 = vpop.f32.mrf.mxu2  ;;  %v1298_v60 = vpop.f32.mrf.mxu0  ;;  %v1655_v31 = vmul.f32 %v1586_v23, %v1543_v13  ;;  %v21658_v35 = vld [vmem:[#allocation2 + $0x28] sm:$0xff]  }
 0x12d   : > { %v1475_v41 = vpop.f32.mrf.mxu1  ;;  %v2641_v30 = vshrl.u32 %v21658_v35, 16  ;;  %v2644_v51 = vshll.u32 %v21658_v35, 16 }
 0x12e   : > { %v1508_v15 = vadd.f32 %v1472_v8, %v1296_v56 }
 0x12f   : > { %15404 = vmatmul.msk.bf16.gmra.mxu0 %vm442_vm0, %v18149_v2 }
 0x130   : > { %v1528_v14 = vadd.f32 %v21583_v22, %v1508_v15  ;;  %15328 = vmatmul.msk.bf16.gmra.mxu3 %vm442_vm0, %v19815_v62  ;;  %2553 = vmatmul.bf16.gmra.mxu1 %v20331_v9  ;;  %v2643_v15 = vrot.slane %v2641_v30, 3  ;;  %v18187_v9 = vld [vmem:[%s25019_s4 + $0x90] sm:$0xff] }
 0x131   : > { %2750 = vmatmul.bf16.gmra.mxu2 %v21578_v17  ;;  %v2635_v17 = vshll.u32 %v21630_v45, 16  ;;  %2988 = vmatpush.bf16.msrb.mxu3 %v18187_v9 }
 0x132   : > { %v1544_v11 = vmax.f32 %v1528_v14, 0.0  ;;  %v19819_v14 = vld [vmem:[%s20883_s24 + $0xa4] sm:$0xff]  }
 0x133   : > { %v1175_v59 = vpop.f32.mrf.mxu3  ;;  %v2637_v32 = vrot.slane %v2635_v17, 4  ;;  %v20335_v17 = vld [vmem:[#allocation2 + $0x24] sm:$0xff]  }
 0x134   : > { %v1656_v25 = vmul.f32 %v1591_v16, %v1544_v11  ;;  %v1299_v24 = vadd.f32 %v1298_v60, %v1175_v59  ;;  %v21632_v1 = vpop.f32.mrf.mxu2  ;;  %v1300_v0 = vpop.f32.mrf.mxu0  ;;  %v18151_v16 = vld [vmem:[%s20883_s24 + $0xbc] sm:$0xff] }
 0x135   : > { %v1477_v10 = vpop.f32.mrf.mxu1  ;;  %v2638_v26 = vor.u32 %v2637_v32, %v2634_v21  ;;  %v21685_v32 = vld [vmem:[#allocation2 + $0x30] sm:$0xff]  }
 0x136   : > { %v18725_v18 = vpack.c.bf16 %v1656_v25, %v1655_v31  ;;  %v1509_v48 = vadd.f32 %v1475_v41, %v1299_v24  ;;  %v2646_v41 = vrot.slane %v2644_v51, 4  ;;  %v18219_v25 = vld [vmem:[%s25019_s4 + $0x150] sm:$0xff]  ;;  %v18218_v51 = vld [vmem:[%s25019_s4 + $0x148] sm:$0xff] }
 0x137   : > { %v2639_v53 = vsel %vm2595_vm1, %v21574_v47, %v2638_v26  ;;  %v18195_v24 = vld [vmem:[%s25019_s4 + $0xd0] sm:$0xff]  ;;  %3678 = vmatpush.bf16.msrb.mxu2 %v18219_v25  ;;  %v1616_v25 = vpop.permute.xlu0 %1615 }
 0x138   : > { %19428 = vst [vmem:[#allocation2 + $0x58] sm:$0xff] %v18725_v18   ;;  %v1529_v33 = vadd.f32 %v21583_v22, %v1509_v48  ;;  %v2647_v31 = vor.u32 %v2646_v41, %v2643_v15  ;;  %3266 = vmatpush.bf16.msrb.mxu0 %v18195_v24  ;;  %v20337_v41 = vld [vmem:[#allocation2 + $0x2c] sm:$0xff]  }
 0x13a   : > { %v1545_v57 = vmax.f32 %v1529_v33, 0.0  ;;  %v2648_v21 = vsel %vm2595_vm1, %v2638_v26, %v2647_v31 }
 0x13b   : > { %v1177_v20 = vpop.f32.mrf.mxu3  ;;  %3679 = vmatpush.bf16.msrb.mxu2 %v18218_v51 }
 0x13c   : > { %v1301_v50 = vadd.f32 %v1300_v0, %v1177_v20  ;;  %v21642_v63 = vpop.f32.mrf.mxu2  ;;  %v1303_v6 = vpop.f32.mrf.mxu0  ;;  %v1657_v62 = vmul.f32 %v1596_v40, %v1545_v57  ;;  %v18203_v0 = vld [vmem:[%s25019_s4 + $0x110] sm:$0xff]  ;;  %v18186_v40 = vld [vmem:[%s25019_s4 + $0x88] sm:$0xff] }
 0x13d   : > { %v1480_v29 = vpop.f32.mrf.mxu1  ;;  %3412 = vmatpush.bf16.msrb.mxu1 %v18203_v0  ;;  %v1611_v20 = vpop.permute.xlu2 %1610  ;;  %2989 = vmatpush.bf16.msrb.mxu3 %v18186_v40  ;;  %v18201_v40 = vld [vmem:[%s25019_s4 + $0x100] sm:$0xff] }
 0x13e   : > { %v1510_v27 = vadd.f32 %v1477_v10, %v1301_v50  ;;  %v2650_v50 = vshrl.u32 %v21685_v32, 16 }
 0x13f   : > { %15405 = vmatmul.msk.bf16.gmra.mxu0 %vm442_vm0, %v18150_v49  ;;  %v1606_v49 = vpop.permute.xlu1 %1605 }
 0x140   : > { %v1530_v39 = vadd.f32 %v21583_v22, %v1510_v27  ;;  %15329 = vmatmul.msk.bf16.gmra.mxu3 %vm442_vm0, %v19817_v28  ;;  %2558 = vmatmul.bf16.gmra.mxu1 %v20333_v44  ;;  %v2653_v27 = vshll.u32 %v21685_v32, 16 }
 0x141   : > { %2755 = vmatmul.bf16.gmra.mxu2 %v2639_v53 }
 0x142   : > { %v1546_v8 = vmax.f32 %v1530_v39, 0.0  ;;  %v2652_v39 = vrot.slane %v2650_v50, 3  ;;  %v2655_v53 = vrot.slane %v2653_v27, 4  ;;  %v18185_v50 = vld [vmem:[%s25019_s4 + $0x80] sm:$0xff] }
 0x143   : > { %v1180_v19 = vpop.f32.mrf.mxu3  ;;  %2990 = vmatpush.bf16.msrb.mxu3 %v18185_v50  ;;  %v18240_v50 = vld [vmem:[%s25019_s4 + $0x1f8] sm:$0xff] }
 0x144   : > { %v1658_v2 = vmul.f32 %v1601_v7, %v1546_v8  ;;  %v1304_v36 = vadd.f32 %v1303_v6, %v1180_v19  ;;  %v21661_v56 = vpop.f32.mrf.mxu2  ;;  %v1305_v47 = vpop.f32.mrf.mxu0  ;;  %v19821_v7 = vld [vmem:[%s20883_s24 + $0xac] sm:$0xff]   ;;  %v18152_v19 = vld [vmem:[%s20883_s24 + $0xc4] sm:$0xff] }
 0x145   : > { %v1482_v55 = vpop.f32.mrf.mxu1 }
 0x146   : > { %v18730_v4 = vpack.c.bf16 %v1658_v2, %v1657_v62  ;;  %v1511_v60 = vadd.f32 %v1480_v29, %v1304_v36  ;;  %v21699_v36 = vor.u32 %v2655_v53, %v2652_v39  ;;  %v18217_v39 = vld [vmem:[%s25019_s4 + $0x140] sm:$0xff] }
 0x147   : > { %v18193_v53 = vld [vmem:[%s25019_s4 + $0xc0] sm:$0xff]  ;;  %3680 = vmatpush.bf16.msrb.mxu2 %v18217_v39  ;;  %v19855_v39 = vld [vmem:[#allocation2 + $0xc] sm:$0x8] }
 0x148   : > { %19429 = vst [vmem:[#allocation2 + $0x60] sm:$0xff] %v18730_v4   ;;  %v1531_v11 = vadd.f32 %v21583_v22, %v1511_v60  ;;  %v18202_v4 = vld [vmem:[%s25019_s4 + $0x108] sm:$0xff] }
 0x149   : > { %3413 = vmatpush.bf16.msrb.mxu1 %v18202_v4 }
 0x14a   : > { %v1547_v48 = vmax.f32 %v1531_v11, 0.0  ;;  %v1621_v11 = vpop.permute.xlu1 %1620 }
 0x14b   : > { %v1182_v13 = vpop.f32.mrf.mxu3 }
 0x14c   : > { %v1306_v23 = vadd.f32 %v1305_v47, %v1182_v13  ;;  %v21670_v59 = vpop.f32.mrf.mxu2  ;;  %v1308_v18 = vpop.f32.mrf.mxu0  ;;  %v1659_v5 = vmul.f32 %v1606_v49, %v1547_v48  ;;  %v18194_v47 = vld [vmem:[%s25019_s4 + $0xc8] sm:$0xff] }
 0x14d   : > { %v1485_v12 = vpop.f32.mrf.mxu1  ;;  %3267 = vmatpush.bf16.msrb.mxu0 %v18194_v47  ;;  %3414 = vmatpush.bf16.msrb.mxu1 %v18201_v40 }
 0x14e   : > { %v1512_v10 = vadd.f32 %v1482_v55, %v1306_v23 }
 0x14f   : > { %15406 = vmatmul.msk.bf16.gmra.mxu0 %vm442_vm0, %v18151_v16  ;;  %v21715_v16 = vld [vmem:[#allocation2 + $0x38] sm:$0xff]  }
 0x150   : > { %v1532_v61 = vadd.f32 %v21583_v22, %v1512_v10  ;;  %15330 = vmatmul.msk.bf16.gmra.mxu3 %vm442_vm0, %v19819_v14  ;;  %2563 = vmatmul.bf16.gmra.mxu1 %v20335_v17  ;;  %v2657_v14 = vsel %vm2595_vm1, %v2647_v31, %v21699_v36  ;;  %v2659_v0 = vshrl.u32 %v21715_v16, 16  ;;  %v2662_v48 = vshll.u32 %v21715_v16, 16 }
 0x151   : > { %2760 = vmatmul.bf16.gmra.mxu2 %v2648_v21  ;;  %3268 = vmatpush.bf16.msrb.mxu0 %v18193_v53  ;;  %v20340_v53 = vld [vmem:[#allocation2 + $0xc] sm:$0xf0]  }
 0x152   : > { %v1548_v28 = vmax.f32 %v1532_v61, 0.0  ;;  %v2664_v49 = vrot.slane %v2662_v48, 4  ;;  %v18232_v48 = vld [vmem:[%s25019_s4 + $0x1b8] sm:$0xff] }
 0x153   : > { %v1185_v33 = vpop.f32.mrf.mxu3  ;;  %3951 = vmatpush.bf16.msra.mxu3 %v18232_v48 }
 0x154   : > { %v1660_v37 = vmul.f32 %v1611_v20, %v1548_v28  ;;  %v1309_v38 = vadd.f32 %v1308_v18, %v1185_v33  ;;  %v21688_v6 = vpop.f32.mrf.mxu2  ;;  %v1310_v29 = vpop.f32.mrf.mxu0  ;;  %v2661_v28 = vrot.slane %v2659_v0, 3  ;;  %v2405_v33 = vld [vmem:[#allocation2 + $0x40] sm:$0xf] }
 0x155   : > { %v1487_v44 = vpop.f32.mrf.mxu1  ;;  %v2470_v27 = vunpack.c.l.b16 %v2405_v33  ;;  %v18272_v33 = vld [vmem:[%s25019_s4 + $0x78] sm:$0xff]  ;;  %4097 = vmatpush.bf16.msra.mxu0 %v18240_v50 }
 0x156   : > { %v18735_v26 = vpack.c.bf16 %v1660_v37, %v1659_v5  ;;  %v1513_v57 = vadd.f32 %v1485_v12, %v1309_v38  ;;  %v19822_v37 = vld [vmem:[%s20883_s24 + $0xb4] sm:$0xff]   ;;  %v18153_v38 = vld [vmem:[%s20883_s24 + $0xcc] sm:$0xff]  ;;  %4753 = vmatpush.bf16.msra.mxu2 %v18272_v33 }
 0x158   : > { %19430 = vst [vmem:[#allocation2 + $0x68] sm:$0xff] %v18735_v26   ;;  %v1533_v30 = vadd.f32 %v21583_v22, %v1513_v57  ;;  %v21729_v57 = vor.u32 %v2664_v49, %v2661_v28 }
 0x15a   : > { %v1549_v9 = vmax.f32 %v1533_v30, 0.0  ;;  %v20338_v30 = vld [vmem:[#allocation2 + $0x34] sm:$0xff]   ;;  %v2666_v4 = vsel %vm2595_vm1, %v21699_v36, %v21729_v57 }
 0x15b   : > { %v1187_v8 = vpop.f32.mrf.mxu3 }
 0x15c   : > { %v1311_v62 = vadd.f32 %v1310_v29, %v1187_v8  ;;  %v21697_v2 = vpop.f32.mrf.mxu2  ;;  %v1313_v55 = vpop.f32.mrf.mxu0  ;;  %v1661_v18 = vmul.f32 %v1616_v25, %v1549_v9 }
 0x15d   : > { %v1490_v15 = vpop.f32.mrf.mxu1 }
 0x15e   : > { %v1514_v60 = vadd.f32 %v1487_v44, %v1311_v62  ;;  %v2594_v62 = vpack.c.b16 %v2470_v27, %v2470_v27 }
 0x15f   : > { %15407 = vmatmul.msk.bf16.gmra.mxu0 %vm442_vm0, %v18152_v19 }
 0x160   : > { %v1534_v13 = vadd.f32 %v21583_v22, %v1514_v60  ;;  %15331 = vmatmul.msk.bf16.gmra.mxu3 %vm442_vm0, %v19821_v7  ;;  %2568 = vmatmul.bf16.gmra.mxu1 %v20337_v41  ;;  %v2668_v9 = vshrl.u32 %v2594_v62, 16  ;;  %v2671_v25 = vshll.u32 %v2594_v62, 16 }
 0x161   : > { %2765 = vmatmul.bf16.gmra.mxu2 %v2657_v14 }
 0x162   : > { %v1550_v23 = vmax.f32 %v1534_v13, 0.0  ;;  %v2670_v36 = vrot.slane %v2668_v9, 3 }
 0x163   : > { %v1190_v24 = vpop.f32.mrf.mxu3 }
 0x164   : > { %v1662_v10 = vmul.f32 %v1621_v11, %v1550_v23  ;;  %v1314_v12 = vadd.f32 %v1313_v55, %v1190_v24  ;;  %v21718_v17 = vpop.f32.mrf.mxu2  ;;  %v1315_v31 = vpop.f32.mrf.mxu0 }
 0x165   : > { %v1492_v21 = vpop.f32.mrf.mxu1  ;;  %v1626_v55 = vpop.permute.xlu2 %1625 }
 0x166   : > { %v18740_v61 = vpack.c.bf16 %v1662_v10, %v1661_v18  ;;  %v1515_v20 = vadd.f32 %v1490_v15, %v1314_v12  ;;  %v1631_v15 = vpop.permute.xlu0 %1630  ;;  %v2673_v12 = vrot.slane %v2671_v25, 4 }
 0x168   : > { %19431 = vst [vmem:[#allocation2 + $0x70] sm:$0xff] %v18740_v61   ;;  %v1535_v29 = vadd.f32 %v21583_v22, %v1515_v20  ;;  %v18154_v61 = vld [vmem:[%s20883_s24 + $0xd4] sm:$0xff]  ;;  %v2674_v49 = vor.u32 %v2673_v12, %v2670_v36  ;;  %s20489_s24 = smul.u32 6, %s296_s22 }
 0x16a   : > { %v1551_v51 = vmax.f32 %v1535_v29, 0.0  ;;  %v2675_v62 = vsel %vm2595_vm1, %v21729_v57, %v2674_v49  ;;  %v18231_v49 = vld [vmem:[%s25019_s4 + $0x1b0] sm:$0xff]  ;;  %s298_s25 = scalar_lea.vmem [#allocation4], %s20489_s24  ;;  %s20576_s24 = scalar_lea.hbm %s25023_s8, 12 }
 0x16b   : > { %v1192_v5 = vpop.f32.mrf.mxu3  ;;  %3952 = vmatpush.bf16.msra.mxu3 %v18231_v49  ;;  %s14863_s23 = sshll.u32 %s298_s25, 4  ;;  %p20578_p1 = scmp.lt.s32.totalorder %s20576_s24, %s20572_s20  ;;  %s14864_s23 = int_to_ptr.vmem [resolvable:$true] %s14863_s23 }
 0x16c   : > { %v1316_v26 = vadd.f32 %v1315_v31, %v1192_v5  ;;  %v21727_v44 = vpop.f32.mrf.mxu2  ;;  %v1318_v8 = vpop.f32.mrf.mxu0  ;;  %v1663_v13 = vmul.f32 %v1626_v55, %v1551_v51  ;;  %v18256_v5 = vld [vmem:[%s25019_s4 + $0x238] sm:$0xff]  ;;  %v19856_v51 = vor.u32 %v20340_v53, %v19855_v39 }
 0x16d   : > { %v1495_v19 = vpop.f32.mrf.mxu1  ;;  %4363 = vmatpush.bf16.msra.mxu1 %v18256_v5  ;;  %v1636_v55 = vpop.permute.xlu1 %1635  ;;  %p20579_p2 = por %p20578_p1, %p20577_p0 }
 0x16e   : > { %v1516_v7 = vadd.f32 %v1492_v21, %v1316_v26  ;;  %v3126_v25 = vshrl.u32 %v19856_v51, 16 }
 0x16f   : > { %15408 = vmatmul.msk.bf16.gmra.mxu0 %vm442_vm0, %v18153_v38  ;;  %v18848_v38 = vunpack.c.h.b16 %v21715_v16  ;;  %p20580_p3 = pnand %p20579_p2, %p20575_p13 }
 0x170   : > { %v1536_v47 = vadd.f32 %v21583_v22, %v1516_v7  ;;  %15332 = vmatmul.msk.bf16.gmra.mxu3 %vm442_vm0, %v19822_v37  ;;  %2573 = vmatmul.bf16.gmra.mxu1 %v20338_v30  ;;  %v20342_v7 = vld [vmem:[#allocation2 + $0x14] sm:$0xff]   ;;  %v3128_v33 = vrot.slane %v3126_v25, 3 }
 0x171   : > { %2770 = vmatmul.bf16.gmra.mxu2 %v2666_v4  ;;  %v2478_v40 = vpack.c.b16 %v2470_v27, %v18848_v38  ;;  %v1641_v27 = vpop.permute.xlu2 %1640  ;;  %v18209_v4 = vld [vmem:[#allocation2 + $0x10] sm:$0xff]  ;;  %v3134_v9 = vshrl.u32 %v20342_v7, 16  ;;  %v3137_v43 = vshll.u32 %v20342_v7, 16 }
 0x172   : > { %v1552_v60 = vmax.f32 %v1536_v47, 0.0  ;;  %v3552_v36 = vshll.u32 %v18209_v4, 16 }
 0x173   : > { %v1195_v41 = vpop.f32.mrf.mxu3 }
 0x174   : > { %v1664_v14 = vmul.f32 %v1631_v15, %v1552_v60  ;;  %v1319_v11 = vadd.f32 %v1318_v8, %v1195_v41  ;;  %v21746_v23 = vpop.f32.mrf.mxu2  ;;  %v1320_v24 = vpop.f32.mrf.mxu0  ;;  %v18177_v8 = vld [vmem:[#allocation2 + $0x4] sm:$0xff]  ;;  %v21773_v15 = vld [vmem:[#allocation2 + $0xc] sm:$0xff]  ;;  %v3554_v5 = vrot.slane %v3552_v36, 1 }
 0x175   : > { %v1497_v18 = vpop.f32.mrf.mxu1  ;;  %v2862_v41 = vshll.u32 %v18177_v8, 16  ;;  %v2867_v48 = vshll.u32 %v21773_v15, 16 }
 0x176   : > { %v18745_v0 = vpack.c.bf16 %v1664_v14, %v1663_v13  ;;  %v1517_v10 = vadd.f32 %v1495_v19, %v1319_v11  ;;  %v21777_v11 = vld [vmem:[#allocation2 + $0x18] sm:$0xff] }
 0x177   : > { %v2864_v12 = vrot.slane %v2862_v41, 1 }
 0x178   : > { %19432 = vst [vmem:[#allocation2 + $0x78] sm:$0xff] %v18745_v0   ;;  %v1537_v21 = vadd.f32 %v21583_v22, %v1517_v10  ;;  %v2860_v10 = vshrl.u32 %v18177_v8, 16  ;;  %v3550_v8 = vshrl.u32 %v18209_v4, 16 }
 0x17a   : > { %v1553_v19 = vmax.f32 %v1537_v21, 0.0  ;;  %v2865_v38 = vor.u32 %v2864_v12, %v2860_v10 }
 0x17b   : > { %v1197_v31 = vpop.f32.mrf.mxu3 }
 0x17c   : > { %v1321_v20 = vadd.f32 %v1320_v24, %v1197_v31  ;;  %v21753_v28 = vpop.f32.mrf.mxu2  ;;  %v1323_v37 = vpop.f32.mrf.mxu0  ;;  %v1665_v52 = vmul.f32 %v1636_v55, %v1553_v19  ;;  %v3129_v24 = vshll.u32 %v19856_v51, 16  ;;  %v3136_v31 = vrot.slane %v3134_v9, 3  ;;  %v18271_v19 = vld [vmem:[%s25019_s4 + $0x70] sm:$0xff]  ;;  %v20344_v9 = vld [vmem:[#allocation2 + $0x1c] sm:$0xff]  }
 0x17d   : > { %v1500_v26 = vpop.f32.mrf.mxu1  ;;  %4754 = vmatpush.bf16.msra.mxu2 %v18271_v19  ;;  %v3143_v10 = vshrl.u32 %v20344_v9, 16  ;;  %v3146_v36 = vshll.u32 %v20344_v9, 16 }
 0x17e   : > { %v1518_v29 = vadd.f32 %v1497_v18, %v1321_v20  ;;  %v3557_v20 = vshll.u32 %v21777_v11, 16  ;;  %v3131_v50 = vrot.slane %v3129_v24, 4  ;;  %v1646_v24 = vpop.permute.xlu0 %1645 }
 0x17f   : > { %15409 = vmatmul.msk.bf16.gmra.mxu0 %vm442_vm0, %v18154_v61  ;;  %v3139_v61 = vrot.slane %v3137_v43, 4 }
 0x180   : > { %v1538_v30 = vadd.f32 %v21583_v22, %v1518_v29  ;;  %15333 = vmatmul.msk.bf16.gmra.mxu3 %vm442_vm0, %v20610_v58  ;;  %2578 = vmatmul.bf16.gmra.mxu1 %v2478_v40  ;;  %v21784_v29 = vrot.slane %v2867_v48, 1  ;;  %v3559_v7 = vrot.slane %v3557_v20, 1 }
 0x181   : > { %2775 = vmatmul.bf16.gmra.mxu2 %v2675_v62  ;;  %v21786_v39 = vor.u32 %v3139_v61, %v3136_v31  ;;  %v18255_v62 = vld [vmem:[%s25019_s4 + $0x230] sm:$0xff] }
 0x182   : > { %v1554_v47 = vmax.f32 %v1538_v30, 0.0  ;;  %v18239_v30 = vld [vmem:[%s25019_s4 + $0x1f0] sm:$0xff]  ;;  %v2870_v4 = vsel %vm2858_vm2, %v2865_v38, %v21784_v29  ;;  %4364 = vmatpush.bf16.msra.mxu1 %v18255_v62 }
 0x183   : > { %v1200_v60 = vpop.f32.mrf.mxu3  ;;  %4098 = vmatpush.bf16.msra.mxu0 %v18239_v30  ;;  %v2871_v30 = vshrl.u32 %v21773_v15, 16  ;;  %v18254_v15 = vld [vmem:[%s25019_s4 + $0x228] sm:$0xff] }
 0x184   : > { %v1666_v58 = vmul.f32 %v1641_v27, %v1554_v47  ;;  %v1324_v13 = vadd.f32 %v1323_v37, %v1200_v60  ;;  %v21775_v14 = vpop.f32.mrf.mxu2  ;;  %v1325_v57 = vpop.f32.mrf.mxu0  ;;  %v3132_v27 = vor.u32 %v3131_v50, %v3128_v33  ;;  %v3555_v60 = vor.u32 %v3554_v5, %v3550_v8  ;;  %v21811_v33 = vld [vmem:[#allocation2 + $0x20] sm:$0xff] }
 0x185   : > { %v1502_v18 = vpop.f32.mrf.mxu1  ;;  %v3145_v5 = vrot.slane %v3143_v10, 3  ;;  %v3565_v8 = vshll.u32 %v21811_v33, 16  ;;  %v2264_v10 = vpop.permute.xlu2 %2263 }
 0x186   : > { %v18750_v0 = vpack.c.bf16 %v1666_v58, %v1665_v52  ;;  %v1519_v21 = vadd.f32 %v1500_v26, %v1324_v13  ;;  %v3141_v41 = vsel %vm2595_vm1, %v3132_v27, %v21786_v39  ;;  %v19485_v58 = vld [vmem:[#allocation2 + $0x10] sm:$0xff]   ;;  %v3560_v13 = vsel %vm2858_vm2, %v3555_v60, %v3559_v7  ;;  %4365 = vmatpush.bf16.msra.mxu1 %v18254_v15 }
 0x188   : > { %19433 = vst [vmem:[#allocation2 + $0x80] sm:$0xff] %v18750_v0   ;;  %v1539_v53 = vadd.f32 %v21583_v22, %v1519_v21 }
 0x18a   : > { %v1555_v43 = vmax.f32 %v1539_v53, 0.0  ;;  %v21817_v53 = vld [vmem:[%s25018_s3] ss:$0 sm:$0xff] }
 0x18b   : > { %v1202_v37 = vpop.f32.mrf.mxu3 }
 0x18c   : > { %v1326_v40 = vadd.f32 %v1325_v57, %v1202_v37  ;;  %v21789_v26 = vpop.f32.mrf.mxu2  ;;  %v2153_v51 = vpop.f32.mrf.mxu0  ;;  %v1667_v12 = vmul.f32 %v1646_v24, %v1555_v43  ;;  %v3148_v37 = vrot.slane %v3146_v36, 4  ;;  %v2873_v43 = vor.u32 %v2871_v30, %v21784_v29  ;;  %v19486_v24 = vld [vmem:[#allocation2 + $0x18] sm:$0xff]  }
 0x18d   : > { %v2544_v55 = vpop.f32.mrf.mxu1  ;;  %v1651_v57 = vpop.permute.xlu1 %1650 }
 0x18e   : > { %v1520_v47 = vadd.f32 %v1502_v18, %v1326_v40  ;;  %v21806_v18 = vld [vmem:[#allocation2 + $0x14] sm:$0xff]  ;;  %v3561_v40 = vshrl.u32 %v21777_v11, 16  ;;  %v21825_v27 = vor.u32 %v3148_v37, %v3145_v5  ;;  %v18238_v11 = vld [vmem:[%s25019_s4 + $0x1e8] sm:$0xff]  ;;  %v21852_v5 = vld [vmem:[#allocation2 + $0x1c] sm:$0xff] }
 0x18f   : > { %3269 = vmatmul.bf16.vlgmr.msrb.gmra.mxu0 %v3141_v41  ;;  %v2875_v50 = vshll.u32 %v21806_v18, 16  ;;  %v2879_v30 = vshrl.u32 %v21806_v18, 16  ;;  %v18269_v18 = vld [vmem:[%s25019_s4 + $0x60] sm:$0xff] }
 0x190   : > { %v1540_v52 = vadd.f32 %v21583_v22, %v1520_v47  ;;  %2991 = vmatmul.bf16.vlgmr.msrb.gmra.mxu3 %v2870_v4  ;;  %3415 = vmatmul.bf16.vlgmr.msrb.gmra.mxu1 %v19485_v58  ;;  %v3563_v60 = vor.u32 %v3561_v40, %v3559_v7  ;;  %v18270_v4 = vld [vmem:[%s25019_s4 + $0x68] sm:$0xff]  ;;  %v3567_v7 = vrot.slane %v3565_v8, 1 }
 0x191   : > { %3681 = vmatmul.bf16.vlgmr.msrb.gmra.mxu2 %v3560_v13  ;;  %v2877_v62 = vrot.slane %v2875_v50, 1  ;;  %4099 = vmatpush.bf16.msra.mxu0 %v18238_v11  ;;  %v3150_v13 = vsel %vm2595_vm1, %v21786_v39, %v21825_v27 }
 0x192   : > { %v1556_v25 = vmax.f32 %v1540_v52, 0.0  ;;  %4755 = vmatpush.bf16.msra.mxu2 %v18270_v4  ;;  %v3568_v29 = vsel %vm2858_vm2, %v3563_v60, %v3567_v7 }
 0x193   : > { %v1976_v0 = vpop.f32.mrf.mxu3  ;;  %v2878_v58 = vsel %vm2858_vm2, %v2873_v43, %v2877_v62  ;;  %v2881_v4 = vor.u32 %v2879_v30, %v2877_v62  ;;  %v3569_v43 = vshrl.u32 %v21811_v33, 16  ;;  %v18253_v62 = vld [vmem:[%s25019_s4 + $0x220] sm:$0xff] }
 0x194   : > { %v1668_v48 = vmul.f32 %v1651_v57, %v1556_v25  ;;  %v1977_v31 = vadd.f32 %v1976_v0, %v21572_v46  ;;  %v2741_v22 = vpop.f32.mrf.mxu2  ;;  %v2155_v21 = vpop.f32.mrf.mxu0  ;;  %v18230_v46 = vld [vmem:[%s25019_s4 + $0x1a8] sm:$0xff]  ;;  %4366 = vmatpush.bf16.msra.mxu1 %v18253_v62 }
 0x195   : > { %v21809_v61 = vadd.f32 %v2741_v22, %v2544_v55  ;;  %v2546_v49 = vpop.f32.mrf.mxu1  ;;  %3953 = vmatpush.bf16.msra.mxu3 %v18230_v46  ;;  %v20346_v0 = vld [vmem:[#allocation2 + $0x24] sm:$0xff]  }
 0x196   : > { %v18755_v20 = vpack.c.bf16 %v1668_v48, %v1667_v12  ;;  %v2193_v38 = vadd.f32 %v2153_v51, %v1977_v31  ;;  %v2269_v12 = vpop.permute.xlu0 %2268  ;;  %v3152_v37 = vshrl.u32 %v20346_v0, 16  ;;  %4756 = vmatpush.bf16.msra.mxu2 %v18269_v18 }
 0x198   : > { %19434 = vst [vmem:[#allocation2 + $0x88] sm:$0xff] %v18755_v20   ;;  %v2213_v51 = vadd.f32 %v21817_v53, %v2193_v38  ;;  %v21848_v20 = vld [vmem:[#allocation2 + $0x28] sm:$0xff]  ;;  %v3155_v38 = vshll.u32 %v20346_v0, 16 }
 0x19a   : > { %v2229_v57 = vmax.f32 %v2213_v51, 0.0  ;;  %v2883_v51 = vshll.u32 %v21852_v5, 16 }
 0x19b   : > { %v1978_v19 = vpop.f32.mrf.mxu3 }
 0x19c   : > { %v1979_v47 = vadd.f32 %v1978_v19, %v21591_v42  ;;  %v2743_v55 = vpop.f32.mrf.mxu2  ;;  %v2158_v9 = vpop.f32.mrf.mxu0  ;;  %v2341_v31 = vmul.f32 %v2264_v10, %v2229_v57  ;;  %v3573_v19 = vshll.u32 %v21848_v20, 16  ;;  %v20348_v10 = vld [vmem:[#allocation2 + $0x2c] sm:$0xff]  }
 0x19d   : > { %v21838_v41 = vadd.f32 %v2743_v55, %v2546_v49  ;;  %v2549_v52 = vpop.f32.mrf.mxu1  ;;  %v3157_v55 = vrot.slane %v3155_v38, 4 }
 0x19e   : > { %v2194_v42 = vadd.f32 %v2155_v21, %v1979_v47  ;;  %v3154_v47 = vrot.slane %v3152_v37, 3 }
 0x19f   : > { %3274 = vmatmul.bf16.gmra.mxu0 %v3150_v13  ;;  %v2885_v13 = vrot.slane %v2883_v51, 1 }
 0x1a0   : > { %v2214_v25 = vadd.f32 %v21817_v53, %v2194_v42  ;;  %2996 = vmatmul.bf16.gmra.mxu3 %v2878_v58  ;;  %3420 = vmatmul.bf16.gmra.mxu1 %v19486_v24  ;;  %v21863_v42 = vrot.slane %v3573_v19, 1  ;;  %v21876_v57 = vor.u32 %v3157_v55, %v3154_v47  ;;  %v3571_v24 = vor.u32 %v3569_v43, %v3567_v7  ;;  %v2279_v7 = vpop.permute.xlu2 %2278 }
 0x1a1   : > { %3686 = vmatmul.bf16.gmra.mxu2 %v3568_v29  ;;  %v2886_v29 = vsel %vm2858_vm2, %v2881_v4, %v2885_v13  ;;  %v2887_v4 = vshrl.u32 %v21852_v5, 16  ;;  %v18268_v5 = vld [vmem:[%s25019_s4 + $0x58] sm:$0xff] }
 0x1a2   : > { %v2230_v36 = vmax.f32 %v2214_v25, 0.0  ;;  %v3159_v0 = vsel %vm2595_vm1, %v21825_v27, %v21876_v57  ;;  %4757 = vmatpush.bf16.msra.mxu2 %v18268_v5 }
 0x1a3   : > { %v1981_v48 = vpop.f32.mrf.mxu3 }
 0x1a4   : > { %v2342_v22 = vmul.f32 %v2269_v12, %v2230_v36  ;;  %v1982_v39 = vadd.f32 %v1981_v48, %v21607_v34  ;;  %v2746_v21 = vpop.f32.mrf.mxu2  ;;  %v2160_v50 = vpop.f32.mrf.mxu0  ;;  %v18229_v34 = vld [vmem:[%s25019_s4 + $0x1a0] sm:$0xff]  ;;  %v3576_v48 = vsel %vm2858_vm2, %v3571_v24, %v21863_v42 }
 0x1a5   : > { %v21850_v49 = vadd.f32 %v2746_v21, %v2549_v52  ;;  %v2551_v40 = vpop.f32.mrf.mxu1  ;;  %3954 = vmatpush.bf16.msra.mxu3 %v18229_v34  ;;  %v18237_v52 = vld [vmem:[%s25019_s4 + $0x1e0] sm:$0xff]  ;;  %v3161_v21 = vshrl.u32 %v20348_v10, 16 }
 0x1a6   : > { %v18784_v46 = vpack.c.bf16 %v2342_v22, %v2341_v31  ;;  %v2195_v8 = vadd.f32 %v2158_v9, %v1982_v39  ;;  %4100 = vmatpush.bf16.msra.mxu0 %v18237_v52  ;;  %v2274_v22 = vpop.permute.xlu1 %2273  ;;  %v21891_v34 = vld [vmem:[#allocation2 + $0x24] sm:$0xff] }
 0x1a7   : > { %v3163_v51 = vrot.slane %v3161_v21, 3  ;;  %v2284_v21 = vpop.permute.xlu0 %2283 }
 0x1a8   : > { %19470 = vst [vmem:[#allocation2 + $0x90] sm:$0xff] %v18784_v46   ;;  %v2215_v11 = vadd.f32 %v21817_v53, %v2195_v8 }
 0x1aa   : > { %v2231_v36 = vmax.f32 %v2215_v11, 0.0  ;;  %v2891_v11 = vshll.u32 %v21891_v34, 16 }
 0x1ab   : > { %v1983_v60 = vpop.f32.mrf.mxu3 }
 0x1ac   : > { %v1984_v15 = vadd.f32 %v1983_v60, %v21615_v54  ;;  %v2748_v9 = vpop.f32.mrf.mxu2  ;;  %v2163_v54 = vpop.f32.mrf.mxu0  ;;  %v2343_v27 = vmul.f32 %v2274_v22, %v2231_v36 }
 0x1ad   : > { %v21874_v58 = vadd.f32 %v2748_v9, %v2551_v40  ;;  %v2554_v25 = vpop.f32.mrf.mxu1  ;;  %v21887_v40 = vld [vmem:[#allocation2 + $0x30] sm:$0xff]  ;;  %v2889_v9 = vor.u32 %v2887_v4, %v2885_v13  ;;  %v18252_v13 = vld [vmem:[%s25019_s4 + $0x218] sm:$0xff] }
 0x1ae   : > { %v2196_v33 = vadd.f32 %v2160_v50, %v1984_v15  ;;  %v3164_v50 = vshll.u32 %v20348_v10, 16  ;;  %v3581_v60 = vshll.u32 %v21887_v40, 16  ;;  %4367 = vmatpush.bf16.msra.mxu1 %v18252_v13  ;;  %v3585_v13 = vshrl.u32 %v21887_v40, 16 }
 0x1af   : > { %3279 = vmatmul.bf16.gmra.mxu0 %v3159_v0 }
 0x1b0   : > { %v2216_v12 = vadd.f32 %v21817_v53, %v2196_v33  ;;  %3001 = vmatmul.bf16.gmra.mxu3 %v2886_v29  ;;  %3425 = vmatmul.bf16.gmra.mxu1 %v21630_v45  ;;  %v3166_v47 = vrot.slane %v3164_v50, 4  ;;  %v21904_v33 = vrot.slane %v3581_v60, 1  ;;  %v2893_v29 = vrot.slane %v2891_v11, 1 }
 0x1b1   : > { %3691 = vmatmul.bf16.gmra.mxu2 %v3576_v48  ;;  %v20350_v48 = vld [vmem:[#allocation2 + $0x34] sm:$0xff]  }
 0x1b2   : > { %v2232_v31 = vmax.f32 %v2216_v12, 0.0  ;;  %v21899_v43 = vor.u32 %v3166_v47, %v3163_v51  ;;  %v2894_v36 = vsel %vm2858_vm2, %v2889_v9, %v2893_v29 }
 0x1b3   : > { %v1986_v39 = vpop.f32.mrf.mxu3 }
 0x1b4   : > { %v2344_v37 = vmul.f32 %v2279_v7, %v2232_v31  ;;  %v1987_v38 = vadd.f32 %v1986_v39, %v21632_v1  ;;  %v2751_v46 = vpop.f32.mrf.mxu2  ;;  %v2165_v19 = vpop.f32.mrf.mxu0  ;;  %v18228_v1 = vld [vmem:[%s25019_s4 + $0x198] sm:$0xff]  ;;  %v3168_v12 = vsel %vm2595_vm1, %v21876_v57, %v21899_v43  ;;  %v3170_v57 = vshrl.u32 %v20350_v48, 16 }
 0x1b5   : > { %v21889_v8 = vadd.f32 %v2751_v46, %v2554_v25  ;;  %v2556_v30 = vpop.f32.mrf.mxu1  ;;  %3955 = vmatpush.bf16.msra.mxu3 %v18228_v1  ;;  %v18236_v25 = vld [vmem:[%s25019_s4 + $0x1d8] sm:$0xff] }
 0x1b6   : > { %v18789_v45 = vpack.c.bf16 %v2344_v37, %v2343_v27  ;;  %v2197_v55 = vadd.f32 %v2163_v54, %v1987_v38  ;;  %v3577_v54 = vshrl.u32 %v21848_v20, 16  ;;  %4101 = vmatpush.bf16.msra.mxu0 %v18236_v25  ;;  %v21926_v27 = vld [vmem:[#allocation2 + $0x2c] sm:$0xff]  ;;  %v3173_v37 = vshll.u32 %v20350_v48, 16 }
 0x1b7   : > { %v2899_v60 = vshll.u32 %v21926_v27, 16  ;;  %v3172_v1 = vrot.slane %v3170_v57, 3  ;;  %v3587_v48 = vor.u32 %v3585_v13, %v21904_v33 }
 0x1b8   : > { %19471 = vst [vmem:[#allocation2 + $0x98] sm:$0xff] %v18789_v45   ;;  %v2217_v18 = vadd.f32 %v21817_v53, %v2197_v55  ;;  %v3579_v10 = vor.u32 %v3577_v54, %v21863_v42  ;;  %v2289_v42 = vpop.permute.xlu1 %2288  ;;  %v3175_v4 = vrot.slane %v3173_v37, 4  ;;  %v21969_v37 = vld [vmem:[#allocation2 + $0x34] sm:$0xff] }
 0x1ba   : > { %v2233_v7 = vmax.f32 %v2217_v18, 0.0  ;;  %v3584_v22 = vsel %vm2858_vm2, %v3579_v10, %v21904_v33  ;;  %v2895_v18 = vshrl.u32 %v21891_v34, 16  ;;  %v18235_v34 = vld [vmem:[%s25019_s4 + $0x1d0] sm:$0xff]  ;;  %v2294_v33 = vpop.permute.xlu2 %2293 }
 0x1bb   : > { %v1988_v15 = vpop.f32.mrf.mxu3  ;;  %4102 = vmatpush.bf16.msra.mxu0 %v18235_v34 }
 0x1bc   : > { %v1989_v52 = vadd.f32 %v1988_v15, %v21642_v63  ;;  %v2753_v62 = vpop.f32.mrf.mxu2  ;;  %v2168_v63 = vpop.f32.mrf.mxu0  ;;  %v2345_v38 = vmul.f32 %v2284_v21, %v2233_v7 }
 0x1bd   : > { %v21915_v24 = vadd.f32 %v2753_v62, %v2556_v30  ;;  %v2559_v20 = vpop.f32.mrf.mxu1  ;;  %v21929_v30 = vld [vmem:[#allocation2 + $0x38] sm:$0xff]  ;;  %v21941_v62 = vor.u32 %v3175_v4, %v3172_v1  ;;  %v2907_v4 = vshll.u32 %v21969_v37, 16 }
 0x1be   : > { %v2198_v0 = vadd.f32 %v2165_v19, %v1989_v52  ;;  %v3589_v15 = vshll.u32 %v21929_v30, 16  ;;  %v21939_v52 = vrot.slane %v2899_v60, 1 }
 0x1bf   : > { %3284 = vmatmul.bf16.gmra.mxu0 %v3168_v12 }
 0x1c0   : > { %v2218_v31 = vadd.f32 %v21817_v53, %v2198_v0  ;;  %3006 = vmatmul.bf16.gmra.mxu3 %v2894_v36  ;;  %3430 = vmatmul.bf16.gmra.mxu1 %v21658_v35  ;;  %v18267_v0 = vld [vmem:[%s25019_s4 + $0x50] sm:$0xff]  ;;  %v2897_v36 = vor.u32 %v2895_v18, %v2893_v29 }
 0x1c1   : > { %3696 = vmatmul.bf16.gmra.mxu2 %v3584_v22  ;;  %v20352_v22 = vld [vmem:[#allocation2 + $0x3c] sm:$0xff]  }
 0x1c2   : > { %v2234_v39 = vmax.f32 %v2218_v31, 0.0  ;;  %4758 = vmatpush.bf16.msra.mxu2 %v18267_v0  ;;  %v2902_v7 = vsel %vm2858_vm2, %v2897_v36, %v21939_v52  ;;  %v3177_v31 = vsel %vm2595_vm1, %v21899_v43, %v21941_v62  ;;  %v3179_v43 = vshrl.u32 %v20352_v22, 16  ;;  %v18266_v36 = vld [vmem:[%s25019_s4 + $0x48] sm:$0xff] }
 0x1c3   : > { %v1991_v50 = vpop.f32.mrf.mxu3 }
 0x1c4   : > { %v2346_v46 = vmul.f32 %v2289_v42, %v2234_v39  ;;  %v1992_v19 = vadd.f32 %v1991_v50, %v21661_v56  ;;  %v2756_v45 = vpop.f32.mrf.mxu2  ;;  %v2170_v47 = vpop.f32.mrf.mxu0  ;;  %v18227_v56 = vld [vmem:[%s25019_s4 + $0x190] sm:$0xff] }
 0x1c5   : > { %v21931_v51 = vadd.f32 %v2756_v45, %v2559_v20  ;;  %v2561_v55 = vpop.f32.mrf.mxu1  ;;  %3956 = vmatpush.bf16.msra.mxu3 %v18227_v56  ;;  %v18251_v20 = vld [vmem:[%s25019_s4 + $0x210] sm:$0xff]  ;;  %v2299_v50 = vpop.permute.xlu0 %2298 }
 0x1c6   : > { %v18794_v35 = vpack.c.bf16 %v2346_v46, %v2345_v38  ;;  %v2199_v11 = vadd.f32 %v2168_v63, %v1992_v19  ;;  %v21946_v63 = vrot.slane %v3589_v15, 1  ;;  %4368 = vmatpush.bf16.msra.mxu1 %v18251_v20  ;;  %v3182_v38 = vshll.u32 %v20352_v22, 16  ;;  %4759 = vmatpush.bf16.msra.mxu2 %v18266_v36 }
 0x1c7   : > { %v3593_v20 = vshrl.u32 %v21929_v30, 16 }
 0x1c8   : > { %19472 = vst [vmem:[#allocation2 + $0xa0] sm:$0xff] %v18794_v35   ;;  %v2219_v54 = vadd.f32 %v21817_v53, %v2199_v11  ;;  %v3592_v29 = vsel %vm2858_vm2, %v3587_v48, %v21946_v63  ;;  %v21972_v35 = vld [vmem:[#allocation2 + $0x40] sm:$0xff]  ;;  %v3181_v11 = vrot.slane %v3179_v43, 3  ;;  %v3184_v15 = vrot.slane %v3182_v38, 4 }
 0x1c9   : > { %v22013_v43 = vld [vmem:[#allocation2 + $0x3c] sm:$0xff] }
 0x1ca   : > { %v2235_v42 = vmax.f32 %v2219_v54, 0.0  ;;  %v2903_v54 = vshrl.u32 %v21926_v27, 16  ;;  %v18234_v27 = vld [vmem:[%s25019_s4 + $0x1c8] sm:$0xff] }
 0x1cb   : > { %v1993_v9 = vpop.f32.mrf.mxu3  ;;  %4103 = vmatpush.bf16.msra.mxu0 %v18234_v27 }
 0x1cc   : > { %v1994_v5 = vadd.f32 %v1993_v9, %v21670_v59  ;;  %v2758_v25 = vpop.f32.mrf.mxu2  ;;  %v2173_v59 = vpop.f32.mrf.mxu0  ;;  %v2347_v46 = vmul.f32 %v2294_v33, %v2235_v42  ;;  %v3597_v9 = vshll.u32 %v21972_v35, 16  ;;  %v2905_v48 = vor.u32 %v2903_v54, %v21939_v52 }
 0x1cd   : > { %v21957_v10 = vadd.f32 %v2758_v25, %v2561_v55  ;;  %v2564_v40 = vpop.f32.mrf.mxu1  ;;  %v21984_v25 = vor.u32 %v3184_v15, %v3181_v11  ;;  %v2915_v11 = vshll.u32 %v22013_v43, 16 }
 0x1ce   : > { %v2200_v12 = vadd.f32 %v2170_v47, %v1994_v5  ;;  %v21982_v5 = vrot.slane %v2907_v4, 1 }
 0x1cf   : > { %3289 = vmatmul.bf16.gmra.mxu0 %v3177_v31  ;;  %v3595_v31 = vor.u32 %v3593_v20, %v21946_v63  ;;  %v3186_v42 = vsel %vm2595_vm1, %v21941_v62, %v21984_v25  ;;  %v2309_v63 = vpop.permute.xlu2 %2308  ;;  %v2797_v20 = vld [vmem:[#allocation2 + $0x44] sm:$0x1] }
 0x1d0   : > { %v2220_v39 = vadd.f32 %v21817_v53, %v2200_v12  ;;  %3011 = vmatmul.bf16.gmra.mxu3 %v2902_v7  ;;  %3435 = vmatmul.bf16.gmra.mxu1 %v21685_v32  ;;  %v18250_v12 = vld [vmem:[%s25019_s4 + $0x208] sm:$0xff]  ;;  %v2910_v22 = vsel %vm2858_vm2, %v2905_v48, %v21982_v5  ;;  %v3601_v48 = vshrl.u32 %v21972_v35, 16  ;;  %v3488_v35 = vld [vmem:[#allocation2 + $0x50] sm:$0x1] }
 0x1d1   : > { %3701 = vmatmul.bf16.gmra.mxu2 %v3592_v29  ;;  %4369 = vmatpush.bf16.msra.mxu1 %v18250_v12 }
 0x1d2   : > { %v2236_v21 = vmax.f32 %v2220_v39, 0.0  ;;  %v20353_v39 = vld [vmem:[#allocation2 + $0x44] sm:$0xff]  }
 0x1d3   : > { %v1996_v57 = vpop.f32.mrf.mxu3  ;;  %v3188_v62 = vshrl.u32 %v20353_v39, 16  ;;  %v3191_v38 = vshll.u32 %v20353_v39, 16 }
 0x1d4   : > { %v2348_v19 = vmul.f32 %v2299_v50, %v2236_v21  ;;  %v1997_v45 = vadd.f32 %v1996_v57, %v21688_v6  ;;  %v2761_v47 = vpop.f32.mrf.mxu2  ;;  %v2175_v60 = vpop.f32.mrf.mxu0  ;;  %v18226_v6 = vld [vmem:[%s25019_s4 + $0x188] sm:$0xff] }
 0x1d5   : > { %v21974_v55 = vadd.f32 %v2761_v47, %v2564_v40  ;;  %v2566_v1 = vpop.f32.mrf.mxu1  ;;  %3957 = vmatpush.bf16.msra.mxu3 %v18226_v6  ;;  %v2304_v50 = vpop.permute.xlu1 %2303  ;;  %v3190_v15 = vrot.slane %v3188_v62, 3 }
 0x1d6   : > { %v18799_v32 = vpack.c.bf16 %v2348_v19, %v2347_v46  ;;  %v2201_v56 = vadd.f32 %v2173_v59, %v1997_v45  ;;  %v21989_v59 = vrot.slane %v3597_v9, 1 }
 0x1d8   : > { %19473 = vst [vmem:[#allocation2 + $0xa8] sm:$0xff] %v18799_v32   ;;  %v2221_v13 = vadd.f32 %v21817_v53, %v2201_v56  ;;  %v3600_v52 = vsel %vm2858_vm2, %v3595_v31, %v21989_v59  ;;  %v3193_v56 = vrot.slane %v3191_v38, 4  ;;  %v18249_v31 = vld [vmem:[%s25019_s4 + $0x200] sm:$0xff]  ;;  %v3539_v38 = vunpack.c.l.b16 %v3488_v35  ;;  %v18288_v35 = vld [vmem:[%s25019_s4 + $0xb8] sm:$0xff] }
 0x1d9   : > { %4370 = vmatpush.bf16.msra.mxu1 %v18249_v31 }
 0x1da   : > { %v2237_v29 = vmax.f32 %v2221_v13, 0.0  ;;  %v2911_v13 = vshrl.u32 %v21969_v37, 16  ;;  %v18233_v37 = vld [vmem:[%s25019_s4 + $0x1c0] sm:$0xff] }
 0x1db   : > { %v1998_v18 = vpop.f32.mrf.mxu3  ;;  %4104 = vmatpush.bf16.msra.mxu0 %v18233_v37  ;;  %v22063_v37 = vld [vmem:[#allocation2 + $0x1c] sm:$0xf] }
 0x1dc   : > { %v1999_v0 = vadd.f32 %v1998_v18, %v21697_v2  ;;  %v2763_v34 = vpop.f32.mrf.mxu2  ;;  %v2178_v2 = vpop.f32.mrf.mxu0  ;;  %v2349_v46 = vmul.f32 %v2304_v50, %v2237_v29  ;;  %v22022_v18 = vld [vmem:[#allocation2 + $0x48] sm:$0xff]  }
 0x1dd   : > { %v22000_v40 = vadd.f32 %v2763_v34, %v2566_v1  ;;  %v2569_v7 = vpop.f32.mrf.mxu1  ;;  %v22028_v34 = vor.u32 %v3193_v56, %v3190_v15  ;;  %v18880_v36 = vunpack.c.h.b16 %v22022_v18 }
 0x1de   : > { %v2202_v30 = vadd.f32 %v2175_v60, %v1999_v0  ;;  %v22016_v60 = vld [vmem:[#allocation2 + $0x48] sm:$0xff]  ;;  %v2917_v0 = vrot.slane %v2915_v11, 1 }
 0x1df   : > { %3294 = vmatmul.bf16.gmra.mxu0 %v3186_v42  ;;  %v3605_v6 = vshll.u32 %v22016_v60, 16  ;;  %v2913_v42 = vor.u32 %v2911_v13, %v21982_v5  ;;  %v3124_v50 = vpack.c.b16 %v18880_v36, %v18880_v36  ;;  %v22054_v5 = vld [vmem:[#allocation2 + $0x40] sm:$0xff]  }
 0x1e0   : > { %v2222_v33 = vadd.f32 %v21817_v53, %v2202_v30  ;;  %3016 = vmatmul.bf16.gmra.mxu3 %v2910_v22  ;;  %3440 = vmatmul.bf16.gmra.mxu1 %v21715_v16 }
 0x1e1   : > { %3706 = vmatmul.bf16.gmra.mxu2 %v3600_v52  ;;  %v22034_v30 = vrot.slane %v3605_v6, 1  ;;  %v2918_v52 = vsel %vm2858_vm2, %v2913_v42, %v2917_v0  ;;  %v18304_v42 = vld [vmem:[%s25019_s4 + $0x138] sm:$0xff]  ;;  %5198 = vmatpush.bf16.msrb.mxu0 %v18288_v35 }
 0x1e2   : > { %v2238_v21 = vmax.f32 %v2222_v33, 0.0  ;;  %v3603_v33 = vor.u32 %v3601_v48, %v21989_v59  ;;  %v2919_v48 = vshrl.u32 %v22013_v43, 16  ;;  %v18296_v43 = vld [vmem:[%s25019_s4 + $0xf8] sm:$0xff] }
 0x1e3   : > { %v2001_v57 = vpop.f32.mrf.mxu3  ;;  %5475 = vmatpush.bf16.msrb.mxu1 %v18296_v43 }
 0x1e4   : > { %v2350_v19 = vmul.f32 %v2309_v63, %v2238_v21  ;;  %v2002_v45 = vadd.f32 %v2001_v57, %v21718_v17  ;;  %v2766_v47 = vpop.f32.mrf.mxu2  ;;  %v2180_v1 = vpop.f32.mrf.mxu0  ;;  %v18225_v17 = vld [vmem:[%s25019_s4 + $0x180] sm:$0xff]  ;;  %v3195_v63 = vsel %vm2595_vm1, %v21984_v25, %v22028_v34  ;;  %v2848_v21 = vunpack.c.l.b16 %v2797_v20 }
 0x1e5   : > { %v22018_v32 = vadd.f32 %v2766_v47, %v2569_v7  ;;  %v2571_v4 = vpop.f32.mrf.mxu1  ;;  %3958 = vmatpush.bf16.msra.mxu3 %v18225_v17  ;;  %v18265_v7 = vld [vmem:[%s25019_s4 + $0x40] sm:$0xff]  ;;  %v3608_v59 = vsel %vm2858_vm2, %v3603_v33, %v22034_v30  ;;  %v2314_v25 = vpop.permute.xlu0 %2313  ;;  %v2921_v31 = vor.u32 %v2919_v48, %v2917_v0 }
 0x1e6   : > { %v18804_v16 = vpack.c.bf16 %v2350_v19, %v2349_v46  ;;  %v2203_v9 = vadd.f32 %v2178_v2, %v2002_v45  ;;  %4760 = vmatpush.bf16.msra.mxu2 %v18265_v7  ;;  %v2319_v46 = vpop.permute.xlu1 %2318  ;;  %v2857_v47 = vpack.c.b16 %v2848_v21, %v2848_v21 }
 0x1e8   : > { %19474 = vst [vmem:[#allocation2 + $0xb0] sm:$0xff] %v18804_v16   ;;  %v2223_v27 = vadd.f32 %v21817_v53, %v2203_v9  ;;  %v3200_v16 = vshll.u32 %v3124_v50, 16  ;;  %v3548_v9 = vpack.c.b16 %v3539_v38, %v3539_v38  ;;  %v2923_v20 = vshll.u32 %v2857_v47, 16 }
 0x1ea   : > { %v2239_v57 = vmax.f32 %v2223_v27, 0.0  ;;  %v3202_v27 = vrot.slane %v3200_v16, 4  ;;  %v3613_v7 = vshll.u32 %v3548_v9, 16  ;;  %5620 = vmatpush.bf16.msrb.mxu2 %v18304_v42  ;;  %v18241_v16 = vld [vmem:[#allocation2 + $0x1c] sm:$0xff]  ;;  %v22098_v42 = vld [vmem:[#allocation2 + $0x24] sm:$0xff] }
 0x1eb   : > { %v2003_v54 = vpop.f32.mrf.mxu3 }
 0x1ec   : > { %v2004_v12 = vadd.f32 %v2003_v54, %v21727_v44  ;;  %v2768_v2 = vpop.f32.mrf.mxu2  ;;  %v2183_v44 = vpop.f32.mrf.mxu0 }
 0x1ed   : > { %v22045_v22 = vadd.f32 %v2768_v2, %v2571_v4  ;;  %v2574_v29 = vpop.f32.mrf.mxu1  ;;  %v2351_v4 = vmul.f32 %v2314_v25, %v2239_v57  ;;  %v3615_v57 = vrot.slane %v3613_v7, 1 }
 0x1ee   : > { %v2204_v39 = vadd.f32 %v2180_v1, %v2004_v12  ;;  %v3197_v1 = vshrl.u32 %v3124_v50, 16  ;;  %v3738_v12 = vld [vmem:[#allocation2 + $0x18] sm:$0x8]  ;;  %v3609_v50 = vshrl.u32 %v22016_v60, 16 }
 0x1ef   : > { %3299 = vmatmul.bf16.gmra.mxu0 %v3195_v63  ;;  %v3789_v33 = vunpack.c.l.b16 %v3738_v12 }
 0x1f0   : > { %v2224_v62 = vadd.f32 %v21817_v53, %v2204_v39  ;;  %3021 = vmatmul.bf16.gmra.mxu3 %v2918_v52  ;;  %3445 = vmatmul.bf16.gmra.mxu1 %v22054_v5  ;;  %v3199_v36 = vrot.slane %v3197_v1, 3  ;;  %v2925_v39 = vrot.slane %v2923_v20, 1  ;;  %v3790_v52 = vunpack.c.l.b16 %v22063_v37  ;;  %v18262_v37 = vld [vmem:[%s25019_s4 + $0x28] sm:$0xff] }
 0x1f1   : > { %3711 = vmatmul.bf16.gmra.mxu2 %v3608_v59 }
 0x1f2   : > { %v2240_v19 = vmax.f32 %v2224_v62, 0.0  ;;  %v2926_v25 = vsel %vm2858_vm2, %v2921_v31, %v2925_v39 }
 0x1f3   : > { %v2006_v45 = vpop.f32.mrf.mxu3 }
 0x1f4   : > { %v2352_v11 = vmul.f32 %v2319_v46, %v2240_v19  ;;  %v2007_v15 = vadd.f32 %v2006_v45, %v21746_v23  ;;  %v2771_v56 = vpop.f32.mrf.mxu2  ;;  %v2185_v17 = vpop.f32.mrf.mxu0  ;;  %v18264_v23 = vld [vmem:[%s25019_s4 + $0x38] sm:$0xff]  ;;  %v3611_v19 = vor.u32 %v3609_v50, %v22034_v30  ;;  %v18287_v50 = vld [vmem:[%s25019_s4 + $0xb0] sm:$0xff] }
 0x1f5   : > { %v22060_v6 = vadd.f32 %v2771_v56, %v2574_v29  ;;  %v2576_v13 = vpop.f32.mrf.mxu1  ;;  %4949 = vmatpush.bf16.msrb.mxu3 %v18264_v23  ;;  %v3203_v29 = vor.u32 %v3202_v27, %v3199_v36  ;;  %v2324_v30 = vpop.permute.xlu2 %2323  ;;  %v4242_v27 = vshll.u32 %v18241_v16, 16  ;;  %5199 = vmatpush.bf16.msrb.mxu0 %v18287_v50 }
 0x1f6   : > { %v18809_v54 = vpack.c.bf16 %v2352_v11, %v2351_v4  ;;  %v2205_v2 = vadd.f32 %v2183_v44, %v2007_v15  ;;  %v3616_v1 = vsel %vm2858_vm2, %v3611_v19, %v3615_v57  ;;  %v19493_v11 = vld [vmem:[#allocation2 + $0x20] sm:$0xff]   ;;  %v2329_v15 = vpop.permute.xlu0 %2328  ;;  %v18295_v57 = vld [vmem:[%s25019_s4 + $0xf0] sm:$0xff] }
 0x1f7   : > { %v3204_v45 = vsel %vm2595_vm1, %v22028_v34, %v3203_v29  ;;  %v18263_v34 = vld [vmem:[%s25019_s4 + $0x30] sm:$0xff]  ;;  %v3824_v48 = vshrl.u32 %v19493_v11, 16  ;;  %v3827_v7 = vshll.u32 %v19493_v11, 16  ;;  %v4244_v39 = vrot.slane %v4242_v27, 1  ;;  %5476 = vmatpush.bf16.msrb.mxu1 %v18295_v57  ;;  %v18286_v57 = vld [vmem:[%s25019_s4 + $0xa8] sm:$0xff] }
 0x1f8   : > { %19475 = vst [vmem:[#allocation2 + $0xb8] sm:$0xff] %v18809_v54   ;;  %v2225_v0 = vadd.f32 %v21817_v53, %v2205_v2 }
 0x1f9   : > { %4950 = vmatpush.bf16.msrb.mxu3 %v18263_v34  ;;  %v3826_v29 = vrot.slane %v3824_v48, 3  ;;  %5200 = vmatpush.bf16.msrb.mxu0 %v18286_v57 }
 0x1fa   : > { %v2241_v60 = vmax.f32 %v2225_v0, 0.0  ;;  %v4240_v0 = vshrl.u32 %v18241_v16, 16 }
 0x1fb   : > { %v2008_v44 = vpop.f32.mrf.mxu3 }
 0x1fc   : > { %v2009_v63 = vadd.f32 %v2008_v44, %v21753_v28  ;;  %v2773_v21 = vpop.f32.mrf.mxu2  ;;  %v2188_v59 = vpop.f32.mrf.mxu0  ;;  %v3806_v28 = vpack.c.b16 %v3790_v52, %v3789_v33  ;;  %v2353_v54 = vmul.f32 %v2324_v30, %v2241_v60  ;;  %v3829_v33 = vrot.slane %v3827_v7, 4 }
 0x1fd   : > { %v22081_v62 = vadd.f32 %v2773_v21, %v2576_v13  ;;  %v2579_v46 = vpop.f32.mrf.mxu1  ;;  %v18303_v21 = vld [vmem:[%s25019_s4 + $0x130] sm:$0xff]  ;;  %v4245_v60 = vor.u32 %v4244_v39, %v4240_v0  ;;  %4951 = vmatpush.bf16.msrb.mxu3 %v18262_v37 }
 0x1fe   : > { %v2206_v38 = vadd.f32 %v2185_v17, %v2009_v63  ;;  %v3816_v9 = vshrl.u32 %v3806_v28, 16  ;;  %v3819_v17 = vshll.u32 %v3806_v28, 16  ;;  %v4247_v63 = vshll.u32 %v22098_v42, 16  ;;  %5621 = vmatpush.bf16.msrb.mxu2 %v18303_v21  ;;  %v22153_v37 = vld [vmem:[#allocation2 + $0x34] sm:$0xff] }
 0x1ff   : > { %3304 = vmatmul.bf16.gmra.mxu0 %v3204_v45  ;;  %v18883_v28 = vunpack.c.l.b16 %v19493_v11  ;;  %v3830_v16 = vor.u32 %v3829_v33, %v3826_v29 }
 0x200   : > { %v2226_v47 = vadd.f32 %v21817_v53, %v2206_v38  ;;  %3026 = vmatmul.bf16.gmra.mxu3 %v2926_v25  ;;  %3450 = vmatmul.bf16.gmra.mxu1 %v22022_v18  ;;  %v3818_v35 = vrot.slane %v3816_v9, 3  ;;  %v3821_v43 = vrot.slane %v3819_v17, 4 }
 0x201   : > { %3716 = vmatmul.bf16.gmra.mxu2 %v3616_v1 }
 0x202   : > { %v2242_v4 = vmax.f32 %v2226_v47, 0.0  ;;  %v3822_v38 = vor.u32 %v3821_v43, %v3818_v35  ;;  %v22129_v35 = vld [vmem:[#allocation2 + $0x2c] sm:$0xff] }
 0x203   : > { %v2011_v56 = vpop.f32.mrf.mxu3  ;;  %v4255_v21 = vshll.u32 %v22129_v35, 16 }
 0x204   : > { %v2354_v13 = vmul.f32 %v2329_v15, %v2242_v4  ;;  %v2012_v20 = vadd.f32 %v2011_v56, %v21775_v14  ;;  %v2776_v36 = vpop.f32.mrf.mxu2  ;;  %v2190_v2 = vpop.f32.mrf.mxu0  ;;  %v22100_v14 = vld [vmem:[#allocation2 + $0x44] sm:$0xf]  ;;  %v4033_v15 = vpack.c.b16 %v18883_v28, %v3790_v52  ;;  %v4249_v56 = vrot.slane %v4247_v63, 1 }
 0x205   : > { %v22096_v12 = vadd.f32 %v2776_v36, %v2579_v46  ;;  %v2581_v31 = vpop.f32.mrf.mxu1  ;;  %v18911_v46 = vunpack.c.l.b16 %v22022_v18  ;;  %v4673_v30 = vunpack.c.l.b16 %v22100_v14  ;;  %v2334_v52 = vpop.permute.xlu1 %2333  ;;  %v4257_v28 = vrot.slane %v4255_v21, 1  ;;  %v22339_v14 = vld [vmem:[#allocation2 + $0x4c] sm:$0xff] }
 0x206   : > { %v18814_v23 = vpack.c.bf16 %v2354_v13, %v2353_v54  ;;  %v2207_v44 = vadd.f32 %v2188_v59, %v2012_v20  ;;  %v4250_v54 = vsel %vm2858_vm2, %v4245_v60, %v4249_v56  ;;  %v19494_v13 = vld [vmem:[#allocation2 + $0x28] sm:$0xff]   ;;  %v2339_v20 = vpop.permute.xlu2 %2338 }
 0x207   : > { %v4689_v11 = vpack.c.b16 %v18911_v46, %v4673_v30  ;;  %v3836_v48 = vshll.u32 %v19494_v13, 16 }
 0x208   : > { %19476 = vst [vmem:[#allocation2 + $0xc0] sm:$0xff] %v18814_v23   ;;  %v2227_v19 = vadd.f32 %v21817_v53, %v2207_v44 }
 0x209   : > { %v3838_v0 = vrot.slane %v3836_v48, 4 }
 0x20a   : > { %v2243_v9 = vmax.f32 %v2227_v19, 0.0 }
 0x20b   : > { %v2013_v59 = vpop.f32.mrf.mxu3 }
 0x20c   : > { %v2014_v25 = vadd.f32 %v2013_v59, %v21789_v26  ;;  %v2778_v45 = vpop.f32.mrf.mxu2  ;;  %v3270_v1 = vpop.f32.mrf.mxu0  ;;  %v3831_v26 = vsel %vm2595_vm1, %v3822_v38, %v3830_v16  ;;  %v2355_v7 = vmul.f32 %v2334_v52, %v2243_v9  ;;  %v18294_v59 = vld [vmem:[%s25019_s4 + $0xe8] sm:$0xff] }
 0x20d   : > { %v22115_v47 = vadd.f32 %v2778_v45, %v2581_v31  ;;  %v3416_v34 = vpop.f32.mrf.mxu1  ;;  %v4251_v45 = vshrl.u32 %v22098_v42, 16  ;;  %5477 = vmatpush.bf16.msrb.mxu1 %v18294_v59 }
 0x20e   : > { %v2208_v4 = vadd.f32 %v2190_v2, %v2014_v25  ;;  %v3833_v2 = vshrl.u32 %v19494_v13, 16 }
 0x20f   : > { %4105 = vmatmul.bf16.vlgmr.msra.gmra.mxu0 %v4033_v15  ;;  %v4253_v15 = vor.u32 %v4251_v45, %v4249_v56  ;;  %v20358_v45 = vld [vmem:[#allocation2 + $0x54] sm:$0xff]  }
 0x210   : > { %v2228_v17 = vadd.f32 %v21817_v53, %v2208_v4  ;;  %3959 = vmatmul.bf16.vlgmr.msra.gmra.mxu3 %v3831_v26  ;;  %4371 = vmatmul.bf16.vlgmr.msra.gmra.mxu1 %v4250_v54  ;;  %v3835_v33 = vrot.slane %v3833_v2, 3  ;;  %v18261_v54 = vld [vmem:[%s25019_s4 + $0x20] sm:$0xff] }
 0x211   : > { %4761 = vmatmul.bf16.vlgmr.msra.gmra.mxu2 %v4689_v11  ;;  %v20356_v11 = vld [vmem:[#allocation2 + $0x4c] sm:$0xff]   ;;  %4952 = vmatpush.bf16.msrb.mxu3 %v18261_v54 }
 0x212   : > { %v2244_v36 = vmax.f32 %v2228_v17, 0.0  ;;  %v3839_v46 = vor.u32 %v3838_v0, %v3835_v33  ;;  %v19495_v17 = vld [vmem:[#allocation2 + $0x30] sm:$0xff]  }
 0x213   : > { %v2992_v27 = vpop.f32.mrf.mxu3  ;;  %v3845_v56 = vshll.u32 %v19495_v17, 16 }
 0x214   : > { %v2356_v23 = vmul.f32 %v2339_v20, %v2244_v36  ;;  %v3032_v53 = vadd.f32 %v2992_v27, %v21809_v61  ;;  %v3682_v31 = vpop.f32.mrf.mxu2  ;;  %v3272_v43 = vpop.f32.mrf.mxu0  ;;  %v18302_v61 = vld [vmem:[%s25019_s4 + $0x128] sm:$0xff]  ;;  %v3840_v26 = vsel %vm2595_vm1, %v3830_v16, %v3839_v46  ;;  %v3842_v20 = vshrl.u32 %v19495_v17, 16 }
 0x215   : > { %v3418_v29 = vpop.f32.mrf.mxu1  ;;  %5622 = vmatpush.bf16.msrb.mxu2 %v18302_v61 }
 0x216   : > { %v18819_v44 = vpack.c.bf16 %v2356_v23, %v2355_v7  ;;  %v3310_v39 = vadd.f32 %v3270_v1, %v3032_v53  ;;  %v3844_v48 = vrot.slane %v3842_v20, 3  ;;  %v3847_v7 = vrot.slane %v3845_v56, 4 }
 0x217   : > { %v4263_v53 = vshll.u32 %v22153_v37, 16 }
 0x218   : > { %19477 = vst [vmem:[#allocation2 + $0xc8] sm:$0xff] %v18819_v44   ;;  %v3456_v63 = vadd.f32 %v3416_v34, %v3310_v39  ;;  %v19894_v34 = vld [vmem:[#allocation2 + $0x24] sm:$0xff]  }
 0x219   : > { %v18293_v44 = vld [vmem:[%s25019_s4 + $0xe0] sm:$0xff]  ;;  %v4265_v21 = vrot.slane %v4263_v53, 1 }
 0x21a   : > { %v22132_v50 = vadd.f32 %v3682_v31, %v3456_v63  ;;  %v4259_v63 = vshrl.u32 %v22129_v35, 16  ;;  %5478 = vmatpush.bf16.msrb.mxu1 %v18293_v44 }
 0x21b   : > { %v2994_v38 = vpop.f32.mrf.mxu3 }
 0x21c   : > { %v3033_v19 = vadd.f32 %v2994_v38, %v21838_v41  ;;  %v3684_v25 = vpop.f32.mrf.mxu2  ;;  %v3275_v60 = vpop.f32.mrf.mxu0  ;;  %v4258_v41 = vsel %vm2858_vm2, %v4253_v15, %v4257_v28  ;;  %v19896_v38 = vld [vmem:[#allocation2 + $0x2c] sm:$0xff]  }
 0x21d   : > { %v3421_v4 = vpop.f32.mrf.mxu1 }
 0x21e   : > { %v3311_v1 = vadd.f32 %v3272_v43, %v3033_v19  ;;  %v18301_v43 = vld [vmem:[%s25019_s4 + $0x120] sm:$0xff]  ;;  %v4261_v19 = vor.u32 %v4259_v63, %v4257_v28 }
 0x21f   : > { %4110 = vmatmul.bf16.gmra.mxu0 %v19894_v34  ;;  %5623 = vmatpush.bf16.msrb.mxu2 %v18301_v43  ;;  %v20360_v63 = vld [vmem:[#allocation2 + $0x5c] sm:$0xff]  }
 0x220   : > { %v3457_v9 = vadd.f32 %v3418_v29, %v3311_v1  ;;  %3964 = vmatmul.bf16.gmra.mxu3 %v3840_v26  ;;  %4376 = vmatmul.bf16.gmra.mxu1 %v4258_v41  ;;  %v3848_v29 = vor.u32 %v3847_v7, %v3844_v48  ;;  %v19496_v1 = vld [vmem:[#allocation2 + $0x38] sm:$0xff]  }
 0x221   : > { %4766 = vmatmul.bf16.gmra.mxu2 %v20356_v11  ;;  %v3851_v15 = vshrl.u32 %v19496_v1, 16  ;;  %v3854_v28 = vshll.u32 %v19496_v1, 16  ;;  %v22177_v11 = vld [vmem:[#allocation2 + $0x3c] sm:$0xff] }
 0x222   : > { %v22147_v42 = vadd.f32 %v3684_v25, %v3457_v9  ;;  %v3849_v25 = vsel %vm2595_vm1, %v3839_v46, %v3848_v29  ;;  %v4271_v56 = vshll.u32 %v22177_v11, 16 }
 0x223   : > { %v2997_v13 = vpop.f32.mrf.mxu3  ;;  %v3853_v54 = vrot.slane %v3851_v15, 3 }
 0x224   : > { %v3034_v16 = vadd.f32 %v2997_v13, %v21850_v49  ;;  %v3687_v36 = vpop.f32.mrf.mxu2  ;;  %v3277_v52 = vpop.f32.mrf.mxu0  ;;  %v18285_v49 = vld [vmem:[%s25019_s4 + $0xa0] sm:$0xff]  ;;  %v3856_v13 = vrot.slane %v3854_v28, 4  ;;  %v4273_v53 = vrot.slane %v4271_v56, 1 }
 0x225   : > { %v3423_v2 = vpop.f32.mrf.mxu1  ;;  %5201 = vmatpush.bf16.msrb.mxu0 %v18285_v49 }
 0x226   : > { %v3312_v27 = vadd.f32 %v3275_v60, %v3034_v16 }
 0x228   : > { %v3458_v23 = vadd.f32 %v3421_v4, %v3312_v27  ;;  %v18260_v4 = vld [vmem:[%s25019_s4 + $0x18] sm:$0xff] }
 0x229   : > { %4953 = vmatpush.bf16.msrb.mxu3 %v18260_v4 }
 0x22a   : > { %v22156_v31 = vadd.f32 %v3687_v36, %v3458_v23  ;;  %v18300_v36 = vld [vmem:[%s25019_s4 + $0x118] sm:$0xff]  ;;  %v4267_v23 = vshrl.u32 %v22153_v37, 16 }
 0x22b   : > { %v2999_v39 = vpop.f32.mrf.mxu3  ;;  %5624 = vmatpush.bf16.msrb.mxu2 %v18300_v36 }
 0x22c   : > { %v3035_v33 = vadd.f32 %v2999_v39, %v21874_v58  ;;  %v3689_v0 = vpop.f32.mrf.mxu2  ;;  %v3280_v61 = vpop.f32.mrf.mxu0  ;;  %v4266_v58 = vsel %vm2858_vm2, %v4261_v19, %v4265_v21  ;;  %v19898_v39 = vld [vmem:[#allocation2 + $0x34] sm:$0xff]  }
 0x22d   : > { %v3426_v59 = vpop.f32.mrf.mxu1 }
 0x22e   : > { %v3313_v57 = vadd.f32 %v3277_v52, %v3035_v33  ;;  %v18292_v52 = vld [vmem:[%s25019_s4 + $0xd8] sm:$0xff]  ;;  %v4269_v33 = vor.u32 %v4267_v23, %v4265_v21  ;;  %v3863_v21 = vshll.u32 %v22054_v5, 16  ;;  %v18258_v23 = vld [vmem:[%s25019_s4 + $0x8] sm:$0xff] }
 0x22f   : > { %4115 = vmatmul.bf16.gmra.mxu0 %v19896_v38  ;;  %5479 = vmatpush.bf16.msrb.mxu1 %v18292_v52  ;;  %v3860_v38 = vshrl.u32 %v22054_v5, 16  ;;  %v18299_v5 = vld [vmem:[%s25019_s4 + $0x110] sm:$0xff] }
 0x230   : > { %v3459_v60 = vadd.f32 %v3423_v2, %v3313_v57  ;;  %3969 = vmatmul.bf16.gmra.mxu3 %v3849_v25  ;;  %4381 = vmatmul.bf16.gmra.mxu1 %v4266_v58  ;;  %v3857_v2 = vor.u32 %v3856_v13, %v3853_v54  ;;  %v18259_v57 = vld [vmem:[%s25019_s4 + $0x10] sm:$0xff]  ;;  %v22203_v25 = vld [vmem:[#allocation2 + $0x44] sm:$0xff]  ;;  %v3865_v4 = vrot.slane %v3863_v21, 4  ;;  %v4275_v54 = vshrl.u32 %v22177_v11, 16 }
 0x231   : > { %4771 = vmatmul.bf16.gmra.mxu2 %v20358_v45  ;;  %4954 = vmatpush.bf16.msrb.mxu3 %v18259_v57  ;;  %v3862_v1 = vrot.slane %v3860_v38, 3  ;;  %v4279_v15 = vshll.u32 %v22203_v25, 16  ;;  %v18290_v21 = vld [vmem:[%s25019_s4 + $0xc8] sm:$0xff] }
 0x232   : > { %v22171_v35 = vadd.f32 %v3689_v0, %v3459_v60  ;;  %v3858_v0 = vsel %vm2595_vm1, %v3848_v29, %v3857_v2  ;;  %5625 = vmatpush.bf16.msrb.mxu2 %v18299_v5  ;;  %v4277_v52 = vor.u32 %v4275_v54, %v4273_v53  ;;  %v19902_v5 = vld [vmem:[#allocation2 + $0x44] sm:$0xff]  }
 0x233   : > { %v3002_v34 = vpop.f32.mrf.mxu3  ;;  %v4281_v13 = vrot.slane %v4279_v15, 1  ;;  %v18257_v54 = vld [vmem:[%s25019_s4] sm:$0xff] }
 0x234   : > { %v3036_v46 = vadd.f32 %v3002_v34, %v21889_v8  ;;  %v3692_v26 = vpop.f32.mrf.mxu2  ;;  %v3282_v9 = vpop.f32.mrf.mxu0  ;;  %v18284_v8 = vld [vmem:[%s25019_s4 + $0x98] sm:$0xff] }
 0x235   : > { %v3428_v17 = vpop.f32.mrf.mxu1  ;;  %5202 = vmatpush.bf16.msrb.mxu0 %v18284_v8  ;;  %v19900_v8 = vld [vmem:[#allocation2 + $0x3c] sm:$0xff]   ;;  %4955 = vmatpush.bf16.msrb.mxu3 %v18258_v23 }
 0x236   : > { %v3314_v41 = vadd.f32 %v3280_v61, %v3036_v46  ;;  %v18291_v46 = vld [vmem:[%s25019_s4 + $0xd0] sm:$0xff] }
 0x237   : > { %5480 = vmatpush.bf16.msrb.mxu1 %v18291_v46 }
 0x238   : > { %v3460_v20 = vadd.f32 %v3426_v59, %v3314_v41 }
 0x239   : > { %4956 = vmatpush.bf16.msrb.mxu3 %v18257_v54 }
 0x23a   : > { %v22180_v16 = vadd.f32 %v3692_v26, %v3460_v20 }
 0x23b   : > { %v3004_v27 = vpop.f32.mrf.mxu3  ;;  %5481 = vmatpush.bf16.msrb.mxu1 %v18290_v21 }
 0x23c   : > { %v3037_v48 = vadd.f32 %v3004_v27, %v21915_v24  ;;  %v3694_v7 = vpop.f32.mrf.mxu2  ;;  %v3285_v43 = vpop.f32.mrf.mxu0  ;;  %v4274_v24 = vsel %vm2858_vm2, %v4269_v33, %v4273_v53  ;;  %v3872_v53 = vshll.u32 %v22022_v18, 16 }
 0x23d   : > { %v3431_v44 = vpop.f32.mrf.mxu1 }
 0x23e   : > { %v3315_v49 = vadd.f32 %v3282_v9, %v3037_v48  ;;  %v3866_v9 = vor.u32 %v3865_v4, %v3862_v1  ;;  %v20362_v48 = vld [vmem:[#allocation2 + $0x64] sm:$0xff]  }
 0x23f   : > { %4120 = vmatmul.bf16.gmra.mxu0 %v19898_v39  ;;  %v22229_v39 = vld [vmem:[#allocation2 + $0x4c] sm:$0xff] }
 0x240   : > { %v3461_v61 = vadd.f32 %v3428_v17, %v3315_v49  ;;  %3974 = vmatmul.bf16.gmra.mxu3 %v3858_v0  ;;  %4386 = vmatmul.bf16.gmra.mxu1 %v4274_v24  ;;  %v3867_v27 = vsel %vm2595_vm1, %v3857_v2, %v3866_v9  ;;  %v3869_v49 = vshrl.u32 %v22022_v18, 16  ;;  %v3874_v24 = vrot.slane %v3872_v53, 4  ;;  %v18298_v18 = vld [vmem:[%s25019_s4 + $0x108] sm:$0xff] }
 0x241   : > { %4776 = vmatmul.bf16.gmra.mxu2 %v20360_v63 }
 0x242   : > { %v22195_v37 = vadd.f32 %v3694_v7, %v3461_v61  ;;  %v3871_v61 = vrot.slane %v3869_v49, 3  ;;  %5626 = vmatpush.bf16.msrb.mxu2 %v18298_v18  ;;  %v3754_v49 = vld [vmem:[#allocation2 + $0x58] sm:$0xf] }
 0x243   : > { %v3007_v59 = vpop.f32.mrf.mxu3 }
 0x244   : > { %v3038_v29 = vadd.f32 %v3007_v59, %v21931_v51  ;;  %v3697_v19 = vpop.f32.mrf.mxu2  ;;  %v3287_v45 = vpop.f32.mrf.mxu0  ;;  %v18283_v51 = vld [vmem:[%s25019_s4 + $0x90] sm:$0xff]  ;;  %v4287_v59 = vshll.u32 %v22229_v39, 16 }
 0x245   : > { %v3433_v58 = vpop.f32.mrf.mxu1  ;;  %5203 = vmatpush.bf16.msrb.mxu0 %v18283_v51 }
 0x246   : > { %v3316_v60 = vadd.f32 %v3285_v43, %v3038_v29  ;;  %v4289_v1 = vrot.slane %v4287_v59, 1 }
 0x248   : > { %v3462_v34 = vadd.f32 %v3431_v44, %v3316_v60 }
 0x24a   : > { %v22206_v28 = vadd.f32 %v3697_v19, %v3462_v34  ;;  %v22243_v19 = vor.u32 %v3874_v24, %v3871_v61 }
 0x24b   : > { %v3009_v26 = vpop.f32.mrf.mxu3 }
 0x24c   : > { %v3039_v41 = vadd.f32 %v3009_v26, %v21957_v10  ;;  %v3699_v17 = vpop.f32.mrf.mxu2  ;;  %v3290_v20 = vpop.f32.mrf.mxu0  ;;  %v4282_v10 = vsel %vm2858_vm2, %v4277_v52, %v4281_v13  ;;  %v3876_v46 = vsel %vm2595_vm1, %v3866_v9, %v22243_v19  ;;  %v20364_v26 = vld [vmem:[#allocation2 + $0x6c] sm:$0xff]  }
 0x24d   : > { %v3436_v36 = vpop.f32.mrf.mxu1 }
 0x24e   : > { %v3317_v56 = vadd.f32 %v3287_v45, %v3039_v41 }
 0x24f   : > { %4125 = vmatmul.bf16.gmra.mxu0 %v19900_v8  ;;  %v22260_v8 = vld [vmem:[#allocation2 + $0x54] sm:$0xff] }
 0x250   : > { %v3463_v7 = vadd.f32 %v3433_v58, %v3317_v56  ;;  %3979 = vmatmul.bf16.gmra.mxu3 %v3867_v27  ;;  %4391 = vmatmul.bf16.gmra.mxu1 %v4282_v10  ;;  %v4283_v58 = vshrl.u32 %v22203_v25, 16 }
 0x251   : > { %4781 = vmatmul.bf16.gmra.mxu2 %v20362_v48 }
 0x252   : > { %v22221_v11 = vadd.f32 %v3699_v17, %v3463_v7  ;;  %v4285_v51 = vor.u32 %v4283_v58, %v4281_v13  ;;  %v22250_v17 = vld [vmem:[#allocation2 + $0x50] sm:$0xff]  }
 0x253   : > { %v3012_v43 = vpop.f32.mrf.mxu3  ;;  %v3881_v9 = vshll.u32 %v22250_v17, 16 }
 0x254   : > { %v3040_v2 = vadd.f32 %v3012_v43, %v21974_v55  ;;  %v3702_v44 = vpop.f32.mrf.mxu2  ;;  %v3292_v33 = vpop.f32.mrf.mxu0  ;;  %v18282_v55 = vld [vmem:[%s25019_s4 + $0x88] sm:$0xff]  ;;  %v4295_v43 = vshll.u32 %v22260_v8, 16 }
 0x255   : > { %v3438_v63 = vpop.f32.mrf.mxu1  ;;  %5204 = vmatpush.bf16.msrb.mxu0 %v18282_v55  ;;  %v3883_v10 = vrot.slane %v3881_v9, 4  ;;  %v4178_v55 = vld [vmem:[#allocation2 + $0x5c] sm:$0x1] }
 0x256   : > { %v3318_v0 = vadd.f32 %v3290_v20, %v3040_v2  ;;  %v3878_v20 = vshrl.u32 %v22250_v17, 16  ;;  %v18297_v2 = vld [vmem:[%s25019_s4 + $0x100] sm:$0xff]  ;;  %v4297_v59 = vrot.slane %v4295_v43, 1 }
 0x257   : > { %5627 = vmatpush.bf16.msrb.mxu2 %v18297_v2 }
 0x258   : > { %v3464_v57 = vadd.f32 %v3436_v36, %v3318_v0  ;;  %v3880_v7 = vrot.slane %v3878_v20, 3 }
 0x25a   : > { %v22232_v38 = vadd.f32 %v3702_v44, %v3464_v57  ;;  %v18289_v44 = vld [vmem:[%s25019_s4 + $0xc0] sm:$0xff]  ;;  %v22274_v0 = vor.u32 %v3883_v10, %v3880_v7  ;;  %v4291_v57 = vshrl.u32 %v22229_v39, 16  ;;  %v4299_v7 = vshrl.u32 %v22260_v8, 16  ;;  %v22312_v10 = vld [vmem:[#allocation2 + $0x78] sm:$0xff]  }
 0x25b   : > { %v3014_v29 = vpop.f32.mrf.mxu3  ;;  %5482 = vmatpush.bf16.msrb.mxu1 %v18289_v44  ;;  %v18936_v8 = vunpack.c.h.b16 %v22312_v10 }
 0x25c   : > { %v3041_v45 = vadd.f32 %v3014_v29, %v22000_v40  ;;  %v3704_v60 = vpop.f32.mrf.mxu2  ;;  %v3295_v4 = vpop.f32.mrf.mxu0  ;;  %v4290_v40 = vsel %vm2858_vm2, %v4285_v51, %v4289_v1  ;;  %v22283_v58 = vsel %vm2595_vm1, %v22243_v19, %v22274_v0 }
 0x25d   : > { %v3441_v15 = vpop.f32.mrf.mxu1 }
 0x25e   : > { %v3319_v34 = vadd.f32 %v3292_v33, %v3041_v45  ;;  %v19903_v45 = vld [vmem:[#allocation2 + $0x4c] sm:$0xff]  }
 0x25f   : > { %4130 = vmatmul.bf16.gmra.mxu0 %v19902_v5 }
 0x260   : > { %v3465_v41 = vadd.f32 %v3438_v63, %v3319_v34  ;;  %3984 = vmatmul.bf16.gmra.mxu3 %v3876_v46  ;;  %4396 = vmatmul.bf16.gmra.mxu1 %v4290_v40  ;;  %v22276_v63 = vunpack.c.l.b16 %v3754_v49 }
 0x261   : > { %4786 = vmatmul.bf16.gmra.mxu2 %v20364_v26 }
 0x262   : > { %v22252_v25 = vadd.f32 %v3704_v60, %v3465_v41  ;;  %v4293_v60 = vor.u32 %v4291_v57, %v4289_v1  ;;  %v18320_v1 = vld [vmem:[%s25019_s4 + $0x178] sm:$0xff] }
 0x263   : > { %v3017_v13 = vpop.f32.mrf.mxu3  ;;  %5885 = vmatpush.bf16.msra.mxu3 %v18320_v1  ;;  %v18352_v1 = vld [vmem:[%s25019_s4 + $0x238] sm:$0xff] }
 0x264   : > { %v3042_v56 = vadd.f32 %v3017_v13, %v22018_v32  ;;  %v3707_v36 = vpop.f32.mrf.mxu2  ;;  %v3297_v52 = vpop.f32.mrf.mxu0  ;;  %v18281_v32 = vld [vmem:[%s25019_s4 + $0x80] sm:$0xff]  ;;  %v4298_v34 = vsel %vm2858_vm2, %v4293_v60, %v4297_v59  ;;  %v20367_v60 = vld [vmem:[#allocation2 + $0x4c] sm:$0xf0]   ;;  %6572 = vmatpush.bf16.msra.mxu2 %v18352_v1 }
 0x265   : > { %v3443_v48 = vpop.f32.mrf.mxu1  ;;  %5205 = vmatpush.bf16.msrb.mxu0 %v18281_v32 }
 0x266   : > { %v3320_v27 = vadd.f32 %v3295_v4, %v3042_v56  ;;  %v20365_v4 = vld [vmem:[#allocation2 + $0x74] sm:$0xff]  }
 0x268   : > { %v3466_v23 = vadd.f32 %v3441_v15, %v3320_v27  ;;  %v4229_v15 = vunpack.c.l.b16 %v4178_v55  ;;  %v4624_v27 = vld [vmem:[#allocation2 + $0x80] sm:$0xf] }
 0x269   : > { %v22316_v2 = vunpack.c.l.b16 %v4624_v27 }
 0x26a   : > { %v22263_v53 = vadd.f32 %v3707_v36, %v3466_v23  ;;  %v4238_v54 = vpack.c.b16 %v4229_v15, %v4229_v15  ;;  %v4608_v23 = vld [vmem:[#allocation2 + $0x40] sm:$0x8] }
 0x26b   : > { %v3019_v33 = vpop.f32.mrf.mxu3 }
 0x26c   : > { %v3043_v61 = vadd.f32 %v3019_v33, %v22045_v22  ;;  %v3709_v24 = vpop.f32.mrf.mxu2  ;;  %v3300_v18 = vpop.f32.mrf.mxu0  ;;  %v3814_v22 = vpack.c.b16 %v22276_v63, %v22276_v63  ;;  %v18908_v33 = vunpack.c.h.b16 %v22250_v17 }
 0x26d   : > { %v3446_v29 = vpop.f32.mrf.mxu1 }
 0x26e   : > { %v3321_v21 = vadd.f32 %v3297_v52, %v3043_v61  ;;  %v3887_v46 = vshrl.u32 %v3814_v22, 16  ;;  %v3890_v26 = vshll.u32 %v3814_v22, 16  ;;  %v4303_v52 = vshll.u32 %v4238_v54, 16 }
 0x26f   : > { %4135 = vmatmul.bf16.gmra.mxu0 %v19903_v45  ;;  %v4301_v61 = vor.u32 %v4299_v7, %v4297_v59  ;;  %v4696_v45 = vpack.c.b16 %v22316_v2, %v18936_v8  ;;  %v5082_v7 = vshll.u32 %v22339_v14, 16  ;;  %v18319_v8 = vld [vmem:[%s25019_s4 + $0x170] sm:$0xff] }
 0x270   : > { %v3467_v39 = vadd.f32 %v3443_v48, %v3321_v21  ;;  %3989 = vmatmul.bf16.gmra.mxu3 %v22283_v58  ;;  %4401 = vmatmul.bf16.gmra.mxu1 %v4298_v34  ;;  %v3889_v56 = vrot.slane %v3887_v46, 3  ;;  %v3892_v36 = vrot.slane %v3890_v26, 4  ;;  %v19936_v34 = vld [vmem:[#allocation2 + $0x4c] sm:$0x8]  ;;  %v18336_v46 = vld [vmem:[%s25019_s4 + $0x1f8] sm:$0xff] }
 0x271   : > { %4791 = vmatmul.bf16.gmra.mxu2 %v20365_v4  ;;  %v20369_v4 = vld [vmem:[#allocation2 + $0x54] sm:$0xff]   ;;  %v19937_v15 = vor.u32 %v20367_v60, %v19936_v34  ;;  %6307 = vmatpush.bf16.msra.mxu1 %v18336_v46 }
 0x272   : > { %v22289_v5 = vadd.f32 %v3709_v24, %v3467_v39  ;;  %v3893_v49 = vor.u32 %v3892_v36, %v3889_v56  ;;  %v4305_v24 = vrot.slane %v4303_v52, 1  ;;  %v18273_v39 = vld [vmem:[#allocation2 + $0x44] sm:$0xff]  ;;  %v5351_v54 = vshll.u32 %v20369_v4, 16  ;;  %5886 = vmatpush.bf16.msra.mxu3 %v18319_v8  ;;  %v18351_v46 = vld [vmem:[%s25019_s4 + $0x230] sm:$0xff]  ;;  %v4483_v8 = vpop.permute.xlu0 %4482 }
 0x273   : > { %v3022_v51 = vpop.f32.mrf.mxu3  ;;  %v5077_v56 = vshll.u32 %v18273_v39, 16  ;;  %v5340_v52 = vshrl.u32 %v19937_v15, 16  ;;  %v5343_v27 = vshll.u32 %v19937_v15, 16  ;;  %6573 = vmatpush.bf16.msra.mxu2 %v18351_v46 }
 0x274   : > { %v3044_v41 = vadd.f32 %v3022_v51, %v22060_v6  ;;  %v3712_v40 = vpop.f32.mrf.mxu2  ;;  %v3302_v13 = vpop.f32.mrf.mxu0  ;;  %v3894_v3 = vsel %vm2595_vm1, %v22274_v0, %v3893_v49  ;;  %v4306_v59 = vsel %vm2858_vm2, %v4301_v61, %v4305_v24  ;;  %v18328_v51 = vld [vmem:[%s25019_s4 + $0x1b8] sm:$0xff]  ;;  %v5353_v49 = vrot.slane %v5351_v54, 4 }
 0x275   : > { %v3448_v9 = vpop.f32.mrf.mxu1  ;;  %6162 = vmatpush.bf16.msra.mxu0 %v18328_v51  ;;  %v5342_v61 = vrot.slane %v5340_v52, 3  ;;  %v5345_v24 = vrot.slane %v5343_v27, 4 }
 0x276   : > { %v3322_v20 = vadd.f32 %v3300_v18, %v3044_v41  ;;  %v4803_v18 = vunpack.c.l.b16 %v4608_v23 }
 0x278   : > { %v3468_v6 = vadd.f32 %v3446_v29, %v3322_v20  ;;  %v4040_v29 = vpack.c.b16 %v22276_v63, %v18908_v33  ;;  %v4804_v22 = vpack.c.b16 %v4673_v30, %v4803_v18  ;;  %v5075_v18 = vshrl.u32 %v18273_v39, 16 }
 0x27a   : > { %v22309_v48 = vadd.f32 %v3712_v40, %v3468_v6  ;;  %v5348_v40 = vshrl.u32 %v20369_v4, 16  ;;  %v4814_v20 = vshrl.u32 %v4804_v22, 16 }
 0x27b   : > { %v3024_v43 = vpop.f32.mrf.mxu3 }
 0x27c   : > { %v3045_v32 = vadd.f32 %v3024_v43, %v22081_v62  ;;  %v3714_v44 = vpop.f32.mrf.mxu2  ;;  %v3305_v57 = vpop.f32.mrf.mxu0  ;;  %v5350_v43 = vrot.slane %v5348_v40, 3 }
 0x27d   : > { %v3451_v21 = vpop.f32.mrf.mxu1 }
 0x27e   : > { %v3323_v55 = vadd.f32 %v3302_v13, %v3045_v32 }
 0x27f   : > { %4140 = vmatmul.bf16.gmra.mxu0 %v4040_v29 }
 0x280   : > { %v3469_v62 = vadd.f32 %v3448_v9, %v3323_v55  ;;  %3994 = vmatmul.bf16.gmra.mxu3 %v3894_v3  ;;  %4406 = vmatmul.bf16.gmra.mxu1 %v4306_v59  ;;  %v4817_v9 = vshll.u32 %v4804_v22, 16  ;;  %v5084_v55 = vrot.slane %v5082_v7, 1  ;;  %v5346_v22 = vor.u32 %v5345_v24, %v5342_v61 }
 0x281   : > { %4796 = vmatmul.bf16.gmra.mxu2 %v4696_v45 }
 0x282   : > { %v22328_v63 = vadd.f32 %v3714_v44, %v3469_v62  ;;  %v4819_v32 = vrot.slane %v4817_v9, 4  ;;  %v5079_v44 = vrot.slane %v5077_v56, 1  ;;  %v22373_v56 = vld [vmem:[%s25020_s5] ss:$0 sm:$0xff] }
 0x283   : > { %v3027_v26 = vpop.f32.mrf.mxu3 }
 0x284   : > { %v3046_v30 = vadd.f32 %v3027_v26, %v22096_v12  ;;  %v3717_v41 = vpop.f32.mrf.mxu2  ;;  %v3307_v13 = vpop.f32.mrf.mxu0  ;;  %v4816_v12 = vrot.slane %v4814_v20, 3  ;;  %v5080_v62 = vor.u32 %v5079_v44, %v5075_v18  ;;  %v18335_v26 = vld [vmem:[%s25019_s4 + $0x1f0] sm:$0xff] }
 0x285   : > { %v3453_v6 = vpop.f32.mrf.mxu1  ;;  %6308 = vmatpush.bf16.msra.mxu1 %v18335_v26 }
 0x286   : > { %v3324_v36 = vadd.f32 %v3305_v57, %v3046_v30  ;;  %v4820_v60 = vor.u32 %v4819_v32, %v4816_v12  ;;  %v5085_v15 = vsel %vm2858_vm2, %v5080_v62, %v5084_v55 }
 0x288   : > { %v3470_v23 = vadd.f32 %v3451_v21, %v3324_v36  ;;  %v5354_v21 = vor.u32 %v5353_v49, %v5350_v43  ;;  %v4829_v34 = vsel %vm2595_vm1, %v4820_v60, %v22243_v19  ;;  %v18327_v19 = vld [vmem:[%s25019_s4 + $0x1b0] sm:$0xff]  ;;  %v5086_v49 = vshrl.u32 %v22339_v14, 16 }
 0x289   : > { %6163 = vmatpush.bf16.msra.mxu0 %v18327_v19 }
 0x28a   : > { %v22343_v33 = vadd.f32 %v3717_v41, %v3470_v23  ;;  %v5355_v39 = vsel %vm2595_vm1, %v5346_v22, %v5354_v21  ;;  %v22365_v41 = vld [vmem:[#allocation2 + $0x54] sm:$0xff]  ;;  %v18318_v23 = vld [vmem:[%s25019_s4 + $0x168] sm:$0xff]  ;;  %v5088_v18 = vor.u32 %v5086_v49, %v5084_v55 }
 0x28b   : > { %v3029_v57 = vpop.f32.mrf.mxu3  ;;  %5887 = vmatpush.bf16.msra.mxu3 %v18318_v23  ;;  %v18350_v22 = vld [vmem:[%s25019_s4 + $0x228] sm:$0xff] }
 0x28c   : > { %v3047_v29 = vadd.f32 %v3029_v57, %v22115_v47  ;;  %v3719_v3 = vpop.f32.mrf.mxu2  ;;  %v4106_v45 = vpop.f32.mrf.mxu0  ;;  %v20371_v47 = vld [vmem:[#allocation2 + $0x5c] sm:$0xff]   ;;  %6574 = vmatpush.bf16.msra.mxu2 %v18350_v22 }
 0x28d   : > { %v4372_v4 = vpop.f32.mrf.mxu1  ;;  %v5357_v54 = vshrl.u32 %v20371_v47, 16 }
 0x28e   : > { %v3325_v59 = vadd.f32 %v3307_v13, %v3047_v29  ;;  %v5360_v13 = vshll.u32 %v20371_v47, 16 }
 0x28f   : > { %5206 = vmatmul.bf16.vlgmr.msrb.gmra.mxu0 %v5085_v15  ;;  %v5359_v27 = vrot.slane %v5357_v54, 3 }
 0x290   : > { %v3471_v1 = vadd.f32 %v3453_v6, %v3325_v59  ;;  %4957 = vmatmul.bf16.vlgmr.msrb.gmra.mxu3 %v4829_v34  ;;  %5483 = vmatmul.bf16.vlgmr.msrb.gmra.mxu1 %v5355_v39  ;;  %v5090_v6 = vshll.u32 %v22365_v41, 16  ;;  %v19538_v59 = vld [vmem:[#allocation2 + $0x58] sm:$0xff]  }
 0x291   : > { %5628 = vmatmul.bf16.vlgmr.msrb.gmra.mxu2 %v22250_v17  ;;  %v4840_v15 = vshrl.u32 %v19538_v59, 16  ;;  %v22404_v39 = vld [vmem:[#allocation2 + $0x5c] sm:$0xff] }
 0x292   : > { %v22354_v51 = vadd.f32 %v3719_v3, %v3471_v1  ;;  %v22381_v12 = vrot.slane %v5090_v6, 1  ;;  %v4843_v1 = vshll.u32 %v19538_v59, 16 }
 0x293   : > { %v3960_v30 = vpop.f32.mrf.mxu3 }
 0x294   : > { %v4000_v40 = vadd.f32 %v3960_v30, %v22132_v50  ;;  %v22368_v17 = vpop.f32.mrf.mxu2  ;;  %v4108_v20 = vpop.f32.mrf.mxu0  ;;  %v5362_v50 = vrot.slane %v5360_v13, 4  ;;  %v5093_v60 = vsel %vm2858_vm2, %v5088_v18, %v22381_v12  ;;  %v4845_v6 = vrot.slane %v4843_v1, 4 }
 0x295   : > { %v4374_v36 = vpop.f32.mrf.mxu1 }
 0x296   : > { %v4146_v9 = vadd.f32 %v4106_v45, %v4000_v40  ;;  %v22386_v24 = vor.u32 %v5362_v50, %v5359_v27  ;;  %v4488_v40 = vpop.permute.xlu1 %4487 }
 0x298   : > { %v4412_v52 = vadd.f32 %v4372_v4, %v4146_v9  ;;  %v20373_v4 = vld [vmem:[#allocation2 + $0x64] sm:$0xff]  }
 0x299   : > { %v5366_v26 = vshrl.u32 %v20373_v4, 16  ;;  %v5369_v30 = vshll.u32 %v20373_v4, 16 }
 0x29a   : > { %v4432_v7 = vadd.f32 %v22373_v56, %v4412_v52  ;;  %v5098_v52 = vshll.u32 %v22404_v39, 16 }
 0x29b   : > { %v3962_v43 = vpop.f32.mrf.mxu3 }
 0x29c   : > { %v4448_v32 = vmax.f32 %v4432_v7, 0.0  ;;  %v4001_v44 = vadd.f32 %v3962_v43, %v22147_v42  ;;  %v22384_v61 = vpop.f32.mrf.mxu2  ;;  %v4111_v57 = vpop.f32.mrf.mxu0  ;;  %v5364_v42 = vsel %vm2595_vm1, %v5354_v21, %v22386_v24  ;;  %v18334_v21 = vld [vmem:[%s25019_s4 + $0x1e8] sm:$0xff]  ;;  %v5368_v7 = vrot.slane %v5366_v26, 3  ;;  %v18317_v43 = vld [vmem:[%s25019_s4 + $0x160] sm:$0xff] }
 0x29d   : > { %v4377_v45 = vpop.f32.mrf.mxu1  ;;  %6309 = vmatpush.bf16.msra.mxu1 %v18334_v21  ;;  %5888 = vmatpush.bf16.msra.mxu3 %v18317_v43  ;;  %v18349_v21 = vld [vmem:[%s25019_s4 + $0x220] sm:$0xff] }
 0x29e   : > { %v4560_v29 = vmul.f32 %v4483_v8, %v4448_v32  ;;  %v4147_v3 = vadd.f32 %v4108_v20, %v4001_v44  ;;  %v5094_v44 = vshrl.u32 %v22365_v41, 16  ;;  %v22418_v8 = vrot.slane %v5098_v52, 1  ;;  %6575 = vmatpush.bf16.msra.mxu2 %v18349_v21 }
 0x29f   : > { %5211 = vmatmul.bf16.gmra.mxu0 %v5093_v60 }
 0x2a0   : > { %v4576_v14 = vpack.c.bf16 %v4560_v29, %v4560_v29  ;;  %v4413_v62 = vadd.f32 %v4374_v36, %v4147_v3  ;;  %4962 = vmatmul.bf16.gmra.mxu3 %v22283_v58  ;;  %5488 = vmatmul.bf16.gmra.mxu1 %v5364_v42  ;;  %v18326_v58 = vld [vmem:[%s25019_s4 + $0x1a8] sm:$0xff]  ;;  %v4842_v36 = vrot.slane %v4840_v15, 3 }
 0x2a1   : > { %5633 = vmatmul.bf16.gmra.mxu2 %v19538_v59  ;;  %6164 = vmatpush.bf16.msra.mxu0 %v18326_v58  ;;  %v22434_v58 = vld [vmem:[#allocation2 + $0x60] sm:$0xff]  }
 0x2a2   : > { %4592 = vst.msk [vmem:[#allocation3 + $0x10] sm:$0xf] %vm313_vm3, %v4576_v14  ;;  %v4433_v55 = vadd.f32 %v22373_v56, %v4413_v62  ;;  %v22415_v32 = vor.u32 %v4845_v6, %v4842_v36  ;;  %v5096_v14 = vor.u32 %v5094_v44, %v22381_v12  ;;  %v20375_v12 = vld [vmem:[#allocation2 + $0x6c] sm:$0xff]   ;;  %v4849_v1 = vshrl.u32 %v22434_v58, 16  ;;  %v18316_v44 = vld [vmem:[%s25019_s4 + $0x158] sm:$0xff] }
 0x2a3   : > { %v3965_v34 = vpop.f32.mrf.mxu3  ;;  %5889 = vmatpush.bf16.msra.mxu3 %v18316_v44 }
 0x2a4   : > { %v4449_v47 = vmax.f32 %v4433_v55, 0.0  ;;  %v4002_v46 = vadd.f32 %v3965_v34, %v22156_v31  ;;  %v22407_v19 = vpop.f32.mrf.mxu2  ;;  %v4113_v54 = vpop.f32.mrf.mxu0  ;;  %v5371_v31 = vrot.slane %v5369_v30, 4  ;;  %v4847_v41 = vsel %vm2595_vm1, %v22274_v0, %v22415_v32  ;;  %v18325_v34 = vld [vmem:[%s25019_s4 + $0x1a0] sm:$0xff] }
 0x2a5   : > { %v4379_v9 = vpop.f32.mrf.mxu1  ;;  %v5101_v4 = vsel %vm2858_vm2, %v5096_v14, %v22418_v8  ;;  %6165 = vmatpush.bf16.msra.mxu0 %v18325_v34 }
 0x2a6   : > { %v4561_v13 = vmul.f32 %v4488_v40, %v4449_v47  ;;  %v4148_v20 = vadd.f32 %v4111_v57, %v4002_v46  ;;  %v22423_v3 = vor.u32 %v5371_v31, %v5368_v7  ;;  %v4852_v47 = vshll.u32 %v22434_v58, 16  ;;  %v22450_v46 = vld [vmem:[#allocation2 + $0x64] sm:$0xff] }
 0x2a7   : > { %v5106_v7 = vshll.u32 %v22450_v46, 16 }
 0x2a8   : > { %v4577_v27 = vpack.c.bf16 %v4561_v13, %v4561_v13  ;;  %v4414_v50 = vadd.f32 %v4377_v45, %v4148_v20  ;;  %v4493_v45 = vpop.permute.xlu2 %4492  ;;  %v5373_v22 = vsel %vm2595_vm1, %v22386_v24, %v22423_v3  ;;  %v18333_v24 = vld [vmem:[%s25019_s4 + $0x1e0] sm:$0xff]  ;;  %v5378_v13 = vshll.u32 %v20375_v12, 16  ;;  %v4498_v20 = vpop.permute.xlu0 %4497 }
 0x2a9   : > { %6310 = vmatpush.bf16.msra.mxu1 %v18333_v24  ;;  %v19540_v24 = vld [vmem:[#allocation2 + $0x68] sm:$0xff]  }
 0x2aa   : > { %4593 = vst.msk [vmem:[#allocation3 + $0x14] sm:$0xf] %vm313_vm3, %v4577_v27  ;;  %v4434_v23 = vadd.f32 %v22373_v56, %v4414_v50  ;;  %v4851_v27 = vrot.slane %v4849_v1, 3  ;;  %v4854_v50 = vrot.slane %v4852_v47, 4  ;;  %v18324_v1 = vld [vmem:[%s25019_s4 + $0x198] sm:$0xff] }
 0x2ab   : > { %v3967_v49 = vpop.f32.mrf.mxu3  ;;  %6166 = vmatpush.bf16.msra.mxu0 %v18324_v1  ;;  %v19541_v1 = vld [vmem:[#allocation2 + $0x70] sm:$0xff]  }
 0x2ac   : > { %v4450_v57 = vmax.f32 %v4434_v23, 0.0  ;;  %v4003_v18 = vadd.f32 %v3967_v49, %v22171_v35  ;;  %v22421_v29 = vpop.f32.mrf.mxu2  ;;  %v4116_v60 = vpop.f32.mrf.mxu0 }
 0x2ad   : > { %v4382_v59 = vpop.f32.mrf.mxu1 }
 0x2ae   : > { %v4562_v62 = vmul.f32 %v4493_v45, %v4450_v57  ;;  %v4149_v42 = vadd.f32 %v4113_v54, %v4003_v18  ;;  %v5375_v54 = vshrl.u32 %v20375_v12, 16  ;;  %v22461_v18 = vor.u32 %v4854_v50, %v4851_v27 }
 0x2af   : > { %5216 = vmatmul.bf16.gmra.mxu0 %v5101_v4  ;;  %v5102_v45 = vshrl.u32 %v22404_v39, 16 }
 0x2b0   : > { %v4578_v35 = vpack.c.bf16 %v4562_v62, %v4562_v62  ;;  %v4415_v55 = vadd.f32 %v4379_v9, %v4149_v42  ;;  %4967 = vmatmul.bf16.gmra.mxu3 %v4847_v41  ;;  %5493 = vmatmul.bf16.gmra.mxu1 %v5373_v22  ;;  %v5377_v43 = vrot.slane %v5375_v54, 3  ;;  %v4503_v41 = vpop.permute.xlu1 %4502  ;;  %v4856_v39 = vsel %vm2595_vm1, %v22415_v32, %v22461_v18  ;;  %v18348_v32 = vld [vmem:[%s25019_s4 + $0x218] sm:$0xff]  ;;  %v22491_v54 = vld [vmem:[#allocation2 + $0x6c] sm:$0xff] }
 0x2b1   : > { %5638 = vmatmul.bf16.gmra.mxu2 %v22434_v58 }
 0x2b2   : > { %4594 = vst.msk [vmem:[#allocation3 + $0x18] sm:$0xf] %vm313_vm3, %v4578_v35  ;;  %v4435_v0 = vadd.f32 %v22373_v56, %v4415_v55  ;;  %v5104_v35 = vor.u32 %v5102_v45, %v22418_v8  ;;  %v20377_v8 = vld [vmem:[#allocation2 + $0x74] sm:$0xff]   ;;  %6576 = vmatpush.bf16.msra.mxu2 %v18348_v32 }
 0x2b3   : > { %v3970_v15 = vpop.f32.mrf.mxu3 }
 0x2b4   : > { %v4451_v26 = vmax.f32 %v4435_v0, 0.0  ;;  %v4004_v30 = vadd.f32 %v3970_v15, %v22180_v16  ;;  %v22453_v40 = vpop.f32.mrf.mxu2  ;;  %v4118_v9 = vpop.f32.mrf.mxu0  ;;  %v5380_v16 = vrot.slane %v5378_v13, 4 }
 0x2b5   : > { %v4384_v52 = vpop.f32.mrf.mxu1 }
 0x2b6   : > { %v4563_v36 = vmul.f32 %v4498_v20, %v4451_v26  ;;  %v4150_v6 = vadd.f32 %v4116_v60, %v4004_v30  ;;  %v22464_v60 = vrot.slane %v5106_v7, 1  ;;  %v4858_v26 = vshrl.u32 %v19540_v24, 16 }
 0x2b7   : > { %v4861_v30 = vshll.u32 %v19540_v24, 16 }
 0x2b8   : > { %v4579_v31 = vpack.c.bf16 %v4563_v36, %v4563_v36  ;;  %v4416_v23 = vadd.f32 %v4382_v59, %v4150_v6  ;;  %v22469_v59 = vor.u32 %v5380_v16, %v5377_v43  ;;  %v5109_v0 = vsel %vm2858_vm2, %v5104_v35, %v22464_v60 }
 0x2b9   : > { %v5384_v36 = vshrl.u32 %v20377_v8, 16  ;;  %v5387_v6 = vshll.u32 %v20377_v8, 16  ;;  %v4863_v43 = vrot.slane %v4861_v30, 4  ;;  %v5114_v16 = vshll.u32 %v22491_v54, 16  ;;  %v18323_v30 = vld [vmem:[%s25019_s4 + $0x190] sm:$0xff] }
 0x2ba   : > { %4595 = vst.msk [vmem:[#allocation3 + $0x1c] sm:$0xf] %vm313_vm3, %v4579_v31  ;;  %v4436_v49 = vadd.f32 %v22373_v56, %v4416_v23  ;;  %v5382_v34 = vsel %vm2595_vm1, %v22423_v3, %v22469_v59  ;;  %v18332_v3 = vld [vmem:[%s25019_s4 + $0x1d8] sm:$0xff]  ;;  %v4860_v23 = vrot.slane %v4858_v26, 3  ;;  %v18347_v26 = vld [vmem:[%s25019_s4 + $0x210] sm:$0xff]  ;;  %6167 = vmatpush.bf16.msra.mxu0 %v18323_v30 }
 0x2bb   : > { %v3972_v57 = vpop.f32.mrf.mxu3  ;;  %6311 = vmatpush.bf16.msra.mxu1 %v18332_v3  ;;  %v22505_v35 = vrot.slane %v5114_v16, 1  ;;  %v20379_v3 = vld [vmem:[#allocation2 + $0x7c] sm:$0xff]   ;;  %6577 = vmatpush.bf16.msra.mxu2 %v18347_v26 }
 0x2bc   : > { %v4452_v14 = vmax.f32 %v4436_v49, 0.0  ;;  %v4005_v62 = vadd.f32 %v3972_v57, %v22195_v37  ;;  %v22467_v42 = vpop.f32.mrf.mxu2  ;;  %v4121_v4 = vpop.f32.mrf.mxu0  ;;  %v5386_v57 = vrot.slane %v5384_v36, 3  ;;  %v4870_v36 = vshll.u32 %v19541_v1, 16 }
 0x2bd   : > { %v4387_v12 = vpop.f32.mrf.mxu1 }
 0x2be   : > { %v4564_v55 = vmul.f32 %v4503_v41, %v4452_v14  ;;  %v4151_v22 = vadd.f32 %v4118_v9, %v4005_v62  ;;  %v18315_v14 = vld [vmem:[%s25019_s4 + $0x150] sm:$0xff]  ;;  %v22502_v41 = vor.u32 %v4863_v43, %v4860_v23  ;;  %v4518_v23 = vpop.permute.xlu1 %4517 }
 0x2bf   : > { %5221 = vmatmul.bf16.gmra.mxu0 %v5109_v0  ;;  %5890 = vmatpush.bf16.msra.mxu3 %v18315_v14  ;;  %v4513_v0 = vpop.permute.xlu0 %4512 }
 0x2c0   : > { %v4580_v37 = vpack.c.bf16 %v4564_v55, %v4564_v55  ;;  %v4417_v21 = vadd.f32 %v4384_v52, %v4151_v22  ;;  %4972 = vmatmul.bf16.gmra.mxu3 %v4856_v39  ;;  %5498 = vmatmul.bf16.gmra.mxu1 %v5382_v34  ;;  %v4508_v52 = vpop.permute.xlu2 %4507 }
 0x2c1   : > { %5643 = vmatmul.bf16.gmra.mxu2 %v19540_v24 }
 0x2c2   : > { %4596 = vst.msk [vmem:[#allocation3 + $0x20] sm:$0xf] %vm313_vm3, %v4580_v37  ;;  %v4437_v15 = vadd.f32 %v22373_v56, %v4417_v21 }
 0x2c3   : > { %v3975_v47 = vpop.f32.mrf.mxu3 }
 0x2c4   : > { %v4453_v13 = vmax.f32 %v4437_v15, 0.0  ;;  %v4006_v20 = vadd.f32 %v3975_v47, %v22206_v28  ;;  %v22494_v9 = vpop.f32.mrf.mxu2  ;;  %v4123_v27 = vpop.f32.mrf.mxu0  ;;  %v5389_v28 = vrot.slane %v5387_v6, 4  ;;  %v22535_v6 = vld [vmem:[#allocation2 + $0x74] sm:$0xff] }
 0x2c5   : > { %v4389_v31 = vpop.f32.mrf.mxu1 }
 0x2c6   : > { %v4565_v50 = vmul.f32 %v4508_v52, %v4453_v13  ;;  %v4152_v7 = vadd.f32 %v4121_v4, %v4006_v20  ;;  %v5110_v4 = vshrl.u32 %v22450_v46, 16  ;;  %v22510_v39 = vor.u32 %v5389_v28, %v5386_v57 }
 0x2c7   : > { %v22516_v46 = vsel %vm2595_vm1, %v22461_v18, %v22502_v41  ;;  %v4867_v20 = vshrl.u32 %v19541_v1, 16  ;;  %v4872_v28 = vrot.slane %v4870_v36, 4  ;;  %v4879_v36 = vshll.u32 %v22312_v10, 16 }
 0x2c8   : > { %v4581_v49 = vpack.c.bf16 %v4565_v50, %v4565_v50  ;;  %v4418_v44 = vadd.f32 %v4387_v12, %v4152_v7  ;;  %v5112_v21 = vor.u32 %v5110_v4, %v22464_v60  ;;  %v5391_v60 = vsel %vm2595_vm1, %v22469_v59, %v22510_v39  ;;  %v18331_v59 = vld [vmem:[%s25019_s4 + $0x1d0] sm:$0xff] }
 0x2c9   : > { %v5393_v7 = vshrl.u32 %v20379_v3, 16  ;;  %6312 = vmatpush.bf16.msra.mxu1 %v18331_v59  ;;  %v4869_v57 = vrot.slane %v4867_v20, 3  ;;  %v4876_v20 = vshrl.u32 %v22312_v10, 16 }
 0x2ca   : > { %4597 = vst.msk [vmem:[#allocation3 + $0x24] sm:$0xf] %vm313_vm3, %v4581_v49  ;;  %v4438_v45 = vadd.f32 %v22373_v56, %v4418_v44 }
 0x2cb   : > { %v3977_v62 = vpop.f32.mrf.mxu3  ;;  %v5395_v4 = vrot.slane %v5393_v7, 3 }
 0x2cc   : > { %v4454_v55 = vmax.f32 %v4438_v45, 0.0  ;;  %v4007_v22 = vadd.f32 %v3977_v62, %v22221_v11  ;;  %v22508_v12 = vpop.f32.mrf.mxu2  ;;  %v4126_v37 = vpop.f32.mrf.mxu0  ;;  %v5117_v11 = vsel %vm2858_vm2, %v5112_v21, %v22505_v35  ;;  %v5122_v45 = vshll.u32 %v22535_v6, 16 }
 0x2cd   : > { %v4392_v8 = vpop.f32.mrf.mxu1  ;;  %v22546_v21 = vor.u32 %v4872_v28, %v4869_v57 }
 0x2ce   : > { %v4566_v34 = vmul.f32 %v4513_v0, %v4454_v55  ;;  %v4153_v24 = vadd.f32 %v4123_v27, %v4007_v22  ;;  %v18314_v22 = vld [vmem:[%s25019_s4 + $0x148] sm:$0xff] }
 0x2cf   : > { %5226 = vmatmul.bf16.gmra.mxu0 %v5117_v11  ;;  %5891 = vmatpush.bf16.msra.mxu3 %v18314_v22 }
 0x2d0   : > { %v4582_v15 = vpack.c.bf16 %v4566_v34, %v4566_v34  ;;  %v4419_v32 = vadd.f32 %v4389_v31, %v4153_v24  ;;  %4977 = vmatmul.bf16.gmra.mxu3 %v22516_v46  ;;  %5503 = vmatmul.bf16.gmra.mxu1 %v5391_v60  ;;  %v5396_v31 = vshll.u32 %v20379_v3, 16  ;;  %v22549_v34 = vrot.slane %v5122_v45, 1 }
 0x2d1   : > { %5648 = vmatmul.bf16.gmra.mxu2 %v19541_v1 }
 0x2d2   : > { %4598 = vst.msk [vmem:[#allocation3 + $0x28] sm:$0xf] %vm313_vm3, %v4582_v15  ;;  %v4439_v47 = vadd.f32 %v22373_v56, %v4419_v32  ;;  %v4523_v32 = vpop.permute.xlu2 %4522 }
 0x2d3   : > { %v3980_v13 = vpop.f32.mrf.mxu3 }
 0x2d4   : > { %v4455_v52 = vmax.f32 %v4439_v47, 0.0  ;;  %v4008_v27 = vadd.f32 %v3980_v13, %v22232_v38  ;;  %v22538_v50 = vpop.f32.mrf.mxu2  ;;  %v4128_v43 = vpop.f32.mrf.mxu0  ;;  %v5398_v38 = vrot.slane %v5396_v31, 4  ;;  %v20380_v13 = vld [vmem:[#allocation2 + $0x84] sm:$0xff]   ;;  %v22582_v31 = vld [vmem:[#allocation2 + $0x7c] sm:$0xff] }
 0x2d5   : > { %v4394_v44 = vpop.f32.mrf.mxu1 }
 0x2d6   : > { %v4567_v16 = vmul.f32 %v4518_v23, %v4455_v52  ;;  %v4154_v49 = vadd.f32 %v4126_v37, %v4008_v27  ;;  %v5118_v37 = vshrl.u32 %v22491_v54, 16  ;;  %v22554_v15 = vor.u32 %v5398_v38, %v5395_v4  ;;  %v18346_v52 = vld [vmem:[%s25019_s4 + $0x208] sm:$0xff] }
 0x2d7   : > { %v22560_v54 = vsel %vm2595_vm1, %v22502_v41, %v22546_v21  ;;  %v18330_v27 = vld [vmem:[%s25019_s4 + $0x1c8] sm:$0xff]  ;;  %6578 = vmatpush.bf16.msra.mxu2 %v18346_v52  ;;  %v4881_v4 = vrot.slane %v4879_v36, 4  ;;  %v5130_v38 = vshll.u32 %v22582_v31, 16 }
 0x2d8   : > { %v4583_v14 = vpack.c.bf16 %v4567_v16, %v4567_v16  ;;  %v4420_v62 = vadd.f32 %v4392_v8, %v4154_v49  ;;  %v5120_v1 = vor.u32 %v5118_v37, %v22505_v35  ;;  %v5400_v35 = vsel %vm2595_vm1, %v22510_v39, %v22554_v15  ;;  %v18322_v39 = vld [vmem:[%s25019_s4 + $0x188] sm:$0xff]  ;;  %6313 = vmatpush.bf16.msra.mxu1 %v18330_v27 }
 0x2d9   : > { %v5405_v49 = vshll.u32 %v20380_v13, 16  ;;  %6168 = vmatpush.bf16.msra.mxu0 %v18322_v39  ;;  %v22588_v37 = vld [vmem:[#allocation2 + $0x88] sm:$0xff]  }
 0x2da   : > { %4599 = vst.msk [vmem:[#allocation3 + $0x2c] sm:$0xf] %vm313_vm3, %v4583_v14  ;;  %v4440_v55 = vadd.f32 %v22373_v56, %v4420_v62  ;;  %v4878_v62 = vrot.slane %v4876_v20, 3 }
 0x2db   : > { %v3982_v0 = vpop.f32.mrf.mxu3 }
 0x2dc   : > { %v4456_v24 = vmax.f32 %v4440_v55, 0.0  ;;  %v4009_v8 = vadd.f32 %v3982_v0, %v22252_v25  ;;  %v22552_v11 = vpop.f32.mrf.mxu2  ;;  %v4131_v60 = vpop.f32.mrf.mxu0  ;;  %v5125_v25 = vsel %vm2858_vm2, %v5120_v1, %v22549_v34  ;;  %v5126_v1 = vshrl.u32 %v22535_v6, 16 }
 0x2dd   : > { %v4397_v26 = vpop.f32.mrf.mxu1 }
 0x2de   : > { %v4568_v3 = vmul.f32 %v4523_v32, %v4456_v24  ;;  %v4155_v47 = vadd.f32 %v4128_v43, %v4009_v8  ;;  %v22592_v8 = vor.u32 %v4881_v4, %v4878_v62  ;;  %v18313_v32 = vld [vmem:[%s25019_s4 + $0x140] sm:$0xff] }
 0x2df   : > { %5231 = vmatmul.bf16.gmra.mxu0 %v5125_v25  ;;  %5892 = vmatpush.bf16.msra.mxu3 %v18313_v32 }
 0x2e0   : > { %v4584_v30 = vpack.c.bf16 %v4568_v3, %v4568_v3  ;;  %v4421_v59 = vadd.f32 %v4394_v44, %v4155_v47  ;;  %4982 = vmatmul.bf16.gmra.mxu3 %v22560_v54  ;;  %5508 = vmatmul.bf16.gmra.mxu1 %v5400_v35  ;;  %v4528_v44 = vpop.permute.xlu0 %4527  ;;  %v22598_v3 = vrot.slane %v5130_v38, 1  ;;  %v18968_v47 = vunpack.c.h.b16 %v22588_v37  ;;  %v5014_v35 = vld [vmem:[#allocation2 + $0x84] sm:$0x1] }
 0x2e1   : > { %5653 = vmatmul.bf16.gmra.mxu2 %v22312_v10  ;;  %v5402_v10 = vshrl.u32 %v20380_v13, 16  ;;  %v4533_v13 = vpop.permute.xlu1 %4532  ;;  %v4883_v39 = vsel %vm2595_vm1, %v22546_v21, %v22592_v8 }
 0x2e2   : > { %4600 = vst.msk [vmem:[#allocation3 + $0x30] sm:$0xf] %vm313_vm3, %v4584_v30  ;;  %v4441_v41 = vadd.f32 %v22373_v56, %v4421_v59 }
 0x2e3   : > { %v3985_v7 = vpop.f32.mrf.mxu3  ;;  %v5404_v0 = vrot.slane %v5402_v10, 3 }
 0x2e4   : > { %v4457_v23 = vmax.f32 %v4441_v41, 0.0  ;;  %v4010_v43 = vadd.f32 %v3985_v7, %v22263_v53  ;;  %v22585_v16 = vpop.f32.mrf.mxu2  ;;  %v4133_v57 = vpop.f32.mrf.mxu0  ;;  %v5407_v53 = vrot.slane %v5405_v49, 4  ;;  %v5128_v41 = vor.u32 %v5126_v1, %v22549_v34  ;;  %v22617_v49 = vld [vmem:[#allocation2 + $0x80] sm:$0xff]  }
 0x2e5   : > { %v4399_v14 = vpop.f32.mrf.mxu1  ;;  %v5064_v7 = vunpack.c.l.b16 %v5014_v35 }
 0x2e6   : > { %v4569_v28 = vmul.f32 %v4528_v44, %v4457_v23  ;;  %v4156_v45 = vadd.f32 %v4131_v60, %v4010_v43  ;;  %v22604_v59 = vor.u32 %v5407_v53, %v5404_v0  ;;  %v5133_v27 = vsel %vm2858_vm2, %v5128_v41, %v22598_v3  ;;  %v18345_v44 = vld [vmem:[%s25019_s4 + $0x200] sm:$0xff]  ;;  %v4538_v53 = vpop.permute.xlu2 %4537 }
 0x2e7   : > { %v5338_v23 = vpack.c.b16 %v18968_v47, %v18968_v47  ;;  %v5073_v62 = vpack.c.b16 %v5064_v7, %v5064_v7  ;;  %6579 = vmatpush.bf16.msra.mxu2 %v18345_v44 }
 0x2e8   : > { %v4585_v55 = vpack.c.bf16 %v4569_v28, %v4569_v28  ;;  %v4422_v22 = vadd.f32 %v4397_v26, %v4156_v45  ;;  %v5409_v34 = vsel %vm2595_vm1, %v22554_v15, %v22604_v59  ;;  %v18329_v15 = vld [vmem:[%s25019_s4 + $0x1c0] sm:$0xff] }
 0x2e9   : > { %v5414_v0 = vshll.u32 %v5338_v23, 16  ;;  %6314 = vmatpush.bf16.msra.mxu1 %v18329_v15  ;;  %v4543_v15 = vpop.permute.xlu0 %4542 }
 0x2ea   : > { %4601 = vst.msk [vmem:[#allocation3 + $0x34] sm:$0xf] %vm313_vm3, %v4585_v55  ;;  %v4442_v24 = vadd.f32 %v22373_v56, %v4422_v22  ;;  %v5411_v22 = vshrl.u32 %v5338_v23, 16 }
 0x2eb   : > { %v3987_v60 = vpop.f32.mrf.mxu3 }
 0x2ec   : > { %v4458_v26 = vmax.f32 %v4442_v24, 0.0  ;;  %v4011_v25 = vadd.f32 %v3987_v60, %v22289_v5  ;;  %v22602_v30 = vpop.f32.mrf.mxu2  ;;  %v4136_v20 = vpop.f32.mrf.mxu0  ;;  %v4812_v5 = vpack.c.b16 %v22316_v2, %v22316_v2  ;;  %v5413_v41 = vrot.slane %v5411_v22, 3 }
 0x2ed   : > { %v4402_v6 = vpop.f32.mrf.mxu1 }
 0x2ee   : > { %v4570_v36 = vmul.f32 %v4533_v13, %v4458_v26  ;;  %v4157_v52 = vadd.f32 %v4133_v57, %v4011_v25  ;;  %v18321_v57 = vld [vmem:[%s25019_s4 + $0x180] sm:$0xff]  ;;  %v4885_v45 = vshrl.u32 %v4812_v5, 16  ;;  %v5138_v25 = vshll.u32 %v5073_v62, 16 }
 0x2ef   : > { %5236 = vmatmul.bf16.gmra.mxu0 %v5133_v27  ;;  %v18392_v27 = vld [vmem:[%s25019_s4 + $0xf8] sm:$0xff] }
 0x2f0   : > { %v4586_v43 = vpack.c.bf16 %v4570_v36, %v4570_v36  ;;  %v4423_v10 = vadd.f32 %v4399_v14, %v4157_v52  ;;  %4987 = vmatmul.bf16.gmra.mxu3 %v4883_v39  ;;  %5513 = vmatmul.bf16.gmra.mxu1 %v5409_v34  ;;  %v4888_v14 = vshll.u32 %v4812_v5, 16  ;;  %v4887_v47 = vrot.slane %v4885_v45, 3  ;;  %v5950_v52 = vld [vmem:[#allocation2 + $0x58] sm:$0x8]  ;;  %v22635_v39 = vld [vmem:[#allocation2 + $0x5c] sm:$0xf] }
 0x2f1   : > { %5658 = vmatmul.bf16.gmra.mxu2 %v22617_v49  ;;  %6169 = vmatpush.bf16.msra.mxu0 %v18321_v57  ;;  %v5416_v36 = vrot.slane %v5414_v0, 4  ;;  %v6000_v45 = vunpack.c.l.b16 %v5950_v52 }
 0x2f2   : > { %4602 = vst.msk [vmem:[#allocation3 + $0x38] sm:$0xf] %vm313_vm3, %v4586_v43  ;;  %v4443_v2 = vadd.f32 %v22373_v56, %v4423_v10  ;;  %v4890_v26 = vrot.slane %v4888_v14, 4  ;;  %v5140_v43 = vrot.slane %v5138_v25, 1  ;;  %v18384_v10 = vld [vmem:[%s25019_s4 + $0xb8] sm:$0xff]  ;;  %7684 = vmatpush.bf16.msrb.mxu2 %v18392_v27  ;;  %v6001_v14 = vunpack.c.l.b16 %v22635_v39 }
 0x2f3   : > { %v3990_v28 = vpop.f32.mrf.mxu3  ;;  %v5417_v57 = vor.u32 %v5416_v36, %v5413_v41  ;;  %7407 = vmatpush.bf16.msrb.mxu1 %v18384_v10  ;;  %v4548_v41 = vpop.permute.xlu1 %4547 }
 0x2f4   : > { %v4459_v4 = vmax.f32 %v4443_v2, 0.0  ;;  %v4012_v38 = vadd.f32 %v3990_v28, %v22309_v48  ;;  %v22632_v55 = vpop.f32.mrf.mxu2  ;;  %v4138_v24 = vpop.f32.mrf.mxu0  ;;  %v5134_v48 = vshrl.u32 %v22582_v31, 16  ;;  %v4891_v7 = vor.u32 %v4890_v26, %v4887_v47  ;;  %v22669_v26 = vld [vmem:[#allocation2 + $0x58] sm:$0xff] }
 0x2f5   : > { %v4404_v1 = vpop.f32.mrf.mxu1 }
 0x2f6   : > { %v4571_v32 = vmul.f32 %v4538_v53, %v4459_v4  ;;  %v4158_v60 = vadd.f32 %v4136_v20, %v4012_v38  ;;  %v18368_v20 = vld [vmem:[%s25019_s4 + $0x78] sm:$0xff]  ;;  %v5136_v23 = vor.u32 %v5134_v48, %v22598_v3  ;;  %v4892_v38 = vsel %vm2595_vm1, %v22592_v8, %v4891_v7 }
 0x2f7   : > { %6962 = vmatpush.bf16.msrb.mxu3 %v18368_v20  ;;  %v5418_v53 = vsel %vm2595_vm1, %v22604_v59, %v5417_v57  ;;  %v5769_v7 = vshll.u32 %v22669_v26, 16 }
 0x2f8   : > { %v4587_v35 = vpack.c.bf16 %v4571_v32, %v4571_v32  ;;  %v4424_v13 = vadd.f32 %v4402_v6, %v4158_v60  ;;  %v18360_v6 = vld [vmem:[%s25019_s4 + $0x38] sm:$0xff]  ;;  %v18305_v32 = vld [vmem:[#allocation2 + $0x50] sm:$0xff] }
 0x2f9   : > { %7158 = vmatpush.bf16.msrb.mxu0 %v18360_v6  ;;  %v18337_v60 = vld [vmem:[#allocation2 + $0x5c] sm:$0xff]  ;;  %v5764_v48 = vshll.u32 %v18305_v32, 16 }
 0x2fa   : > { %4603 = vst.msk [vmem:[#allocation3 + $0x3c] sm:$0xf] %vm313_vm3, %v4587_v35  ;;  %v4444_v5 = vadd.f32 %v22373_v56, %v4424_v13  ;;  %v22674_v13 = vld [vmem:[#allocation2 + $0x64] sm:$0xff] }
 0x2fb   : > { %v3992_v31 = vpop.f32.mrf.mxu3  ;;  %v5766_v10 = vrot.slane %v5764_v48, 1 }
 0x2fc   : > { %v4460_v34 = vmax.f32 %v4444_v5, 0.0  ;;  %v4013_v2 = vadd.f32 %v3992_v31, %v22328_v63  ;;  %v22653_v44 = vpop.f32.mrf.mxu2  ;;  %v4141_v28 = vpop.f32.mrf.mxu0  ;;  %v5141_v63 = vsel %vm2858_vm2, %v5136_v23, %v5140_v43  ;;  %v6451_v31 = vshll.u32 %v18337_v60, 16 }
 0x2fd   : > { %v4407_v4 = vpop.f32.mrf.mxu1 }
 0x2fe   : > { %v4572_v3 = vmul.f32 %v4543_v15, %v4460_v34  ;;  %v4159_v62 = vadd.f32 %v4138_v24, %v4013_v2  ;;  %v6017_v24 = vpack.c.b16 %v6001_v14, %v6000_v45  ;;  %v6453_v15 = vrot.slane %v6451_v31, 1  ;;  %v18359_v45 = vld [vmem:[%s25019_s4 + $0x30] sm:$0xff]  ;;  %v18366_v31 = vld [vmem:[%s25019_s4 + $0x68] sm:$0xff] }
 0x2ff   : > { %5241 = vmatmul.bf16.gmra.mxu0 %v5141_v63  ;;  %v18971_v63 = vunpack.c.l.b16 %v22434_v58 }
 0x300   : > { %v4588_v22 = vpack.c.bf16 %v4572_v3, %v4572_v3  ;;  %v4425_v0 = vadd.f32 %v4404_v1, %v4159_v62  ;;  %4992 = vmatmul.bf16.gmra.mxu3 %v4892_v38  ;;  %5518 = vmatmul.bf16.gmra.mxu1 %v5418_v53  ;;  %v18367_v1 = vld [vmem:[%s25019_s4 + $0x70] sm:$0xff]  ;;  %v6027_v52 = vshrl.u32 %v6017_v24, 16  ;;  %v6030_v5 = vshll.u32 %v6017_v24, 16 }
 0x301   : > { %5663 = vmatmul.bf16.gmra.mxu2 %v22588_v37  ;;  %6963 = vmatpush.bf16.msrb.mxu3 %v18367_v1  ;;  %v18383_v3 = vld [vmem:[%s25019_s4 + $0xb0] sm:$0xff]  ;;  %v5771_v38 = vrot.slane %v5769_v7, 1  ;;  %v6449_v24 = vshrl.u32 %v18337_v60, 16  ;;  %v4553_v1 = vpop.permute.xlu2 %4552  ;;  %v6243_v60 = vpack.c.b16 %v18971_v63, %v6001_v14  ;;  %v22704_v7 = vld [vmem:[#allocation2 + $0x60] sm:$0xff]  ;;  %v5773_v63 = vshrl.u32 %v22669_v26, 16 }
 0x302   : > { %4604 = vst.msk [vmem:[#allocation3 + $0x40] sm:$0xf] %vm313_vm3, %v4588_v22  ;;  %v4445_v8 = vadd.f32 %v22373_v56, %v4425_v0  ;;  %v6029_v34 = vrot.slane %v6027_v52, 3  ;;  %v6032_v2 = vrot.slane %v6030_v5, 4  ;;  %7159 = vmatpush.bf16.msrb.mxu0 %v18359_v45  ;;  %7408 = vmatpush.bf16.msrb.mxu1 %v18383_v3  ;;  %v18358_v3 = vld [vmem:[%s25019_s4 + $0x28] sm:$0xff] }
 0x303   : > { %v3995_v47 = vpop.f32.mrf.mxu3  ;;  %v6454_v52 = vor.u32 %v6453_v15, %v6449_v24 }
 0x304   : > { %v4461_v59 = vmax.f32 %v4445_v8, 0.0  ;;  %v4014_v25 = vadd.f32 %v3995_v47, %v22343_v33  ;;  %v22672_v35 = vpop.f32.mrf.mxu2  ;;  %v4143_v36 = vpop.f32.mrf.mxu0  ;;  %v6456_v33 = vshll.u32 %v22674_v13, 16 }
 0x305   : > { %v4409_v6 = vpop.f32.mrf.mxu1  ;;  %6964 = vmatpush.bf16.msrb.mxu3 %v18366_v31 }
 0x306   : > { %v4573_v20 = vmul.f32 %v4548_v41, %v4461_v59  ;;  %v4160_v27 = vadd.f32 %v4141_v28, %v4014_v25  ;;  %v18391_v28 = vld [vmem:[%s25019_s4 + $0xf0] sm:$0xff]  ;;  %v6458_v8 = vrot.slane %v6456_v33, 1  ;;  %v6033_v25 = vor.u32 %v6032_v2, %v6029_v34  ;;  %7160 = vmatpush.bf16.msrb.mxu0 %v18358_v3 }
 0x307   : > { %7685 = vmatpush.bf16.msrb.mxu2 %v18391_v28 }
 0x308   : > { %v4589_v23 = vpack.c.bf16 %v4573_v20, %v4573_v20  ;;  %v4426_v43 = vadd.f32 %v4407_v4, %v4160_v27  ;;  %v5762_v4 = vshrl.u32 %v18305_v32, 16  ;;  %v6459_v27 = vsel %vm2858_vm2, %v6454_v52, %v6458_v8 }
 0x30a   : > { %4605 = vst.msk [vmem:[#allocation3 + $0x44] sm:$0xf] %vm313_vm3, %v4589_v23  ;;  %v4446_v57 = vadd.f32 %v22373_v56, %v4426_v43  ;;  %v5767_v59 = vor.u32 %v5766_v10, %v5762_v4  ;;  %v22707_v23 = vld [vmem:[#allocation2 + $0x6c] sm:$0xff]  ;;  %v4558_v43 = vpop.permute.xlu0 %4557 }
 0x30b   : > { %v3997_v62 = vpop.f32.mrf.mxu3  ;;  %v6464_v28 = vshll.u32 %v22707_v23, 16 }
 0x30c   : > { %v4462_v22 = vmax.f32 %v4446_v57, 0.0  ;;  %v4015_v0 = vadd.f32 %v3997_v62, %v22354_v51  ;;  %v22691_v53 = vpop.f32.mrf.mxu2  ;;  %v5207_v47 = vpop.f32.mrf.mxu0  ;;  %v5772_v58 = vsel %vm2858_vm2, %v5767_v59, %v5771_v38  ;;  %v6042_v51 = vsel %vm2595_vm1, %v6033_v25, %v22461_v18  ;;  %v18382_v62 = vld [vmem:[%s25019_s4 + $0xa8] sm:$0xff] }
 0x30d   : > { %v5484_v32 = vpop.f32.mrf.mxu1  ;;  %v5775_v25 = vor.u32 %v5773_v63, %v5771_v38  ;;  %7409 = vmatpush.bf16.msrb.mxu1 %v18382_v62 }
 0x30e   : > { %v4574_v41 = vmul.f32 %v4553_v1, %v4462_v22  ;;  %v4161_v48 = vadd.f32 %v4143_v36, %v4015_v0  ;;  %v6460_v1 = vshrl.u32 %v22674_v13, 16  ;;  %v18365_v13 = vld [vmem:[%s25019_s4 + $0x60] sm:$0xff] }
 0x30f   : > { %6170 = vmatmul.bf16.vlgmr.msra.gmra.mxu0 %v6042_v51  ;;  %6965 = vmatpush.bf16.msrb.mxu3 %v18365_v13 }
 0x310   : > { %v4590_v5 = vpack.c.bf16 %v4574_v41, %v4574_v41  ;;  %v4427_v20 = vadd.f32 %v4409_v6, %v4161_v48  ;;  %5893 = vmatmul.bf16.vlgmr.msra.gmra.mxu3 %v5772_v58  ;;  %6315 = vmatmul.bf16.vlgmr.msra.gmra.mxu1 %v6243_v60  ;;  %v19975_v58 = vld [vmem:[#allocation2 + $0x64] sm:$0xff]  }
 0x311   : > { %6580 = vmatmul.bf16.vlgmr.msra.gmra.mxu2 %v6459_v27  ;;  %v22734_v60 = vld [vmem:[#allocation2 + $0x68] sm:$0xff] }
 0x312   : > { %4606 = vst.msk [vmem:[#allocation3 + $0x48] sm:$0xf] %vm313_vm3, %v4590_v5  ;;  %v4447_v36 = vadd.f32 %v22373_v56, %v4427_v20  ;;  %v5777_v56 = vshll.u32 %v22704_v7, 16  ;;  %v22737_v20 = vld [vmem:[#allocation2 + $0x74] sm:$0xff]  ;;  %v5785_v31 = vshll.u32 %v22734_v60, 16 }
 0x313   : > { %v4958_v18 = vpop.f32.mrf.mxu3 }
 0x314   : > { %v4463_v39 = vmax.f32 %v4447_v36, 0.0  ;;  %v4959_v14 = vadd.f32 %v4958_v18, %v22368_v17  ;;  %v5629_v6 = vpop.f32.mrf.mxu2  ;;  %v5209_v33 = vpop.f32.mrf.mxu0  ;;  %v18390_v17 = vld [vmem:[%s25019_s4 + $0xe8] sm:$0xff]  ;;  %v5779_v22 = vrot.slane %v5777_v56, 1 }
 0x315   : > { %v5486_v2 = vpop.f32.mrf.mxu1  ;;  %7686 = vmatpush.bf16.msrb.mxu2 %v18390_v17 }
 0x316   : > { %v4575_v10 = vmul.f32 %v4558_v43, %v4463_v39  ;;  %v5247_v34 = vadd.f32 %v5207_v47, %v4959_v14  ;;  %v6466_v47 = vrot.slane %v6464_v28, 1  ;;  %v5780_v52 = vsel %vm2858_vm2, %v5775_v25, %v5779_v22  ;;  %v18381_v43 = vld [vmem:[%s25019_s4 + $0xa0] sm:$0xff] }
 0x317   : > { %v6472_v39 = vshll.u32 %v22737_v20, 16  ;;  %7410 = vmatpush.bf16.msrb.mxu1 %v18381_v43  ;;  %v6476_v43 = vshrl.u32 %v22737_v20, 16 }
 0x318   : > { %v4591_v57 = vpack.c.bf16 %v4575_v10, %v4575_v10  ;;  %v5524_v15 = vadd.f32 %v5484_v32, %v5247_v34  ;;  %v6462_v32 = vor.u32 %v6460_v1, %v6458_v8  ;;  %v5781_v10 = vshrl.u32 %v22704_v7, 16  ;;  %v19548_v7 = vld [vmem:[#allocation2 + $0x78] sm:$0xff]  }
 0x319   : > { %v5787_v34 = vrot.slane %v5785_v31, 1  ;;  %v6065_v25 = vshll.u32 %v19548_v7, 16  ;;  %v5789_v31 = vshrl.u32 %v22734_v60, 16 }
 0x31a   : > { %4607 = vst.msk [vmem:[#allocation3 + $0x4c] sm:$0xf] %vm313_vm3, %v4591_v57  ;;  %v22712_v45 = vadd.f32 %v5629_v6, %v5524_v15  ;;  %v18389_v6 = vld [vmem:[%s25019_s4 + $0xe0] sm:$0xff]  ;;  %v6468_v57 = vshrl.u32 %v22707_v23, 16  ;;  %v6474_v15 = vrot.slane %v6472_v39, 1  ;;  %v5783_v17 = vor.u32 %v5781_v10, %v5779_v22  ;;  %v18364_v22 = vld [vmem:[%s25019_s4 + $0x58] sm:$0xff] }
 0x31b   : > { %v4960_v4 = vpop.f32.mrf.mxu3  ;;  %7687 = vmatpush.bf16.msrb.mxu2 %v18389_v6  ;;  %6966 = vmatpush.bf16.msrb.mxu3 %v18364_v22  ;;  %v6067_v13 = vrot.slane %v6065_v25, 4 }
 0x31c   : > { %v4961_v0 = vadd.f32 %v4960_v4, %v22384_v61  ;;  %v5631_v24 = vpop.f32.mrf.mxu2  ;;  %v5212_v59 = vpop.f32.mrf.mxu0  ;;  %v6467_v61 = vsel %vm2858_vm2, %v6462_v32, %v6466_v47  ;;  %v6470_v4 = vor.u32 %v6468_v57, %v6466_v47  ;;  %v5788_v63 = vsel %vm2858_vm2, %v5783_v17, %v5787_v34  ;;  %v22763_v47 = vld [vmem:[#allocation2 + $0x70] sm:$0xff] }
 0x31d   : > { %v5489_v48 = vpop.f32.mrf.mxu1 }
 0x31e   : > { %v5248_v41 = vadd.f32 %v5209_v33, %v4961_v0  ;;  %v19977_v0 = vld [vmem:[#allocation2 + $0x6c] sm:$0xff]  }
 0x31f   : > { %6175 = vmatmul.bf16.gmra.mxu0 %v22516_v46 }
 0x320   : > { %v5525_v51 = vadd.f32 %v5486_v2, %v5248_v41  ;;  %5898 = vmatmul.bf16.gmra.mxu3 %v5780_v52  ;;  %6320 = vmatmul.bf16.gmra.mxu1 %v19975_v58 }
 0x321   : > { %6585 = vmatmul.bf16.gmra.mxu2 %v6467_v61 }
 0x322   : > { %v22729_v26 = vadd.f32 %v5631_v24, %v5525_v51  ;;  %v5793_v51 = vshll.u32 %v22763_v47, 16 }
 0x323   : > { %v4963_v38 = vpop.f32.mrf.mxu3 }
 0x324   : > { %v4964_v8 = vadd.f32 %v4963_v38, %v22407_v19  ;;  %v5634_v5 = vpop.f32.mrf.mxu2  ;;  %v5214_v46 = vpop.f32.mrf.mxu0  ;;  %v18357_v19 = vld [vmem:[%s25019_s4 + $0x20] sm:$0xff] }
 0x325   : > { %v5491_v36 = vpop.f32.mrf.mxu1  ;;  %7161 = vmatpush.bf16.msrb.mxu0 %v18357_v19 }
 0x326   : > { %v5249_v27 = vadd.f32 %v5212_v59, %v4964_v8  ;;  %v6062_v59 = vshrl.u32 %v19548_v7, 16 }
 0x328   : > { %v5526_v18 = vadd.f32 %v5489_v48, %v5249_v27  ;;  %v6064_v61 = vrot.slane %v6062_v59, 3  ;;  %v18380_v27 = vld [vmem:[%s25019_s4 + $0x98] sm:$0xff] }
 0x329   : > { %7411 = vmatpush.bf16.msrb.mxu1 %v18380_v27 }
 0x32a   : > { %v22741_v14 = vadd.f32 %v5634_v5, %v5526_v18  ;;  %v5795_v18 = vrot.slane %v5793_v51, 1  ;;  %v6068_v39 = vor.u32 %v6067_v13, %v6064_v61  ;;  %v5797_v61 = vshrl.u32 %v22763_v47, 16 }
 0x32b   : > { %v4965_v33 = vpop.f32.mrf.mxu3 }
 0x32c   : > { %v4966_v2 = vadd.f32 %v4965_v33, %v22421_v29  ;;  %v5636_v56 = vpop.f32.mrf.mxu2  ;;  %v5217_v28 = vpop.f32.mrf.mxu0  ;;  %v6475_v29 = vsel %vm2858_vm2, %v6470_v4, %v6474_v15  ;;  %v6069_v60 = vsel %vm2595_vm1, %v22546_v21, %v6068_v39  ;;  %v22793_v4 = vld [vmem:[#allocation2 + $0x78] sm:$0xff]  ;;  %v6074_v21 = vshll.u32 %v22617_v49, 16 }
 0x32d   : > { %v5494_v62 = vpop.f32.mrf.mxu1  ;;  %v5801_v59 = vshll.u32 %v22793_v4, 16 }
 0x32e   : > { %v5250_v3 = vadd.f32 %v5214_v46, %v4966_v2  ;;  %v18356_v46 = vld [vmem:[%s25019_s4 + $0x18] sm:$0xff]  ;;  %v5791_v2 = vor.u32 %v5789_v31, %v5787_v34  ;;  %v18363_v34 = vld [vmem:[%s25019_s4 + $0x50] sm:$0xff]  ;;  %v5799_v31 = vor.u32 %v5797_v61, %v5795_v18 }
 0x32f   : > { %6180 = vmatmul.bf16.gmra.mxu0 %v22560_v54  ;;  %v22766_v54 = vld [vmem:[#allocation2 + $0x7c] sm:$0xff]  ;;  %6967 = vmatpush.bf16.msrb.mxu3 %v18363_v34  ;;  %v5803_v13 = vrot.slane %v5801_v59, 1  ;;  %v5805_v59 = vshrl.u32 %v22793_v4, 16 }
 0x330   : > { %v5527_v24 = vadd.f32 %v5491_v36, %v5250_v3  ;;  %5903 = vmatmul.bf16.gmra.mxu3 %v5788_v63  ;;  %6325 = vmatmul.bf16.gmra.mxu1 %v19977_v0  ;;  %v6480_v8 = vshll.u32 %v22766_v54, 16  ;;  %v5796_v17 = vsel %vm2858_vm2, %v5791_v2, %v5795_v18  ;;  %v19979_v3 = vld [vmem:[#allocation2 + $0x74] sm:$0xff]   ;;  %v6071_v63 = vshrl.u32 %v22617_v49, 16  ;;  %v19981_v2 = vld [vmem:[#allocation2 + $0x7c] sm:$0xff]   ;;  %v18362_v18 = vld [vmem:[%s25019_s4 + $0x48] sm:$0xff] }
 0x331   : > { %6590 = vmatmul.bf16.gmra.mxu2 %v6475_v29  ;;  %7162 = vmatpush.bf16.msrb.mxu0 %v18356_v46  ;;  %v22798_v29 = vld [vmem:[#allocation2 + $0x84] sm:$0xff]  ;;  %v18355_v49 = vld [vmem:[%s25019_s4 + $0x10] sm:$0xff]  ;;  %v6484_v46 = vshrl.u32 %v22766_v54, 16 }
 0x332   : > { %v22758_v23 = vadd.f32 %v5636_v56, %v5527_v24  ;;  %v6482_v33 = vrot.slane %v6480_v8, 1  ;;  %v6073_v25 = vrot.slane %v6071_v63, 3 }
 0x333   : > { %v4968_v1 = vpop.f32.mrf.mxu3  ;;  %6968 = vmatpush.bf16.msrb.mxu3 %v18362_v18 }
 0x334   : > { %v4969_v41 = vadd.f32 %v4968_v1, %v22453_v40  ;;  %v5639_v48 = vpop.f32.mrf.mxu2  ;;  %v5219_v32 = vpop.f32.mrf.mxu0  ;;  %v18388_v40 = vld [vmem:[%s25019_s4 + $0xd8] sm:$0xff] }
 0x335   : > { %v5496_v58 = vpop.f32.mrf.mxu1  ;;  %7688 = vmatpush.bf16.msrb.mxu2 %v18388_v40  ;;  %7163 = vmatpush.bf16.msrb.mxu0 %v18355_v49 }
 0x336   : > { %v5251_v52 = vadd.f32 %v5217_v28, %v4969_v41  ;;  %v6478_v28 = vor.u32 %v6476_v43, %v6474_v15  ;;  %v6076_v41 = vrot.slane %v6074_v21, 4  ;;  %v6486_v43 = vor.u32 %v6484_v46, %v6482_v33 }
 0x338   : > { %v5528_v38 = vadd.f32 %v5494_v62, %v5251_v52 }
 0x33a   : > { %v22770_v5 = vadd.f32 %v5639_v48, %v5528_v38  ;;  %v6077_v38 = vor.u32 %v6076_v41, %v6073_v25 }
 0x33b   : > { %v4970_v36 = vpop.f32.mrf.mxu3 }
 0x33c   : > { %v4971_v6 = vadd.f32 %v4970_v36, %v22467_v42  ;;  %v5641_v19 = vpop.f32.mrf.mxu2  ;;  %v5222_v10 = vpop.f32.mrf.mxu0  ;;  %v6483_v42 = vsel %vm2858_vm2, %v6478_v28, %v6482_v33  ;;  %v6078_v47 = vsel %vm2595_vm1, %v6068_v39, %v6077_v38  ;;  %v22824_v33 = vld [vmem:[#allocation2 + $0x80] sm:$0xff]  ;;  %v6080_v28 = vshrl.u32 %v22588_v37, 16 }
 0x33d   : > { %v5499_v57 = vpop.f32.mrf.mxu1  ;;  %v6083_v39 = vshll.u32 %v22588_v37, 16  ;;  %v18354_v37 = vld [vmem:[%s25019_s4 + $0x8] sm:$0xff] }
 0x33e   : > { %v5252_v56 = vadd.f32 %v5219_v32, %v4971_v6  ;;  %v6488_v32 = vshll.u32 %v22798_v29, 16  ;;  %v6082_v63 = vrot.slane %v6080_v28, 3  ;;  %7164 = vmatpush.bf16.msrb.mxu0 %v18354_v37 }
 0x33f   : > { %6185 = vmatmul.bf16.gmra.mxu0 %v6069_v60  ;;  %v6085_v21 = vrot.slane %v6083_v39, 4 }
 0x340   : > { %v5529_v62 = vadd.f32 %v5496_v58, %v5252_v56  ;;  %5908 = vmatmul.bf16.gmra.mxu3 %v5796_v17  ;;  %6330 = vmatmul.bf16.gmra.mxu1 %v19979_v3  ;;  %v18379_v58 = vld [vmem:[%s25019_s4 + $0x90] sm:$0xff]  ;;  %v6490_v27 = vrot.slane %v6488_v32, 1 }
 0x341   : > { %6595 = vmatmul.bf16.gmra.mxu2 %v6483_v42  ;;  %7412 = vmatpush.bf16.msrb.mxu1 %v18379_v58  ;;  %v22829_v3 = vld [vmem:[#allocation2 + $0x8c] sm:$0xff]  ;;  %v22845_v41 = vor.u32 %v6085_v21, %v6082_v63  ;;  %v5813_v21 = vshrl.u32 %v22824_v33, 16 }
 0x342   : > { %v22788_v20 = vadd.f32 %v5641_v19, %v5529_v62 }
 0x343   : > { %v4973_v15 = vpop.f32.mrf.mxu3  ;;  %v6087_v4 = vsel %vm2595_vm1, %v6077_v38, %v22845_v41 }
 0x344   : > { %v4974_v0 = vadd.f32 %v4973_v15, %v22494_v9  ;;  %v5644_v24 = vpop.f32.mrf.mxu2  ;;  %v5224_v7 = vpop.f32.mrf.mxu0  ;;  %v18387_v9 = vld [vmem:[%s25019_s4 + $0xd0] sm:$0xff]  ;;  %v5809_v15 = vshll.u32 %v22824_v33, 16 }
 0x345   : > { %v5501_v1 = vpop.f32.mrf.mxu1  ;;  %7689 = vmatpush.bf16.msrb.mxu2 %v18387_v9  ;;  %v6492_v9 = vshrl.u32 %v22798_v29, 16  ;;  %v22853_v29 = vld [vmem:[#allocation2 + $0x90] sm:$0xff]  }
 0x346   : > { %v5253_v22 = vadd.f32 %v5222_v10, %v4974_v0  ;;  %v5804_v10 = vsel %vm2858_vm2, %v5799_v31, %v5803_v13  ;;  %v5811_v25 = vrot.slane %v5809_v15, 1  ;;  %v6089_v38 = vshrl.u32 %v22853_v29, 16  ;;  %v18377_v15 = vld [vmem:[%s25019_s4 + $0x80] sm:$0xff] }
 0x348   : > { %v5530_v48 = vadd.f32 %v5499_v57, %v5253_v22  ;;  %v18378_v22 = vld [vmem:[%s25019_s4 + $0x88] sm:$0xff]  ;;  %v6091_v28 = vrot.slane %v6089_v38, 3 }
 0x349   : > { %7413 = vmatpush.bf16.msrb.mxu1 %v18378_v22 }
 0x34a   : > { %v22802_v52 = vadd.f32 %v5644_v24, %v5530_v48  ;;  %v6496_v24 = vshll.u32 %v22829_v3, 16 }
 0x34b   : > { %v4975_v51 = vpop.f32.mrf.mxu3 }
 0x34c   : > { %v4976_v8 = vadd.f32 %v4975_v51, %v22508_v12  ;;  %v5646_v40 = vpop.f32.mrf.mxu2  ;;  %v5227_v36 = vpop.f32.mrf.mxu0  ;;  %v6491_v12 = vsel %vm2858_vm2, %v6486_v43, %v6490_v27  ;;  %v6498_v49 = vrot.slane %v6496_v24, 1  ;;  %v5807_v51 = vor.u32 %v5805_v59, %v5803_v13 }
 0x34d   : > { %v5504_v19 = vpop.f32.mrf.mxu1  ;;  %v6092_v43 = vshll.u32 %v22853_v29, 16  ;;  %7414 = vmatpush.bf16.msrb.mxu1 %v18377_v15 }
 0x34e   : > { %v5254_v6 = vadd.f32 %v5224_v7, %v4976_v8  ;;  %v5812_v46 = vsel %vm2858_vm2, %v5807_v51, %v5811_v25 }
 0x34f   : > { %6190 = vmatmul.bf16.gmra.mxu0 %v6078_v47  ;;  %v6094_v39 = vrot.slane %v6092_v43, 4 }
 0x350   : > { %v5531_v56 = vadd.f32 %v5501_v1, %v5254_v6  ;;  %5913 = vmatmul.bf16.gmra.mxu3 %v5804_v10  ;;  %6335 = vmatmul.bf16.gmra.mxu1 %v19981_v2  ;;  %v22865_v2 = vld [vmem:[#allocation2 + $0x94] sm:$0xff] }
 0x351   : > { %6600 = vmatmul.bf16.gmra.mxu2 %v6491_v12  ;;  %v22881_v24 = vor.u32 %v6094_v39, %v6091_v28 }
 0x352   : > { %v22819_v54 = vadd.f32 %v5646_v40, %v5531_v56  ;;  %v6494_v40 = vor.u32 %v6492_v9, %v6490_v27  ;;  %v18361_v27 = vld [vmem:[%s25019_s4 + $0x40] sm:$0xff]  ;;  %v5815_v9 = vor.u32 %v5813_v21, %v5811_v25 }
 0x353   : > { %v4978_v57 = vpop.f32.mrf.mxu3  ;;  %6969 = vmatpush.bf16.msrb.mxu3 %v18361_v27 }
 0x354   : > { %v4979_v17 = vadd.f32 %v4978_v57, %v22538_v50  ;;  %v5649_v60 = vpop.f32.mrf.mxu2  ;;  %v5229_v62 = vpop.f32.mrf.mxu0  ;;  %v18386_v50 = vld [vmem:[%s25019_s4 + $0xc8] sm:$0xff] }
 0x355   : > { %v5506_v34 = vpop.f32.mrf.mxu1  ;;  %7690 = vmatpush.bf16.msrb.mxu2 %v18386_v50 }
 0x356   : > { %v5255_v42 = vadd.f32 %v5227_v36, %v4979_v17  ;;  %v19983_v36 = vld [vmem:[#allocation2 + $0x84] sm:$0xff]  }
 0x358   : > { %v5532_v0 = vadd.f32 %v5504_v19, %v5255_v42  ;;  %v22860_v19 = vld [vmem:[#allocation2 + $0x88] sm:$0xff] }
 0x359   : > { %v5817_v57 = vshll.u32 %v22860_v19, 16 }
 0x35a   : > { %v22833_v7 = vadd.f32 %v5649_v60, %v5532_v0  ;;  %v6504_v60 = vshll.u32 %v22865_v2, 16 }
 0x35b   : > { %v4980_v1 = vpop.f32.mrf.mxu3  ;;  %v5819_v0 = vrot.slane %v5817_v57, 1 }
 0x35c   : > { %v4981_v48 = vadd.f32 %v4980_v1, %v22552_v11  ;;  %v5651_v32 = vpop.f32.mrf.mxu2  ;;  %v5232_v58 = vpop.f32.mrf.mxu0  ;;  %v6499_v11 = vsel %vm2858_vm2, %v6494_v40, %v6498_v49  ;;  %v6500_v1 = vshrl.u32 %v22829_v3, 16  ;;  %v6506_v59 = vrot.slane %v6504_v60, 1  ;;  %v19984_v40 = vld [vmem:[#allocation2 + $0x8c] sm:$0xff]  }
 0x35d   : > { %v5509_v8 = vpop.f32.mrf.mxu1 }
 0x35e   : > { %v5256_v61 = vadd.f32 %v5229_v62, %v4981_v48  ;;  %v5966_v62 = vld [vmem:[#allocation2 + $0x98] sm:$0xf]  ;;  %v5701_v48 = vld [vmem:[#allocation2 + $0x90] sm:$0x1] }
 0x35f   : > { %6195 = vmatmul.bf16.gmra.mxu0 %v6087_v4  ;;  %v22883_v50 = vunpack.c.l.b16 %v5966_v62  ;;  %v6508_v62 = vshrl.u32 %v22865_v2, 16 }
 0x360   : > { %v5533_v31 = vadd.f32 %v5506_v34, %v5256_v61  ;;  %5918 = vmatmul.bf16.gmra.mxu3 %v5812_v46  ;;  %6340 = vmatmul.bf16.gmra.mxu1 %v19983_v36  ;;  %v18353_v34 = vld [vmem:[%s25019_s4] sm:$0xff]  ;;  %v6502_v61 = vor.u32 %v6500_v1, %v6498_v49  ;;  %v5751_v46 = vunpack.c.l.b16 %v5701_v48 }
 0x361   : > { %6605 = vmatmul.bf16.gmra.mxu2 %v6499_v11  ;;  %7165 = vmatpush.bf16.msrb.mxu0 %v18353_v34  ;;  %v6025_v3 = vpack.c.b16 %v22883_v50, %v22883_v50  ;;  %v6817_v34 = vld [vmem:[#allocation2 + $0x80] sm:$0x8]  ;;  %v6510_v1 = vor.u32 %v6508_v62, %v6506_v59 }
 0x362   : > { %v22855_v13 = vadd.f32 %v5651_v32, %v5533_v31  ;;  %v6507_v25 = vsel %vm2858_vm2, %v6502_v61, %v6506_v59  ;;  %v18400_v31 = vld [vmem:[%s25019_s4 + $0x138] sm:$0xff]  ;;  %v5760_v11 = vpack.c.b16 %v5751_v46, %v5751_v46  ;;  %v7012_v2 = vunpack.c.l.b16 %v6817_v34  ;;  %v19582_v59 = vld [vmem:[#allocation2 + $0x88] sm:$0xff]  }
 0x363   : > { %v4983_v6 = vpop.f32.mrf.mxu3  ;;  %v6098_v27 = vshrl.u32 %v6025_v3, 16  ;;  %7829 = vmatpush.bf16.msra.mxu3 %v18400_v31 }
 0x364   : > { %v4984_v10 = vadd.f32 %v4983_v6, %v22585_v16  ;;  %v5654_v47 = vpop.f32.mrf.mxu2  ;;  %v5234_v56 = vpop.f32.mrf.mxu0  ;;  %v18385_v16 = vld [vmem:[%s25019_s4 + $0xc0] sm:$0xff]  ;;  %v6101_v6 = vshll.u32 %v6025_v3, 16  ;;  %v20017_v3 = vld [vmem:[#allocation2 + $0x8c] sm:$0x8] }
 0x365   : > { %v5511_v18 = vpop.f32.mrf.mxu1  ;;  %7691 = vmatpush.bf16.msrb.mxu2 %v18385_v16  ;;  %v6100_v57 = vrot.slane %v6098_v27, 3  ;;  %v22903_v16 = vld [vmem:[#allocation2 + $0x84] sm:$0xf] }
 0x366   : > { %v5257_v12 = vadd.f32 %v5232_v58, %v4984_v10  ;;  %v6388_v58 = vld [vmem:[#allocation2 + $0x9c] sm:$0x1]  ;;  %v6103_v28 = vrot.slane %v6101_v6, 4 }
 0x367   : > { %v6438_v36 = vunpack.c.l.b16 %v6388_v58  ;;  %v18996_v58 = vunpack.c.h.b16 %v22853_v29  ;;  %v20396_v29 = vld [vmem:[#allocation2 + $0x94] sm:$0xff]  }
 0x368   : > { %v5534_v17 = vadd.f32 %v5509_v8, %v5257_v12  ;;  %v5820_v8 = vsel %vm2858_vm2, %v5815_v9, %v5819_v0  ;;  %v6104_v21 = vor.u32 %v6103_v28, %v6100_v57 }
 0x369   : > { %v6447_v10 = vpack.c.b16 %v6438_v36, %v6438_v36 }
 0x36a   : > { %v22869_v42 = vadd.f32 %v5654_v47, %v5534_v17 }
 0x36b   : > { %v4985_v63 = vpop.f32.mrf.mxu3  ;;  %v6512_v17 = vshll.u32 %v6447_v10, 16  ;;  %v18432_v10 = vld [vmem:[%s25019_s4 + $0x1f8] sm:$0xff] }
 0x36c   : > { %v4986_v37 = vadd.f32 %v4985_v63, %v22602_v30  ;;  %v5656_v22 = vpop.f32.mrf.mxu2  ;;  %v5237_v32 = vpop.f32.mrf.mxu0  ;;  %v6096_v30 = vsel %vm2595_vm1, %v22845_v41, %v22881_v24  ;;  %8516 = vmatpush.bf16.msra.mxu2 %v18432_v10 }
 0x36d   : > { %v5514_v33 = vpop.f32.mrf.mxu1  ;;  %v6514_v48 = vrot.slane %v6512_v17, 1 }
 0x36e   : > { %v5258_v51 = vadd.f32 %v5234_v56, %v4986_v37 }
 0x36f   : > { %6200 = vmatmul.bf16.gmra.mxu0 %v6096_v30  ;;  %v6250_v30 = vpack.c.b16 %v22883_v50, %v18996_v58  ;;  %v7031_v50 = vshrl.u32 %v19582_v59, 16 }
 0x370   : > { %v5535_v4 = vadd.f32 %v5511_v18, %v5258_v51  ;;  %5923 = vmatmul.bf16.gmra.mxu3 %v5820_v8  ;;  %6345 = vmatmul.bf16.gmra.mxu1 %v19984_v40  ;;  %v5825_v18 = vshll.u32 %v5760_v11, 16  ;;  %v6882_v51 = vunpack.c.l.b16 %v22903_v16  ;;  %v22918_v11 = vld [vmem:[#allocation2 + $0x8c] sm:$0xff] }
 0x371   : > { %6610 = vmatmul.bf16.gmra.mxu2 %v6507_v25  ;;  %v18369_v25 = vld [vmem:[#allocation2 + $0x84] sm:$0xff]  ;;  %v7033_v34 = vrot.slane %v7031_v50, 3 }
 0x372   : > { %v22894_v49 = vadd.f32 %v5656_v22, %v5535_v4  ;;  %v5827_v63 = vrot.slane %v5825_v18, 1  ;;  %v7013_v46 = vpack.c.b16 %v6882_v51, %v7012_v2 }
 0x373   : > { %v4988_v41 = vpop.f32.mrf.mxu3 }
 0x374   : > { %v4989_v38 = vadd.f32 %v4988_v41, %v22632_v55  ;;  %v5659_v43 = vpop.f32.mrf.mxu2  ;;  %v5239_v47 = vpop.f32.mrf.mxu0  ;;  %v5821_v55 = vshrl.u32 %v22860_v19, 16  ;;  %v6105_v19 = vsel %vm2595_vm1, %v22881_v24, %v6104_v21  ;;  %v7034_v41 = vshll.u32 %v19582_v59, 16 }
 0x375   : > { %v5516_v12 = vpop.f32.mrf.mxu1  ;;  %v7023_v18 = vshrl.u32 %v7013_v46, 16  ;;  %v7026_v57 = vshll.u32 %v7013_v46, 16 }
 0x376   : > { %v5259_v56 = vadd.f32 %v5237_v32, %v4989_v38  ;;  %v5823_v9 = vor.u32 %v5821_v55, %v5819_v0  ;;  %v6515_v0 = vsel %vm2858_vm2, %v6510_v1, %v6514_v48  ;;  %v7557_v38 = vshrl.u32 %v20396_v29, 16 }
 0x377   : > { %v7025_v1 = vrot.slane %v7023_v18, 3  ;;  %v7028_v48 = vrot.slane %v7026_v57, 4  ;;  %v18415_v18 = vld [vmem:[%s25019_s4 + $0x170] sm:$0xff] }
 0x378   : > { %v5536_v39 = vadd.f32 %v5514_v33, %v5259_v56  ;;  %v5828_v8 = vsel %vm2858_vm2, %v5823_v9, %v5827_v63  ;;  %v18424_v56 = vld [vmem:[%s25019_s4 + $0x1b8] sm:$0xff]  ;;  %v7291_v63 = vshll.u32 %v22918_v11, 16  ;;  %v7559_v21 = vrot.slane %v7557_v38, 3  ;;  %v18423_v57 = vld [vmem:[%s25019_s4 + $0x1b0] sm:$0xff] }
 0x379   : > { %8371 = vmatpush.bf16.msra.mxu1 %v18424_v56 }
 0x37a   : > { %v22900_v60 = vadd.f32 %v5659_v43, %v5536_v39  ;;  %v7560_v43 = vshll.u32 %v20396_v29, 16  ;;  %v7286_v39 = vshll.u32 %v18369_v25, 16  ;;  %v7029_v29 = vor.u32 %v7028_v48, %v7025_v1 }
 0x37b   : > { %v4990_v15 = vpop.f32.mrf.mxu3 }
 0x37c   : > { %v4991_v37 = vadd.f32 %v4990_v15, %v22653_v44  ;;  %v5661_v22 = vpop.f32.mrf.mxu2  ;;  %v5242_v32 = vpop.f32.mrf.mxu0  ;;  %v20394_v44 = vld [vmem:[#allocation2 + $0x8c] sm:$0xf0]   ;;  %v7036_v15 = vrot.slane %v7034_v41, 4 }
 0x37d   : > { %v5519_v61 = vpop.f32.mrf.mxu1  ;;  %v20018_v36 = vor.u32 %v20394_v44, %v20017_v3  ;;  %v7284_v44 = vshrl.u32 %v18369_v25, 16  ;;  %8372 = vmatpush.bf16.msra.mxu1 %v18423_v57 }
 0x37e   : > { %v5260_v33 = vadd.f32 %v5239_v47, %v4991_v37  ;;  %v18416_v47 = vld [vmem:[%s25019_s4 + $0x178] sm:$0xff]  ;;  %v7562_v37 = vrot.slane %v7560_v43, 4 }
 0x37f   : > { %6205 = vmatmul.bf16.gmra.mxu0 %v6105_v19  ;;  %v7549_v17 = vshrl.u32 %v20018_v36, 16  ;;  %v7552_v62 = vshll.u32 %v20018_v36, 16 }
 0x380   : > { %v5537_v40 = vadd.f32 %v5516_v12, %v5260_v33  ;;  %5928 = vmatmul.bf16.gmra.mxu3 %v5828_v8  ;;  %6350 = vmatmul.bf16.gmra.mxu1 %v6250_v30  ;;  %v22933_v8 = vor.u32 %v7036_v15, %v7033_v34 }
 0x381   : > { %6615 = vmatmul.bf16.gmra.mxu2 %v6515_v0  ;;  %8094 = vmatpush.bf16.msra.mxu0 %v18416_v47  ;;  %v7551_v58 = vrot.slane %v7549_v17, 3  ;;  %v7554_v2 = vrot.slane %v7552_v62, 4  ;;  %v18399_v0 = vld [vmem:[%s25019_s4 + $0x130] sm:$0xff]  ;;  %v22966_v62 = vld [vmem:[%s25020_s5] ss:$0 sm:$0xff] }
 0x382   : > { %v22916_v4 = vadd.f32 %v5661_v22, %v5537_v40  ;;  %v18999_v22 = vunpack.c.l.b16 %v19582_v59  ;;  %v22936_v40 = vor.u32 %v7562_v37, %v7559_v21  ;;  %7830 = vmatpush.bf16.msra.mxu3 %v18399_v0  ;;  %v7295_v21 = vshrl.u32 %v22918_v11, 16  ;;  %v20383_v0 = vld [vmem:[#allocation2 + $0x8c] sm:$0xff]   ;;  %v6692_v11 = vpop.permute.xlu1 %6691 }
 0x383   : > { %v4993_v31 = vpop.f32.mrf.mxu3  ;;  %v7555_v50 = vor.u32 %v7554_v2, %v7551_v58  ;;  %v18398_v58 = vld [vmem:[%s25019_s4 + $0x128] sm:$0xff] }
 0x384   : > { %v4994_v27 = vadd.f32 %v4993_v31, %v22672_v35  ;;  %v5664_v6 = vpop.f32.mrf.mxu2  ;;  %v5244_v12 = vpop.f32.mrf.mxu0  ;;  %v6898_v36 = vpack.c.b16 %v18999_v22, %v6882_v51  ;;  %v22950_v51 = vld [vmem:[#allocation2 + $0x94] sm:$0xff] }
 0x385   : > { %v5521_v35 = vpop.f32.mrf.mxu1  ;;  %8095 = vmatpush.bf16.msra.mxu0 %v18415_v18 }
 0x386   : > { %v5261_v28 = vadd.f32 %v5242_v32, %v4994_v27  ;;  %v7288_v32 = vrot.slane %v7286_v39, 1  ;;  %v7564_v27 = vsel %vm2595_vm1, %v7555_v50, %v22936_v40  ;;  %7831 = vmatpush.bf16.msra.mxu3 %v18398_v58 }
 0x388   : > { %v5538_v55 = vadd.f32 %v5519_v61, %v5261_v28  ;;  %v7293_v61 = vrot.slane %v7291_v63, 1  ;;  %v7289_v31 = vor.u32 %v7288_v32, %v7284_v44 }
 0x38a   : > { %v22931_v9 = vadd.f32 %v5664_v6, %v5538_v55  ;;  %v7294_v41 = vsel %vm2858_vm2, %v7289_v31, %v7293_v61  ;;  %v20398_v6 = vld [vmem:[#allocation2 + $0x9c] sm:$0xff]  }
 0x38b   : > { %v4995_v33 = vpop.f32.mrf.mxu3  ;;  %v7566_v47 = vshrl.u32 %v20398_v6, 16  ;;  %v7569_v56 = vshll.u32 %v20398_v6, 16 }
 0x38c   : > { %v4996_v19 = vadd.f32 %v4995_v33, %v22691_v53  ;;  %v5666_v30 = vpop.f32.mrf.mxu2  ;;  %v6171_v59 = vpop.f32.mrf.mxu0  ;;  %v7038_v53 = vsel %vm2595_vm1, %v7029_v29, %v22933_v8  ;;  %v7297_v33 = vor.u32 %v7295_v21, %v7293_v61  ;;  %v20400_v29 = vld [vmem:[#allocation2 + $0xa4] sm:$0xff]  }
 0x38d   : > { %v6316_v3 = vpop.f32.mrf.mxu1  ;;  %v7568_v34 = vrot.slane %v7566_v47, 3  ;;  %v7571_v15 = vrot.slane %v7569_v56, 4  ;;  %v18414_v47 = vld [vmem:[%s25019_s4 + $0x168] sm:$0xff] }
 0x38e   : > { %v5262_v46 = vadd.f32 %v5244_v12, %v4996_v19  ;;  %v18431_v12 = vld [vmem:[%s25019_s4 + $0x1f0] sm:$0xff]  ;;  %v18422_v56 = vld [vmem:[%s25019_s4 + $0x1a8] sm:$0xff]  ;;  %8096 = vmatpush.bf16.msra.mxu0 %v18414_v47 }
 0x38f   : > { %7166 = vmatmul.bf16.vlgmr.msrb.gmra.mxu0 %v7038_v53  ;;  %8517 = vmatpush.bf16.msra.mxu2 %v18431_v12  ;;  %v22973_v32 = vor.u32 %v7571_v15, %v7568_v34 }
 0x390   : > { %v5539_v25 = vadd.f32 %v5521_v35, %v5262_v46  ;;  %6970 = vmatmul.bf16.vlgmr.msrb.gmra.mxu3 %v6898_v36  ;;  %7415 = vmatmul.bf16.vlgmr.msrb.gmra.mxu1 %v7294_v41  ;;  %v22986_v36 = vld [vmem:[#allocation2 + $0x98] sm:$0xff]  }
 0x391   : > { %7692 = vmatmul.bf16.vlgmr.msrb.gmra.mxu2 %v7564_v27  ;;  %v7573_v61 = vsel %vm2595_vm1, %v22936_v40, %v22973_v32  ;;  %v22990_v41 = vld [vmem:[#allocation2 + $0x9c] sm:$0xff]  ;;  %v7575_v27 = vshrl.u32 %v20400_v29, 16  ;;  %8373 = vmatpush.bf16.msra.mxu1 %v18422_v56 }
 0x392   : > { %v22948_v38 = vadd.f32 %v5666_v30, %v5539_v25  ;;  %v7052_v25 = vshll.u32 %v22986_v36, 16  ;;  %v18429_v56 = vld [vmem:[%s25019_s4 + $0x1e0] sm:$0xff] }
 0x393   : > { %v5894_v16 = vpop.f32.mrf.mxu3  ;;  %v7577_v15 = vrot.slane %v7575_v27, 3 }
 0x394   : > { %v5934_v43 = vadd.f32 %v5894_v16, %v22712_v45  ;;  %v6581_v10 = vpop.f32.mrf.mxu2  ;;  %v6173_v28 = vpop.f32.mrf.mxu0  ;;  %v7299_v45 = vshll.u32 %v22950_v51, 16 }
 0x395   : > { %v6318_v39 = vpop.f32.mrf.mxu1 }
 0x396   : > { %v6211_v35 = vadd.f32 %v6171_v59, %v5934_v43  ;;  %v22969_v37 = vrot.slane %v7299_v45, 1  ;;  %v7047_v59 = vsel %vm2595_vm1, %v22933_v8, %v22881_v24  ;;  %v7049_v8 = vshrl.u32 %v22986_v36, 16 }
 0x397   : > { %v7578_v43 = vshll.u32 %v20400_v29, 16  ;;  %v7307_v45 = vshll.u32 %v22990_v41, 16  ;;  %v20385_v29 = vld [vmem:[#allocation2 + $0x94] sm:$0xff]  }
 0x398   : > { %v6356_v17 = vadd.f32 %v6316_v3, %v6211_v35  ;;  %v7051_v35 = vrot.slane %v7049_v8, 3 }
 0x399   : > { %v23008_v58 = vrot.slane %v7307_v45, 1 }
 0x39a   : > { %v6621_v55 = vadd.f32 %v6581_v10, %v6356_v17  ;;  %v18430_v10 = vld [vmem:[%s25019_s4 + $0x1e8] sm:$0xff] }
 0x39b   : > { %v5896_v63 = vpop.f32.mrf.mxu3  ;;  %8518 = vmatpush.bf16.msra.mxu2 %v18430_v10 }
 0x39c   : > { %v6641_v22 = vadd.f32 %v22966_v62, %v6621_v55  ;;  %v5935_v1 = vadd.f32 %v5896_v63, %v22729_v26  ;;  %v6583_v48 = vpop.f32.mrf.mxu2  ;;  %v6176_v2 = vpop.f32.mrf.mxu0  ;;  %v7302_v26 = vsel %vm2858_vm2, %v7297_v33, %v22969_v37  ;;  %v7580_v55 = vrot.slane %v7578_v43, 4 }
 0x39d   : > { %v6321_v44 = vpop.f32.mrf.mxu1 }
 0x39e   : > { %v6657_v19 = vmax.f32 %v6641_v22, 0.0  ;;  %v6212_v30 = vadd.f32 %v6173_v28, %v5935_v1 }
 0x39f   : > { %7171 = vmatmul.bf16.gmra.mxu0 %v7047_v59  ;;  %8519 = vmatpush.bf16.msra.mxu2 %v18429_v56 }
 0x3a0   : > { %v6769_v46 = vmul.f32 %v6692_v11, %v6657_v19  ;;  %v6357_v3 = vadd.f32 %v6318_v39, %v6212_v30  ;;  %6975 = vmatmul.bf16.gmra.mxu3 %v20383_v0  ;;  %7420 = vmatmul.bf16.gmra.mxu1 %v7302_v26  ;;  %v7054_v39 = vrot.slane %v7052_v25, 4  ;;  %v23013_v30 = vor.u32 %v7580_v55, %v7577_v15 }
 0x3a1   : > { %7697 = vmatmul.bf16.gmra.mxu2 %v7573_v61  ;;  %v20402_v61 = vld [vmem:[#allocation2 + $0xac] sm:$0xff]  }
 0x3a2   : > { %v6785_v31 = vpack.c.bf16 %v6769_v46, %v6769_v46  ;;  %v6622_v50 = vadd.f32 %v6583_v48, %v6357_v3  ;;  %v23005_v1 = vor.u32 %v7054_v39, %v7051_v35  ;;  %v7303_v48 = vshrl.u32 %v22950_v51, 16  ;;  %v6702_v46 = vpop.permute.xlu0 %6701 }
 0x3a3   : > { %v5899_v53 = vpop.f32.mrf.mxu3  ;;  %v7587_v47 = vshll.u32 %v20402_v61, 16 }
 0x3a4   : > { %6801 = vst.msk [vmem:[#allocation3 + $0x50] sm:$0xf] %vm313_vm3, %v6785_v31  ;;  %v6642_v6 = vadd.f32 %v22966_v62, %v6622_v50  ;;  %v5936_v40 = vadd.f32 %v5899_v53, %v22741_v14  ;;  %v6586_v16 = vpop.f32.mrf.mxu2  ;;  %v6178_v12 = vpop.f32.mrf.mxu0  ;;  %v7305_v11 = vor.u32 %v7303_v48, %v22969_v37  ;;  %v7582_v37 = vsel %vm2595_vm1, %v22973_v32, %v23013_v30  ;;  %v23027_v53 = vld [vmem:[#allocation2 + $0xa0] sm:$0xff]  }
 0x3a5   : > { %v6323_v28 = vpop.f32.mrf.mxu1  ;;  %v6697_v14 = vpop.permute.xlu2 %6696 }
 0x3a6   : > { %v6658_v18 = vmax.f32 %v6642_v6, 0.0  ;;  %v6213_v57 = vadd.f32 %v6176_v2, %v5936_v40  ;;  %v7310_v3 = vsel %vm2858_vm2, %v7305_v11, %v23008_v58  ;;  %v7061_v6 = vshll.u32 %v23027_v53, 16  ;;  %v23031_v40 = vld [vmem:[#allocation2 + $0xa4] sm:$0xff] }
 0x3a8   : > { %v6770_v17 = vmul.f32 %v6697_v14, %v6658_v18  ;;  %v6358_v34 = vadd.f32 %v6321_v44, %v6213_v57  ;;  %v18397_v44 = vld [vmem:[%s25019_s4 + $0x120] sm:$0xff]  ;;  %v7063_v45 = vrot.slane %v7061_v6, 4 }
 0x3a9   : > { %7832 = vmatpush.bf16.msra.mxu3 %v18397_v44  ;;  %v18421_v18 = vld [vmem:[%s25019_s4 + $0x1a0] sm:$0xff] }
 0x3aa   : > { %v6786_v63 = vpack.c.bf16 %v6770_v17, %v6770_v17  ;;  %v6623_v21 = vadd.f32 %v6586_v16, %v6358_v34  ;;  %v7584_v16 = vshrl.u32 %v20402_v61, 16  ;;  %v7315_v17 = vshll.u32 %v23031_v40, 16  ;;  %8374 = vmatpush.bf16.msra.mxu1 %v18421_v18  ;;  %v18412_v18 = vld [vmem:[%s25019_s4 + $0x158] sm:$0xff] }
 0x3ab   : > { %v5901_v22 = vpop.f32.mrf.mxu3 }
 0x3ac   : > { %6802 = vst.msk [vmem:[#allocation3 + $0x54] sm:$0xf] %vm313_vm3, %v6786_v63  ;;  %v6643_v2 = vadd.f32 %v22966_v62, %v6623_v21  ;;  %v5937_v33 = vadd.f32 %v5901_v22, %v22758_v23  ;;  %v6588_v19 = vpop.f32.mrf.mxu2  ;;  %v6181_v0 = vpop.f32.mrf.mxu0  ;;  %v7056_v23 = vsel %vm2595_vm1, %v22881_v24, %v23005_v1  ;;  %v7058_v24 = vshrl.u32 %v23027_v53, 16 }
 0x3ad   : > { %v6326_v26 = vpop.f32.mrf.mxu1  ;;  %v7586_v55 = vrot.slane %v7584_v16, 3  ;;  %v7589_v63 = vrot.slane %v7587_v47, 4  ;;  %v6712_v61 = vpop.permute.xlu2 %6711 }
 0x3ae   : > { %v6659_v59 = vmax.f32 %v6643_v2, 0.0  ;;  %v6214_v51 = vadd.f32 %v6178_v12, %v5937_v33  ;;  %v18413_v12 = vld [vmem:[%s25019_s4 + $0x160] sm:$0xff]  ;;  %v7060_v39 = vrot.slane %v7058_v24, 3  ;;  %v7311_v33 = vshrl.u32 %v22990_v41, 16 }
 0x3af   : > { %7176 = vmatmul.bf16.gmra.mxu0 %v7056_v23 }
 0x3b0   : > { %v6771_v31 = vmul.f32 %v6702_v46, %v6659_v59  ;;  %v6359_v50 = vadd.f32 %v6323_v28, %v6214_v51  ;;  %6980 = vmatmul.bf16.gmra.mxu3 %v20385_v29  ;;  %7425 = vmatmul.bf16.gmra.mxu1 %v7310_v3  ;;  %v23046_v2 = vor.u32 %v7063_v45, %v7060_v39  ;;  %v18396_v51 = vld [vmem:[%s25019_s4 + $0x118] sm:$0xff] }
 0x3b1   : > { %7702 = vmatmul.bf16.gmra.mxu2 %v7582_v37  ;;  %8097 = vmatpush.bf16.msra.mxu0 %v18413_v12  ;;  %v23054_v59 = vor.u32 %v7589_v63, %v7586_v55  ;;  %v7313_v29 = vor.u32 %v7311_v33, %v23008_v58  ;;  %v20387_v3 = vld [vmem:[#allocation2 + $0x9c] sm:$0xff]   ;;  %v20404_v37 = vld [vmem:[#allocation2 + $0xb4] sm:$0xff]  }
 0x3b2   : > { %v6787_v8 = vpack.c.bf16 %v6771_v31, %v6771_v31  ;;  %v6624_v25 = vadd.f32 %v6588_v19, %v6359_v50  ;;  %v23049_v19 = vrot.slane %v7315_v17, 1  ;;  %7833 = vmatpush.bf16.msra.mxu3 %v18396_v51  ;;  %v23065_v50 = vld [vmem:[#allocation2 + $0xa8] sm:$0xff]   ;;  %v18428_v12 = vld [vmem:[%s25019_s4 + $0x1d8] sm:$0xff] }
 0x3b3   : > { %v5904_v27 = vpop.f32.mrf.mxu3  ;;  %v7591_v58 = vsel %vm2595_vm1, %v23013_v30, %v23054_v59  ;;  %v7070_v16 = vshll.u32 %v23065_v50, 16  ;;  %8520 = vmatpush.bf16.msra.mxu2 %v18428_v12 }
 0x3b4   : > { %6803 = vst.msk [vmem:[#allocation3 + $0x58] sm:$0xf] %vm313_vm3, %v6787_v8  ;;  %v6644_v43 = vadd.f32 %v22966_v62, %v6624_v25  ;;  %v5938_v32 = vadd.f32 %v5904_v27, %v22770_v5  ;;  %v6591_v10 = vpop.f32.mrf.mxu2  ;;  %v6183_v57 = vpop.f32.mrf.mxu0  ;;  %v7318_v31 = vsel %vm2858_vm2, %v7313_v29, %v23049_v19 }
 0x3b5   : > { %v6328_v35 = vpop.f32.mrf.mxu1  ;;  %v6707_v5 = vpop.permute.xlu1 %6706  ;;  %8098 = vmatpush.bf16.msra.mxu0 %v18412_v18  ;;  %v7072_v45 = vrot.slane %v7070_v16, 4  ;;  %v23121_v18 = vld [vmem:[#allocation2 + $0xb4] sm:$0xff] }
 0x3b6   : > { %v6660_v28 = vmax.f32 %v6644_v43, 0.0  ;;  %v6215_v14 = vadd.f32 %v6181_v0, %v5938_v32  ;;  %v23072_v43 = vld [vmem:[#allocation2 + $0xac] sm:$0xff]  ;;  %v7593_v32 = vshrl.u32 %v20404_v37, 16 }
 0x3b7   : > { %v7323_v17 = vshll.u32 %v23072_v43, 16 }
 0x3b8   : > { %v6772_v34 = vmul.f32 %v6707_v5, %v6660_v28  ;;  %v6360_v15 = vadd.f32 %v6326_v26, %v6215_v14 }
 0x3ba   : > { %v6788_v21 = vpack.c.bf16 %v6772_v34, %v6772_v34  ;;  %v6625_v22 = vadd.f32 %v6591_v10, %v6360_v15  ;;  %v7596_v10 = vshll.u32 %v20404_v37, 16  ;;  %v7595_v34 = vrot.slane %v7593_v32, 3  ;;  %v23117_v32 = vld [vmem:[#allocation2 + $0xb0] sm:$0xff]  }
 0x3bb   : > { %v5906_v48 = vpop.f32.mrf.mxu3  ;;  %v7079_v12 = vshll.u32 %v23117_v32, 16 }
 0x3bc   : > { %6804 = vst.msk [vmem:[#allocation3 + $0x5c] sm:$0xf] %vm313_vm3, %v6788_v21  ;;  %v6645_v44 = vadd.f32 %v22966_v62, %v6625_v22  ;;  %v5939_v0 = vadd.f32 %v5906_v48, %v22788_v20  ;;  %v6593_v11 = vpop.f32.mrf.mxu2  ;;  %v6186_v26 = vpop.f32.mrf.mxu0  ;;  %v7065_v20 = vsel %vm2595_vm1, %v23005_v1, %v23046_v2  ;;  %v7067_v1 = vshrl.u32 %v23065_v50, 16  ;;  %v19655_v21 = vld [vmem:[#allocation3 + $0x50] sm:$0xff]  }
 0x3bd   : > { %v6331_v23 = vpop.f32.mrf.mxu1  ;;  %v7598_v15 = vrot.slane %v7596_v10, 4 }
 0x3be   : > { %v6661_v46 = vmax.f32 %v6645_v44, 0.0  ;;  %v6216_v41 = vadd.f32 %v6183_v57, %v5939_v0  ;;  %v18420_v57 = vld [vmem:[%s25019_s4 + $0x198] sm:$0xff]  ;;  %v7069_v39 = vrot.slane %v7067_v1, 3  ;;  %v7319_v0 = vshrl.u32 %v23031_v40, 16 }
 0x3bf   : > { %7181 = vmatmul.bf16.gmra.mxu0 %v7065_v20  ;;  %8375 = vmatpush.bf16.msra.mxu1 %v18420_v57  ;;  %v23092_v51 = vor.u32 %v7598_v15, %v7595_v34  ;;  %v20406_v1 = vld [vmem:[#allocation2 + $0xbc] sm:$0xff]  }
 0x3c0   : > { %v6773_v8 = vmul.f32 %v6712_v61, %v6661_v46  ;;  %v6361_v25 = vadd.f32 %v6328_v35, %v6216_v41  ;;  %6985 = vmatmul.bf16.gmra.mxu3 %v20387_v3  ;;  %7430 = vmatmul.bf16.gmra.mxu1 %v7318_v31  ;;  %v23087_v44 = vor.u32 %v7072_v45, %v7069_v39  ;;  %v19172_v61 = vunpack.c.h.b16 %v19655_v21  ;;  %v18411_v39 = vld [vmem:[%s25019_s4 + $0x150] sm:$0xff] }
 0x3c1   : > { %7707 = vmatmul.bf16.gmra.mxu2 %v7591_v58  ;;  %v7321_v20 = vor.u32 %v7319_v0, %v23049_v19  ;;  %v7600_v16 = vsel %vm2595_vm1, %v23054_v59, %v23092_v51  ;;  %v7602_v57 = vshrl.u32 %v20406_v1, 16  ;;  %8099 = vmatpush.bf16.msra.mxu0 %v18411_v39  ;;  %v7331_v21 = vshll.u32 %v23121_v18, 16 }
 0x3c2   : > { %v6789_v27 = vpack.c.bf16 %v6773_v8, %v6773_v8  ;;  %v6626_v24 = vadd.f32 %v6593_v11, %v6361_v25  ;;  %v23090_v11 = vrot.slane %v7323_v17, 1  ;;  %v20389_v25 = vld [vmem:[#allocation2 + $0xa4] sm:$0xff]  }
 0x3c3   : > { %v5909_v6 = vpop.f32.mrf.mxu3 }
 0x3c4   : > { %6805 = vst.msk [vmem:[#allocation3 + $0x60] sm:$0xf] %vm313_vm3, %v6789_v27  ;;  %v6646_v47 = vadd.f32 %v22966_v62, %v6626_v24  ;;  %v5940_v56 = vadd.f32 %v5909_v6, %v22802_v52  ;;  %v6596_v30 = vpop.f32.mrf.mxu2  ;;  %v6188_v28 = vpop.f32.mrf.mxu0  ;;  %v23109_v27 = vsel %vm2595_vm1, %v23046_v2, %v23087_v44  ;;  %v7326_v24 = vsel %vm2858_vm2, %v7321_v20, %v23090_v11 }
 0x3c5   : > { %v6333_v5 = vpop.f32.mrf.mxu1  ;;  %v6717_v52 = vpop.permute.xlu0 %6716 }
 0x3c6   : > { %v6662_v14 = vmax.f32 %v6646_v47, 0.0  ;;  %v6217_v35 = vadd.f32 %v6186_v26, %v5940_v56  ;;  %v10294_v26 = vld [vmem:[#allocation3 + $0x58] sm:$0xf] }
 0x3c7   : > { %v23100_v3 = vunpack.c.l.b16 %v10294_v26 }
 0x3c8   : > { %v6774_v55 = vmul.f32 %v6717_v52, %v6662_v14  ;;  %v6362_v63 = vadd.f32 %v6331_v23, %v6217_v35  ;;  %v18395_v23 = vld [vmem:[%s25019_s4 + $0x110] sm:$0xff]  ;;  %v7605_v35 = vshll.u32 %v20406_v1, 16 }
 0x3c9   : > { %7834 = vmatpush.bf16.msra.mxu3 %v18395_v23  ;;  %v23104_v58 = vpack.c.b16 %v23100_v3, %v19172_v61  ;;  %v18419_v52 = vld [vmem:[%s25019_s4 + $0x190] sm:$0xff]  ;;  %v7327_v23 = vshrl.u32 %v23072_v43, 16  ;;  %v23139_v61 = vrot.slane %v7331_v21, 1 }
 0x3ca   : > { %v6790_v22 = vpack.c.bf16 %v6774_v55, %v6774_v55  ;;  %v6627_v48 = vadd.f32 %v6596_v30, %v6362_v63  ;;  %v7076_v30 = vshrl.u32 %v23117_v32, 16  ;;  %v7081_v63 = vrot.slane %v7079_v12, 4  ;;  %8376 = vmatpush.bf16.msra.mxu1 %v18419_v52 }
 0x3cb   : > { %v5911_v33 = vpop.f32.mrf.mxu3  ;;  %v7607_v0 = vrot.slane %v7605_v35, 4 }
 0x3cc   : > { %6806 = vst.msk [vmem:[#allocation3 + $0x64] sm:$0xf] %vm313_vm3, %v6790_v22  ;;  %v6647_v29 = vadd.f32 %v22966_v62, %v6627_v48  ;;  %v5941_v46 = vadd.f32 %v5911_v33, %v22819_v54  ;;  %v6598_v41 = vpop.f32.mrf.mxu2  ;;  %v6191_v40 = vpop.f32.mrf.mxu0  ;;  %v7078_v55 = vrot.slane %v7076_v30, 3  ;;  %v7604_v33 = vrot.slane %v7602_v57, 3 }
 0x3cd   : > { %v6336_v8 = vpop.f32.mrf.mxu1  ;;  %v6722_v54 = vpop.permute.xlu1 %6721 }
 0x3ce   : > { %v6663_v31 = vmax.f32 %v6647_v29, 0.0  ;;  %v6218_v37 = vadd.f32 %v6188_v28, %v5941_v46 }
 0x3cf   : > { %7186 = vmatmul.bf16.gmra.mxu0 %v23109_v27 }
 0x3d0   : > { %v6775_v6 = vmul.f32 %v6722_v54, %v6663_v31  ;;  %v6363_v19 = vadd.f32 %v6333_v5, %v6218_v37  ;;  %6990 = vmatmul.bf16.gmra.mxu3 %v20389_v25  ;;  %7435 = vmatmul.bf16.gmra.mxu1 %v7326_v24  ;;  %v18427_v5 = vld [vmem:[%s25019_s4 + $0x1d0] sm:$0xff]  ;;  %v23144_v37 = vor.u32 %v7607_v0, %v7604_v33 }
 0x3d1   : > { %7712 = vmatmul.bf16.gmra.mxu2 %v7600_v16  ;;  %v7329_v54 = vor.u32 %v7327_v23, %v23090_v11  ;;  %v23180_v23 = vld [vmem:[#allocation2 + $0xc8] sm:$0xff]  }
 0x3d2   : > { %v6791_v10 = vpack.c.bf16 %v6775_v6, %v6775_v6  ;;  %v6628_v47 = vadd.f32 %v6598_v41, %v6363_v19  ;;  %8521 = vmatpush.bf16.msra.mxu2 %v18427_v5  ;;  %v23136_v41 = vor.u32 %v7081_v63, %v7078_v55  ;;  %v20391_v6 = vld [vmem:[#allocation2 + $0xac] sm:$0xff]   ;;  %v6732_v19 = vpop.permute.xlu0 %6731  ;;  %v7609_v11 = vsel %vm2595_vm1, %v23092_v51, %v23144_v37 }
 0x3d3   : > { %v5914_v56 = vpop.f32.mrf.mxu3  ;;  %v7334_v16 = vsel %vm2858_vm2, %v7329_v54, %v23139_v61 }
 0x3d4   : > { %6807 = vst.msk [vmem:[#allocation3 + $0x68] sm:$0xf] %vm313_vm3, %v6791_v10  ;;  %v6648_v28 = vadd.f32 %v22966_v62, %v6628_v47  ;;  %v5942_v59 = vadd.f32 %v5914_v56, %v22833_v7  ;;  %v6601_v14 = vpop.f32.mrf.mxu2  ;;  %v6193_v45 = vpop.f32.mrf.mxu0  ;;  %v23157_v10 = vld [vmem:[#allocation2 + $0xb8] sm:$0xff]   ;;  %v20407_v47 = vld [vmem:[#allocation2 + $0xc4] sm:$0xff]  }
 0x3d5   : > { %v6338_v15 = vpop.f32.mrf.mxu1  ;;  %v6727_v7 = vpop.permute.xlu2 %6726  ;;  %v7085_v57 = vshrl.u32 %v23157_v10, 16  ;;  %v7611_v35 = vshrl.u32 %v20407_v47, 16  ;;  %v7614_v51 = vshll.u32 %v20407_v47, 16  ;;  %v7223_v47 = vld [vmem:[#allocation2 + $0xc4] sm:$0x1] }
 0x3d6   : > { %v6664_v17 = vmax.f32 %v6648_v28, 0.0  ;;  %v6219_v34 = vadd.f32 %v6191_v40, %v5942_v59  ;;  %v7088_v28 = vshll.u32 %v23157_v10, 16 }
 0x3d7   : > { %v7087_v21 = vrot.slane %v7085_v57, 3  ;;  %v20392_v57 = vld [vmem:[#allocation2 + $0xb4] sm:$0xff]  }
 0x3d8   : > { %v6776_v22 = vmul.f32 %v6727_v7, %v6664_v17  ;;  %v6364_v48 = vadd.f32 %v6336_v8, %v6219_v34  ;;  %v18394_v8 = vld [vmem:[%s25019_s4 + $0x108] sm:$0xff] }
 0x3d9   : > { %7835 = vmatpush.bf16.msra.mxu3 %v18394_v8  ;;  %v18410_v17 = vld [vmem:[%s25019_s4 + $0x148] sm:$0xff] }
 0x3da   : > { %v6792_v26 = vpack.c.bf16 %v6776_v22, %v6776_v22  ;;  %v6629_v29 = vadd.f32 %v6601_v14, %v6364_v48  ;;  %v23165_v14 = vld [vmem:[#allocation2 + $0xbc] sm:$0xff]  ;;  %v18418_v34 = vld [vmem:[%s25019_s4 + $0x188] sm:$0xff]  ;;  %8100 = vmatpush.bf16.msra.mxu0 %v18410_v17  ;;  %v6737_v22 = vpop.permute.xlu1 %6736 }
 0x3db   : > { %v5916_v46 = vpop.f32.mrf.mxu3  ;;  %v7339_v48 = vshll.u32 %v23165_v14, 16  ;;  %8377 = vmatpush.bf16.msra.mxu1 %v18418_v34 }
 0x3dc   : > { %6808 = vst.msk [vmem:[#allocation3 + $0x6c] sm:$0xf] %vm313_vm3, %v6792_v26  ;;  %v6649_v40 = vadd.f32 %v22966_v62, %v6629_v29  ;;  %v5943_v20 = vadd.f32 %v5916_v46, %v22855_v13  ;;  %v6603_v31 = vpop.f32.mrf.mxu2  ;;  %v6196_v25 = vpop.f32.mrf.mxu0  ;;  %v23153_v13 = vsel %vm2595_vm1, %v23087_v44, %v23136_v41  ;;  %v7613_v26 = vrot.slane %v7611_v35, 3  ;;  %v6833_v46 = vld [vmem:[#allocation2 + $0xc0] sm:$0xf] }
 0x3dd   : > { %v6341_v1 = vpop.f32.mrf.mxu1  ;;  %v7616_v29 = vrot.slane %v7614_v51, 4  ;;  %v23185_v54 = vrot.slane %v7339_v48, 1  ;;  %v18409_v48 = vld [vmem:[%s25019_s4 + $0x140] sm:$0xff] }
 0x3de   : > { %v6665_v24 = vmax.f32 %v6649_v40, 0.0  ;;  %v6220_v43 = vadd.f32 %v6193_v45, %v5943_v20  ;;  %v18426_v45 = vld [vmem:[%s25019_s4 + $0x1c8] sm:$0xff]  ;;  %8101 = vmatpush.bf16.msra.mxu0 %v18409_v48 }
 0x3df   : > { %7191 = vmatmul.bf16.gmra.mxu0 %v23153_v13  ;;  %8522 = vmatpush.bf16.msra.mxu2 %v18426_v45 }
 0x3e0   : > { %v6777_v56 = vmul.f32 %v6732_v19, %v6665_v24  ;;  %v6365_v30 = vadd.f32 %v6338_v15, %v6220_v43  ;;  %6995 = vmatmul.bf16.gmra.mxu3 %v20391_v6  ;;  %7440 = vmatmul.bf16.gmra.mxu1 %v7334_v16  ;;  %v23187_v24 = vunpack.c.l.b16 %v6833_v46  ;;  %v19056_v43 = vunpack.c.h.b16 %v23180_v23 }
 0x3e1   : > { %7717 = vmatmul.bf16.gmra.mxu2 %v7609_v11  ;;  %v23193_v16 = vor.u32 %v7616_v29, %v7613_v26 }
 0x3e2   : > { %v6793_v12 = vpack.c.bf16 %v6777_v56, %v6777_v56  ;;  %v6630_v44 = vadd.f32 %v6603_v31, %v6365_v30  ;;  %v7021_v35 = vpack.c.b16 %v23187_v24, %v23187_v24 }
 0x3e3   : > { %v5919_v59 = vpop.f32.mrf.mxu3 }
 0x3e4   : > { %6809 = vst.msk [vmem:[#allocation3 + $0x70] sm:$0xf] %vm313_vm3, %v6793_v12  ;;  %v6650_v5 = vadd.f32 %v22966_v62, %v6630_v44  ;;  %v5944_v39 = vadd.f32 %v5919_v59, %v22869_v42  ;;  %v6606_v52 = vpop.f32.mrf.mxu2  ;;  %v6198_v15 = vpop.f32.mrf.mxu0  ;;  %v7090_v42 = vrot.slane %v7088_v28, 4  ;;  %v7094_v34 = vshrl.u32 %v7021_v35, 16 }
 0x3e5   : > { %v6343_v63 = vpop.f32.mrf.mxu1 }
 0x3e6   : > { %v6666_v7 = vmax.f32 %v6650_v5, 0.0  ;;  %v6221_v55 = vadd.f32 %v6196_v25, %v5944_v39  ;;  %v23182_v31 = vor.u32 %v7090_v42, %v7087_v21  ;;  %v7335_v25 = vshrl.u32 %v23121_v18, 16  ;;  %v18393_v18 = vld [vmem:[%s25019_s4 + $0x100] sm:$0xff] }
 0x3e7   : > { %7836 = vmatpush.bf16.msra.mxu3 %v18393_v18  ;;  %v7273_v5 = vunpack.c.l.b16 %v7223_v47  ;;  %v7547_v39 = vpack.c.b16 %v19056_v43, %v19056_v43 }
 0x3e8   : > { %v6778_v33 = vmul.f32 %v6737_v22, %v6666_v7  ;;  %v6366_v0 = vadd.f32 %v6341_v1, %v6221_v55  ;;  %v7337_v30 = vor.u32 %v7335_v25, %v23139_v61  ;;  %v23202_v28 = vsel %vm2595_vm1, %v23136_v41, %v23182_v31 }
 0x3e9   : > { %v7618_v41 = vsel %vm2595_vm1, %v23144_v37, %v23193_v16  ;;  %v7282_v7 = vpack.c.b16 %v7273_v5, %v7273_v5  ;;  %v7620_v55 = vshrl.u32 %v7547_v39, 16  ;;  %v7623_v22 = vshll.u32 %v7547_v39, 16  ;;  %v18425_v37 = vld [vmem:[%s25019_s4 + $0x1c0] sm:$0xff]  ;;  %v18448_v39 = vld [vmem:[%s25019_s4 + $0x238] sm:$0xff] }
 0x3ea   : > { %v6794_v40 = vpack.c.bf16 %v6778_v33, %v6778_v33  ;;  %v6631_v20 = vadd.f32 %v6606_v52, %v6366_v0  ;;  %v7342_v59 = vsel %vm2858_vm2, %v7337_v30, %v23185_v54  ;;  %v18417_v33 = vld [vmem:[%s25019_s4 + $0x180] sm:$0xff]  ;;  %8523 = vmatpush.bf16.msra.mxu2 %v18425_v37  ;;  %v8159_v30 = vld [vmem:[#allocation2 + $0x98] sm:$0x8]  ;;  %v19024_v5 = vunpack.c.h.b16 %v23157_v10  ;;  %v18447_v37 = vld [vmem:[%s25019_s4 + $0x230] sm:$0xff] }
 0x3eb   : > { %v5921_v8 = vpop.f32.mrf.mxu3  ;;  %8378 = vmatpush.bf16.msra.mxu1 %v18417_v33  ;;  %8781 = vmatpush.bf16.msrb.mxu3 %v18448_v39 }
 0x3ec   : > { %6810 = vst.msk [vmem:[#allocation3 + $0x74] sm:$0xf] %vm313_vm3, %v6794_v40  ;;  %v6651_v1 = vadd.f32 %v22966_v62, %v6631_v20  ;;  %v5945_v6 = vadd.f32 %v5921_v8, %v22894_v49  ;;  %v6608_v19 = vpop.f32.mrf.mxu2  ;;  %v6201_v56 = vpop.f32.mrf.mxu0  ;;  %v7096_v40 = vrot.slane %v7094_v34, 3  ;;  %v7347_v8 = vshll.u32 %v7282_v7, 16 }
 0x3ed   : > { %v6346_v44 = vpop.f32.mrf.mxu1  ;;  %v6742_v49 = vpop.permute.xlu2 %6741  ;;  %v6905_v34 = vpack.c.b16 %v23187_v24, %v19024_v5  ;;  %v18401_v24 = vld [vmem:[#allocation2 + $0x90] sm:$0xff] }
 0x3ee   : > { %v6667_v11 = vmax.f32 %v6651_v1, 0.0  ;;  %v6222_v12 = vadd.f32 %v6198_v15, %v5945_v6  ;;  %v7097_v15 = vshll.u32 %v7021_v35, 16  ;;  %v7622_v1 = vrot.slane %v7620_v55, 3  ;;  %v6752_v7 = vpop.permute.xlu1 %6751 }
 0x3ef   : > { %7196 = vmatmul.bf16.gmra.mxu0 %v23202_v28  ;;  %v7625_v6 = vrot.slane %v7623_v22, 4  ;;  %8782 = vmatpush.bf16.msrb.mxu3 %v18447_v37  ;;  %v18403_v37 = vld [vmem:[#allocation2 + $0xa0] sm:$0xff] }
 0x3f0   : > { %v6779_v61 = vmul.f32 %v6742_v49, %v6667_v11  ;;  %v6367_v52 = vadd.f32 %v6343_v63, %v6222_v12  ;;  %7000 = vmatmul.bf16.gmra.mxu3 %v20392_v57  ;;  %7445 = vmatmul.bf16.gmra.mxu1 %v7342_v59  ;;  %v7099_v20 = vrot.slane %v7097_v15, 4  ;;  %v7349_v57 = vrot.slane %v7347_v8, 1  ;;  %v23226_v49 = vld [vmem:[#allocation2 + $0x9c] sm:$0xf] }
 0x3f1   : > { %7722 = vmatmul.bf16.gmra.mxu2 %v7618_v41  ;;  %v8209_v41 = vunpack.c.l.b16 %v8159_v30  ;;  %v8210_v15 = vunpack.c.l.b16 %v23226_v49 }
 0x3f2   : > { %v6795_v51 = vpack.c.bf16 %v6779_v61, %v6779_v61  ;;  %v6632_v45 = vadd.f32 %v6608_v19, %v6367_v52  ;;  %v7343_v19 = vshrl.u32 %v23165_v14, 16  ;;  %v7100_v12 = vor.u32 %v7099_v20, %v7096_v40  ;;  %v18456_v61 = vld [vmem:[%s25021_s6 + $0x38] sm:$0xff] }
 0x3f3   : > { %v5924_v17 = vpop.f32.mrf.mxu3  ;;  %v7626_v14 = vor.u32 %v7625_v6, %v7622_v1  ;;  %9153 = vmatpush.bf16.msrb.mxu0 %v18456_v61  ;;  %v7973_v20 = vshll.u32 %v18401_v24, 16 }
 0x3f4   : > { %6811 = vst.msk [vmem:[#allocation3 + $0x78] sm:$0xf] %vm313_vm3, %v6795_v51  ;;  %v6652_v63 = vadd.f32 %v22966_v62, %v6632_v45  ;;  %v5946_v21 = vadd.f32 %v5924_v17, %v22900_v60  ;;  %v6611_v42 = vpop.f32.mrf.mxu2  ;;  %v6203_v0 = vpop.f32.mrf.mxu0  ;;  %v7101_v55 = vsel %vm2595_vm1, %v23182_v31, %v7100_v12 }
 0x3f5   : > { %v6348_v46 = vpop.f32.mrf.mxu1  ;;  %v6747_v60 = vpop.permute.xlu0 %6746  ;;  %v7627_v22 = vsel %vm2595_vm1, %v23193_v16, %v7626_v14 }
 0x3f6   : > { %v6668_v26 = vmax.f32 %v6652_v63, 0.0  ;;  %v6223_v29 = vadd.f32 %v6201_v56, %v5946_v21  ;;  %v7345_v56 = vor.u32 %v7343_v19, %v23185_v54  ;;  %v18468_v54 = vld [vmem:[%s25021_s6 + $0x58] sm:$0xff]  ;;  %v6757_v19 = vpop.permute.xlu2 %6756 }
 0x3f7   : > { %9575 = vmatpush.bf16.msrb.mxu2 %v18468_v54 }
 0x3f8   : > { %v6780_v25 = vmul.f32 %v6747_v60, %v6668_v26  ;;  %v6368_v43 = vadd.f32 %v6346_v44, %v6223_v29  ;;  %v7350_v63 = vsel %vm2858_vm2, %v7345_v56, %v7349_v57  ;;  %v23254_v29 = vld [vmem:[#allocation2 + $0x98] sm:$0xff] }
 0x3fa   : > { %v6796_v47 = vpack.c.bf16 %v6780_v25, %v6780_v25  ;;  %v6633_v18 = vadd.f32 %v6611_v42, %v6368_v43 }
 0x3fb   : > { %v5926_v11 = vpop.f32.mrf.mxu3 }
 0x3fc   : > { %6812 = vst.msk [vmem:[#allocation3 + $0x7c] sm:$0xf] %vm313_vm3, %v6796_v47  ;;  %v6653_v59 = vadd.f32 %v22966_v62, %v6633_v18  ;;  %v5947_v44 = vadd.f32 %v5926_v11, %v22916_v4  ;;  %v6613_v35 = vpop.f32.mrf.mxu2  ;;  %v6206_v52 = vpop.f32.mrf.mxu0  ;;  %v18452_v4 = vld [vmem:[%s25021_s6 + $0x18] sm:$0xff]  ;;  %v7978_v47 = vshll.u32 %v23254_v29, 16  ;;  %v7975_v11 = vrot.slane %v7973_v20, 1 }
 0x3fd   : > { %v6351_v17 = vpop.f32.mrf.mxu1  ;;  %9341 = vmatpush.bf16.msrb.mxu1 %v18452_v4 }
 0x3fe   : > { %v6669_v51 = vmax.f32 %v6653_v59, 0.0  ;;  %v6224_v45 = vadd.f32 %v6203_v0, %v5947_v44  ;;  %v8226_v0 = vpack.c.b16 %v8210_v15, %v8209_v41  ;;  %v7980_v44 = vrot.slane %v7978_v47, 1 }
 0x3ff   : > { %7201 = vmatmul.bf16.gmra.mxu0 %v7101_v55 }
 0x400   : > { %v6781_v21 = vmul.f32 %v6752_v7, %v6669_v51  ;;  %v6369_v42 = vadd.f32 %v6348_v46, %v6224_v45  ;;  %7005 = vmatmul.bf16.gmra.mxu3 %v6905_v34  ;;  %7450 = vmatmul.bf16.gmra.mxu1 %v7350_v63  ;;  %v8236_v1 = vshrl.u32 %v8226_v0, 16  ;;  %v8239_v6 = vshll.u32 %v8226_v0, 16  ;;  %v6762_v45 = vpop.permute.xlu0 %6761 }
 0x401   : > { %7727 = vmatmul.bf16.gmra.mxu2 %v7627_v22 }
 0x402   : > { %v6797_v48 = vpack.c.bf16 %v6781_v21, %v6781_v21  ;;  %v6634_v33 = vadd.f32 %v6613_v35, %v6369_v42  ;;  %v8238_v57 = vrot.slane %v8236_v1, 3  ;;  %v8241_v49 = vrot.slane %v8239_v6, 4 }
 0x403   : > { %v5929_v26 = vpop.f32.mrf.mxu3  ;;  %v19059_v35 = vunpack.c.l.b16 %v23027_v53  ;;  %v7982_v6 = vshrl.u32 %v23254_v29, 16  ;;  %v18445_v29 = vld [vmem:[%s25019_s4 + $0x220] sm:$0xff] }
 0x404   : > { %6813 = vst.msk [vmem:[#allocation3 + $0x80] sm:$0xf] %vm313_vm3, %v6797_v48  ;;  %v6654_v46 = vadd.f32 %v22966_v62, %v6634_v33  ;;  %v5948_v16 = vadd.f32 %v5929_v26, %v22931_v9  ;;  %v6616_v60 = vpop.f32.mrf.mxu2  ;;  %v6208_v40 = vpop.f32.mrf.mxu0  ;;  %v7971_v9 = vshrl.u32 %v18401_v24, 16  ;;  %v8242_v51 = vor.u32 %v8241_v49, %v8238_v57  ;;  %v20056_v49 = vld [vmem:[#allocation2 + $0xa4] sm:$0xff]  }
 0x405   : > { %v6353_v43 = vpop.f32.mrf.mxu1  ;;  %v8452_v7 = vpack.c.b16 %v19059_v35, %v8210_v15  ;;  %v18404_v35 = vld [vmem:[#allocation2 + $0xa8] sm:$0xff] }
 0x406   : > { %v6670_v8 = vmax.f32 %v6654_v46, 0.0  ;;  %v6225_v25 = vadd.f32 %v6206_v52, %v5948_v16  ;;  %v7976_v61 = vor.u32 %v7975_v11, %v7971_v9  ;;  %v8251_v21 = vsel %vm2595_vm1, %v8242_v51, %v23046_v2  ;;  %v6767_v16 = vpop.permute.xlu1 %6766 }
 0x407   : > { %v7984_v11 = vor.u32 %v7982_v6, %v7980_v44 }
 0x408   : > { %v6782_v18 = vmul.f32 %v6757_v19, %v6670_v8  ;;  %v6370_v30 = vadd.f32 %v6351_v17, %v6225_v25  ;;  %v19589_v17 = vld [vmem:[#allocation2 + $0x90] sm:$0xff]   ;;  %v7981_v34 = vsel %vm2858_vm2, %v7976_v61, %v7980_v44  ;;  %v7994_v61 = vshll.u32 %v18404_v35, 16 }
 0x409   : > { %v18467_v8 = vld [vmem:[%s25021_s6 + $0x50] sm:$0xff] }
 0x40a   : > { %v6798_v12 = vpack.c.bf16 %v6782_v18, %v6782_v18  ;;  %v6635_v56 = vadd.f32 %v6616_v60, %v6370_v30  ;;  %v7986_v60 = vshll.u32 %v18403_v37, 16  ;;  %v18455_v25 = vld [vmem:[%s25021_s6 + $0x30] sm:$0xff]  ;;  %9576 = vmatpush.bf16.msrb.mxu2 %v18467_v8 }
 0x40b   : > { %v5931_v59 = vpop.f32.mrf.mxu3  ;;  %9154 = vmatpush.bf16.msrb.mxu0 %v18455_v25 }
 0x40c   : > { %6814 = vst.msk [vmem:[#allocation3 + $0x84] sm:$0xf] %vm313_vm3, %v6798_v12  ;;  %v6655_v5 = vadd.f32 %v22966_v62, %v6635_v56  ;;  %v5949_v14 = vadd.f32 %v5931_v59, %v22948_v38  ;;  %v6618_v39 = vpop.f32.mrf.mxu2  ;;  %v7167_v54 = vpop.f32.mrf.mxu0  ;;  %v18446_v38 = vld [vmem:[%s25019_s4 + $0x228] sm:$0xff]  ;;  %v7988_v19 = vrot.slane %v7986_v60, 1 }
 0x40d   : > { %v7416_v4 = vpop.f32.mrf.mxu1  ;;  %8783 = vmatpush.bf16.msrb.mxu3 %v18446_v38  ;;  %v18444_v38 = vld [vmem:[%s25019_s4 + $0x218] sm:$0xff] }
 0x40e   : > { %v6671_v52 = vmax.f32 %v6655_v5, 0.0  ;;  %v6226_v41 = vadd.f32 %v6208_v40, %v5949_v14  ;;  %v7989_v57 = vsel %vm2858_vm2, %v7984_v11, %v7988_v19 }
 0x40f   : > { %8102 = vmatmul.bf16.vlgmr.msra.gmra.mxu0 %v7981_v34 }
 0x410   : > { %v6783_v55 = vmul.f32 %v6762_v45, %v6671_v52  ;;  %v6371_v63 = vadd.f32 %v6353_v43, %v6226_v41  ;;  %7837 = vmatmul.bf16.vlgmr.msra.gmra.mxu3 %v19589_v17  ;;  %8379 = vmatmul.bf16.vlgmr.msra.gmra.mxu1 %v8251_v21  ;;  %v7990_v41 = vshrl.u32 %v18403_v37, 16 }
 0x411   : > { %8524 = vmatmul.bf16.vlgmr.msra.gmra.mxu2 %v8452_v7  ;;  %8784 = vmatpush.bf16.msrb.mxu3 %v18445_v29 }
 0x412   : > { %v6799_v42 = vpack.c.bf16 %v6783_v55, %v6783_v55  ;;  %v6636_v22 = vadd.f32 %v6618_v39, %v6371_v63  ;;  %v7992_v17 = vor.u32 %v7990_v41, %v7988_v19  ;;  %v20058_v63 = vld [vmem:[#allocation2 + $0xac] sm:$0xff]   ;;  %v20060_v19 = vld [vmem:[#allocation2 + $0xb4] sm:$0xff]  }
 0x413   : > { %v6971_v24 = vpop.f32.mrf.mxu3 }
 0x414   : > { %6815 = vst.msk [vmem:[#allocation3 + $0x88] sm:$0xf] %vm313_vm3, %v6799_v42  ;;  %v6656_v15 = vadd.f32 %v22966_v62, %v6636_v22  ;;  %v7168_v48 = vadd.f32 %v7167_v54, %v6971_v24  ;;  %v7693_v33 = vpop.f32.mrf.mxu2  ;;  %v7169_v0 = vpop.f32.mrf.mxu0  ;;  %v18451_v62 = vld [vmem:[%s25021_s6 + $0x10] sm:$0xff] }
 0x415   : > { %v7418_v46 = vpop.f32.mrf.mxu1  ;;  %9342 = vmatpush.bf16.msrb.mxu1 %v18451_v62  ;;  %v18405_v22 = vld [vmem:[#allocation2 + $0xb0] sm:$0xff]  ;;  %8785 = vmatpush.bf16.msrb.mxu3 %v18444_v38  ;;  %v18442_v38 = vld [vmem:[%s25019_s4 + $0x208] sm:$0xff] }
 0x416   : > { %v6672_v26 = vmax.f32 %v6656_v15, 0.0  ;;  %v7456_v2 = vadd.f32 %v7416_v4, %v7168_v48  ;;  %v7996_v4 = vrot.slane %v7994_v61, 1 }
 0x418   : > { %v6784_v40 = vmul.f32 %v6767_v16, %v6672_v26  ;;  %v23272_v20 = vadd.f32 %v7693_v33, %v7456_v2  ;;  %v7997_v55 = vsel %vm2858_vm2, %v7992_v17, %v7996_v4  ;;  %v18450_v2 = vld [vmem:[%s25021_s6 + $0x8] sm:$0xff]  ;;  %v7998_v16 = vshrl.u32 %v18404_v35, 16 }
 0x419   : > { %9343 = vmatpush.bf16.msrb.mxu1 %v18450_v2 }
 0x41a   : > { %v6800_v43 = vpack.c.bf16 %v6784_v40, %v6784_v40  ;;  %v8000_v62 = vor.u32 %v7998_v16, %v7996_v4  ;;  %v18453_v16 = vld [vmem:[%s25021_s6 + $0x20] sm:$0xff] }
 0x41b   : > { %v6973_v1 = vpop.f32.mrf.mxu3 }
 0x41c   : > { %6816 = vst.msk [vmem:[#allocation3 + $0x8c] sm:$0xf] %vm313_vm3, %v6800_v43  ;;  %v7170_v47 = vadd.f32 %v7169_v0, %v6973_v1  ;;  %v7695_v18 = vpop.f32.mrf.mxu2  ;;  %v7172_v30 = vpop.f32.mrf.mxu0  ;;  %v8002_v0 = vshll.u32 %v18405_v22, 16 }
 0x41d   : > { %v7421_v56 = vpop.f32.mrf.mxu1 }
 0x41e   : > { %v7457_v12 = vadd.f32 %v7418_v46, %v7170_v47  ;;  %v8004_v60 = vrot.slane %v8002_v0, 1 }
 0x41f   : > { %8107 = vmatmul.bf16.gmra.mxu0 %v7989_v57 }
 0x420   : > { %v23286_v59 = vadd.f32 %v7695_v18, %v7457_v12  ;;  %7842 = vmatmul.bf16.gmra.mxu3 %v22986_v36  ;;  %8384 = vmatmul.bf16.gmra.mxu1 %v23109_v27  ;;  %v8005_v6 = vsel %vm2858_vm2, %v8000_v62, %v8004_v60  ;;  %v23319_v18 = vld [vmem:[#allocation2 + $0xc0] sm:$0xff]   ;;  %v18406_v12 = vld [vmem:[#allocation2 + $0xb8] sm:$0xff] }
 0x421   : > { %8529 = vmatmul.bf16.gmra.mxu2 %v20056_v49  ;;  %v8280_v49 = vshrl.u32 %v23319_v18, 16  ;;  %v8283_v29 = vshll.u32 %v23319_v18, 16 }
 0x423   : > { %v6976_v9 = vpop.f32.mrf.mxu3 }
 0x424   : > { %v7173_v44 = vadd.f32 %v7172_v30, %v6976_v9  ;;  %v7698_v5 = vpop.f32.mrf.mxu2  ;;  %v7174_v14 = vpop.f32.mrf.mxu0  ;;  %v18443_v30 = vld [vmem:[%s25019_s4 + $0x210] sm:$0xff] }
 0x425   : > { %v7423_v54 = vpop.f32.mrf.mxu1  ;;  %8786 = vmatpush.bf16.msrb.mxu3 %v18443_v30 }
 0x426   : > { %v7458_v39 = vadd.f32 %v7421_v56, %v7173_v44 }
 0x428   : > { %v23293_v52 = vadd.f32 %v7698_v5, %v7458_v39  ;;  %v8282_v5 = vrot.slane %v8280_v49, 3 }
 0x429   : > { %8787 = vmatpush.bf16.msrb.mxu3 %v18442_v38 }
 0x42b   : > { %v6978_v36 = vpop.f32.mrf.mxu3 }
 0x42c   : > { %v7175_v27 = vadd.f32 %v7174_v14, %v6978_v36  ;;  %v7700_v51 = vpop.f32.mrf.mxu2  ;;  %v7177_v45 = vpop.f32.mrf.mxu0  ;;  %v8285_v14 = vrot.slane %v8283_v29, 4 }
 0x42d   : > { %v7426_v7 = vpop.f32.mrf.mxu1 }
 0x42e   : > { %v7459_v34 = vadd.f32 %v7423_v54, %v7175_v27  ;;  %v8006_v54 = vshrl.u32 %v18405_v22, 16  ;;  %v8286_v4 = vor.u32 %v8285_v14, %v8282_v5  ;;  %v23337_v22 = vld [vmem:[#allocation2 + $0xc0] sm:$0xff] }
 0x42f   : > { %8112 = vmatmul.bf16.gmra.mxu0 %v7997_v55 }
 0x430   : > { %v23296_v21 = vadd.f32 %v7700_v51, %v7459_v34  ;;  %7847 = vmatmul.bf16.gmra.mxu3 %v23027_v53  ;;  %8389 = vmatmul.bf16.gmra.mxu1 %v23153_v13  ;;  %v18466_v53 = vld [vmem:[%s25021_s6 + $0x48] sm:$0xff]  ;;  %v8008_v51 = vor.u32 %v8006_v54, %v8004_v60  ;;  %v18449_v60 = vld [vmem:[%s25021_s6] sm:$0xff] }
 0x431   : > { %8534 = vmatmul.bf16.gmra.mxu2 %v20058_v63  ;;  %v18454_v13 = vld [vmem:[%s25021_s6 + $0x28] sm:$0xff]  ;;  %v8287_v63 = vsel %vm2595_vm1, %v23182_v31, %v8286_v4  ;;  %v8018_v31 = vshll.u32 %v23337_v22, 16  ;;  %9344 = vmatpush.bf16.msrb.mxu1 %v18449_v60 }
 0x432   : > { %9577 = vmatpush.bf16.msrb.mxu2 %v18466_v53  ;;  %9155 = vmatpush.bf16.msrb.mxu0 %v18454_v13 }
 0x433   : > { %v6981_v42 = vpop.f32.mrf.mxu3 }
 0x434   : > { %v7178_v24 = vadd.f32 %v7177_v45, %v6981_v42  ;;  %v7703_v37 = vpop.f32.mrf.mxu2  ;;  %v7179_v15 = vpop.f32.mrf.mxu0 }
 0x435   : > { %v7428_v33 = vpop.f32.mrf.mxu1 }
 0x436   : > { %v7460_v48 = vadd.f32 %v7426_v7, %v7178_v24  ;;  %v20062_v7 = vld [vmem:[#allocation2 + $0xbc] sm:$0xff]   ;;  %9156 = vmatpush.bf16.msrb.mxu0 %v18453_v16 }
 0x438   : > { %v23303_v26 = vadd.f32 %v7703_v37, %v7460_v48 }
 0x43b   : > { %v6983_v46 = vpop.f32.mrf.mxu3 }
 0x43c   : > { %v7180_v40 = vadd.f32 %v7179_v15, %v6983_v46  ;;  %v7705_v8 = vpop.f32.mrf.mxu2  ;;  %v7182_v25 = vpop.f32.mrf.mxu0  ;;  %v8289_v15 = vshrl.u32 %v23180_v23, 16  ;;  %v18465_v46 = vld [vmem:[%s25021_s6 + $0x40] sm:$0xff] }
 0x43d   : > { %v7431_v1 = vpop.f32.mrf.mxu1  ;;  %9578 = vmatpush.bf16.msrb.mxu2 %v18465_v46  ;;  %v18472_v46 = vld [vmem:[%s25021_s6 + $0x78] sm:$0xff] }
 0x43e   : > { %v7461_v43 = vadd.f32 %v7428_v33, %v7180_v40  ;;  %v8291_v13 = vrot.slane %v8289_v15, 3 }
 0x43f   : > { %8117 = vmatmul.bf16.gmra.mxu0 %v8005_v6 }
 0x440   : > { %v23315_v47 = vadd.f32 %v7705_v8, %v7461_v43  ;;  %7852 = vmatmul.bf16.gmra.mxu3 %v23065_v50  ;;  %8394 = vmatmul.bf16.gmra.mxu1 %v23202_v28  ;;  %v8010_v28 = vshll.u32 %v18406_v12, 16  ;;  %v8014_v8 = vshrl.u32 %v18406_v12, 16  ;;  %v23358_v12 = vld [vmem:[#allocation2 + $0xd0] sm:$0xff]  }
 0x441   : > { %8539 = vmatmul.bf16.gmra.mxu2 %v20060_v19  ;;  %v8298_v14 = vshrl.u32 %v23358_v12, 16 }
 0x442   : > { %v8012_v61 = vrot.slane %v8010_v28, 1 }
 0x443   : > { %v6986_v11 = vpop.f32.mrf.mxu3 }
 0x444   : > { %v7183_v56 = vadd.f32 %v7182_v25, %v6986_v11  ;;  %v7708_v57 = vpop.f32.mrf.mxu2  ;;  %v7184_v50 = vpop.f32.mrf.mxu0  ;;  %v8013_v34 = vsel %vm2858_vm2, %v8008_v51, %v8012_v61  ;;  %v8020_v25 = vrot.slane %v8018_v31, 1  ;;  %v8016_v19 = vor.u32 %v8014_v8, %v8012_v61  ;;  %v20065_v31 = vld [vmem:[#allocation2 + $0xcc] sm:$0xff]  }
 0x445   : > { %v7433_v35 = vpop.f32.mrf.mxu1 }
 0x446   : > { %v7462_v9 = vadd.f32 %v7431_v1, %v7183_v56  ;;  %v8021_v56 = vsel %vm2858_vm2, %v8016_v19, %v8020_v25 }
 0x448   : > { %v23326_v44 = vadd.f32 %v7708_v57, %v7462_v9  ;;  %v20064_v57 = vld [vmem:[#allocation2 + $0xc4] sm:$0xff]  }
 0x44b   : > { %v6988_v39 = vpop.f32.mrf.mxu3 }
 0x44c   : > { %v7185_v36 = vadd.f32 %v7184_v50, %v6988_v39  ;;  %v7710_v41 = vpop.f32.mrf.mxu2  ;;  %v7187_v27 = vpop.f32.mrf.mxu0  ;;  %v18441_v50 = vld [vmem:[%s25019_s4 + $0x200] sm:$0xff] }
 0x44d   : > { %v7436_v17 = vpop.f32.mrf.mxu1  ;;  %8788 = vmatpush.bf16.msrb.mxu3 %v18441_v50  ;;  %v19084_v50 = vunpack.c.h.b16 %v23358_v12 }
 0x44e   : > { %v7463_v45 = vadd.f32 %v7433_v35, %v7185_v36  ;;  %v23363_v35 = vld [vmem:[#allocation2 + $0xc8] sm:$0xff] }
 0x44f   : > { %8122 = vmatmul.bf16.gmra.mxu0 %v8013_v34  ;;  %v8026_v36 = vshll.u32 %v23363_v35, 16  ;;  %v8022_v34 = vshrl.u32 %v23337_v22, 16 }
 0x450   : > { %v23329_v55 = vadd.f32 %v7710_v41, %v7463_v45  ;;  %7857 = vmatmul.bf16.gmra.mxu3 %v23117_v32  ;;  %8399 = vmatmul.bf16.gmra.mxu1 %v8287_v63  ;;  %v8292_v32 = vshll.u32 %v23180_v23, 16  ;;  %v8175_v41 = vld [vmem:[#allocation2 + $0xd8] sm:$0xf] }
 0x451   : > { %8544 = vmatmul.bf16.gmra.mxu2 %v20062_v7  ;;  %v8225_v45 = vunpack.c.l.b16 %v8175_v41  ;;  %v8028_v7 = vrot.slane %v8026_v36, 1  ;;  %v8024_v15 = vor.u32 %v8022_v34, %v8020_v25  ;;  %9837 = vmatpush.bf16.msra.mxu3 %v18472_v46 }
 0x452   : > { %v8294_v2 = vrot.slane %v8292_v32, 4 }
 0x453   : > { %v6991_v42 = vpop.f32.mrf.mxu3 }
 0x454   : > { %v7188_v24 = vadd.f32 %v7187_v27, %v6991_v42  ;;  %v7713_v37 = vpop.f32.mrf.mxu2  ;;  %v7189_v48 = vpop.f32.mrf.mxu0  ;;  %v8295_v1 = vor.u32 %v8294_v2, %v8291_v13  ;;  %v8300_v27 = vrot.slane %v8298_v14, 3  ;;  %v18492_v14 = vld [vmem:[%s25021_s6 + $0xd8] sm:$0xff] }
 0x455   : > { %v7438_v0 = vpop.f32.mrf.mxu1  ;;  %10479 = vmatpush.bf16.msra.mxu2 %v18492_v14 }
 0x456   : > { %v7464_v33 = vadd.f32 %v7436_v17, %v7188_v24  ;;  %v8296_v29 = vsel %vm2595_vm1, %v8286_v4, %v8295_v1  ;;  %v7910_v24 = vld [vmem:[#allocation2 + $0xd0] sm:$0x1] }
 0x457   : > { %v7960_v13 = vunpack.c.l.b16 %v7910_v24  ;;  %v18457_v24 = vld [vmem:[#allocation3 + $0x4] sm:$0xff] }
 0x458   : > { %v23342_v53 = vadd.f32 %v7713_v37, %v7464_v33  ;;  %v8234_v33 = vpack.c.b16 %v8225_v45, %v8225_v45 }
 0x459   : > { %v7969_v8 = vpack.c.b16 %v7960_v13, %v7960_v13 }
 0x45a   : > { %v8307_v16 = vshrl.u32 %v8234_v33, 16  ;;  %v8310_v60 = vshll.u32 %v8234_v33, 16  ;;  %v23400_v33 = vld [vmem:[#allocation2 + $0xa4] sm:$0xff] }
 0x45b   : > { %v6993_v40 = vpop.f32.mrf.mxu3 }
 0x45c   : > { %v7190_v62 = vadd.f32 %v7189_v48, %v6993_v40  ;;  %v7715_v43 = vpop.f32.mrf.mxu2  ;;  %v7192_v6 = vpop.f32.mrf.mxu0 }
 0x45d   : > { %v7441_v11 = vpop.f32.mrf.mxu1 }
 0x45e   : > { %v7465_v30 = vadd.f32 %v7438_v0, %v7190_v62  ;;  %v8029_v0 = vsel %vm2858_vm2, %v8024_v15, %v8028_v7  ;;  %v19634_v15 = vld [vmem:[#allocation3 + $0x8] sm:$0xff]  }
 0x45f   : > { %8127 = vmatmul.bf16.gmra.mxu0 %v8021_v56  ;;  %v9026_v56 = vld [vmem:[#allocation3] sm:$0x8]  ;;  %v9221_v46 = vshll.u32 %v19634_v15, 16 }
 0x460   : > { %v23354_v49 = vadd.f32 %v7715_v43, %v7465_v30  ;;  %7862 = vmatmul.bf16.gmra.mxu3 %v23157_v10  ;;  %8404 = vmatmul.bf16.gmra.mxu1 %v8296_v29  ;;  %v8301_v10 = vshll.u32 %v23358_v12, 16  ;;  %v8312_v30 = vrot.slane %v8310_v60, 4  ;;  %v8030_v29 = vshrl.u32 %v23363_v35, 16 }
 0x461   : > { %8549 = vmatmul.bf16.gmra.mxu2 %v20064_v57 }
 0x462   : > { %v8303_v51 = vrot.slane %v8301_v10, 4  ;;  %v18476_v10 = vld [vmem:[%s25021_s6 + $0x98] sm:$0xff]  ;;  %v8032_v35 = vor.u32 %v8030_v29, %v8028_v7 }
 0x463   : > { %v6996_v9 = vpop.f32.mrf.mxu3  ;;  %9967 = vmatpush.bf16.msra.mxu0 %v18476_v10  ;;  %v18433_v7 = vld [vmem:[#allocation2 + $0x9c] sm:$0xff] }
 0x464   : > { %v7193_v28 = vadd.f32 %v7192_v6, %v6996_v9  ;;  %v7718_v5 = vpop.f32.mrf.mxu2  ;;  %v7194_v39 = vpop.f32.mrf.mxu0  ;;  %v8304_v42 = vor.u32 %v8303_v51, %v8300_v27  ;;  %v8459_v27 = vpack.c.b16 %v8225_v45, %v19084_v50  ;;  %v8660_v60 = vshll.u32 %v18433_v7, 16 }
 0x465   : > { %v7443_v61 = vpop.f32.mrf.mxu1 }
 0x466   : > { %v7466_v54 = vadd.f32 %v7441_v11, %v7193_v28  ;;  %v8305_v22 = vsel %vm2595_vm1, %v8295_v1, %v8304_v42  ;;  %v8034_v11 = vshll.u32 %v7969_v8, 16  ;;  %v23379_v1 = vld [vmem:[#allocation3 + $0x4] sm:$0xf] }
 0x467   : > { %v9076_v28 = vunpack.c.l.b16 %v23379_v1  ;;  %v9223_v1 = vrot.slane %v9221_v46, 4 }
 0x468   : > { %v23368_v4 = vadd.f32 %v7718_v5, %v7466_v54  ;;  %v9199_v5 = vunpack.c.l.b16 %v9026_v56  ;;  %v8662_v56 = vrot.slane %v8660_v60, 1 }
 0x46b   : > { %v6998_v17 = vpop.f32.mrf.mxu3 }
 0x46c   : > { %v7195_v63 = vadd.f32 %v7194_v39, %v6998_v17  ;;  %v7720_v38 = vpop.f32.mrf.mxu2  ;;  %v7197_v37 = vpop.f32.mrf.mxu0  ;;  %v18488_v39 = vld [vmem:[%s25021_s6 + $0xb8] sm:$0xff] }
 0x46d   : > { %v7446_v48 = vpop.f32.mrf.mxu1  ;;  %10217 = vmatpush.bf16.msra.mxu1 %v18488_v39 }
 0x46e   : > { %v7467_v32 = vadd.f32 %v7443_v61, %v7195_v63  ;;  %v8036_v61 = vrot.slane %v8034_v11, 1  ;;  %v9200_v63 = vpack.c.b16 %v9076_v28, %v9199_v5 }
 0x46f   : > { %8132 = vmatmul.bf16.gmra.mxu0 %v8029_v0  ;;  %v23402_v0 = vld [vmem:[#allocation3 + $0xc] sm:$0xff] }
 0x470   : > { %v23372_v2 = vadd.f32 %v7720_v38, %v7467_v32  ;;  %7867 = vmatmul.bf16.gmra.mxu3 %v23319_v18  ;;  %8409 = vmatmul.bf16.gmra.mxu1 %v8305_v22  ;;  %v8309_v18 = vrot.slane %v8307_v16, 3  ;;  %v8037_v38 = vsel %vm2858_vm2, %v8032_v35, %v8036_v61  ;;  %v9210_v32 = vshrl.u32 %v9200_v63, 16 }
 0x471   : > { %8554 = vmatmul.bf16.gmra.mxu2 %v20065_v31  ;;  %v9213_v45 = vshll.u32 %v9200_v63, 16  ;;  %v9218_v22 = vshrl.u32 %v19634_v15, 16 }
 0x472   : > { %v8313_v9 = vor.u32 %v8312_v30, %v8309_v18  ;;  %v9212_v8 = vrot.slane %v9210_v32, 3  ;;  %v19087_v30 = vunpack.c.l.b16 %v19634_v15 }
 0x473   : > { %v7001_v40 = vpop.f32.mrf.mxu3  ;;  %v9220_v11 = vrot.slane %v9218_v22, 3 }
 0x474   : > { %v7198_v25 = vadd.f32 %v7197_v37, %v7001_v40  ;;  %v7723_v62 = vpop.f32.mrf.mxu2  ;;  %v7199_v43 = vpop.f32.mrf.mxu0  ;;  %v8314_v34 = vsel %vm2595_vm1, %v8304_v42, %v8313_v9  ;;  %v9458_v42 = vshll.u32 %v18457_v24, 16  ;;  %v8658_v9 = vshrl.u32 %v18433_v7, 16  ;;  %v23421_v7 = vld [vmem:[#allocation2 + $0xac] sm:$0xff] }
 0x475   : > { %v7448_v19 = vpop.f32.mrf.mxu1  ;;  %v9224_v35 = vor.u32 %v9223_v1, %v9220_v11  ;;  %v8673_v46 = vshll.u32 %v23421_v7, 16 }
 0x476   : > { %v7468_v6 = vadd.f32 %v7446_v48, %v7198_v25  ;;  %v9215_v25 = vrot.slane %v9213_v45, 4 }
 0x478   : > { %v23381_v57 = vadd.f32 %v7723_v62, %v7468_v6  ;;  %v8665_v62 = vshll.u32 %v23400_v33, 16  ;;  %v9460_v6 = vrot.slane %v9458_v42, 1  ;;  %v9216_v29 = vor.u32 %v9215_v25, %v9212_v8  ;;  %v23426_v42 = vld [vmem:[#allocation3 + $0x14] sm:$0xff] }
 0x479   : > { %v18475_v25 = vld [vmem:[%s25021_s6 + $0x90] sm:$0xff] }
 0x47a   : > { %v8667_v5 = vrot.slane %v8665_v62, 1  ;;  %v18487_v62 = vld [vmem:[%s25021_s6 + $0xb0] sm:$0xff]  ;;  %9968 = vmatpush.bf16.msra.mxu0 %v18475_v25 }
 0x47b   : > { %v7003_v54 = vpop.f32.mrf.mxu3  ;;  %10218 = vmatpush.bf16.msra.mxu1 %v18487_v62 }
 0x47c   : > { %v7200_v12 = vadd.f32 %v7199_v43, %v7003_v54  ;;  %v7725_v36 = vpop.f32.mrf.mxu2  ;;  %v7202_v41 = vpop.f32.mrf.mxu0  ;;  %v9456_v43 = vshrl.u32 %v18457_v24, 16  ;;  %v9092_v54 = vpack.c.b16 %v19087_v30, %v9076_v28  ;;  %v23416_v28 = vld [vmem:[#allocation3 + $0x10] sm:$0xff]  }
 0x47d   : > { %v7451_v17 = vpop.f32.mrf.mxu1  ;;  %v9227_v45 = vshrl.u32 %v23416_v28, 16 }
 0x47e   : > { %v7469_v51 = vadd.f32 %v7448_v19, %v7200_v12  ;;  %v9463_v19 = vshll.u32 %v23402_v0, 16  ;;  %v9461_v14 = vor.u32 %v9460_v6, %v9456_v43  ;;  %v8669_v6 = vshrl.u32 %v23400_v33, 16 }
 0x47f   : > { %8137 = vmatmul.bf16.gmra.mxu0 %v8037_v38  ;;  %v18471_v38 = vld [vmem:[%s25021_s6 + $0x70] sm:$0xff]  ;;  %v9229_v60 = vrot.slane %v9227_v45, 3 }
 0x480   : > { %v23397_v37 = vadd.f32 %v7725_v36, %v7469_v51  ;;  %7872 = vmatmul.bf16.gmra.mxu3 %v23180_v23  ;;  %8414 = vmatmul.bf16.gmra.mxu1 %v8314_v34  ;;  %v9465_v61 = vrot.slane %v9463_v19, 1  ;;  %v8663_v36 = vor.u32 %v8662_v56, %v8658_v9  ;;  %v9225_v51 = vsel %vm2595_vm1, %v9216_v29, %v9224_v35 }
 0x481   : > { %8559 = vmatmul.bf16.gmra.mxu2 %v8459_v27  ;;  %9838 = vmatpush.bf16.msra.mxu3 %v18471_v38  ;;  %v8675_v19 = vrot.slane %v8673_v46, 1  ;;  %v9467_v56 = vshrl.u32 %v23402_v0, 16  ;;  %v8671_v9 = vor.u32 %v8669_v6, %v8667_v5  ;;  %v8677_v46 = vshrl.u32 %v23421_v7, 16 }
 0x482   : > { %v9466_v63 = vsel %vm2858_vm2, %v9461_v14, %v9465_v61 }
 0x483   : > { %v7006_v48 = vpop.f32.mrf.mxu3 }
 0x484   : > { %v7203_v31 = vadd.f32 %v7202_v41, %v7006_v48  ;;  %v7728_v13 = vpop.f32.mrf.mxu2  ;;  %v7204_v16 = vpop.f32.mrf.mxu0  ;;  %v9230_v48 = vshll.u32 %v23416_v28, 16 }
 0x485   : > { %v7453_v40 = vpop.f32.mrf.mxu1 }
 0x486   : > { %v7470_v23 = vadd.f32 %v7451_v17, %v7203_v31  ;;  %v8668_v17 = vsel %vm2858_vm2, %v8663_v36, %v8667_v5  ;;  %v23450_v5 = vld [vmem:[#allocation3 + $0x18] sm:$0xff]  }
 0x488   : > { %v23406_v18 = vadd.f32 %v7728_v13, %v7470_v23  ;;  %v9232_v23 = vrot.slane %v9230_v48, 4 }
 0x48a   : > { %v9233_v1 = vor.u32 %v9232_v23, %v9229_v60 }
 0x48b   : > { %v7008_v50 = vpop.f32.mrf.mxu3 }
 0x48c   : > { %v7205_v10 = vadd.f32 %v7204_v16, %v7008_v50  ;;  %v7730_v39 = vpop.f32.mrf.mxu2  ;;  %v8103_v12 = vpop.f32.mrf.mxu0 }
 0x48d   : > { %v8380_v27 = vpop.f32.mrf.mxu1 }
 0x48e   : > { %v7471_v41 = vadd.f32 %v7453_v40, %v7205_v10  ;;  %v9471_v40 = vshll.u32 %v23426_v42, 16 }
 0x48f   : > { %16970 = vmatmul.msk.bf16.vlgmr.msrb.gmra.mxu0 %vm9124_vm4, %v9092_v54  ;;  %v9469_v54 = vor.u32 %v9467_v56, %v9465_v61  ;;  %v23454_v61 = vld [vmem:[#allocation2 + $0xb4] sm:$0xff] }
 0x490   : > { %v23410_v34 = vadd.f32 %v7730_v39, %v7471_v41  ;;  %8789 = vmatmul.bf16.vlgmr.msrb.gmra.mxu3 %v8668_v17  ;;  %16994 = vmatmul.msk.bf16.vlgmr.msrb.gmra.mxu1 %vm9124_vm4, %v9225_v51  ;;  %v9473_v29 = vrot.slane %v9471_v40, 1  ;;  %v20410_v39 = vld [vmem:[#allocation3 + $0xc] sm:$0xff]   ;;  %v9236_v17 = vshrl.u32 %v23450_v5, 16 }
 0x491   : > { %17058 = vmatmul.msk.bf16.vlgmr.msrb.gmra.mxu2 %vm9124_vm4, %v9466_v63  ;;  %v23459_v63 = vld [vmem:[#allocation3 + $0x1c] sm:$0xff] }
 0x492   : > { %v9474_v0 = vsel %vm2858_vm2, %v9469_v54, %v9473_v29  ;;  %v9238_v48 = vrot.slane %v9236_v17, 3 }
 0x493   : > { %v7838_v24 = vpop.f32.mrf.mxu3 }
 0x494   : > { %v7878_v15 = vadd.f32 %v7838_v24, %v23272_v20  ;;  %v8525_v32 = vpop.f32.mrf.mxu2  ;;  %v8105_v31 = vpop.f32.mrf.mxu0  ;;  %v18491_v20 = vld [vmem:[%s25021_s6 + $0xd0] sm:$0xff] }
 0x495   : > { %v8382_v22 = vpop.f32.mrf.mxu1  ;;  %10480 = vmatpush.bf16.msra.mxu2 %v18491_v20  ;;  %v9475_v20 = vshrl.u32 %v23426_v42, 16  ;;  %v23474_v42 = vld [vmem:[#allocation3 + $0x20] sm:$0xff]  }
 0x496   : > { %v8143_v13 = vadd.f32 %v8103_v12, %v7878_v15  ;;  %v8676_v12 = vsel %vm2858_vm2, %v8671_v9, %v8675_v19  ;;  %v9245_v54 = vshrl.u32 %v23474_v42, 16 }
 0x497   : > { %v9477_v56 = vor.u32 %v9475_v20, %v9473_v29  ;;  %v18470_v29 = vld [vmem:[%s25021_s6 + $0x68] sm:$0xff] }
 0x498   : > { %v8420_v16 = vadd.f32 %v8380_v27, %v8143_v13  ;;  %v9479_v13 = vshll.u32 %v23459_v63, 16  ;;  %9839 = vmatpush.bf16.msra.mxu3 %v18470_v29  ;;  %v9247_v17 = vrot.slane %v9245_v54, 3 }
 0x49a   : > { %v23430_v8 = vadd.f32 %v8525_v32, %v8420_v16  ;;  %v8681_v32 = vshll.u32 %v23454_v61, 16  ;;  %v9481_v25 = vrot.slane %v9479_v13, 1 }
 0x49b   : > { %v7840_v43 = vpop.f32.mrf.mxu3 }
 0x49c   : > { %v7879_v30 = vadd.f32 %v7840_v43, %v23286_v59  ;;  %v8527_v11 = vpop.f32.mrf.mxu2  ;;  %v8108_v50 = vpop.f32.mrf.mxu0  ;;  %v9234_v59 = vsel %vm2595_vm1, %v9224_v35, %v9233_v1  ;;  %v9239_v35 = vshll.u32 %v23450_v5, 16  ;;  %v8683_v16 = vrot.slane %v8681_v32, 1  ;;  %v18486_v32 = vld [vmem:[%s25021_s6 + $0xa8] sm:$0xff] }
 0x49d   : > { %v8385_v10 = vpop.f32.mrf.mxu1  ;;  %v8679_v43 = vor.u32 %v8677_v46, %v8675_v19  ;;  %10219 = vmatpush.bf16.msra.mxu1 %v18486_v32 }
 0x49e   : > { %v8144_v14 = vadd.f32 %v8105_v31, %v7879_v30  ;;  %v9241_v31 = vrot.slane %v9239_v35, 4 }
 0x49f   : > { %16971 = vmatmul.msk.bf16.gmra.mxu0 %vm9124_vm4, %v20410_v39 }
 0x4a0   : > { %v8421_v33 = vadd.f32 %v8382_v22, %v8144_v14  ;;  %8794 = vmatmul.bf16.gmra.mxu3 %v8676_v12  ;;  %16995 = vmatmul.msk.bf16.gmra.mxu1 %vm9124_vm4, %v9234_v59  ;;  %v9242_v40 = vor.u32 %v9241_v31, %v9238_v48  ;;  %v9248_v12 = vshll.u32 %v23474_v42, 16  ;;  %v8685_v48 = vshrl.u32 %v23454_v61, 16 }
 0x4a1   : > { %17059 = vmatmul.msk.bf16.gmra.mxu2 %vm9124_vm4, %v9474_v0 }
 0x4a2   : > { %v23452_v36 = vadd.f32 %v8527_v11, %v8421_v33  ;;  %v20412_v11 = vld [vmem:[#allocation3 + $0x14] sm:$0xff]   ;;  %v9243_v7 = vsel %vm2595_vm1, %v9233_v1, %v9242_v40  ;;  %v23486_v33 = vld [vmem:[#allocation3 + $0x24] sm:$0xff]  ;;  %v9250_v35 = vrot.slane %v9248_v12, 4 }
 0x4a3   : > { %v7843_v41 = vpop.f32.mrf.mxu3  ;;  %v9491_v32 = vshrl.u32 %v23486_v33, 16 }
 0x4a4   : > { %v7880_v27 = vadd.f32 %v7843_v41, %v23293_v52  ;;  %v8530_v51 = vpop.f32.mrf.mxu2  ;;  %v8110_v38 = vpop.f32.mrf.mxu0  ;;  %v23503_v46 = vor.u32 %v9250_v35, %v9247_v17 }
 0x4a5   : > { %v8387_v15 = vpop.f32.mrf.mxu1 }
 0x4a6   : > { %v8145_v24 = vadd.f32 %v8108_v50, %v7880_v27  ;;  %v8684_v50 = vsel %vm2858_vm2, %v8679_v43, %v8683_v16 }
 0x4a8   : > { %v8422_v45 = vadd.f32 %v8385_v10, %v8145_v24  ;;  %v23481_v10 = vld [vmem:[#allocation2 + $0xbc] sm:$0xff] }
 0x4a9   : > { %v8689_v27 = vshll.u32 %v23481_v10, 16  ;;  %v8693_v17 = vshrl.u32 %v23481_v10, 16 }
 0x4aa   : > { %v23463_v22 = vadd.f32 %v8530_v51, %v8422_v45 }
 0x4ab   : > { %v7845_v52 = vpop.f32.mrf.mxu3  ;;  %v8691_v31 = vrot.slane %v8689_v27, 1 }
 0x4ac   : > { %v7881_v60 = vadd.f32 %v7845_v52, %v23296_v21  ;;  %v8532_v23 = vpop.f32.mrf.mxu2  ;;  %v8113_v62 = vpop.f32.mrf.mxu0  ;;  %v9482_v21 = vsel %vm2858_vm2, %v9477_v56, %v9481_v25 }
 0x4ad   : > { %v8390_v30 = vpop.f32.mrf.mxu1 }
 0x4ae   : > { %v8146_v6 = vadd.f32 %v8110_v38, %v7881_v60  ;;  %v9487_v38 = vshll.u32 %v23486_v33, 16  ;;  %v9483_v60 = vshrl.u32 %v23459_v63, 16  ;;  %v23541_v33 = vld [vmem:[#allocation3 + $0x30] sm:$0xff]  }
 0x4af   : > { %16972 = vmatmul.msk.bf16.gmra.mxu0 %vm9124_vm4, %v20412_v11 }
 0x4b0   : > { %v8423_v9 = vadd.f32 %v8387_v15, %v8146_v6  ;;  %8799 = vmatmul.bf16.gmra.mxu3 %v8684_v50  ;;  %16996 = vmatmul.msk.bf16.gmra.mxu1 %vm9124_vm4, %v9243_v7  ;;  %v18474_v15 = vld [vmem:[%s25021_s6 + $0x88] sm:$0xff]  ;;  %v9485_v11 = vor.u32 %v9483_v60, %v9481_v25 }
 0x4b1   : > { %17060 = vmatmul.msk.bf16.gmra.mxu2 %vm9124_vm4, %v9482_v21  ;;  %9969 = vmatpush.bf16.msra.mxu0 %v18474_v15 }
 0x4b2   : > { %v23476_v19 = vadd.f32 %v8532_v23, %v8423_v9  ;;  %v9489_v23 = vrot.slane %v9487_v38, 1  ;;  %v23517_v9 = vld [vmem:[#allocation2 + $0xc4] sm:$0xff] }
 0x4b3   : > { %v7848_v14 = vpop.f32.mrf.mxu3  ;;  %v8697_v12 = vshll.u32 %v23517_v9, 16 }
 0x4b4   : > { %v7882_v39 = vadd.f32 %v7848_v14, %v23303_v26  ;;  %v8535_v1 = vpop.f32.mrf.mxu2  ;;  %v8115_v59 = vpop.f32.mrf.mxu0  ;;  %v18490_v26 = vld [vmem:[%s25021_s6 + $0xc8] sm:$0xff]  ;;  %v9490_v63 = vsel %vm2858_vm2, %v9485_v11, %v9489_v23 }
 0x4b5   : > { %v8392_v41 = vpop.f32.mrf.mxu1  ;;  %10481 = vmatpush.bf16.msra.mxu2 %v18490_v26  ;;  %v23522_v14 = vld [vmem:[#allocation3 + $0x2c] sm:$0xff]  ;;  %v8699_v35 = vrot.slane %v8697_v12, 1  ;;  %v8701_v12 = vshrl.u32 %v23517_v9, 16 }
 0x4b6   : > { %v8147_v0 = vadd.f32 %v8113_v62, %v7882_v39  ;;  %v8687_v62 = vor.u32 %v8685_v48, %v8683_v16  ;;  %v23513_v16 = vld [vmem:[#allocation3 + $0x28] sm:$0xff]   ;;  %v9495_v27 = vshll.u32 %v23522_v14, 16 }
 0x4b7   : > { %v9254_v29 = vshrl.u32 %v23513_v16, 16 }
 0x4b8   : > { %v8424_v51 = vadd.f32 %v8390_v30, %v8147_v0  ;;  %v20414_v30 = vld [vmem:[#allocation3 + $0x1c] sm:$0xff]   ;;  %v8692_v61 = vsel %vm2858_vm2, %v8687_v62, %v8691_v31  ;;  %v9493_v62 = vor.u32 %v9491_v32, %v9489_v23  ;;  %v9499_v32 = vshrl.u32 %v23522_v14, 16 }
 0x4b9   : > { %v9256_v0 = vrot.slane %v9254_v29, 3  ;;  %v18469_v23 = vld [vmem:[%s25021_s6 + $0x60] sm:$0xff] }
 0x4ba   : > { %v23490_v24 = vadd.f32 %v8535_v1, %v8424_v51  ;;  %9840 = vmatpush.bf16.msra.mxu3 %v18469_v23 }
 0x4bb   : > { %v7850_v45 = vpop.f32.mrf.mxu3 }
 0x4bc   : > { %v7883_v13 = vadd.f32 %v7850_v45, %v23315_v47  ;;  %v8537_v52 = vpop.f32.mrf.mxu2  ;;  %v8118_v20 = vpop.f32.mrf.mxu0  ;;  %v9252_v47 = vsel %vm2595_vm1, %v9242_v40, %v23503_v46  ;;  %v9257_v40 = vshll.u32 %v23513_v16, 16  ;;  %v9497_v45 = vrot.slane %v9495_v27, 1  ;;  %v18485_v27 = vld [vmem:[%s25021_s6 + $0xa0] sm:$0xff] }
 0x4bd   : > { %v8395_v6 = vpop.f32.mrf.mxu1  ;;  %10220 = vmatpush.bf16.msra.mxu1 %v18485_v27  ;;  %v8597_v27 = vld [vmem:[#allocation2 + $0xdc] sm:$0x1] }
 0x4be   : > { %v8148_v43 = vadd.f32 %v8115_v59, %v7883_v13  ;;  %v8695_v13 = vor.u32 %v8693_v17, %v8691_v31  ;;  %v9498_v10 = vsel %vm2858_vm2, %v9493_v62, %v9497_v45  ;;  %v8703_v17 = vor.u32 %v8701_v12, %v8699_v35  ;;  %v20418_v62 = vld [vmem:[#allocation3 + $0x2c] sm:$0xff]  }
 0x4bf   : > { %16973 = vmatmul.msk.bf16.gmra.mxu0 %vm9124_vm4, %v20414_v30 }
 0x4c0   : > { %v8425_v56 = vadd.f32 %v8392_v41, %v8148_v43  ;;  %8804 = vmatmul.bf16.gmra.mxu3 %v8692_v61  ;;  %16997 = vmatmul.msk.bf16.gmra.mxu1 %vm9124_vm4, %v9252_v47  ;;  %v9259_v41 = vrot.slane %v9257_v40, 4  ;;  %v8700_v43 = vsel %vm2858_vm2, %v8695_v13, %v8699_v35  ;;  %v9266_v47 = vshll.u32 %v23541_v33, 16  ;;  %v23574_v35 = vld [vmem:[#allocation3 + $0x38] sm:$0xff]  }
 0x4c1   : > { %17061 = vmatmul.msk.bf16.gmra.mxu2 %vm9124_vm4, %v9490_v63  ;;  %v23551_v63 = vld [vmem:[#allocation3 + $0x34] sm:$0xff] }
 0x4c2   : > { %v23515_v50 = vadd.f32 %v8537_v52, %v8425_v56  ;;  %v9260_v15 = vor.u32 %v9259_v41, %v9256_v0  ;;  %v9263_v56 = vshrl.u32 %v23541_v33, 16  ;;  %v18489_v0 = vld [vmem:[%s25021_s6 + $0xc0] sm:$0xff] }
 0x4c3   : > { %v7853_v25 = vpop.f32.mrf.mxu3  ;;  %v18473_v41 = vld [vmem:[%s25021_s6 + $0x80] sm:$0xff]  ;;  %10482 = vmatpush.bf16.msra.mxu2 %v18489_v0 }
 0x4c4   : > { %v7884_v7 = vadd.f32 %v7853_v25, %v23326_v44  ;;  %v8540_v21 = vpop.f32.mrf.mxu2  ;;  %v8120_v39 = vpop.f32.mrf.mxu0  ;;  %9970 = vmatpush.bf16.msra.mxu0 %v18473_v41  ;;  %v9042_v0 = vld [vmem:[#allocation3 + $0x40] sm:$0xf] }
 0x4c5   : > { %v8397_v54 = vpop.f32.mrf.mxu1 }
 0x4c6   : > { %v8149_v1 = vadd.f32 %v8118_v20, %v7884_v7  ;;  %v20416_v20 = vld [vmem:[#allocation3 + $0x24] sm:$0xff]   ;;  %v18439_v7 = vld [vmem:[#allocation2 + $0xcc] sm:$0xff] }
 0x4c8   : > { %v8426_v59 = vadd.f32 %v8395_v6, %v8149_v1  ;;  %v9268_v1 = vrot.slane %v9266_v47, 4  ;;  %v23586_v47 = vld [vmem:[#allocation3 + $0x3c] sm:$0xff] }
 0x4c9   : > { %v9511_v12 = vshll.u32 %v23586_v47, 16 }
 0x4ca   : > { %v23526_v51 = vadd.f32 %v8540_v21, %v8426_v59 }
 0x4cb   : > { %v7855_v44 = vpop.f32.mrf.mxu3 }
 0x4cc   : > { %v7885_v38 = vadd.f32 %v7855_v44, %v23329_v55  ;;  %v8542_v26 = vpop.f32.mrf.mxu2  ;;  %v8123_v48 = vpop.f32.mrf.mxu0  ;;  %v23535_v55 = vsel %vm2595_vm1, %v23503_v46, %v9260_v15 }
 0x4cd   : > { %v8400_v60 = vpop.f32.mrf.mxu1 }
 0x4ce   : > { %v8150_v52 = vadd.f32 %v8120_v39, %v7885_v38  ;;  %v9265_v39 = vrot.slane %v9263_v56, 3 }
 0x4cf   : > { %16974 = vmatmul.msk.bf16.gmra.mxu0 %vm9124_vm4, %v20416_v20 }
 0x4d0   : > { %v8427_v6 = vadd.f32 %v8397_v54, %v8150_v52  ;;  %8809 = vmatmul.bf16.gmra.mxu3 %v8700_v43  ;;  %16998 = vmatmul.msk.bf16.gmra.mxu1 %vm9124_vm4, %v23535_v55  ;;  %v9503_v54 = vshll.u32 %v23551_v63, 16  ;;  %v9501_v43 = vor.u32 %v9499_v32, %v9497_v45 }
 0x4d1   : > { %17062 = vmatmul.msk.bf16.gmra.mxu2 %vm9124_vm4, %v9498_v10 }
 0x4d2   : > { %v23543_v31 = vadd.f32 %v8542_v26, %v8427_v6  ;;  %v9269_v26 = vor.u32 %v9268_v1, %v9265_v39 }
 0x4d3   : > { %v7858_v30 = vpop.f32.mrf.mxu3 }
 0x4d4   : > { %v7886_v11 = vadd.f32 %v7858_v30, %v23342_v53  ;;  %v8545_v61 = vpop.f32.mrf.mxu2  ;;  %v8125_v25 = vpop.f32.mrf.mxu0  ;;  %v8705_v53 = vshll.u32 %v18439_v7, 16  ;;  %v23581_v30 = vld [vmem:[#allocation2 + $0xd4] sm:$0xff] }
 0x4d5   : > { %v8402_v29 = vpop.f32.mrf.mxu1 }
 0x4d6   : > { %v8151_v21 = vadd.f32 %v8123_v48, %v7886_v11  ;;  %v9505_v48 = vrot.slane %v9503_v54, 1  ;;  %v8707_v52 = vrot.slane %v8705_v53, 1  ;;  %v9272_v11 = vshrl.u32 %v23574_v35, 16 }
 0x4d7   : > { %v8709_v53 = vshrl.u32 %v18439_v7, 16 }
 0x4d8   : > { %v8428_v40 = vadd.f32 %v8400_v60, %v8151_v21  ;;  %v8708_v6 = vsel %vm2858_vm2, %v8703_v17, %v8707_v52  ;;  %v9506_v14 = vsel %vm2858_vm2, %v9501_v43, %v9505_v48  ;;  %v9274_v39 = vrot.slane %v9272_v11, 3 }
 0x4d9   : > { %v8647_v43 = vunpack.c.l.b16 %v8597_v27 }
 0x4da   : > { %v23555_v59 = vadd.f32 %v8545_v61, %v8428_v40  ;;  %v9275_v61 = vshll.u32 %v23574_v35, 16  ;;  %v8713_v40 = vshll.u32 %v23581_v30, 16 }
 0x4db   : > { %v7860_v44 = vpop.f32.mrf.mxu3 }
 0x4dc   : > { %v7887_v38 = vadd.f32 %v7860_v44, %v23354_v49  ;;  %v8547_v9 = vpop.f32.mrf.mxu2  ;;  %v8128_v13 = vpop.f32.mrf.mxu0  ;;  %v23571_v49 = vsel %vm2595_vm1, %v9260_v15, %v9269_v26  ;;  %v9277_v1 = vrot.slane %v9275_v61, 4  ;;  %v8715_v17 = vrot.slane %v8713_v40, 1 }
 0x4dd   : > { %v8405_v20 = vpop.f32.mrf.mxu1 }
 0x4de   : > { %v8152_v60 = vadd.f32 %v8125_v25, %v7887_v38  ;;  %v23592_v38 = vor.u32 %v9277_v1, %v9274_v39 }
 0x4df   : > { %16975 = vmatmul.msk.bf16.gmra.mxu0 %vm9124_vm4, %v20418_v62  ;;  %v9091_v62 = vunpack.c.l.b16 %v9042_v0 }
 0x4e0   : > { %v8429_v10 = vadd.f32 %v8402_v29, %v8152_v60  ;;  %8814 = vmatmul.bf16.gmra.mxu3 %v8708_v6  ;;  %16999 = vmatmul.msk.bf16.gmra.mxu1 %vm9124_vm4, %v23571_v49  ;;  %v9513_v60 = vrot.slane %v9511_v12, 1  ;;  %v9402_v6 = vld [vmem:[#allocation3 + $0x44] sm:$0x1]  ;;  %v8717_v12 = vshrl.u32 %v23581_v30, 16 }
 0x4e1   : > { %17063 = vmatmul.msk.bf16.gmra.mxu2 %vm9124_vm4, %v9506_v14  ;;  %v20419_v14 = vld [vmem:[#allocation3 + $0x34] sm:$0xff]  }
 0x4e2   : > { %v23579_v23 = vadd.f32 %v8547_v9, %v8429_v10 }
 0x4e3   : > { %v7863_v45 = vpop.f32.mrf.mxu3 }
 0x4e4   : > { %v7888_v15 = vadd.f32 %v7863_v45, %v23368_v4  ;;  %v8550_v56 = vpop.f32.mrf.mxu2  ;;  %v8130_v25 = vpop.f32.mrf.mxu0  ;;  %v8711_v4 = vor.u32 %v8709_v53, %v8707_v52  ;;  %v23599_v52 = vsel %vm2595_vm1, %v9269_v26, %v23592_v38  ;;  %v18496_v26 = vld [vmem:[%s25021_s6 + $0xf8] sm:$0xff] }
 0x4e5   : > { %v8407_v29 = vpop.f32.mrf.mxu1  ;;  %10609 = vmatpush.bf16.msrb.mxu3 %v18496_v26 }
 0x4e6   : > { %v8153_v21 = vadd.f32 %v8128_v13, %v7888_v15  ;;  %v9507_v13 = vshrl.u32 %v23551_v63, 16  ;;  %v8716_v11 = vsel %vm2858_vm2, %v8711_v4, %v8715_v17  ;;  %v9208_v63 = vpack.c.b16 %v9091_v62, %v9091_v62 }
 0x4e7   : > { %v9445_v15 = vunpack.c.l.b16 %v9402_v6 }
 0x4e8   : > { %v8430_v54 = vadd.f32 %v8405_v20, %v8153_v21  ;;  %v9509_v45 = vor.u32 %v9507_v13, %v9505_v48  ;;  %v8656_v48 = vpack.c.b16 %v8647_v43, %v8647_v43  ;;  %v9281_v40 = vshrl.u32 %v9208_v63, 16 }
 0x4e9   : > { %v9284_v39 = vshll.u32 %v9208_v63, 16  ;;  %v9454_v1 = vpack.c.b16 %v9445_v15, %v9445_v15  ;;  %v8719_v13 = vor.u32 %v8717_v12, %v8715_v17  ;;  %v20098_v63 = vld [vmem:[#allocation3 + $0xc] sm:$0x8]  ;;  %v10278_v17 = vld [vmem:[#allocation3 + $0x18] sm:$0x8] }
 0x4ea   : > { %v23590_v41 = vadd.f32 %v8550_v56, %v8430_v54  ;;  %v8721_v53 = vshll.u32 %v8656_v48, 16  ;;  %v9283_v4 = vrot.slane %v9281_v40, 3  ;;  %v20423_v40 = vld [vmem:[#allocation3 + $0x14] sm:$0xff]  }
 0x4eb   : > { %v7865_v44 = vpop.f32.mrf.mxu3 }
 0x4ec   : > { %v7889_v9 = vadd.f32 %v7865_v44, %v23372_v2  ;;  %v8552_v32 = vpop.f32.mrf.mxu2  ;;  %v8133_v20 = vpop.f32.mrf.mxu0  ;;  %v9514_v2 = vsel %vm2858_vm2, %v9509_v45, %v9513_v60  ;;  %v8723_v43 = vrot.slane %v8721_v53, 1 }
 0x4ed   : > { %v8410_v10 = vpop.f32.mrf.mxu1 }
 0x4ee   : > { %v8154_v7 = vadd.f32 %v8130_v25, %v7889_v9  ;;  %v9286_v9 = vrot.slane %v9284_v39, 4  ;;  %v18516_v39 = vld [vmem:[%s25021_s6 + $0x38] sm:$0xff] }
 0x4ef   : > { %16976 = vmatmul.msk.bf16.gmra.mxu0 %vm9124_vm4, %v20419_v14  ;;  %v23616_v14 = vld [vmem:[#allocation3 + $0x1c] sm:$0xf]  ;;  %11098 = vmatpush.bf16.msrb.mxu1 %v18516_v39 }
 0x4f0   : > { %v8431_v61 = vadd.f32 %v8407_v29, %v8154_v7  ;;  %8819 = vmatmul.bf16.gmra.mxu3 %v8716_v11  ;;  %17000 = vmatmul.msk.bf16.gmra.mxu1 %vm9124_vm4, %v23599_v52  ;;  %v19112_v7 = vunpack.c.h.b16 %v23574_v35  ;;  %v9287_v30 = vor.u32 %v9286_v9, %v9283_v4  ;;  %v9714_v4 = vshrl.u32 %v20423_v40, 16 }
 0x4f1   : > { %17064 = vmatmul.msk.bf16.gmra.mxu2 %vm9124_vm4, %v9514_v2  ;;  %v8724_v2 = vsel %vm2858_vm2, %v8719_v13, %v8723_v43  ;;  %v9717_v9 = vshll.u32 %v20423_v40, 16  ;;  %v23642_v43 = vld [vmem:[#allocation3 + $0x18] sm:$0xff] }
 0x4f2   : > { %v23606_v56 = vadd.f32 %v8552_v32, %v8431_v61  ;;  %v9519_v32 = vshll.u32 %v9454_v1, 16  ;;  %v9099_v26 = vpack.c.b16 %v9091_v62, %v19112_v7 }
 0x4f3   : > { %v7868_v25 = vpop.f32.mrf.mxu3 }
 0x4f4   : > { %v7890_v21 = vadd.f32 %v7868_v25, %v23381_v57  ;;  %v8555_v29 = vpop.f32.mrf.mxu2  ;;  %v8135_v54 = vpop.f32.mrf.mxu0  ;;  %v9521_v61 = vrot.slane %v9519_v32, 1 }
 0x4f5   : > { %v8412_v27 = vpop.f32.mrf.mxu1 }
 0x4f6   : > { %v8155_v0 = vadd.f32 %v8133_v20, %v7890_v21  ;;  %v9515_v20 = vshrl.u32 %v23586_v47, 16  ;;  %v20421_v21 = vld [vmem:[#allocation3 + $0xc] sm:$0xf0]   ;;  %v18508_v47 = vld [vmem:[%s25021_s6 + $0x118] sm:$0xff] }
 0x4f7   : > { %v20099_v12 = vor.u32 %v20421_v21, %v20098_v63  ;;  %10859 = vmatpush.bf16.msrb.mxu0 %v18508_v47  ;;  %v9716_v63 = vrot.slane %v9714_v4, 3 }
 0x4f8   : > { %v8432_v44 = vadd.f32 %v8410_v10, %v8155_v0  ;;  %v9517_v25 = vor.u32 %v9515_v20, %v9513_v60  ;;  %v9288_v60 = vsel %vm2595_vm1, %v23592_v38, %v9287_v30  ;;  %v18477_v0 = vld [vmem:[#allocation3 + $0x10] sm:$0xff] }
 0x4f9   : > { %v9706_v7 = vshrl.u32 %v20099_v12, 16  ;;  %v10100_v20 = vshll.u32 %v18477_v0, 16 }
 0x4fa   : > { %v23613_v6 = vadd.f32 %v8555_v29, %v8432_v44  ;;  %v10322_v29 = vunpack.c.l.b16 %v23616_v14  ;;  %v9522_v62 = vsel %vm2858_vm2, %v9517_v25, %v9521_v61  ;;  %v18527_v14 = vld [vmem:[%s25021_s6 + $0x50] sm:$0xff] }
 0x4fb   : > { %v7870_v57 = vpop.f32.mrf.mxu3  ;;  %v9708_v25 = vrot.slane %v9706_v7, 3  ;;  %v20425_v7 = vld [vmem:[#allocation3 + $0x1c] sm:$0xff]  }
 0x4fc   : > { %v7891_v45 = vadd.f32 %v7870_v57, %v23397_v37  ;;  %v8557_v11 = vpop.f32.mrf.mxu2  ;;  %v8138_v10 = vpop.f32.mrf.mxu0  ;;  %v18512_v37 = vld [vmem:[%s25021_s6 + $0x18] sm:$0xff] }
 0x4fd   : > { %v8415_v48 = vpop.f32.mrf.mxu1  ;;  %11286 = vmatpush.bf16.msrb.mxu2 %v18512_v37 }
 0x4fe   : > { %v8156_v15 = vadd.f32 %v8135_v54, %v7891_v45  ;;  %v10321_v54 = vunpack.c.l.b16 %v10278_v17  ;;  %v9709_v45 = vshll.u32 %v20099_v12, 16  ;;  %v9719_v17 = vrot.slane %v9717_v9, 4 }
 0x4ff   : > { %16977 = vmatmul.msk.bf16.gmra.mxu0 %vm9124_vm4, %v9099_v26  ;;  %v10105_v26 = vshll.u32 %v23642_v43, 16 }
 0x500   : > { %v8433_v1 = vadd.f32 %v8412_v27, %v8156_v15  ;;  %8824 = vmatmul.bf16.gmra.mxu3 %v8724_v2  ;;  %17001 = vmatmul.msk.bf16.gmra.mxu1 %vm9124_vm4, %v9288_v60  ;;  %v10338_v27 = vpack.c.b16 %v10322_v29, %v10321_v54  ;;  %v9711_v21 = vrot.slane %v9709_v45, 4 }
 0x501   : > { %17065 = vmatmul.msk.bf16.gmra.mxu2 %vm9124_vm4, %v9522_v62  ;;  %v10098_v62 = vshrl.u32 %v18477_v0, 16  ;;  %v10107_v54 = vrot.slane %v10105_v26, 1 }
 0x502   : > { %v23637_v53 = vadd.f32 %v8557_v11, %v8433_v1  ;;  %v10348_v61 = vshrl.u32 %v10338_v27, 16  ;;  %v10351_v2 = vshll.u32 %v10338_v27, 16  ;;  %v9720_v1 = vor.u32 %v9719_v17, %v9716_v63  ;;  %v23665_v63 = vld [vmem:[#allocation3 + $0x20] sm:$0xff] }
 0x503   : > { %v7873_v44 = vpop.f32.mrf.mxu3  ;;  %v9712_v27 = vor.u32 %v9711_v21, %v9708_v25  ;;  %v18495_v25 = vld [vmem:[%s25021_s6 + $0xf0] sm:$0xff] }
 0x504   : > { %v7892_v32 = vadd.f32 %v7873_v44, %v23406_v18  ;;  %v8560_v13 = vpop.f32.mrf.mxu2  ;;  %v8140_v57 = vpop.f32.mrf.mxu0  ;;  %v10102_v18 = vrot.slane %v10100_v20, 1  ;;  %v10350_v47 = vrot.slane %v10348_v61, 3  ;;  %v10353_v40 = vrot.slane %v10351_v2, 4  ;;  %10610 = vmatpush.bf16.msrb.mxu3 %v18495_v25 }
 0x505   : > { %v8417_v30 = vpop.f32.mrf.mxu1  ;;  %v9723_v20 = vshrl.u32 %v20425_v7, 16  ;;  %v9726_v61 = vshll.u32 %v20425_v7, 16 }
 0x506   : > { %v8157_v11 = vadd.f32 %v8138_v10, %v7892_v32  ;;  %v10103_v4 = vor.u32 %v10102_v18, %v10098_v62  ;;  %v10354_v9 = vor.u32 %v10353_v40, %v10350_v47 }
 0x507   : > { %v9725_v18 = vrot.slane %v9723_v20, 3  ;;  %v9728_v47 = vrot.slane %v9726_v61, 4  ;;  %v18515_v20 = vld [vmem:[%s25021_s6 + $0x30] sm:$0xff] }
 0x508   : > { %v8434_v15 = vadd.f32 %v8415_v48, %v8157_v11  ;;  %v10363_v0 = vsel %vm2595_vm1, %v10354_v9, %v23503_v46  ;;  %v23662_v11 = vld [vmem:[%s25020_s5] ss:$0 sm:$0xff]  ;;  %11099 = vmatpush.bf16.msrb.mxu1 %v18515_v20 }
 0x509   : > { %v23674_v62 = vor.u32 %v9728_v47, %v9725_v18 }
 0x50a   : > { %v23645_v37 = vadd.f32 %v8560_v13, %v8434_v15  ;;  %v9721_v13 = vsel %vm2595_vm1, %v9712_v27, %v9720_v1 }
 0x50b   : > { %v7875_v39 = vpop.f32.mrf.mxu3 }
 0x50c   : > { %v7893_v10 = vadd.f32 %v7875_v39, %v23410_v34  ;;  %v8562_v60 = vpop.f32.mrf.mxu2  ;;  %v9158_v12 = vpop.f32.mrf.mxu0  ;;  %v10108_v34 = vsel %vm2858_vm2, %v10103_v4, %v10107_v54  ;;  %v10113_v39 = vshll.u32 %v23665_v63, 16 }
 0x50d   : > { %v9346_v48 = vpop.f32.mrf.mxu1 }
 0x50e   : > { %v8158_v44 = vadd.f32 %v8140_v57, %v7893_v10  ;;  %v9347_v32 = vadd.f32 %v9346_v48, %v9158_v12  ;;  %v10109_v48 = vshrl.u32 %v23642_v43, 16  ;;  %v10115_v4 = vrot.slane %v10113_v39, 1 }
 0x50f   : > { %17122 = vmatmul.msk.bf16.vlgmr.msra.gmra.mxu0 %vm9124_vm4, %v23416_v28  ;;  %v9730_v43 = vsel %vm2595_vm1, %v9720_v1, %v23674_v62 }
 0x510   : > { %v8435_v45 = vadd.f32 %v8417_v30, %v8158_v44  ;;  %17090 = vmatmul.msk.bf16.vlgmr.msra.gmra.mxu3 %vm9124_vm4, %v9721_v13  ;;  %17186 = vmatmul.msk.bf16.vlgmr.msra.gmra.mxu1 %vm9124_vm4, %v10108_v34  ;;  %v18511_v34 = vld [vmem:[%s25021_s6 + $0x10] sm:$0xff] }
 0x511   : > { %17218 = vmatmul.msk.bf16.vlgmr.msra.gmra.mxu2 %vm9124_vm4, %v10363_v0 }
 0x512   : > { %v23657_v57 = vadd.f32 %v8562_v60, %v8435_v45  ;;  %v10111_v45 = vor.u32 %v10109_v48, %v10107_v54  ;;  %11287 = vmatpush.bf16.msrb.mxu2 %v18511_v34 }
 0x513   : > { %v8790_v30 = vpop.f32.mrf.mxu3 }
 0x514   : > { %v8830_v28 = vadd.f32 %v8790_v30, %v23430_v8  ;;  %v9580_v2 = vpop.f32.mrf.mxu2  ;;  %v9160_v17 = vpop.f32.mrf.mxu0  ;;  %v20427_v30 = vld [vmem:[#allocation3 + $0x24] sm:$0xff]   ;;  %v10116_v54 = vsel %vm2858_vm2, %v10111_v45, %v10115_v4  ;;  %v10117_v45 = vshrl.u32 %v23665_v63, 16 }
 0x515   : > { %v23667_v46 = vadd.f32 %v9580_v2, %v9347_v32  ;;  %v9348_v26 = vpop.f32.mrf.mxu1  ;;  %v8901_v8 = vpop.permute.xlu2 %8900 }
 0x516   : > { %v8850_v15 = vadd.f32 %v23662_v11, %v8830_v28  ;;  %v9349_v21 = vadd.f32 %v9348_v26, %v9160_v17  ;;  %v8906_v28 = vpop.permute.xlu0 %8905  ;;  %v9732_v17 = vshrl.u32 %v20427_v30, 16  ;;  %v10119_v20 = vor.u32 %v10117_v45, %v10115_v4 }
 0x518   : > { %v8866_v40 = vmax.f32 %v8850_v15, 0.0  ;;  %v9735_v15 = vshll.u32 %v20427_v30, 16 }
 0x51a   : > { %v8978_v10 = vmul.f32 %v8901_v8, %v8866_v40  ;;  %v9734_v8 = vrot.slane %v9732_v17, 3 }
 0x51b   : > { %v8792_v60 = vpop.f32.mrf.mxu3 }
 0x51c   : > { %v8994_v12 = vpack.c.bf16 %v8978_v10, %v8978_v10  ;;  %v8831_v27 = vadd.f32 %v8792_v60, %v23452_v36  ;;  %v9582_v44 = vpop.f32.mrf.mxu2  ;;  %v9163_v32 = vpop.f32.mrf.mxu0  ;;  %v18507_v36 = vld [vmem:[%s25021_s6 + $0x110] sm:$0xff]  ;;  %v9737_v10 = vrot.slane %v9735_v15, 4 }
 0x51d   : > { %v23678_v9 = vadd.f32 %v9582_v44, %v9349_v21  ;;  %v9351_v7 = vpop.f32.mrf.mxu1  ;;  %10860 = vmatpush.bf16.msrb.mxu0 %v18507_v36  ;;  %v8916_v63 = vpop.permute.xlu2 %8915 }
 0x51e   : > { %9010 = vst.msk [vmem:[#allocation3 + $0x90] sm:$0xf] %vm313_vm3, %v8994_v12  ;;  %v8851_v13 = vadd.f32 %v23662_v11, %v8831_v27  ;;  %v9352_v0 = vadd.f32 %v9351_v7, %v9163_v32  ;;  %v8911_v27 = vpop.permute.xlu1 %8910  ;;  %v9738_v48 = vor.u32 %v9737_v10, %v9734_v8 }
 0x51f   : > { %17123 = vmatmul.msk.bf16.gmra.mxu0 %vm9124_vm4, %v23450_v5  ;;  %v23701_v5 = vld [vmem:[#allocation3 + $0x28] sm:$0xff] }
 0x520   : > { %v8867_v61 = vmax.f32 %v8851_v13, 0.0  ;;  %17091 = vmatmul.msk.bf16.gmra.mxu3 %vm9124_vm4, %v9730_v43  ;;  %17187 = vmatmul.msk.bf16.gmra.mxu1 %vm9124_vm4, %v10116_v54  ;;  %v10121_v12 = vshll.u32 %v23701_v5, 16  ;;  %v9739_v54 = vsel %vm2595_vm1, %v23674_v62, %v9738_v48  ;;  %v10125_v45 = vshrl.u32 %v23701_v5, 16 }
 0x521   : > { %17219 = vmatmul.msk.bf16.gmra.mxu2 %vm9124_vm4, %v23535_v55 }
 0x522   : > { %v8979_v1 = vmul.f32 %v8906_v28, %v8867_v61  ;;  %v10123_v34 = vrot.slane %v10121_v12, 1  ;;  %v20429_v28 = vld [vmem:[#allocation3 + $0x2c] sm:$0xff]   ;;  %v8921_v12 = vpop.permute.xlu0 %8920 }
 0x523   : > { %v8795_v2 = vpop.f32.mrf.mxu3  ;;  %v9741_v17 = vshrl.u32 %v20429_v28, 16  ;;  %v9744_v15 = vshll.u32 %v20429_v28, 16  ;;  %v18510_v28 = vld [vmem:[%s25021_s6 + $0x8] sm:$0xff] }
 0x524   : > { %v8995_v26 = vpack.c.bf16 %v8979_v1, %v8979_v1  ;;  %v8832_v25 = vadd.f32 %v8795_v2, %v23463_v22  ;;  %v9585_v21 = vpop.f32.mrf.mxu2  ;;  %v9165_v47 = vpop.f32.mrf.mxu0  ;;  %11288 = vmatpush.bf16.msrb.mxu2 %v18510_v28 }
 0x525   : > { %v23703_v18 = vadd.f32 %v9585_v21, %v9352_v0  ;;  %v9353_v40 = vpop.f32.mrf.mxu1  ;;  %v23724_v21 = vld [vmem:[#allocation3 + $0x30] sm:$0xff]  ;;  %v9743_v8 = vrot.slane %v9741_v17, 3  ;;  %v9746_v10 = vrot.slane %v9744_v15, 4 }
 0x526   : > { %9011 = vst.msk [vmem:[#allocation3 + $0x94] sm:$0xf] %vm313_vm3, %v8995_v26  ;;  %v8852_v55 = vadd.f32 %v23662_v11, %v8832_v25  ;;  %v9354_v39 = vadd.f32 %v9353_v40, %v9165_v47 }
 0x528   : > { %v8868_v60 = vmax.f32 %v8852_v55, 0.0 }
 0x52a   : > { %v8980_v44 = vmul.f32 %v8911_v27, %v8868_v60 }
 0x52b   : > { %v8797_v22 = vpop.f32.mrf.mxu3 }
 0x52c   : > { %v8996_v32 = vpack.c.bf16 %v8980_v44, %v8980_v44  ;;  %v8833_v13 = vadd.f32 %v8797_v22, %v23476_v19  ;;  %v9587_v7 = vpop.f32.mrf.mxu2  ;;  %v9168_v0 = vpop.f32.mrf.mxu0  ;;  %v10124_v19 = vsel %vm2858_vm2, %v10119_v20, %v10123_v34  ;;  %v23734_v22 = vor.u32 %v9746_v10, %v9743_v8 }
 0x52d   : > { %v23710_v36 = vadd.f32 %v9587_v7, %v9354_v39  ;;  %v9356_v30 = vpop.f32.mrf.mxu1 }
 0x52e   : > { %9012 = vst.msk [vmem:[#allocation3 + $0x98] sm:$0xf] %vm313_vm3, %v8996_v32  ;;  %v8853_v43 = vadd.f32 %v23662_v11, %v8833_v13  ;;  %v9357_v61 = vadd.f32 %v9356_v30, %v9168_v0  ;;  %v9748_v5 = vsel %vm2595_vm1, %v9738_v48, %v23734_v22  ;;  %v23760_v48 = vld [vmem:[#allocation3 + $0x40] sm:$0xff]  }
 0x52f   : > { %17124 = vmatmul.msk.bf16.gmra.mxu0 %vm9124_vm4, %v23474_v42 }
 0x530   : > { %v8869_v1 = vmax.f32 %v8853_v43, 0.0  ;;  %17092 = vmatmul.msk.bf16.gmra.mxu3 %vm9124_vm4, %v9739_v54  ;;  %17188 = vmatmul.msk.bf16.gmra.mxu1 %vm9124_vm4, %v10124_v19  ;;  %v10127_v54 = vor.u32 %v10125_v45, %v10123_v34  ;;  %v20431_v19 = vld [vmem:[#allocation3 + $0x34] sm:$0xff]  }
 0x531   : > { %17220 = vmatmul.msk.bf16.gmra.mxu2 %vm9124_vm4, %v23571_v49  ;;  %v18494_v49 = vld [vmem:[%s25021_s6 + $0xe8] sm:$0xff] }
 0x532   : > { %v8981_v4 = vmul.f32 %v8916_v63, %v8869_v1  ;;  %10611 = vmatpush.bf16.msrb.mxu3 %v18494_v49  ;;  %v18514_v63 = vld [vmem:[%s25021_s6 + $0x28] sm:$0xff]  ;;  %v10395_v49 = vshll.u32 %v23760_v48, 16 }
 0x533   : > { %v8800_v2 = vpop.f32.mrf.mxu3  ;;  %11100 = vmatpush.bf16.msrb.mxu1 %v18514_v63 }
 0x534   : > { %v8997_v62 = vpack.c.bf16 %v8981_v4, %v8981_v4  ;;  %v8834_v26 = vadd.f32 %v8800_v2, %v23490_v24  ;;  %v9590_v25 = vpop.f32.mrf.mxu2  ;;  %v9170_v42 = vpop.f32.mrf.mxu0  ;;  %v10129_v24 = vshll.u32 %v23724_v21, 16 }
 0x535   : > { %v23726_v47 = vadd.f32 %v9590_v25, %v9357_v61  ;;  %v9358_v40 = vpop.f32.mrf.mxu1  ;;  %v8926_v2 = vpop.permute.xlu1 %8925 }
 0x536   : > { %9013 = vst.msk [vmem:[#allocation3 + $0x9c] sm:$0xf] %vm313_vm3, %v8997_v62  ;;  %v8854_v55 = vadd.f32 %v23662_v11, %v8834_v26  ;;  %v9359_v39 = vadd.f32 %v9358_v40, %v9170_v42  ;;  %v10131_v0 = vrot.slane %v10129_v24, 1  ;;  %v9750_v62 = vshrl.u32 %v20431_v19, 16 }
 0x537   : > { %v9753_v26 = vshll.u32 %v20431_v19, 16  ;;  %v10392_v40 = vshrl.u32 %v23760_v48, 16 }
 0x538   : > { %v8870_v60 = vmax.f32 %v8854_v55, 0.0  ;;  %v10132_v34 = vsel %vm2858_vm2, %v10127_v54, %v10131_v0  ;;  %v23763_v55 = vld [vmem:[#allocation3 + $0x38] sm:$0xff]  ;;  %v9752_v24 = vrot.slane %v9750_v62, 3 }
 0x53a   : > { %v8982_v27 = vmul.f32 %v8921_v12, %v8870_v60  ;;  %v9755_v12 = vrot.slane %v9753_v26, 4  ;;  %v8936_v26 = vpop.permute.xlu0 %8935 }
 0x53b   : > { %v8802_v44 = vpop.f32.mrf.mxu3 }
 0x53c   : > { %v8998_v32 = vpack.c.bf16 %v8982_v27, %v8982_v27  ;;  %v8835_v13 = vadd.f32 %v8802_v44, %v23515_v50  ;;  %v9592_v7 = vpop.f32.mrf.mxu2  ;;  %v9173_v30 = vpop.f32.mrf.mxu0  ;;  %v18506_v50 = vld [vmem:[%s25021_s6 + $0x108] sm:$0xff]  ;;  %v10394_v44 = vrot.slane %v10392_v40, 3 }
 0x53d   : > { %v23738_v43 = vadd.f32 %v9592_v7, %v9359_v39  ;;  %v9361_v61 = vpop.f32.mrf.mxu1  ;;  %10861 = vmatpush.bf16.msrb.mxu0 %v18506_v50 }
 0x53e   : > { %9014 = vst.msk [vmem:[#allocation3 + $0xa0] sm:$0xf] %vm313_vm3, %v8998_v32  ;;  %v8855_v20 = vadd.f32 %v23662_v11, %v8835_v13  ;;  %v9362_v1 = vadd.f32 %v9361_v61, %v9173_v30  ;;  %v10397_v32 = vrot.slane %v10395_v49, 4  ;;  %v8931_v13 = vpop.permute.xlu2 %8930  ;;  %v23772_v30 = vor.u32 %v9755_v12, %v9752_v24 }
 0x53f   : > { %17125 = vmatmul.msk.bf16.gmra.mxu0 %vm9124_vm4, %v23513_v16 }
 0x540   : > { %v8871_v4 = vmax.f32 %v8855_v20, 0.0  ;;  %17093 = vmatmul.msk.bf16.gmra.mxu3 %vm9124_vm4, %v9748_v5  ;;  %17189 = vmatmul.msk.bf16.gmra.mxu1 %vm9124_vm4, %v10132_v34  ;;  %v10133_v20 = vshrl.u32 %v23724_v21, 16  ;;  %v9757_v21 = vsel %vm2595_vm1, %v23734_v22, %v23772_v30 }
 0x541   : > { %17221 = vmatmul.msk.bf16.gmra.mxu2 %vm9124_vm4, %v23599_v52 }
 0x542   : > { %v8983_v17 = vmul.f32 %v8926_v2, %v8871_v4  ;;  %v10135_v34 = vor.u32 %v10133_v20, %v10131_v0  ;;  %v23794_v0 = vld [vmem:[#allocation3 + $0x48] sm:$0xff]   ;;  %v8941_v20 = vpop.permute.xlu1 %8940 }
 0x543   : > { %v8805_v15 = vpop.f32.mrf.mxu3 }
 0x544   : > { %v8999_v25 = vpack.c.bf16 %v8983_v17, %v8983_v17  ;;  %v8836_v16 = vadd.f32 %v8805_v15, %v23526_v51  ;;  %v9595_v42 = vpop.f32.mrf.mxu2  ;;  %v9175_v39 = vpop.f32.mrf.mxu0  ;;  %v10137_v51 = vshll.u32 %v23763_v55, 16  ;;  %v20433_v17 = vld [vmem:[#allocation3 + $0x3c] sm:$0xff]  }
 0x545   : > { %v23767_v52 = vadd.f32 %v9595_v42, %v9362_v1  ;;  %v9363_v10 = vpop.f32.mrf.mxu1  ;;  %v23776_v1 = vor.u32 %v10397_v32, %v10394_v44  ;;  %v9762_v42 = vshll.u32 %v20433_v17, 16 }
 0x546   : > { %9015 = vst.msk [vmem:[#allocation3 + $0xa4] sm:$0xf] %vm313_vm3, %v8999_v25  ;;  %v8856_v8 = vadd.f32 %v23662_v11, %v8836_v16  ;;  %v9364_v60 = vadd.f32 %v9363_v10, %v9175_v39  ;;  %v10139_v50 = vrot.slane %v10137_v51, 1  ;;  %v9759_v16 = vshrl.u32 %v20433_v17, 16  ;;  %v23797_v39 = vld [vmem:[#allocation3 + $0x40] sm:$0xff] }
 0x547   : > { %v10399_v62 = vsel %vm2595_vm1, %v23592_v38, %v23776_v1  ;;  %v10404_v38 = vshll.u32 %v23794_v0, 16  ;;  %v9764_v44 = vrot.slane %v9762_v42, 4  ;;  %v18513_v42 = vld [vmem:[%s25021_s6 + $0x20] sm:$0xff] }
 0x548   : > { %v8872_v27 = vmax.f32 %v8856_v8, 0.0  ;;  %v10140_v15 = vsel %vm2858_vm2, %v10135_v34, %v10139_v50  ;;  %v10401_v8 = vshrl.u32 %v23794_v0, 16  ;;  %v9761_v51 = vrot.slane %v9759_v16, 3  ;;  %v20434_v16 = vld [vmem:[#allocation3 + $0x44] sm:$0xff]   ;;  %11101 = vmatpush.bf16.msrb.mxu1 %v18513_v42  ;;  %v10044_v42 = vld [vmem:[#allocation3 + $0x50] sm:$0x1] }
 0x54a   : > { %v8984_v7 = vmul.f32 %v8931_v13, %v8872_v27  ;;  %v18493_v27 = vld [vmem:[%s25021_s6 + $0xe0] sm:$0xff]  ;;  %v10145_v13 = vshll.u32 %v23797_v39, 16 }
 0x54b   : > { %v8807_v45 = vpop.f32.mrf.mxu3  ;;  %10612 = vmatpush.bf16.msrb.mxu3 %v18493_v27  ;;  %v23844_v27 = vld [vmem:[#allocation3 + $0x48] sm:$0xff] }
 0x54c   : > { %v9000_v61 = vpack.c.bf16 %v8984_v7, %v8984_v7  ;;  %v8837_v54 = vadd.f32 %v8807_v45, %v23543_v31  ;;  %v9597_v28 = vpop.f32.mrf.mxu2  ;;  %v9178_v19 = vpop.f32.mrf.mxu0  ;;  %v10403_v7 = vrot.slane %v10401_v8, 3  ;;  %v10406_v45 = vrot.slane %v10404_v38, 4 }
 0x54d   : > { %v23778_v5 = vadd.f32 %v9597_v28, %v9364_v60  ;;  %v9366_v4 = vpop.f32.mrf.mxu1  ;;  %v23809_v28 = vor.u32 %v9764_v44, %v9761_v51  ;;  %v9768_v38 = vshrl.u32 %v20434_v16, 16 }
 0x54e   : > { %9016 = vst.msk [vmem:[#allocation3 + $0xa8] sm:$0xf] %vm313_vm3, %v9000_v61  ;;  %v8857_v63 = vadd.f32 %v23662_v11, %v8837_v54  ;;  %v9367_v2 = vadd.f32 %v9366_v4, %v9178_v19  ;;  %v10141_v19 = vshrl.u32 %v23763_v55, 16  ;;  %v18509_v55 = vld [vmem:[%s25021_s6] sm:$0xff] }
 0x54f   : > { %17126 = vmatmul.msk.bf16.gmra.mxu0 %vm9124_vm4, %v23541_v33  ;;  %11289 = vmatpush.bf16.msrb.mxu2 %v18509_v55 }
 0x550   : > { %v8873_v31 = vmax.f32 %v8857_v63, 0.0  ;;  %17094 = vmatmul.msk.bf16.gmra.mxu3 %vm9124_vm4, %v9757_v21  ;;  %17190 = vmatmul.msk.bf16.gmra.mxu1 %vm9124_vm4, %v10140_v15  ;;  %v23815_v21 = vor.u32 %v10406_v45, %v10403_v7 }
 0x551   : > { %17222 = vmatmul.msk.bf16.gmra.mxu2 %vm9124_vm4, %v10399_v62 }
 0x552   : > { %v8985_v22 = vmul.f32 %v8936_v26, %v8873_v31  ;;  %v10143_v26 = vor.u32 %v10141_v19, %v10139_v50 }
 0x553   : > { %v8810_v25 = vpop.f32.mrf.mxu3 }
 0x554   : > { %v9001_v40 = vpack.c.bf16 %v8985_v22, %v8985_v22  ;;  %v8838_v33 = vadd.f32 %v8810_v25, %v23555_v59  ;;  %v9600_v49 = vpop.f32.mrf.mxu2  ;;  %v9180_v60 = vpop.f32.mrf.mxu0  ;;  %v9766_v25 = vsel %vm2595_vm1, %v23772_v30, %v23809_v28 }
 0x555   : > { %v23801_v10 = vadd.f32 %v9600_v49, %v9367_v2  ;;  %v9368_v12 = vpop.f32.mrf.mxu1  ;;  %v23813_v2 = vrot.slane %v10145_v13, 1  ;;  %v8946_v49 = vpop.permute.xlu2 %8945 }
 0x556   : > { %9017 = vst.msk [vmem:[#allocation3 + $0xac] sm:$0xf] %vm313_vm3, %v9001_v40  ;;  %v8858_v24 = vadd.f32 %v23662_v11, %v8838_v33  ;;  %v9369_v59 = vadd.f32 %v9368_v12, %v9180_v60  ;;  %v10408_v33 = vsel %vm2595_vm1, %v23776_v1, %v23815_v21  ;;  %v9771_v60 = vshll.u32 %v20434_v16, 16 }
 0x557   : > { %v10148_v50 = vsel %vm2858_vm2, %v10143_v26, %v23813_v2  ;;  %v19144_v26 = vunpack.c.h.b16 %v23794_v0 }
 0x558   : > { %v8874_v32 = vmax.f32 %v8858_v24, 0.0 }
 0x55a   : > { %v8986_v61 = vmul.f32 %v8941_v20, %v8874_v32  ;;  %v9770_v20 = vrot.slane %v9768_v38, 3  ;;  %v10087_v38 = vunpack.c.l.b16 %v10044_v42  ;;  %v18532_v42 = vld [vmem:[%s25021_s6 + $0x78] sm:$0xff] }
 0x55b   : > { %v8812_v54 = vpop.f32.mrf.mxu3 }
 0x55c   : > { %v9002_v63 = vpack.c.bf16 %v8986_v61, %v8986_v61  ;;  %v8839_v4 = vadd.f32 %v8812_v54, %v23579_v23  ;;  %v9602_v34 = vpop.f32.mrf.mxu2  ;;  %v9183_v31 = vpop.f32.mrf.mxu0  ;;  %v18505_v23 = vld [vmem:[%s25021_s6 + $0x100] sm:$0xff]  ;;  %v9773_v61 = vrot.slane %v9771_v60, 4 }
 0x55d   : > { %v23817_v17 = vadd.f32 %v9602_v34, %v9369_v59  ;;  %v9371_v62 = vpop.f32.mrf.mxu1  ;;  %10862 = vmatpush.bf16.msrb.mxu0 %v18505_v23  ;;  %v20544_v59 = vld [vmem:[#allocation3 + $0x50] sm:$0xff]  }
 0x55e   : > { %9018 = vst.msk [vmem:[#allocation3 + $0xb0] sm:$0xf] %vm313_vm3, %v9002_v63  ;;  %v8859_v15 = vadd.f32 %v23662_v11, %v8839_v4  ;;  %v9372_v22 = vadd.f32 %v9371_v62, %v9183_v31  ;;  %v10410_v1 = vshrl.u32 %v20544_v59, 16  ;;  %v10413_v51 = vshll.u32 %v20544_v59, 16  ;;  %v8951_v4 = vpop.permute.xlu0 %8950 }
 0x55f   : > { %17127 = vmatmul.msk.bf16.gmra.mxu0 %vm9124_vm4, %v23574_v35  ;;  %v10149_v62 = vshrl.u32 %v23797_v39, 16 }
 0x560   : > { %v8875_v40 = vmax.f32 %v8859_v15, 0.0  ;;  %17095 = vmatmul.msk.bf16.gmra.mxu3 %vm9124_vm4, %v9766_v25  ;;  %17191 = vmatmul.msk.bf16.gmra.mxu1 %vm9124_vm4, %v10148_v50  ;;  %v10412_v19 = vrot.slane %v10410_v1, 3  ;;  %v10415_v63 = vrot.slane %v10413_v51, 4  ;;  %v23851_v15 = vor.u32 %v9773_v61, %v9770_v20 }
 0x561   : > { %17223 = vmatmul.msk.bf16.gmra.mxu2 %vm9124_vm4, %v10408_v33  ;;  %v10151_v39 = vor.u32 %v10149_v62, %v23813_v2  ;;  %v10096_v51 = vpack.c.b16 %v10087_v38, %v10087_v38  ;;  %11780 = vmatpush.bf16.msra.mxu0 %v18532_v42 }
 0x562   : > { %v8987_v30 = vmul.f32 %v8946_v49, %v8875_v40  ;;  %v23858_v16 = vor.u32 %v10415_v63, %v10412_v19  ;;  %v18528_v19 = vld [vmem:[%s25021_s6 + $0x58] sm:$0xff] }
 0x563   : > { %v8815_v8 = vpop.f32.mrf.mxu3  ;;  %11519 = vmatpush.bf16.msra.mxu3 %v18528_v19 }
 0x564   : > { %v9003_v35 = vpack.c.bf16 %v8987_v30, %v8987_v30  ;;  %v8840_v24 = vadd.f32 %v8815_v8, %v23590_v41  ;;  %v9605_v12 = vpop.f32.mrf.mxu2  ;;  %v9185_v32 = vpop.f32.mrf.mxu0  ;;  %v10153_v41 = vshll.u32 %v23844_v27, 16  ;;  %v9704_v8 = vpack.c.b16 %v19144_v26, %v19144_v26 }
 0x565   : > { %v23846_v44 = vadd.f32 %v9605_v12, %v9372_v22  ;;  %v9373_v7 = vpop.f32.mrf.mxu1  ;;  %v23876_v2 = vsel %vm2595_vm1, %v23815_v21, %v23858_v16 }
 0x566   : > { %9019 = vst.msk [vmem:[#allocation3 + $0xb4] sm:$0xf] %vm313_vm3, %v9003_v35  ;;  %v8860_v13 = vadd.f32 %v23662_v11, %v8840_v24  ;;  %v9374_v45 = vadd.f32 %v9373_v7, %v9185_v32  ;;  %v23856_v25 = vrot.slane %v10153_v41, 1  ;;  %v10346_v24 = vpack.c.b16 %v23100_v3, %v23100_v3 }
 0x567   : > { %v9780_v1 = vshll.u32 %v9704_v8, 16  ;;  %11520 = vmatpush.bf16.msra.mxu3 %v18527_v14 }
 0x568   : > { %v8876_v54 = vmax.f32 %v8860_v13, 0.0  ;;  %v10156_v35 = vsel %vm2858_vm2, %v10151_v39, %v23856_v25  ;;  %v10422_v20 = vshll.u32 %v10346_v24, 16  ;;  %v10157_v39 = vshrl.u32 %v23844_v27, 16 }
 0x56a   : > { %v8988_v34 = vmul.f32 %v8951_v4, %v8876_v54  ;;  %v10424_v26 = vrot.slane %v10422_v20, 4  ;;  %v8966_v20 = vpop.permute.xlu0 %8965 }
 0x56b   : > { %v8817_v31 = vpop.f32.mrf.mxu3 }
 0x56c   : > { %v9004_v55 = vpack.c.bf16 %v8988_v34, %v8988_v34  ;;  %v8841_v23 = vadd.f32 %v8817_v31, %v23606_v56  ;;  %v9607_v22 = vpop.f32.mrf.mxu2  ;;  %v9188_v50 = vpop.f32.mrf.mxu0  ;;  %v9775_v56 = vsel %vm2595_vm1, %v23809_v28, %v23851_v15  ;;  %v9782_v34 = vrot.slane %v9780_v1, 4 }
 0x56d   : > { %v23860_v40 = vadd.f32 %v9607_v22, %v9374_v45  ;;  %v9376_v49 = vpop.f32.mrf.mxu1  ;;  %v8956_v28 = vpop.permute.xlu1 %8955  ;;  %v10419_v45 = vshrl.u32 %v10346_v24, 16  ;;  %v18548_v22 = vld [vmem:[%s25021_s6 + $0xb8] sm:$0xff] }
 0x56e   : > { %9020 = vst.msk [vmem:[#allocation3 + $0xb8] sm:$0xf] %vm313_vm3, %v9004_v55  ;;  %v8861_v33 = vadd.f32 %v23662_v11, %v8841_v23  ;;  %v9377_v30 = vadd.f32 %v9376_v49, %v9188_v50  ;;  %v8961_v55 = vpop.permute.xlu2 %8960  ;;  %v18536_v50 = vld [vmem:[%s25021_s6 + $0x98] sm:$0xff]  ;;  %12158 = vmatpush.bf16.msra.mxu2 %v18548_v22 }
 0x56f   : > { %17128 = vmatmul.msk.bf16.gmra.mxu0 %vm9124_vm4, %v23760_v48  ;;  %v9777_v48 = vshrl.u32 %v9704_v8, 16  ;;  %v10421_v62 = vrot.slane %v10419_v45, 3  ;;  %11909 = vmatpush.bf16.msra.mxu1 %v18536_v50 }
 0x570   : > { %v8877_v60 = vmax.f32 %v8861_v33, 0.0  ;;  %17096 = vmatmul.msk.bf16.gmra.mxu3 %vm9124_vm4, %v9775_v56  ;;  %17192 = vmatmul.msk.bf16.gmra.mxu1 %vm9124_vm4, %v10156_v35 }
 0x571   : > { %17224 = vmatmul.msk.bf16.gmra.mxu2 %vm9124_vm4, %v23876_v2  ;;  %v9779_v4 = vrot.slane %v9777_v48, 3  ;;  %v10425_v35 = vor.u32 %v10424_v26, %v10421_v62  ;;  %v10159_v48 = vor.u32 %v10157_v39, %v23856_v25  ;;  %v18497_v25 = vld [vmem:[#allocation3 + $0x1c] sm:$0xff] }
 0x572   : > { %v8989_v12 = vmul.f32 %v8956_v28, %v8877_v60 }
 0x573   : > { %v8820_v59 = vpop.f32.mrf.mxu3  ;;  %v9783_v49 = vor.u32 %v9782_v34, %v9779_v4 }
 0x574   : > { %v9005_v32 = vpack.c.bf16 %v8989_v12, %v8989_v12  ;;  %v8842_v13 = vadd.f32 %v8820_v59, %v23613_v6  ;;  %v9610_v7 = vpop.f32.mrf.mxu2  ;;  %v9190_v3 = vpop.f32.mrf.mxu0  ;;  %v10161_v6 = vshll.u32 %v10096_v51, 16  ;;  %v10973_v12 = vld [vmem:[#allocation3 + $0x40] sm:$0x8] }
 0x575   : > { %v23884_v61 = vadd.f32 %v9610_v7, %v9377_v30  ;;  %v9378_v41 = vpop.f32.mrf.mxu1  ;;  %v23901_v30 = vld [vmem:[#allocation3 + $0x44] sm:$0xf]  ;;  %v9784_v51 = vsel %vm2595_vm1, %v23851_v15, %v9783_v49  ;;  %v10426_v7 = vsel %vm2595_vm1, %v23858_v16, %v10425_v35  ;;  %v11144_v45 = vunpack.c.l.b16 %v10973_v12 }
 0x576   : > { %9021 = vst.msk [vmem:[#allocation3 + $0xbc] sm:$0xf] %vm313_vm3, %v9005_v32  ;;  %v8862_v54 = vadd.f32 %v23662_v11, %v8842_v13  ;;  %v9379_v63 = vadd.f32 %v9378_v41, %v9190_v3  ;;  %v10163_v60 = vrot.slane %v10161_v6, 1  ;;  %v11022_v1 = vunpack.c.l.b16 %v23901_v30  ;;  %v23920_v41 = vld [vmem:[#allocation3 + $0x24] sm:$0xff] }
 0x577   : > { %v10742_v6 = vshll.u32 %v18497_v25, 16  ;;  %v10747_v42 = vshll.u32 %v23920_v41, 16 }
 0x578   : > { %v8878_v31 = vmax.f32 %v8862_v54, 0.0  ;;  %v10164_v13 = vsel %vm2858_vm2, %v10159_v48, %v10163_v60  ;;  %v11145_v15 = vpack.c.b16 %v11022_v1, %v11144_v45  ;;  %v10740_v60 = vshrl.u32 %v18497_v25, 16 }
 0x579   : > { %v10744_v49 = vrot.slane %v10742_v6, 1  ;;  %v10749_v35 = vrot.slane %v10747_v42, 1 }
 0x57a   : > { %v8990_v23 = vmul.f32 %v8961_v55, %v8878_v31  ;;  %v11155_v55 = vshrl.u32 %v11145_v15, 16 }
 0x57b   : > { %v8822_v33 = vpop.f32.mrf.mxu3 }
 0x57c   : > { %v9006_v56 = vpack.c.bf16 %v8990_v23, %v8990_v23  ;;  %v8843_v8 = vadd.f32 %v8822_v33, %v23637_v53  ;;  %v9612_v38 = vpop.f32.mrf.mxu2  ;;  %v9193_v28 = vpop.f32.mrf.mxu0  ;;  %v11158_v23 = vshll.u32 %v11145_v15, 16 }
 0x57d   : > { %v23904_v24 = vadd.f32 %v9612_v38, %v9379_v63  ;;  %v9381_v27 = vpop.f32.mrf.mxu1  ;;  %v8971_v33 = vpop.permute.xlu1 %8970 }
 0x57e   : > { %9022 = vst.msk [vmem:[#allocation3 + $0xc0] sm:$0xf] %vm313_vm3, %v9006_v56  ;;  %v8863_v59 = vadd.f32 %v23662_v11, %v8843_v8  ;;  %v9382_v53 = vadd.f32 %v9381_v27, %v9193_v28  ;;  %v11157_v56 = vrot.slane %v11155_v55, 3  ;;  %v11160_v8 = vrot.slane %v11158_v23, 4  ;;  %v18531_v55 = vld [vmem:[%s25021_s6 + $0x70] sm:$0xff] }
 0x57f   : > { %17129 = vmatmul.msk.bf16.gmra.mxu0 %vm9124_vm4, %v23794_v0  ;;  %v19175_v28 = vunpack.c.l.b16 %v23794_v0 }
 0x580   : > { %v8879_v32 = vmax.f32 %v8863_v59, 0.0  ;;  %17097 = vmatmul.msk.bf16.gmra.mxu3 %vm9124_vm4, %v9784_v51  ;;  %17193 = vmatmul.msk.bf16.gmra.mxu1 %vm9124_vm4, %v10164_v13  ;;  %v10745_v51 = vor.u32 %v10744_v49, %v10740_v60  ;;  %v11161_v45 = vor.u32 %v11160_v8, %v11157_v56  ;;  %v20137_v56 = vld [vmem:[#allocation3 + $0x24] sm:$0xff]  }
 0x581   : > { %17225 = vmatmul.msk.bf16.gmra.mxu2 %vm9124_vm4, %v10426_v7  ;;  %v11038_v0 = vpack.c.b16 %v19175_v28, %v11022_v1  ;;  %v18499_v1 = vld [vmem:[#allocation3 + $0x2c] sm:$0xff]  ;;  %11781 = vmatpush.bf16.msra.mxu0 %v18531_v55  ;;  %v23971_v28 = vld [vmem:[#allocation3 + $0x34] sm:$0xff] }
 0x582   : > { %v8991_v3 = vmul.f32 %v8966_v20, %v8879_v32  ;;  %v10750_v20 = vsel %vm2858_vm2, %v10745_v51, %v10749_v35 }
 0x583   : > { %v8825_v54 = vpop.f32.mrf.mxu3 }
 0x584   : > { %v9007_v19 = vpack.c.bf16 %v8991_v3, %v8991_v3  ;;  %v8844_v63 = vadd.f32 %v8825_v54, %v23645_v37  ;;  %v9615_v4 = vpop.f32.mrf.mxu2  ;;  %v9195_v31 = vpop.f32.mrf.mxu0  ;;  %v20545_v37 = vld [vmem:[#allocation3 + $0x20] sm:$0xff]  }
 0x585   : > { %v23923_v34 = vadd.f32 %v9615_v4, %v9382_v53  ;;  %v9383_v26 = vpop.f32.mrf.mxu1  ;;  %v19147_v30 = vunpack.c.l.b16 %v20545_v37  ;;  %v8976_v3 = vpop.permute.xlu2 %8975 }
 0x586   : > { %9023 = vst.msk [vmem:[#allocation3 + $0xc4] sm:$0xf] %vm313_vm3, %v9007_v19  ;;  %v8864_v62 = vadd.f32 %v23662_v11, %v8844_v63  ;;  %v9384_v22 = vadd.f32 %v9383_v26, %v9195_v31  ;;  %v10755_v31 = vshll.u32 %v18499_v1, 16  ;;  %v18547_v26 = vld [vmem:[%s25021_s6 + $0xb0] sm:$0xff] }
 0x587   : > { %v10549_v7 = vpack.c.b16 %v19147_v30, %v10322_v29  ;;  %12159 = vmatpush.bf16.msra.mxu2 %v18547_v26  ;;  %v18526_v26 = vld [vmem:[%s25021_s6 + $0x48] sm:$0xff] }
 0x588   : > { %v8880_v50 = vmax.f32 %v8864_v62, 0.0  ;;  %v10757_v42 = vrot.slane %v10755_v31, 1  ;;  %11521 = vmatpush.bf16.msra.mxu3 %v18526_v26 }
 0x58a   : > { %v8992_v39 = vmul.f32 %v8971_v33, %v8880_v50 }
 0x58b   : > { %v8827_v38 = vpop.f32.mrf.mxu3 }
 0x58c   : > { %v9008_v12 = vpack.c.bf16 %v8992_v39, %v8992_v39  ;;  %v8845_v59 = vadd.f32 %v8827_v38, %v23657_v57  ;;  %v9617_v27 = vpop.f32.mrf.mxu2  ;;  %v9972_v53 = vpop.f32.mrf.mxu0  ;;  %v11170_v57 = vsel %vm2595_vm1, %v11161_v45, %v23815_v21  ;;  %v20437_v38 = vld [vmem:[#allocation3 + $0x4c] sm:$0xff]  }
 0x58d   : > { %v23930_v48 = vadd.f32 %v9617_v27, %v9384_v22  ;;  %v10222_v13 = vpop.f32.mrf.mxu1  ;;  %v10751_v22 = vshrl.u32 %v23920_v41, 16 }
 0x58e   : > { %9024 = vst.msk [vmem:[#allocation3 + $0xc8] sm:$0xf] %vm313_vm3, %v9008_v12  ;;  %v8865_v32 = vadd.f32 %v23662_v11, %v8845_v59 }
 0x58f   : > { %17314 = vmatmul.msk.bf16.vlgmr.msrb.gmra.mxu0 %vm9124_vm4, %v10750_v20  ;;  %v10753_v39 = vor.u32 %v10751_v22, %v10749_v35 }
 0x590   : > { %v8881_v25 = vmax.f32 %v8865_v32, 0.0  ;;  %17250 = vmatmul.msk.bf16.vlgmr.msrb.gmra.mxu3 %vm9124_vm4, %v10549_v7  ;;  %17346 = vmatmul.msk.bf16.vlgmr.msrb.gmra.mxu1 %vm9124_vm4, %v11038_v0  ;;  %v10763_v7 = vshll.u32 %v23971_v28, 16 }
 0x591   : > { %17370 = vmatmul.msk.bf16.vlgmr.msrb.gmra.mxu2 %vm9124_vm4, %v11170_v57  ;;  %v10758_v8 = vsel %vm2858_vm2, %v10753_v39, %v10757_v42  ;;  %v10759_v57 = vshrl.u32 %v18499_v1, 16 }
 0x592   : > { %v8993_v11 = vmul.f32 %v8976_v3, %v8881_v25  ;;  %v10765_v3 = vrot.slane %v10763_v7, 1 }
 0x593   : > { %v9842_v29 = vpop.f32.mrf.mxu3 }
 0x594   : > { %v9009_v15 = vpack.c.bf16 %v8993_v11, %v8993_v11  ;;  %v9882_v54 = vadd.f32 %v9842_v29, %v23667_v46  ;;  %v10484_v19 = vpop.f32.mrf.mxu2  ;;  %v9974_v63 = vpop.f32.mrf.mxu0  ;;  %v18535_v46 = vld [vmem:[%s25021_s6 + $0x90] sm:$0xff] }
 0x595   : > { %v10224_v4 = vpop.f32.mrf.mxu1  ;;  %11910 = vmatpush.bf16.msra.mxu1 %v18535_v46  ;;  %v23994_v46 = vld [vmem:[#allocation3 + $0x3c] sm:$0xff] }
 0x596   : > { %9025 = vst.msk [vmem:[#allocation3 + $0xcc] sm:$0xf] %vm313_vm3, %v9009_v15  ;;  %v10012_v21 = vadd.f32 %v9972_v53, %v9882_v54  ;;  %v10761_v15 = vor.u32 %v10759_v57, %v10757_v42  ;;  %v10771_v39 = vshll.u32 %v23994_v46, 16 }
 0x598   : > { %v10262_v6 = vadd.f32 %v10222_v13, %v10012_v21  ;;  %v10766_v21 = vsel %vm2858_vm2, %v10761_v15, %v10765_v3 }
 0x59a   : > { %v23948_v62 = vadd.f32 %v10484_v19, %v10262_v6 }
 0x59b   : > { %v9844_v23 = vpop.f32.mrf.mxu3 }
 0x59c   : > { %v9883_v50 = vadd.f32 %v9844_v23, %v23678_v9  ;;  %v10486_v33 = vpop.f32.mrf.mxu2  ;;  %v9977_v49 = vpop.f32.mrf.mxu0  ;;  %v23967_v9 = vld [vmem:[#allocation3 + $0x58] sm:$0xff]  }
 0x59d   : > { %v10227_v30 = vpop.f32.mrf.mxu1  ;;  %v11181_v27 = vshrl.u32 %v23967_v9, 16  ;;  %v11184_v53 = vshll.u32 %v23967_v9, 16 }
 0x59e   : > { %v10013_v37 = vadd.f32 %v9974_v63, %v9883_v50  ;;  %v20139_v63 = vld [vmem:[#allocation3 + $0x2c] sm:$0xff]  }
 0x59f   : > { %17315 = vmatmul.msk.bf16.gmra.mxu0 %vm9124_vm4, %v10758_v8  ;;  %v11183_v45 = vrot.slane %v11181_v27, 3  ;;  %v11186_v20 = vrot.slane %v11184_v53, 4 }
 0x5a0   : > { %v10263_v60 = vadd.f32 %v10224_v4, %v10013_v37  ;;  %17251 = vmatmul.msk.bf16.gmra.mxu3 %vm9124_vm4, %v20137_v56  ;;  %17347 = vmatmul.msk.bf16.gmra.mxu1 %vm9124_vm4, %v20437_v38  ;;  %v20439_v4 = vld [vmem:[#allocation3 + $0x54] sm:$0xff]   ;;  %v18530_v38 = vld [vmem:[%s25021_s6 + $0x68] sm:$0xff] }
 0x5a1   : > { %17371 = vmatmul.msk.bf16.gmra.mxu2 %vm9124_vm4, %v23876_v2  ;;  %v11187_v14 = vor.u32 %v11186_v20, %v11183_v45  ;;  %11782 = vmatpush.bf16.msra.mxu0 %v18530_v38  ;;  %v20141_v45 = vld [vmem:[#allocation3 + $0x34] sm:$0xff]  }
 0x5a2   : > { %v23969_v41 = vadd.f32 %v10486_v33, %v10263_v60  ;;  %v18534_v60 = vld [vmem:[%s25021_s6 + $0x88] sm:$0xff] }
 0x5a3   : > { %v9847_v35 = vpop.f32.mrf.mxu3  ;;  %v11188_v1 = vsel %vm2595_vm1, %v23858_v16, %v11187_v14  ;;  %11911 = vmatpush.bf16.msra.mxu1 %v18534_v60 }
 0x5a4   : > { %v9884_v12 = vadd.f32 %v9847_v35, %v23703_v18  ;;  %v10489_v59 = vpop.f32.mrf.mxu2  ;;  %v9979_v51 = vpop.f32.mrf.mxu0 }
 0x5a5   : > { %v10229_v13 = vpop.f32.mrf.mxu1 }
 0x5a6   : > { %v10014_v32 = vadd.f32 %v9977_v49, %v9884_v12  ;;  %v10767_v12 = vshrl.u32 %v23971_v28, 16  ;;  %v24019_v28 = vld [vmem:[#allocation3 + $0x68] sm:$0xff]  }
 0x5a8   : > { %v10264_v2 = vadd.f32 %v10227_v30, %v10014_v32 }
 0x5aa   : > { %v23977_v0 = vadd.f32 %v10489_v59, %v10264_v2  ;;  %v10773_v59 = vrot.slane %v10771_v39, 1 }
 0x5ab   : > { %v9849_v25 = vpop.f32.mrf.mxu3 }
 0x5ac   : > { %v9885_v18 = vadd.f32 %v9849_v25, %v23710_v36  ;;  %v10491_v11 = vpop.f32.mrf.mxu2  ;;  %v9982_v29 = vpop.f32.mrf.mxu0  ;;  %v23987_v36 = vld [vmem:[#allocation3 + $0x60] sm:$0xff]  }
 0x5ad   : > { %v10232_v19 = vpop.f32.mrf.mxu1  ;;  %v11190_v16 = vshrl.u32 %v23987_v36, 16  ;;  %v11193_v42 = vshll.u32 %v23987_v36, 16  ;;  %v20441_v25 = vld [vmem:[#allocation3 + $0x5c] sm:$0xff]  }
 0x5ae   : > { %v10015_v54 = vadd.f32 %v9979_v51, %v9885_v18 }
 0x5af   : > { %17316 = vmatmul.msk.bf16.gmra.mxu0 %vm9124_vm4, %v10766_v21  ;;  %v11192_v30 = vrot.slane %v11190_v16, 3  ;;  %v11195_v56 = vrot.slane %v11193_v42, 4 }
 0x5b0   : > { %v10265_v31 = vadd.f32 %v10229_v13, %v10015_v54  ;;  %17252 = vmatmul.msk.bf16.gmra.mxu3 %vm9124_vm4, %v20139_v63  ;;  %17348 = vmatmul.msk.bf16.gmra.mxu1 %vm9124_vm4, %v20439_v4  ;;  %v10769_v13 = vor.u32 %v10767_v12, %v10765_v3  ;;  %v11199_v54 = vshrl.u32 %v24019_v28, 16 }
 0x5b1   : > { %17372 = vmatmul.msk.bf16.gmra.mxu2 %vm9124_vm4, %v11188_v1  ;;  %v11196_v51 = vor.u32 %v11195_v56, %v11192_v30  ;;  %v20143_v30 = vld [vmem:[#allocation3 + $0x3c] sm:$0xff]  }
 0x5b2   : > { %v23989_v6 = vadd.f32 %v10491_v11, %v10265_v31  ;;  %v10774_v20 = vsel %vm2858_vm2, %v10769_v13, %v10773_v59  ;;  %v24023_v11 = vld [vmem:[#allocation3 + $0x44] sm:$0xff]  ;;  %v11201_v1 = vrot.slane %v11199_v54, 3 }
 0x5b3   : > { %v9852_v55 = vpop.f32.mrf.mxu3  ;;  %v10779_v4 = vshll.u32 %v24023_v11, 16  ;;  %v10783_v54 = vshrl.u32 %v24023_v11, 16  ;;  %v24071_v11 = vld [vmem:[#allocation3 + $0x78] sm:$0xff]  }
 0x5b4   : > { %v9886_v23 = vadd.f32 %v9852_v55, %v23726_v47  ;;  %v10494_v22 = vpop.f32.mrf.mxu2  ;;  %v9984_v50 = vpop.f32.mrf.mxu0  ;;  %v18546_v47 = vld [vmem:[%s25021_s6 + $0xa8] sm:$0xff] }
 0x5b5   : > { %v10234_v49 = vpop.f32.mrf.mxu1  ;;  %12160 = vmatpush.bf16.msra.mxu2 %v18546_v47  ;;  %v10781_v16 = vrot.slane %v10779_v4, 1  ;;  %v20443_v47 = vld [vmem:[#allocation3 + $0x64] sm:$0xff]  }
 0x5b6   : > { %v10016_v33 = vadd.f32 %v9982_v29, %v9886_v23 }
 0x5b8   : > { %v10266_v37 = vadd.f32 %v10232_v19, %v10016_v33  ;;  %v11202_v19 = vshll.u32 %v24019_v28, 16 }
 0x5ba   : > { %v24000_v8 = vadd.f32 %v10494_v22, %v10266_v37  ;;  %v11204_v26 = vrot.slane %v11202_v19, 4  ;;  %v10775_v22 = vshrl.u32 %v23994_v46, 16 }
 0x5bb   : > { %v9854_v35 = vpop.f32.mrf.mxu3 }
 0x5bc   : > { %v9887_v27 = vadd.f32 %v9854_v35, %v23738_v43  ;;  %v10496_v53 = vpop.f32.mrf.mxu2  ;;  %v9987_v32 = vpop.f32.mrf.mxu0  ;;  %v11197_v43 = vsel %vm2595_vm1, %v11187_v14, %v11196_v51  ;;  %v18525_v35 = vld [vmem:[%s25021_s6 + $0x40] sm:$0xff] }
 0x5bd   : > { %v10237_v2 = vpop.f32.mrf.mxu1  ;;  %11522 = vmatpush.bf16.msra.mxu3 %v18525_v35 }
 0x5be   : > { %v10017_v7 = vadd.f32 %v9984_v50, %v9887_v27  ;;  %v11205_v50 = vor.u32 %v11204_v26, %v11201_v1 }
 0x5bf   : > { %17317 = vmatmul.msk.bf16.gmra.mxu0 %vm9124_vm4, %v10774_v20 }
 0x5c0   : > { %v10267_v57 = vadd.f32 %v10234_v49, %v10017_v7  ;;  %17253 = vmatmul.msk.bf16.gmra.mxu3 %vm9124_vm4, %v20141_v45  ;;  %17349 = vmatmul.msk.bf16.gmra.mxu1 %vm9124_vm4, %v20441_v25  ;;  %v10777_v49 = vor.u32 %v10775_v22, %v10773_v59  ;;  %v11206_v46 = vsel %vm2595_vm1, %v11196_v51, %v11205_v50  ;;  %v24046_v59 = vld [vmem:[#allocation3 + $0x4c] sm:$0xff] }
 0x5c1   : > { %17373 = vmatmul.msk.bf16.gmra.mxu2 %vm9124_vm4, %v11197_v43  ;;  %v10787_v45 = vshll.u32 %v24046_v59, 16 }
 0x5c2   : > { %v24021_v3 = vadd.f32 %v10496_v53, %v10267_v57  ;;  %v10782_v56 = vsel %vm2858_vm2, %v10777_v49, %v10781_v16  ;;  %v24075_v49 = vld [vmem:[#allocation3 + $0x54] sm:$0xff] }
 0x5c3   : > { %v9857_v18 = vpop.f32.mrf.mxu3  ;;  %v10789_v19 = vrot.slane %v10787_v45, 1 }
 0x5c4   : > { %v9888_v29 = vadd.f32 %v9857_v18, %v23767_v52  ;;  %v10499_v15 = vpop.f32.mrf.mxu2  ;;  %v9989_v63 = vpop.f32.mrf.mxu0  ;;  %v18529_v18 = vld [vmem:[%s25021_s6 + $0x60] sm:$0xff] }
 0x5c5   : > { %v10239_v21 = vpop.f32.mrf.mxu1  ;;  %11783 = vmatpush.bf16.msra.mxu0 %v18529_v18 }
 0x5c6   : > { %v10018_v14 = vadd.f32 %v9987_v32, %v9888_v29  ;;  %v18533_v29 = vld [vmem:[%s25021_s6 + $0x80] sm:$0xff] }
 0x5c7   : > { %11912 = vmatpush.bf16.msra.mxu1 %v18533_v29 }
 0x5c8   : > { %v10268_v31 = vadd.f32 %v10237_v2, %v10018_v14 }
 0x5ca   : > { %v24029_v55 = vadd.f32 %v10499_v15, %v10268_v31  ;;  %v10785_v31 = vor.u32 %v10783_v54, %v10781_v16 }
 0x5cb   : > { %v9859_v23 = vpop.f32.mrf.mxu3 }
 0x5cc   : > { %v9889_v52 = vadd.f32 %v9859_v23, %v23778_v5  ;;  %v10501_v42 = vpop.f32.mrf.mxu2  ;;  %v9992_v33 = vpop.f32.mrf.mxu0  ;;  %v24039_v5 = vld [vmem:[#allocation3 + $0x70] sm:$0xff]   ;;  %v20145_v23 = vld [vmem:[#allocation3 + $0x44] sm:$0xff]   ;;  %v10790_v22 = vsel %vm2858_vm2, %v10785_v31, %v10789_v19  ;;  %v18552_v31 = vld [vmem:[%s25021_s6 + $0xd8] sm:$0xff] }
 0x5cd   : > { %v10242_v37 = vpop.f32.mrf.mxu1  ;;  %v11208_v51 = vshrl.u32 %v24039_v5, 16  ;;  %v11211_v32 = vshll.u32 %v24039_v5, 16  ;;  %12419 = vmatpush.bf16.msrb.mxu3 %v18552_v31 }
 0x5ce   : > { %v10019_v39 = vadd.f32 %v9989_v63, %v9889_v52  ;;  %v20445_v52 = vld [vmem:[#allocation3 + $0x6c] sm:$0xff]  }
 0x5cf   : > { %17318 = vmatmul.msk.bf16.gmra.mxu0 %vm9124_vm4, %v10782_v56  ;;  %v11210_v25 = vrot.slane %v11208_v51, 3  ;;  %v11213_v57 = vrot.slane %v11211_v32, 4  ;;  %v11220_v56 = vshll.u32 %v24071_v11, 16 }
 0x5d0   : > { %v10269_v38 = vadd.f32 %v10239_v21, %v10019_v39  ;;  %17254 = vmatmul.msk.bf16.gmra.mxu3 %vm9124_vm4, %v20143_v30  ;;  %17350 = vmatmul.msk.bf16.gmra.mxu1 %vm9124_vm4, %v20443_v47  ;;  %v11217_v30 = vshrl.u32 %v24071_v11, 16 }
 0x5d1   : > { %17374 = vmatmul.msk.bf16.gmra.mxu2 %vm9124_vm4, %v11206_v46  ;;  %v11214_v21 = vor.u32 %v11213_v57, %v11210_v25  ;;  %v10795_v46 = vshll.u32 %v24075_v49, 16 }
 0x5d2   : > { %v24041_v60 = vadd.f32 %v10501_v42, %v10269_v38 }
 0x5d3   : > { %v9862_v12 = vpop.f32.mrf.mxu3 }
 0x5d4   : > { %v9890_v27 = vadd.f32 %v9862_v12, %v23801_v10  ;;  %v10504_v53 = vpop.f32.mrf.mxu2  ;;  %v9994_v13 = vpop.f32.mrf.mxu0  ;;  %v18545_v10 = vld [vmem:[%s25021_s6 + $0xa0] sm:$0xff]  ;;  %v11219_v12 = vrot.slane %v11217_v30, 3  ;;  %v18568_v30 = vld [vmem:[%s25021_s6 + $0x118] sm:$0xff] }
 0x5d5   : > { %v10244_v2 = vpop.f32.mrf.mxu1  ;;  %12161 = vmatpush.bf16.msra.mxu2 %v18545_v10  ;;  %12797 = vmatpush.bf16.msrb.mxu1 %v18568_v30 }
 0x5d6   : > { %v10020_v7 = vadd.f32 %v9992_v33, %v9890_v27  ;;  %v11222_v27 = vrot.slane %v11220_v56, 4 }
 0x5d8   : > { %v10270_v20 = vadd.f32 %v10242_v37, %v10020_v7  ;;  %v11223_v45 = vor.u32 %v11222_v27, %v11219_v12 }
 0x5da   : > { %v24052_v43 = vadd.f32 %v10504_v53, %v10270_v20  ;;  %v10989_v53 = vld [vmem:[#allocation3 + $0x80] sm:$0xf]  ;;  %v10686_v20 = vld [vmem:[#allocation3 + $0x5c] sm:$0x1] }
 0x5db   : > { %v9864_v15 = vpop.f32.mrf.mxu3  ;;  %v11037_v25 = vunpack.c.l.b16 %v10989_v53 }
 0x5dc   : > { %v9891_v63 = vadd.f32 %v9864_v15, %v23817_v17  ;;  %v10506_v14 = vpop.f32.mrf.mxu2  ;;  %v9997_v4 = vpop.f32.mrf.mxu0  ;;  %v11215_v17 = vsel %vm2595_vm1, %v11205_v50, %v11214_v21  ;;  %v20146_v15 = vld [vmem:[#allocation3 + $0x4c] sm:$0xff]  }
 0x5dd   : > { %v10247_v26 = vpop.f32.mrf.mxu1 }
 0x5de   : > { %v10021_v1 = vadd.f32 %v9994_v13, %v9891_v63  ;;  %v10791_v13 = vshrl.u32 %v24046_v59, 16  ;;  %v20446_v63 = vld [vmem:[#allocation3 + $0x74] sm:$0xff]   ;;  %v11153_v59 = vpack.c.b16 %v11037_v25, %v11037_v25 }
 0x5df   : > { %17319 = vmatmul.msk.bf16.gmra.mxu0 %vm9124_vm4, %v10790_v22 }
 0x5e0   : > { %v10271_v42 = vadd.f32 %v10244_v2, %v10021_v1  ;;  %17255 = vmatmul.msk.bf16.gmra.mxu3 %vm9124_vm4, %v20145_v23  ;;  %17351 = vmatmul.msk.bf16.gmra.mxu1 %vm9124_vm4, %v20445_v52  ;;  %v10793_v10 = vor.u32 %v10791_v13, %v10789_v19  ;;  %v11226_v52 = vshrl.u32 %v11153_v59, 16 }
 0x5e1   : > { %17375 = vmatmul.msk.bf16.gmra.mxu2 %vm9124_vm4, %v11215_v17 }
 0x5e2   : > { %v24073_v16 = vadd.f32 %v10506_v14, %v10271_v42  ;;  %v10729_v14 = vunpack.c.l.b16 %v10686_v20  ;;  %v11229_v42 = vshll.u32 %v11153_v59, 16 }
 0x5e3   : > { %v9867_v33 = vpop.f32.mrf.mxu3 }
 0x5e4   : > { %v9892_v39 = vadd.f32 %v9867_v33, %v23846_v44  ;;  %v10509_v37 = vpop.f32.mrf.mxu2  ;;  %v9999_v47 = vpop.f32.mrf.mxu0  ;;  %v10797_v44 = vrot.slane %v10795_v46, 1 }
 0x5e5   : > { %v10249_v38 = vpop.f32.mrf.mxu1 }
 0x5e6   : > { %v10022_v50 = vadd.f32 %v9997_v4, %v9892_v39  ;;  %v10798_v54 = vsel %vm2858_vm2, %v10793_v10, %v10797_v44  ;;  %v18576_v39 = vld [vmem:[%s25021_s6 + $0x38] sm:$0xff]  ;;  %v20448_v10 = vld [vmem:[#allocation3 + $0x4c] sm:$0xf0]  }
 0x5e7   : > { %13036 = vmatpush.bf16.msrb.mxu2 %v18576_v39 }
 0x5e8   : > { %v10272_v35 = vadd.f32 %v10247_v26, %v10022_v50  ;;  %v10738_v26 = vpack.c.b16 %v10729_v14, %v10729_v14  ;;  %v11231_v50 = vrot.slane %v11229_v42, 4 }
 0x5ea   : > { %v24081_v51 = vadd.f32 %v10509_v37, %v10272_v35  ;;  %v18556_v37 = vld [vmem:[%s25021_s6 + $0xf8] sm:$0xff]  ;;  %v10799_v35 = vshrl.u32 %v24075_v49, 16  ;;  %v20179_v49 = vld [vmem:[#allocation3 + $0x4c] sm:$0x8] }
 0x5eb   : > { %v9869_v32 = vpop.f32.mrf.mxu3  ;;  %12548 = vmatpush.bf16.msrb.mxu0 %v18556_v37 }
 0x5ec   : > { %v9893_v7 = vadd.f32 %v9869_v32, %v23860_v40  ;;  %v10511_v2 = vpop.f32.mrf.mxu2  ;;  %v10002_v57 = vpop.f32.mrf.mxu0  ;;  %v11224_v40 = vsel %vm2595_vm1, %v11214_v21, %v11223_v45 }
 0x5ed   : > { %v10252_v29 = vpop.f32.mrf.mxu1 }
 0x5ee   : > { %v10023_v18 = vadd.f32 %v9999_v47, %v9893_v7  ;;  %v11228_v47 = vrot.slane %v11226_v52, 3  ;;  %v10801_v7 = vor.u32 %v10799_v35, %v10797_v44  ;;  %v18517_v44 = vld [vmem:[#allocation3 + $0x44] sm:$0xff] }
 0x5ef   : > { %17320 = vmatmul.msk.bf16.gmra.mxu0 %vm9124_vm4, %v10798_v54 }
 0x5f0   : > { %v10273_v4 = vadd.f32 %v10249_v38, %v10023_v18  ;;  %17256 = vmatmul.msk.bf16.gmra.mxu3 %vm9124_vm4, %v20146_v15  ;;  %17352 = vmatmul.msk.bf16.gmra.mxu1 %vm9124_vm4, %v20446_v63  ;;  %v11232_v32 = vor.u32 %v11231_v50, %v11228_v47  ;;  %v20450_v15 = vld [vmem:[#allocation3 + $0x54] sm:$0xff]   ;;  %v20180_v63 = vor.u32 %v20448_v10, %v20179_v49  ;;  %v20452_v49 = vld [vmem:[#allocation3 + $0x5c] sm:$0xff]  }
 0x5f1   : > { %17376 = vmatmul.msk.bf16.gmra.mxu2 %vm9124_vm4, %v11224_v40  ;;  %v24120_v40 = vld [vmem:[#allocation3 + $0x4c] sm:$0xff]  ;;  %v11657_v59 = vshrl.u32 %v20450_v15, 16  ;;  %v11660_v31 = vshll.u32 %v20450_v15, 16 }
 0x5f2   : > { %v24091_v19 = vadd.f32 %v10511_v2, %v10273_v4  ;;  %v19200_v2 = vunpack.c.h.b16 %v24071_v11  ;;  %v18537_v4 = vld [vmem:[#allocation3 + $0x50] sm:$0xff]  ;;  %v11652_v52 = vshll.u32 %v20180_v63, 16 }
 0x5f3   : > { %v9872_v1 = vpop.f32.mrf.mxu3  ;;  %v11659_v39 = vrot.slane %v11657_v59, 3  ;;  %v11662_v37 = vrot.slane %v11660_v31, 4  ;;  %v24145_v31 = vld [vmem:[#allocation3 + $0x54] sm:$0xff] }
 0x5f4   : > { %v9894_v23 = vadd.f32 %v9872_v1, %v23884_v61  ;;  %v10514_v22 = vpop.f32.mrf.mxu2  ;;  %v10004_v21 = vpop.f32.mrf.mxu0  ;;  %v10803_v61 = vshll.u32 %v10738_v26, 16  ;;  %v24123_v26 = vld [vmem:[#allocation3 + $0x58] sm:$0xff] }
 0x5f5   : > { %v10254_v33 = vpop.f32.mrf.mxu1 }
 0x5f6   : > { %v10024_v17 = vadd.f32 %v10002_v57, %v9894_v23  ;;  %v10805_v12 = vrot.slane %v10803_v61, 1  ;;  %v11402_v23 = vshll.u32 %v18517_v44, 16  ;;  %v12046_v61 = vshll.u32 %v24123_v26, 16 }
 0x5f8   : > { %v10274_v56 = vadd.f32 %v10252_v29, %v10024_v17  ;;  %v10806_v18 = vsel %vm2858_vm2, %v10801_v7, %v10805_v12  ;;  %v11045_v29 = vpack.c.b16 %v11037_v25, %v19200_v2  ;;  %v12041_v17 = vshll.u32 %v18537_v4, 16 }
 0x5f9   : > { %v11400_v12 = vshrl.u32 %v18517_v44, 16  ;;  %v12039_v7 = vshrl.u32 %v18537_v4, 16  ;;  %v12048_v2 = vrot.slane %v12046_v61, 1  ;;  %v18551_v4 = vld [vmem:[%s25021_s6 + $0xd0] sm:$0xff] }
 0x5fa   : > { %v24106_v38 = vadd.f32 %v10514_v22, %v10274_v56  ;;  %v11649_v22 = vshrl.u32 %v20180_v63, 16  ;;  %v11404_v56 = vrot.slane %v11402_v23, 1  ;;  %12420 = vmatpush.bf16.msrb.mxu3 %v18551_v4 }
 0x5fb   : > { %v9874_v46 = vpop.f32.mrf.mxu3 }
 0x5fc   : > { %v9895_v27 = vadd.f32 %v9874_v46, %v23904_v24  ;;  %v10516_v53 = vpop.f32.mrf.mxu2  ;;  %v10007_v13 = vpop.f32.mrf.mxu0  ;;  %v11233_v24 = vsel %vm2595_vm1, %v11223_v45, %v11232_v32  ;;  %v11651_v47 = vrot.slane %v11649_v22, 3  ;;  %v12043_v46 = vrot.slane %v12041_v17, 1  ;;  %v24151_v22 = vld [vmem:[%s25022_s7] ss:$0 sm:$0xff] }
 0x5fd   : > { %v10257_v57 = vpop.f32.mrf.mxu1 }
 0x5fe   : > { %v10025_v20 = vadd.f32 %v10004_v21, %v9895_v27  ;;  %v12044_v15 = vor.u32 %v12043_v46, %v12039_v7 }
 0x5ff   : > { %17321 = vmatmul.msk.bf16.gmra.mxu0 %vm9124_vm4, %v10806_v18 }
 0x600   : > { %v10275_v54 = vadd.f32 %v10254_v33, %v10025_v20  ;;  %17257 = vmatmul.msk.bf16.gmra.mxu3 %vm9124_vm4, %v23104_v58  ;;  %17353 = vmatmul.msk.bf16.gmra.mxu1 %vm9124_vm4, %v11045_v29  ;;  %v11407_v33 = vshll.u32 %v24120_v40, 16  ;;  %v12049_v63 = vsel %vm2858_vm2, %v12044_v15, %v12048_v2 }
 0x601   : > { %17377 = vmatmul.msk.bf16.gmra.mxu2 %vm9124_vm4, %v11233_v24 }
 0x602   : > { %v24118_v14 = vadd.f32 %v10516_v53, %v10275_v54  ;;  %v11409_v27 = vrot.slane %v11407_v33, 1  ;;  %v24129_v53 = vor.u32 %v11662_v37, %v11659_v39  ;;  %v11415_v39 = vshll.u32 %v24145_v31, 16 }
 0x603   : > { %v9877_v25 = vpop.f32.mrf.mxu3 }
 0x604   : > { %v9896_v58 = vadd.f32 %v9877_v25, %v23923_v34  ;;  %v10519_v1 = vpop.f32.mrf.mxu2  ;;  %v10009_v45 = vpop.f32.mrf.mxu0  ;;  %v11654_v34 = vrot.slane %v11652_v52, 4  ;;  %v24153_v52 = vld [vmem:[#allocation3 + $0x60] sm:$0xff] }
 0x605   : > { %v10259_v21 = vpop.f32.mrf.mxu1 }
 0x606   : > { %v10026_v42 = vadd.f32 %v10007_v13, %v9896_v58  ;;  %v11655_v10 = vor.u32 %v11654_v34, %v11651_v47  ;;  %v11666_v58 = vshrl.u32 %v20452_v49, 16  ;;  %v18555_v47 = vld [vmem:[%s25021_s6 + $0xf0] sm:$0xff] }
 0x607   : > { %v18567_v34 = vld [vmem:[%s25021_s6 + $0x110] sm:$0xff]  ;;  %12549 = vmatpush.bf16.msrb.mxu0 %v18555_v47  ;;  %v12058_v47 = vshrl.u32 %v24153_v52, 16 }
 0x608   : > { %v10276_v30 = vadd.f32 %v10257_v57, %v10026_v42  ;;  %v11405_v57 = vor.u32 %v11404_v56, %v11400_v12  ;;  %v11664_v24 = vsel %vm2595_vm1, %v11655_v10, %v24129_v53  ;;  %v11668_v37 = vrot.slane %v11666_v58, 3  ;;  %v18575_v56 = vld [vmem:[%s25021_s6 + $0x30] sm:$0xff]  ;;  %12798 = vmatpush.bf16.msrb.mxu1 %v18567_v34 }
 0x609   : > { %13037 = vmatpush.bf16.msrb.mxu2 %v18575_v56  ;;  %v11417_v12 = vrot.slane %v11415_v39, 1 }
 0x60a   : > { %v24127_v50 = vadd.f32 %v10519_v1, %v10276_v30  ;;  %v11410_v54 = vsel %vm2858_vm2, %v11405_v57, %v11409_v27  ;;  %v11669_v1 = vshll.u32 %v20452_v49, 16 }
 0x60b   : > { %v9879_v35 = vpop.f32.mrf.mxu3 }
 0x60c   : > { %v9897_v32 = vadd.f32 %v9879_v35, %v23930_v48  ;;  %v10521_v13 = vpop.f32.mrf.mxu2  ;;  %v10864_v20 = vpop.f32.mrf.mxu0  ;;  %v19693_v48 = vld [vmem:[#allocation3 + $0x50] sm:$0xff]   ;;  %v11671_v30 = vrot.slane %v11669_v1, 4  ;;  %v11411_v35 = vshrl.u32 %v24120_v40, 16 }
 0x60d   : > { %v11103_v29 = vpop.f32.mrf.mxu1 }
 0x60e   : > { %v10027_v18 = vadd.f32 %v10009_v45, %v9897_v32  ;;  %v11672_v32 = vor.u32 %v11671_v30, %v11668_v37 }
 0x60f   : > { %17466 = vmatmul.msk.bf16.vlgmr.msra.gmra.mxu0 %vm9124_vm4, %v11664_v24 }
 0x610   : > { %v10277_v44 = vadd.f32 %v10259_v21, %v10027_v18  ;;  %17434 = vmatmul.msk.bf16.vlgmr.msra.gmra.mxu3 %vm9124_vm4, %v11410_v54  ;;  %17498 = vmatmul.msk.bf16.vlgmr.msra.gmra.mxu1 %vm9124_vm4, %v19693_v48  ;;  %v11673_v40 = vsel %vm2595_vm1, %v24129_v53, %v11672_v32 }
 0x611   : > { %17562 = vmatmul.msk.bf16.vlgmr.msra.gmra.mxu2 %vm9124_vm4, %v12049_v63 }
 0x612   : > { %v24143_v25 = vadd.f32 %v10521_v13, %v10277_v44  ;;  %v20454_v44 = vld [vmem:[#allocation3 + $0x64] sm:$0xff]  }
 0x613   : > { %v10614_v59 = vpop.f32.mrf.mxu3  ;;  %v11678_v53 = vshll.u32 %v20454_v44, 16 }
 0x614   : > { %v10654_v45 = vadd.f32 %v10614_v59, %v23948_v62  ;;  %v11291_v23 = vpop.f32.mrf.mxu2  ;;  %v10866_v21 = vpop.f32.mrf.mxu0  ;;  %v12054_v62 = vshll.u32 %v24153_v52, 16  ;;  %v24187_v59 = vld [vmem:[#allocation3 + $0x68] sm:$0xff] }
 0x615   : > { %v24155_v42 = vadd.f32 %v11291_v23, %v11103_v29  ;;  %v11105_v33 = vpop.f32.mrf.mxu1  ;;  %v11413_v29 = vor.u32 %v11411_v35, %v11409_v27  ;;  %v24184_v27 = vld [vmem:[#allocation3 + $0x5c] sm:$0xff]  ;;  %v12062_v39 = vshll.u32 %v24187_v59, 16  ;;  %v18550_v52 = vld [vmem:[%s25021_s6 + $0xc8] sm:$0xff] }
 0x616   : > { %v10904_v17 = vadd.f32 %v10864_v20, %v10654_v45  ;;  %v12050_v20 = vshrl.u32 %v24123_v26, 16  ;;  %v12056_v57 = vrot.slane %v12054_v62, 1  ;;  %12421 = vmatpush.bf16.msrb.mxu3 %v18550_v52 }
 0x617   : > { %v11418_v49 = vsel %vm2858_vm2, %v11413_v29, %v11417_v12  ;;  %v12064_v34 = vrot.slane %v12062_v39, 1 }
 0x618   : > { %v10924_v61 = vadd.f32 %v24151_v22, %v10904_v17  ;;  %v12052_v24 = vor.u32 %v12050_v20, %v12048_v2  ;;  %v11675_v2 = vshrl.u32 %v20454_v44, 16  ;;  %v11680_v17 = vrot.slane %v11678_v53, 4  ;;  %v24214_v44 = vld [vmem:[#allocation3 + $0x70] sm:$0xff] }
 0x61a   : > { %10940 = vxpose.xlu0.b32.start [1/16] (narrow) %v10924_v61, 8 }
 0x61b   : > { %v10616_v46 = vpop.f32.mrf.mxu3 }
 0x61c   : > { %v10655_v13 = vadd.f32 %v10616_v46, %v23969_v41  ;;  %v11293_v7 = vpop.f32.mrf.mxu2  ;;  %v10869_v18 = vpop.f32.mrf.mxu0  ;;  %v12057_v41 = vsel %vm2858_vm2, %v12052_v24, %v12056_v57 }
 0x61d   : > { %v24172_v10 = vadd.f32 %v11293_v7, %v11105_v33  ;;  %v11108_v54 = vpop.f32.mrf.mxu1 }
 0x61e   : > { %v10905_v15 = vadd.f32 %v10866_v21, %v10655_v13  ;;  %v11677_v21 = vrot.slane %v11675_v2, 3 }
 0x61f   : > { %17467 = vmatmul.msk.bf16.gmra.mxu0 %vm9124_vm4, %v11673_v40 }
 0x620   : > { %v10925_v48 = vadd.f32 %v24151_v22, %v10905_v15  ;;  %17435 = vmatmul.msk.bf16.gmra.mxu3 %vm9124_vm4, %v11418_v49  ;;  %17499 = vmatmul.msk.bf16.gmra.mxu1 %vm9124_vm4, %v23967_v9  ;;  %v11423_v9 = vshll.u32 %v24184_v27, 16  ;;  %v11681_v61 = vor.u32 %v11680_v17, %v11677_v21  ;;  %v11427_v21 = vshrl.u32 %v24184_v27, 16 }
 0x621   : > { %17563 = vmatmul.msk.bf16.gmra.mxu2 %vm9124_vm4, %v12057_v41 }
 0x622   : > { %10941 = vxpose.xlu0.b32.cont [2/16] (narrow) %v10925_v48, 8  ;;  %v11425_v30 = vrot.slane %v11423_v9, 1  ;;  %v11682_v15 = vsel %vm2595_vm1, %v11672_v32, %v11681_v61  ;;  %v24211_v32 = vld [vmem:[#allocation3 + $0x64] sm:$0xff] }
 0x623   : > { %v10619_v26 = vpop.f32.mrf.mxu3  ;;  %v11431_v2 = vshll.u32 %v24211_v32, 16 }
 0x624   : > { %v10656_v63 = vadd.f32 %v10619_v26, %v23977_v0  ;;  %v11296_v4 = vpop.f32.mrf.mxu2  ;;  %v10871_v1 = vpop.f32.mrf.mxu0  ;;  %v11419_v0 = vshrl.u32 %v24145_v31, 16  ;;  %v20456_v31 = vld [vmem:[#allocation3 + $0x6c] sm:$0xff]  }
 0x625   : > { %v24189_v58 = vadd.f32 %v11296_v4, %v11108_v54  ;;  %v11110_v23 = vpop.f32.mrf.mxu1  ;;  %v11687_v24 = vshll.u32 %v20456_v31, 16  ;;  %v11433_v17 = vrot.slane %v11431_v2, 1 }
 0x626   : > { %v10906_v45 = vadd.f32 %v10869_v18, %v10656_v63  ;;  %v11421_v13 = vor.u32 %v11419_v0, %v11417_v12  ;;  %v12060_v18 = vor.u32 %v12058_v47, %v12056_v57  ;;  %v11684_v57 = vshrl.u32 %v20456_v31, 16 }
 0x627   : > { %v11689_v63 = vrot.slane %v11687_v24, 4  ;;  %v12066_v0 = vshrl.u32 %v24187_v59, 16 }
 0x628   : > { %v10926_v33 = vadd.f32 %v24151_v22, %v10906_v45  ;;  %v11426_v29 = vsel %vm2858_vm2, %v11421_v13, %v11425_v30  ;;  %v11686_v53 = vrot.slane %v11684_v57, 3  ;;  %v18554_v45 = vld [vmem:[%s25021_s6 + $0xe8] sm:$0xff] }
 0x629   : > { %12550 = vmatpush.bf16.msrb.mxu0 %v18554_v45 }
 0x62a   : > { %10942 = vxpose.xlu0.b32.cont [3/16] (narrow) %v10926_v33, 8  ;;  %v11690_v33 = vor.u32 %v11689_v63, %v11686_v53 }
 0x62b   : > { %v10621_v37 = vpop.f32.mrf.mxu3 }
 0x62c   : > { %v10657_v62 = vadd.f32 %v10621_v37, %v23989_v6  ;;  %v11298_v56 = vpop.f32.mrf.mxu2  ;;  %v10874_v35 = vpop.f32.mrf.mxu0  ;;  %v12065_v6 = vsel %vm2858_vm2, %v12060_v18, %v12064_v34  ;;  %v11691_v27 = vsel %vm2595_vm1, %v11681_v61, %v11690_v33 }
 0x62d   : > { %v24197_v46 = vadd.f32 %v11298_v56, %v11110_v23  ;;  %v11113_v20 = vpop.f32.mrf.mxu1  ;;  %v18566_v23 = vld [vmem:[%s25021_s6 + $0x108] sm:$0xff] }
 0x62e   : > { %v10907_v7 = vadd.f32 %v10871_v1, %v10657_v62  ;;  %v12070_v1 = vshll.u32 %v24214_v44, 16  ;;  %12799 = vmatpush.bf16.msrb.mxu1 %v18566_v23 }
 0x62f   : > { %17468 = vmatmul.msk.bf16.gmra.mxu0 %vm9124_vm4, %v11682_v15 }
 0x630   : > { %v10927_v54 = vadd.f32 %v24151_v22, %v10907_v7  ;;  %17436 = vmatmul.msk.bf16.gmra.mxu3 %vm9124_vm4, %v11426_v29  ;;  %17500 = vmatmul.msk.bf16.gmra.mxu1 %vm9124_vm4, %v23987_v36  ;;  %v12072_v62 = vrot.slane %v12070_v1, 1  ;;  %v20458_v29 = vld [vmem:[#allocation3 + $0x74] sm:$0xff]   ;;  %v12074_v1 = vshrl.u32 %v24214_v44, 16  ;;  %v18549_v44 = vld [vmem:[%s25021_s6 + $0xc0] sm:$0xff] }
 0x631   : > { %17564 = vmatmul.msk.bf16.gmra.mxu2 %vm9124_vm4, %v12065_v6  ;;  %v11696_v61 = vshll.u32 %v20458_v29, 16  ;;  %v24247_v6 = vld [vmem:[#allocation3 + $0x78] sm:$0xff]  ;;  %12422 = vmatpush.bf16.msrb.mxu3 %v18549_v44 }
 0x632   : > { %10943 = vxpose.xlu0.b32.cont [4/16] (narrow) %v10927_v54, 8 }
 0x633   : > { %v10624_v12 = vpop.f32.mrf.mxu3 }
 0x634   : > { %v10658_v49 = vadd.f32 %v10624_v12, %v24000_v8  ;;  %v11301_v40 = vpop.f32.mrf.mxu2  ;;  %v10876_v36 = vpop.f32.mrf.mxu0  ;;  %v18574_v8 = vld [vmem:[%s25021_s6 + $0x28] sm:$0xff] }
 0x635   : > { %v24216_v48 = vadd.f32 %v11301_v40, %v11113_v20  ;;  %v11115_v26 = vpop.f32.mrf.mxu1  ;;  %13038 = vmatpush.bf16.msrb.mxu2 %v18574_v8  ;;  %v12068_v20 = vor.u32 %v12066_v0, %v12064_v34  ;;  %v11693_v34 = vshrl.u32 %v20458_v29, 16  ;;  %v11698_v40 = vrot.slane %v11696_v61, 4 }
 0x636   : > { %v10908_v41 = vadd.f32 %v10874_v35, %v10658_v49  ;;  %v11429_v35 = vor.u32 %v11427_v21, %v11425_v30  ;;  %v24244_v30 = vld [vmem:[#allocation3 + $0x6c] sm:$0xff] }
 0x637   : > { %v11695_v49 = vrot.slane %v11693_v34, 3 }
 0x638   : > { %v10928_v4 = vadd.f32 %v24151_v22, %v10908_v41  ;;  %v11434_v18 = vsel %vm2858_vm2, %v11429_v35, %v11433_v17  ;;  %v12078_v41 = vshll.u32 %v24247_v6, 16 }
 0x639   : > { %v11699_v53 = vor.u32 %v11698_v40, %v11695_v49 }
 0x63a   : > { %10944 = vxpose.xlu0.b32.cont [5/16] (narrow) %v10928_v4, 8  ;;  %v12080_v8 = vrot.slane %v12078_v41, 1  ;;  %v12082_v41 = vshrl.u32 %v24247_v6, 16 }
 0x63b   : > { %v10626_v9 = vpop.f32.mrf.mxu3 }
 0x63c   : > { %v10659_v39 = vadd.f32 %v10626_v9, %v24021_v3  ;;  %v11303_v37 = vpop.f32.mrf.mxu2  ;;  %v10879_v47 = vpop.f32.mrf.mxu0  ;;  %v12073_v3 = vsel %vm2858_vm2, %v12068_v20, %v12072_v62 }
 0x63d   : > { %v24233_v56 = vadd.f32 %v11303_v37, %v11115_v26  ;;  %v11118_v7 = vpop.f32.mrf.mxu1  ;;  %v12076_v37 = vor.u32 %v12074_v1, %v12072_v62 }
 0x63e   : > { %v10909_v13 = vadd.f32 %v10876_v36, %v10659_v39 }
 0x63f   : > { %17469 = vmatmul.msk.bf16.gmra.mxu0 %vm9124_vm4, %v11691_v27 }
 0x640   : > { %v10929_v15 = vadd.f32 %v24151_v22, %v10909_v13  ;;  %17437 = vmatmul.msk.bf16.gmra.mxu3 %vm9124_vm4, %v11434_v18  ;;  %17501 = vmatmul.msk.bf16.gmra.mxu1 %vm9124_vm4, %v24019_v28  ;;  %v11439_v28 = vshll.u32 %v24244_v30, 16  ;;  %v24274_v18 = vld [vmem:[#allocation3 + $0x80] sm:$0xff] }
 0x641   : > { %17565 = vmatmul.msk.bf16.gmra.mxu2 %vm9124_vm4, %v12073_v3 }
 0x642   : > { %10945 = vxpose.xlu0.b32.cont [6/16] (narrow) %v10929_v15, 8  ;;  %v11441_v2 = vrot.slane %v11439_v28, 1 }
 0x643   : > { %v10629_v59 = vpop.f32.mrf.mxu3 }
 0x644   : > { %v10660_v31 = vadd.f32 %v10629_v59, %v24029_v55  ;;  %v11306_v54 = vpop.f32.mrf.mxu2  ;;  %v10881_v12 = vpop.f32.mrf.mxu0  ;;  %v11435_v55 = vshrl.u32 %v24211_v32, 16  ;;  %v20460_v32 = vld [vmem:[#allocation3 + $0x7c] sm:$0xff]  }
 0x645   : > { %v24249_v52 = vadd.f32 %v11306_v54, %v11118_v7  ;;  %v11120_v24 = vpop.f32.mrf.mxu1  ;;  %v11702_v62 = vshrl.u32 %v20460_v32, 16  ;;  %v11705_v13 = vshll.u32 %v20460_v32, 16  ;;  %v18553_v54 = vld [vmem:[%s25021_s6 + $0xe0] sm:$0xff]  ;;  %v24307_v32 = vld [vmem:[#allocation3 + $0x88] sm:$0xff] }
 0x646   : > { %v10910_v57 = vadd.f32 %v10879_v47, %v10660_v31  ;;  %v11437_v9 = vor.u32 %v11435_v55, %v11433_v17  ;;  %v11700_v47 = vsel %vm2595_vm1, %v11690_v33, %v11699_v53  ;;  %v24271_v33 = vld [vmem:[#allocation3 + $0x74] sm:$0xff]  ;;  %v12086_v31 = vshll.u32 %v24274_v18, 16  ;;  %12551 = vmatpush.bf16.msrb.mxu0 %v18553_v54  ;;  %v11347_v54 = vld [vmem:[#allocation3 + $0x84] sm:$0x1] }
 0x647   : > { %v11447_v3 = vshll.u32 %v24271_v33, 16  ;;  %v11704_v59 = vrot.slane %v11702_v62, 3  ;;  %v11707_v34 = vrot.slane %v11705_v13, 4 }
 0x648   : > { %v10930_v36 = vadd.f32 %v24151_v22, %v10910_v57  ;;  %v11442_v0 = vsel %vm2858_vm2, %v11437_v9, %v11441_v2  ;;  %v12084_v9 = vor.u32 %v12082_v41, %v12080_v8 }
 0x649   : > { %v11449_v28 = vrot.slane %v11447_v3, 1  ;;  %v11708_v49 = vor.u32 %v11707_v34, %v11704_v59 }
 0x64a   : > { %10946 = vxpose.xlu0.b32.cont [7/16] (narrow) %v10930_v36, 8 }
 0x64b   : > { %v10631_v26 = vpop.f32.mrf.mxu3 }
 0x64c   : > { %v10661_v63 = vadd.f32 %v10631_v26, %v24041_v60  ;;  %v11308_v4 = vpop.f32.mrf.mxu2  ;;  %v10884_v23 = vpop.f32.mrf.mxu0  ;;  %v12081_v60 = vsel %vm2858_vm2, %v12076_v37, %v12080_v8  ;;  %v12088_v26 = vrot.slane %v12086_v31, 1  ;;  %v12090_v31 = vshrl.u32 %v24274_v18, 16 }
 0x64d   : > { %v24257_v45 = vadd.f32 %v11308_v4, %v11120_v24  ;;  %v11123_v39 = vpop.f32.mrf.mxu1  ;;  %v11443_v24 = vshrl.u32 %v24244_v30, 16  ;;  %v11709_v30 = vsel %vm2595_vm1, %v11699_v53, %v11708_v49 }
 0x64e   : > { %v10911_v21 = vadd.f32 %v10881_v12, %v10661_v63  ;;  %v18565_v12 = vld [vmem:[%s25021_s6 + $0x100] sm:$0xff]  ;;  %v12092_v41 = vor.u32 %v12090_v31, %v12088_v26 }
 0x64f   : > { %17470 = vmatmul.msk.bf16.gmra.mxu0 %vm9124_vm4, %v11700_v47  ;;  %12800 = vmatpush.bf16.msrb.mxu1 %v18565_v12  ;;  %v11445_v4 = vor.u32 %v11443_v24, %v11441_v2  ;;  %v24304_v2 = vld [vmem:[#allocation3 + $0x7c] sm:$0xff] }
 0x650   : > { %v10931_v35 = vadd.f32 %v24151_v22, %v10911_v21  ;;  %17438 = vmatmul.msk.bf16.gmra.mxu3 %vm9124_vm4, %v11442_v0  ;;  %17502 = vmatmul.msk.bf16.gmra.mxu1 %vm9124_vm4, %v24039_v5 }
 0x651   : > { %17566 = vmatmul.msk.bf16.gmra.mxu2 %vm9124_vm4, %v12081_v60  ;;  %v11450_v21 = vsel %vm2858_vm2, %v11445_v4, %v11449_v28  ;;  %v11389_v4 = vunpack.c.l.b16 %v11347_v54  ;;  %v12098_v54 = vshrl.u32 %v24307_v32, 16 }
 0x652   : > { %10947 = vxpose.xlu0.b32.cont [8/16] (narrow) %v10931_v35, 8 }
 0x653   : > { %v10634_v17 = vpop.f32.mrf.mxu3 }
 0x654   : > { %v10662_v7 = vadd.f32 %v10634_v17, %v24052_v43  ;;  %v11311_v20 = vpop.f32.mrf.mxu2  ;;  %v10886_v5 = vpop.f32.mrf.mxu0  ;;  %v18573_v43 = vld [vmem:[%s25021_s6 + $0x20] sm:$0xff] }
 0x655   : > { %v24276_v27 = vadd.f32 %v11311_v20, %v11123_v39  ;;  %v11125_v15 = vpop.f32.mrf.mxu1  ;;  %13039 = vmatpush.bf16.msrb.mxu2 %v18573_v43  ;;  %v20461_v39 = vld [vmem:[#allocation3 + $0x84] sm:$0xff]   ;;  %v12094_v20 = vshll.u32 %v24307_v32, 16 }
 0x656   : > { %v10912_v29 = vadd.f32 %v10884_v23, %v10662_v7  ;;  %v11711_v8 = vshrl.u32 %v20461_v39, 16  ;;  %v11714_v53 = vshll.u32 %v20461_v39, 16 }
 0x657   : > { %v24324_v43 = vrot.slane %v12094_v20, 1  ;;  %v18592_v20 = vld [vmem:[%s25021_s6 + $0x78] sm:$0xff] }
 0x658   : > { %v10932_v61 = vadd.f32 %v24151_v22, %v10912_v29  ;;  %v11713_v62 = vrot.slane %v11711_v8, 3  ;;  %v11716_v13 = vrot.slane %v11714_v53, 4  ;;  %v11451_v29 = vshrl.u32 %v24271_v33, 16  ;;  %13718 = vmatpush.bf16.msra.mxu1 %v18592_v20 }
 0x65a   : > { %10948 = vxpose.xlu0.b32.cont [9/16] (narrow) %v10932_v61, 8  ;;  %v24319_v3 = vor.u32 %v11716_v13, %v11713_v62  ;;  %v11453_v24 = vor.u32 %v11451_v29, %v11449_v28  ;;  %v12097_v28 = vsel %vm2858_vm2, %v12092_v41, %v24324_v43  ;;  %v24349_v13 = vld [vmem:[#allocation3 + $0x5c] sm:$0xf]  ;;  %v11459_v29 = vshrl.u32 %v24304_v2, 16 }
 0x65b   : > { %v10636_v57 = vpop.f32.mrf.mxu3  ;;  %v12262_v41 = vunpack.c.l.b16 %v24349_v13 }
 0x65c   : > { %v10663_v40 = vadd.f32 %v10636_v57, %v24073_v16  ;;  %v11313_v36 = vpop.f32.mrf.mxu2  ;;  %v10889_v63 = vpop.f32.mrf.mxu0  ;;  %v12089_v16 = vsel %vm2858_vm2, %v12084_v9, %v12088_v26 }
 0x65d   : > { %v24293_v55 = vadd.f32 %v11313_v36, %v11125_v15  ;;  %v11128_v23 = vpop.f32.mrf.mxu1 }
 0x65e   : > { %v10913_v1 = vadd.f32 %v10886_v5, %v10663_v40  ;;  %v24314_v5 = vld [vmem:[#allocation3 + $0x88] sm:$0xff]   ;;  %v11986_v40 = vld [vmem:[#allocation3 + $0x90] sm:$0x1] }
 0x65f   : > { %17471 = vmatmul.msk.bf16.gmra.mxu0 %vm9124_vm4, %v11709_v30  ;;  %v19232_v59 = vunpack.c.h.b16 %v24314_v5  ;;  %v12028_v26 = vunpack.c.l.b16 %v11986_v40 }
 0x660   : > { %v10933_v37 = vadd.f32 %v24151_v22, %v10913_v1  ;;  %17439 = vmatmul.msk.bf16.gmra.mxu3 %vm9124_vm4, %v11450_v21  ;;  %17503 = vmatmul.msk.bf16.gmra.mxu1 %vm9124_vm4, %v24071_v11  ;;  %v11455_v11 = vshll.u32 %v24304_v2, 16  ;;  %v11398_v21 = vpack.c.b16 %v11389_v4, %v11389_v4 }
 0x661   : > { %17567 = vmatmul.msk.bf16.gmra.mxu2 %vm9124_vm4, %v12089_v16  ;;  %v11647_v1 = vpack.c.b16 %v19232_v59, %v19232_v59 }
 0x662   : > { %10949 = vxpose.xlu0.b32.cont [10/16] (narrow) %v10933_v37, 8  ;;  %v24317_v15 = vrot.slane %v11455_v11, 1 }
 0x663   : > { %v10639_v6 = vpop.f32.mrf.mxu3  ;;  %v11720_v30 = vshrl.u32 %v11647_v1, 16  ;;  %v11723_v39 = vshll.u32 %v11647_v1, 16 }
 0x664   : > { %v10664_v0 = vadd.f32 %v10639_v6, %v24081_v51  ;;  %v11316_v47 = vpop.f32.mrf.mxu2  ;;  %v10891_v60 = vpop.f32.mrf.mxu0  ;;  %v12037_v6 = vpack.c.b16 %v12028_v26, %v12028_v26 }
 0x665   : > { %v24309_v35 = vadd.f32 %v11316_v47, %v11128_v23  ;;  %v11130_v17 = vpop.f32.mrf.mxu1  ;;  %v24335_v23 = vld [vmem:[#allocation3 + $0x80] sm:$0xff]  }
 0x666   : > { %v10914_v44 = vadd.f32 %v10889_v63, %v10664_v0  ;;  %v11458_v63 = vsel %vm2858_vm2, %v11453_v24, %v24317_v15  ;;  %v12102_v62 = vshll.u32 %v12037_v6, 16  ;;  %v12219_v24 = vld [vmem:[#allocation3 + $0x58] sm:$0x8] }
 0x667   : > { %v12261_v4 = vunpack.c.l.b16 %v12219_v24 }
 0x668   : > { %v10934_v7 = vadd.f32 %v24151_v22, %v10914_v44  ;;  %v11722_v44 = vrot.slane %v11720_v30, 3  ;;  %v24379_v30 = vld [vmem:[#allocation3 + $0x64] sm:$0xff] }
 0x66a   : > { %10950 = vxpose.xlu0.b32.cont [11/16] (narrow) %v10934_v7, 8  ;;  %v18588_v7 = vld [vmem:[%s25021_s6 + $0x58] sm:$0xff] }
 0x66b   : > { %v10641_v51 = vpop.f32.mrf.mxu3  ;;  %13457 = vmatpush.bf16.msra.mxu0 %v18588_v7  ;;  %v24385_v7 = vld [vmem:[#allocation3 + $0x84] sm:$0xf] }
 0x66c   : > { %v10665_v34 = vadd.f32 %v10641_v51, %v24091_v19  ;;  %v11318_v61 = vpop.f32.mrf.mxu2  ;;  %v10894_v57 = vpop.f32.mrf.mxu0  ;;  %v11718_v19 = vsel %vm2595_vm1, %v11708_v49, %v24319_v3  ;;  %v18572_v49 = vld [vmem:[%s25021_s6 + $0x18] sm:$0xff] }
 0x66d   : > { %v24326_v12 = vadd.f32 %v11318_v61, %v11130_v17  ;;  %v11133_v36 = vpop.f32.mrf.mxu1  ;;  %13224 = vmatpush.bf16.msra.mxu3 %v18572_v49  ;;  %v11725_v17 = vrot.slane %v11723_v39, 4 }
 0x66e   : > { %v10915_v33 = vadd.f32 %v10891_v60, %v10665_v34  ;;  %v11463_v60 = vshll.u32 %v11398_v21, 16 }
 0x66f   : > { %17472 = vmatmul.msk.bf16.gmra.mxu0 %vm9124_vm4, %v11718_v19  ;;  %v11726_v34 = vor.u32 %v11725_v17, %v11722_v44  ;;  %v12100_v19 = vor.u32 %v12098_v54, %v24324_v43  ;;  %v12278_v43 = vpack.c.b16 %v12262_v41, %v12261_v4 }
 0x670   : > { %v10935_v18 = vadd.f32 %v24151_v22, %v10915_v33  ;;  %17440 = vmatmul.msk.bf16.gmra.mxu3 %vm9124_vm4, %v11458_v63  ;;  %17504 = vmatmul.msk.bf16.gmra.mxu1 %vm9124_vm4, %v24335_v23  ;;  %v11465_v59 = vrot.slane %v11463_v60, 1 }
 0x671   : > { %17568 = vmatmul.msk.bf16.gmra.mxu2 %vm9124_vm4, %v12097_v28  ;;  %v11727_v32 = vsel %vm2595_vm1, %v24319_v3, %v11726_v34  ;;  %v18557_v28 = vld [vmem:[#allocation3 + $0x5c] sm:$0xff]  ;;  %v12291_v6 = vshll.u32 %v12278_v43, 16 }
 0x672   : > { %10951 = vxpose.xlu0.b32.cont [12/16] (narrow) %v10935_v18, 8  ;;  %v19701_v18 = vld [vmem:[#allocation3 + $0x60] sm:$0xff]  }
 0x673   : > { %v10644_v9 = vpop.f32.mrf.mxu3  ;;  %v12296_v3 = vshrl.u32 %v19701_v18, 16  ;;  %v12299_v49 = vshll.u32 %v19701_v18, 16  ;;  %v12293_v13 = vrot.slane %v12291_v6, 4 }
 0x674   : > { %v10666_v37 = vadd.f32 %v10644_v9, %v24106_v38  ;;  %v11321_v16 = vpop.f32.mrf.mxu2  ;;  %v10896_v53 = vpop.f32.mrf.mxu0  ;;  %v18596_v38 = vld [vmem:[%s25021_s6 + $0x98] sm:$0xff] }
 0x675   : > { %v24346_v8 = vadd.f32 %v11321_v16, %v11133_v36  ;;  %v11135_v47 = vpop.f32.mrf.mxu1  ;;  %13847 = vmatpush.bf16.msra.mxu2 %v18596_v38  ;;  %v11461_v36 = vor.u32 %v11459_v29, %v24317_v15  ;;  %v12288_v16 = vshrl.u32 %v12278_v43, 16  ;;  %v12298_v60 = vrot.slane %v12296_v3, 3 }
 0x676   : > { %v10916_v0 = vadd.f32 %v10894_v57, %v10666_v37  ;;  %v12104_v57 = vrot.slane %v12102_v62, 1  ;;  %v12301_v44 = vrot.slane %v12299_v49, 4  ;;  %v19263_v29 = vunpack.c.l.b16 %v24314_v5 }
 0x677   : > { %v12290_v62 = vrot.slane %v12288_v16, 3 }
 0x678   : > { %v10936_v11 = vadd.f32 %v24151_v22, %v10916_v0  ;;  %v12105_v15 = vsel %vm2858_vm2, %v12100_v19, %v12104_v57 }
 0x679   : > { %v12294_v24 = vor.u32 %v12293_v13, %v12290_v62  ;;  %v12689_v62 = vshrl.u32 %v24379_v30, 16 }
 0x67a   : > { %10952 = vxpose.xlu0.b32.cont [13/16] (narrow) %v10936_v11, 8  ;;  %v12685_v11 = vshll.u32 %v24379_v30, 16  ;;  %v19703_v30 = vld [vmem:[#allocation3 + $0x70] sm:$0xff]  }
 0x67b   : > { %v10646_v51 = vpop.f32.mrf.mxu3 }
 0x67c   : > { %v10667_v61 = vadd.f32 %v10646_v51, %v24118_v14  ;;  %v11323_v31 = vpop.f32.mrf.mxu2  ;;  %v10899_v33 = vpop.f32.mrf.mxu0  ;;  %v11466_v14 = vsel %vm2858_vm2, %v11461_v36, %v11465_v59  ;;  %v12302_v51 = vor.u32 %v12301_v44, %v12298_v60 }
 0x67d   : > { %v24363_v40 = vadd.f32 %v11323_v31, %v11135_v47  ;;  %v11138_v63 = vpop.f32.mrf.mxu1  ;;  %v12680_v47 = vshll.u32 %v18557_v28, 16  ;;  %v12687_v31 = vrot.slane %v12685_v11, 1 }
 0x67e   : > { %v10917_v2 = vadd.f32 %v10896_v53, %v10667_v61  ;;  %v12678_v61 = vshrl.u32 %v18557_v28, 16 }
 0x67f   : > { %17473 = vmatmul.msk.bf16.gmra.mxu0 %vm9124_vm4, %v11727_v32  ;;  %v12682_v38 = vrot.slane %v12680_v47, 1  ;;  %v18591_v47 = vld [vmem:[%s25021_s6 + $0x70] sm:$0xff] }
 0x680   : > { %v10937_v1 = vadd.f32 %v24151_v22, %v10917_v2  ;;  %17441 = vmatmul.msk.bf16.gmra.mxu3 %vm9124_vm4, %v11466_v14  ;;  %17505 = vmatmul.msk.bf16.gmra.mxu1 %vm9124_vm4, %v24314_v5  ;;  %v12303_v14 = vsel %vm2595_vm1, %v12294_v24, %v12302_v51 }
 0x681   : > { %17569 = vmatmul.msk.bf16.gmra.mxu2 %vm9124_vm4, %v12105_v15  ;;  %v12683_v19 = vor.u32 %v12682_v38, %v12678_v61  ;;  %13719 = vmatpush.bf16.msra.mxu1 %v18591_v47  ;;  %v20464_v61 = vld [vmem:[#allocation3 + $0x8c] sm:$0xff]  }
 0x682   : > { %10953 = vxpose.xlu0.b32.cont [14/16] (narrow) %v10937_v1, 8  ;;  %v19702_v1 = vld [vmem:[#allocation3 + $0x68] sm:$0xff]  }
 0x683   : > { %v10649_v26 = vpop.f32.mrf.mxu3  ;;  %v12688_v4 = vsel %vm2858_vm2, %v12683_v19, %v12687_v31  ;;  %v12308_v43 = vshll.u32 %v19702_v1, 16  ;;  %v24427_v19 = vld [vmem:[#allocation3 + $0x74] sm:$0xff] }
 0x684   : > { %v10668_v9 = vadd.f32 %v10649_v26, %v24127_v50  ;;  %v11326_v21 = vpop.f32.mrf.mxu2  ;;  %v10901_v37 = vpop.f32.mrf.mxu0  ;;  %v19235_v50 = vunpack.c.l.b16 %v19701_v18  ;;  %v12305_v18 = vshrl.u32 %v19702_v1, 16  ;;  %v18559_v26 = vld [vmem:[#allocation3 + $0x6c] sm:$0xff] }
 0x685   : > { %v24381_v39 = vadd.f32 %v11326_v21, %v11138_v63  ;;  %v11140_v0 = vpop.f32.mrf.mxu1  ;;  %v12693_v6 = vshll.u32 %v18559_v26, 16 }
 0x686   : > { %v10918_v53 = vadd.f32 %v10899_v33, %v10668_v9  ;;  %v12960_v33 = vunpack.c.l.b16 %v24385_v7  ;;  %v12488_v63 = vpack.c.b16 %v19235_v50, %v12262_v41  ;;  %v18571_v41 = vld [vmem:[%s25021_s6 + $0x10] sm:$0xff]  ;;  %v12307_v21 = vrot.slane %v12305_v18, 3 }
 0x687   : > { %13225 = vmatpush.bf16.msra.mxu3 %v18571_v41  ;;  %v12695_v13 = vrot.slane %v12693_v6, 1 }
 0x688   : > { %v10938_v17 = vadd.f32 %v24151_v22, %v10918_v53  ;;  %v12976_v32 = vpack.c.b16 %v19263_v29, %v12960_v33  ;;  %v20218_v29 = vld [vmem:[#allocation3 + $0x64] sm:$0xff]  }
 0x68a   : > { %10954 = vxpose.xlu0.b32.cont [15/16] (narrow) %v10938_v17, 8 }
 0x68b   : > { %v10651_v20 = vpop.f32.mrf.mxu3 }
 0x68c   : > { %v10669_v59 = vadd.f32 %v10651_v20, %v24143_v25  ;;  %v11328_v34 = vpop.f32.mrf.mxu2  ;;  %v11785_v57 = vpop.f32.mrf.mxu0 }
 0x68d   : > { %v24389_v54 = vadd.f32 %v11328_v34, %v11140_v0  ;;  %v11914_v2 = vpop.f32.mrf.mxu1  ;;  %v18595_v0 = vld [vmem:[%s25021_s6 + $0x90] sm:$0xff] }
 0x68e   : > { %v10919_v36 = vadd.f32 %v10901_v37, %v10669_v59  ;;  %v12310_v37 = vrot.slane %v12308_v43, 4  ;;  %13848 = vmatpush.bf16.msra.mxu2 %v18595_v0  ;;  %v12691_v59 = vor.u32 %v12689_v62, %v12687_v31  ;;  %v12317_v31 = vshll.u32 %v19703_v30, 16 }
 0x68f   : > { %17626 = vmatmul.msk.bf16.vlgmr.msrb.gmra.mxu0 %vm9124_vm4, %v12488_v63 }
 0x690   : > { %v10939_v25 = vadd.f32 %v24151_v22, %v10919_v36  ;;  %17594 = vmatmul.msk.bf16.vlgmr.msrb.gmra.mxu3 %vm9124_vm4, %v12303_v14  ;;  %17690 = vmatmul.msk.bf16.vlgmr.msrb.gmra.mxu1 %vm9124_vm4, %v12688_v4  ;;  %v12311_v44 = vor.u32 %v12310_v37, %v12307_v21  ;;  %v12319_v1 = vrot.slane %v12317_v31, 4 }
 0x691   : > { %17722 = vmatmul.msk.bf16.vlgmr.msrb.gmra.mxu2 %vm9124_vm4, %v12976_v32 }
 0x692   : > { %10955 = vxpose.xlu0.b32.end [16/16] (narrow) %v10939_v25, 8  ;;  %v12312_v34 = vsel %vm2595_vm1, %v12302_v51, %v12311_v44 }
 0x693   : > { %v11524_v15 = vpop.f32.mrf.mxu3 }
 0x694   : > { %v11564_v22 = vadd.f32 %v11524_v15, %v24155_v42  ;;  %v12163_v28 = vpop.f32.mrf.mxu2  ;;  %v11787_v3 = vpop.f32.mrf.mxu0  ;;  %v18587_v42 = vld [vmem:[%s25021_s6 + $0x50] sm:$0xff]  ;;  %v12701_v15 = vshll.u32 %v24427_v19, 16 }
 0x695   : > { %v11916_v9 = vpop.f32.mrf.mxu1  ;;  %13458 = vmatpush.bf16.msra.mxu0 %v18587_v42  ;;  %v20466_v42 = vld [vmem:[#allocation3 + $0x94] sm:$0xff]  }
 0x696   : > { %v11825_v49 = vadd.f32 %v11785_v57, %v11564_v22 }
 0x698   : > { %v11954_v16 = vadd.f32 %v11914_v2, %v11825_v49  ;;  %v12314_v2 = vshrl.u32 %v19703_v30, 16  ;;  %v12697_v49 = vshrl.u32 %v18559_v26, 16  ;;  %v18570_v26 = vld [vmem:[%s25021_s6 + $0x8] sm:$0xff] }
 0x699   : > { %13226 = vmatpush.bf16.msra.mxu3 %v18570_v26 }
 0x69a   : > { %v24405_v53 = vadd.f32 %v12163_v28, %v11954_v16  ;;  %v12316_v4 = vrot.slane %v12314_v2, 3  ;;  %v20220_v16 = vld [vmem:[#allocation3 + $0x6c] sm:$0xff]   ;;  %v12699_v6 = vor.u32 %v12697_v49, %v12695_v13 }
 0x69b   : > { %v11526_v60 = vpop.f32.mrf.mxu3  ;;  %v18590_v2 = vld [vmem:[%s25021_s6 + $0x68] sm:$0xff] }
 0x69c   : > { %v11565_v17 = vadd.f32 %v11526_v60, %v24172_v10  ;;  %v12165_v11 = vpop.f32.mrf.mxu2  ;;  %v11790_v50 = vpop.f32.mrf.mxu0  ;;  %v12696_v10 = vsel %vm2858_vm2, %v12691_v59, %v12695_v13  ;;  %v12320_v22 = vor.u32 %v12319_v1, %v12316_v4  ;;  %13720 = vmatpush.bf16.msra.mxu1 %v18590_v2 }
 0x69d   : > { %v11919_v20 = vpop.f32.mrf.mxu1 }
 0x69e   : > { %v11826_v38 = vadd.f32 %v11787_v3, %v11565_v17  ;;  %v12321_v0 = vsel %vm2595_vm1, %v12311_v44, %v12320_v22  ;;  %v19704_v17 = vld [vmem:[#allocation3 + $0x78] sm:$0xff]  }
 0x69f   : > { %17627 = vmatmul.msk.bf16.gmra.mxu0 %vm9124_vm4, %v20218_v29  ;;  %v12326_v62 = vshll.u32 %v19704_v17, 16 }
 0x6a0   : > { %v11955_v57 = vadd.f32 %v11916_v9, %v11826_v38  ;;  %17595 = vmatmul.msk.bf16.gmra.mxu3 %vm9124_vm4, %v12312_v34  ;;  %17691 = vmatmul.msk.bf16.gmra.mxu1 %vm9124_vm4, %v12696_v10  ;;  %v18561_v38 = vld [vmem:[#allocation3 + $0x7c] sm:$0xff] }
 0x6a1   : > { %17723 = vmatmul.msk.bf16.gmra.mxu2 %vm9124_vm4, %v20464_v61  ;;  %v12328_v61 = vrot.slane %v12326_v62, 4  ;;  %v12709_v10 = vshll.u32 %v18561_v38, 16 }
 0x6a2   : > { %v24424_v24 = vadd.f32 %v12165_v11, %v11955_v57  ;;  %v12323_v11 = vshrl.u32 %v19704_v17, 16 }
 0x6a3   : > { %v11529_v36 = vpop.f32.mrf.mxu3 }
 0x6a4   : > { %v11566_v51 = vadd.f32 %v11529_v36, %v24189_v58  ;;  %v12168_v63 = vpop.f32.mrf.mxu2  ;;  %v11792_v14 = vpop.f32.mrf.mxu0  ;;  %v12703_v58 = vrot.slane %v12701_v15, 1  ;;  %v12325_v34 = vrot.slane %v12323_v11, 3  ;;  %v18594_v36 = vld [vmem:[%s25021_s6 + $0x88] sm:$0xff]  ;;  %v20222_v15 = vld [vmem:[#allocation3 + $0x74] sm:$0xff]  }
 0x6a5   : > { %v11921_v25 = vpop.f32.mrf.mxu1  ;;  %13849 = vmatpush.bf16.msra.mxu2 %v18594_v36 }
 0x6a6   : > { %v11827_v32 = vadd.f32 %v11790_v50, %v11566_v51  ;;  %v12704_v60 = vsel %vm2858_vm2, %v12699_v6, %v12703_v58  ;;  %v12329_v51 = vor.u32 %v12328_v61, %v12325_v34  ;;  %v20224_v34 = vld [vmem:[#allocation3 + $0x7c] sm:$0xff]  }
 0x6a8   : > { %v11956_v41 = vadd.f32 %v11919_v20, %v11827_v32  ;;  %v12705_v32 = vshrl.u32 %v24427_v19, 16 }
 0x6aa   : > { %v24430_v18 = vadd.f32 %v12168_v63, %v11956_v41 }
 0x6ab   : > { %v11531_v43 = vpop.f32.mrf.mxu3 }
 0x6ac   : > { %v11567_v28 = vadd.f32 %v11531_v43, %v24197_v46  ;;  %v12170_v3 = vpop.f32.mrf.mxu2  ;;  %v11795_v9 = vpop.f32.mrf.mxu0  ;;  %v12707_v43 = vor.u32 %v12705_v32, %v12703_v58  ;;  %v12335_v58 = vshll.u32 %v24335_v23, 16  ;;  %v24486_v32 = vld [vmem:[#allocation3 + $0x8c] sm:$0xff] }
 0x6ad   : > { %v11924_v37 = vpop.f32.mrf.mxu1 }
 0x6ae   : > { %v11828_v21 = vadd.f32 %v11792_v14, %v11567_v28  ;;  %v12330_v28 = vsel %vm2595_vm1, %v12320_v22, %v12329_v51 }
 0x6af   : > { %17628 = vmatmul.msk.bf16.gmra.mxu0 %vm9124_vm4, %v20220_v16  ;;  %v18562_v16 = vld [vmem:[#allocation3 + $0x84] sm:$0xff] }
 0x6b0   : > { %v11957_v47 = vadd.f32 %v11921_v25, %v11828_v21  ;;  %17596 = vmatmul.msk.bf16.gmra.mxu3 %vm9124_vm4, %v12321_v0  ;;  %17692 = vmatmul.msk.bf16.gmra.mxu1 %vm9124_vm4, %v12704_v60  ;;  %v12711_v25 = vrot.slane %v12709_v10, 1  ;;  %v12332_v21 = vshrl.u32 %v24335_v23, 16  ;;  %v12337_v60 = vrot.slane %v12335_v58, 4  ;;  %v20470_v10 = vld [vmem:[#allocation3 + $0xa4] sm:$0xff]  }
 0x6b1   : > { %17724 = vmatmul.msk.bf16.gmra.mxu2 %vm9124_vm4, %v20466_v42  ;;  %v12717_v26 = vshll.u32 %v18562_v16, 16 }
 0x6b2   : > { %v24439_v46 = vadd.f32 %v12170_v3, %v11957_v47  ;;  %v20468_v3 = vld [vmem:[#allocation3 + $0x9c] sm:$0xff]   ;;  %v12334_v47 = vrot.slane %v12332_v21, 3 }
 0x6b3   : > { %v11534_v44 = vpop.f32.mrf.mxu3  ;;  %v12719_v23 = vrot.slane %v12717_v26, 1  ;;  %v20472_v26 = vld [vmem:[#allocation3 + $0xac] sm:$0xff]  }
 0x6b4   : > { %v11568_v13 = vadd.f32 %v11534_v44, %v24216_v48  ;;  %v12173_v50 = vpop.f32.mrf.mxu2  ;;  %v11797_v20 = vpop.f32.mrf.mxu0  ;;  %v18586_v48 = vld [vmem:[%s25021_s6 + $0x48] sm:$0xff]  ;;  %v12338_v62 = vor.u32 %v12337_v60, %v12334_v47 }
 0x6b5   : > { %v11926_v59 = vpop.f32.mrf.mxu1  ;;  %13459 = vmatpush.bf16.msra.mxu0 %v18586_v48  ;;  %v20226_v47 = vld [vmem:[#allocation3 + $0x84] sm:$0xff]  }
 0x6b6   : > { %v11829_v29 = vadd.f32 %v11795_v9, %v11568_v13 }
 0x6b8   : > { %v11958_v57 = vadd.f32 %v11924_v37, %v11829_v29 }
 0x6ba   : > { %v24445_v30 = vadd.f32 %v12173_v50, %v11958_v57  ;;  %v12339_v57 = vsel %vm2595_vm1, %v12329_v51, %v12338_v62  ;;  %v12344_v51 = vshll.u32 %v24314_v5, 16 }
 0x6bb   : > { %v11536_v31 = vpop.f32.mrf.mxu3 }
 0x6bc   : > { %v11569_v63 = vadd.f32 %v11536_v31, %v24233_v56  ;;  %v12175_v14 = vpop.f32.mrf.mxu2  ;;  %v11800_v4 = vpop.f32.mrf.mxu0  ;;  %v12712_v56 = vsel %vm2858_vm2, %v12707_v43, %v12711_v25  ;;  %v12341_v31 = vshrl.u32 %v24314_v5, 16  ;;  %v18593_v5 = vld [vmem:[%s25021_s6 + $0x80] sm:$0xff] }
 0x6bd   : > { %v11929_v41 = vpop.f32.mrf.mxu1  ;;  %13850 = vmatpush.bf16.msra.mxu2 %v18593_v5 }
 0x6be   : > { %v11830_v1 = vadd.f32 %v11797_v20, %v11569_v63  ;;  %v12713_v20 = vshrl.u32 %v18561_v38, 16  ;;  %v18569_v38 = vld [vmem:[%s25021_s6] sm:$0xff] }
 0x6bf   : > { %17629 = vmatmul.msk.bf16.gmra.mxu0 %vm9124_vm4, %v20222_v15  ;;  %13227 = vmatpush.bf16.msra.mxu3 %v18569_v38  ;;  %v12346_v15 = vrot.slane %v12344_v51, 4  ;;  %v12235_v38 = vld [vmem:[#allocation3 + $0x98] sm:$0xf] }
 0x6c0   : > { %v11959_v49 = vadd.f32 %v11926_v59, %v11830_v1  ;;  %17597 = vmatmul.msk.bf16.gmra.mxu3 %vm9124_vm4, %v12330_v28  ;;  %17693 = vmatmul.msk.bf16.gmra.mxu1 %vm9124_vm4, %v12712_v56  ;;  %v12715_v61 = vor.u32 %v12713_v20, %v12711_v25  ;;  %v12725_v28 = vshll.u32 %v24486_v32, 16 }
 0x6c1   : > { %17725 = vmatmul.msk.bf16.gmra.mxu2 %vm9124_vm4, %v20468_v3 }
 0x6c2   : > { %v24464_v19 = vadd.f32 %v12175_v14, %v11959_v49  ;;  %v12720_v48 = vsel %vm2858_vm2, %v12715_v61, %v12719_v23  ;;  %v18589_v49 = vld [vmem:[%s25021_s6 + $0x60] sm:$0xff] }
 0x6c3   : > { %v11539_v9 = vpop.f32.mrf.mxu3  ;;  %13721 = vmatpush.bf16.msra.mxu1 %v18589_v49  ;;  %v20473_v49 = vld [vmem:[#allocation3 + $0xb4] sm:$0xff]  }
 0x6c4   : > { %v11570_v22 = vadd.f32 %v11539_v9, %v24249_v52  ;;  %v12178_v37 = vpop.f32.mrf.mxu2  ;;  %v11802_v6 = vpop.f32.mrf.mxu0 }
 0x6c5   : > { %v11931_v42 = vpop.f32.mrf.mxu1 }
 0x6c6   : > { %v11831_v0 = vadd.f32 %v11800_v4, %v11570_v22  ;;  %v12721_v22 = vshrl.u32 %v18562_v16, 16  ;;  %v24508_v16 = vld [vmem:[#allocation3 + $0x90] sm:$0xff]  }
 0x6c7   : > { %v12350_v20 = vshrl.u32 %v24508_v16, 16 }
 0x6c8   : > { %v11960_v17 = vadd.f32 %v11929_v41, %v11831_v0  ;;  %v12343_v41 = vrot.slane %v12341_v31, 3  ;;  %v12723_v60 = vor.u32 %v12721_v22, %v12719_v23  ;;  %v18608_v22 = vld [vmem:[%s25021_s6 + $0xb8] sm:$0xff] }
 0x6c9   : > { %14096 = vmatpush.bf16.msrb.mxu3 %v18608_v22  ;;  %v20260_v22 = vld [vmem:[#allocation3 + $0x8c] sm:$0x8] }
 0x6ca   : > { %v24469_v44 = vadd.f32 %v12178_v37, %v11960_v17  ;;  %v24500_v9 = vor.u32 %v12346_v15, %v12343_v41  ;;  %v12727_v37 = vrot.slane %v12725_v28, 1  ;;  %v12625_v41 = vld [vmem:[#allocation3 + $0x9c] sm:$0x1]  ;;  %v20227_v28 = vld [vmem:[#allocation3 + $0x8c] sm:$0xff]  }
 0x6cb   : > { %v11541_v11 = vpop.f32.mrf.mxu3 }
 0x6cc   : > { %v11571_v13 = vadd.f32 %v11541_v11, %v24257_v45  ;;  %v12180_v50 = vpop.f32.mrf.mxu2  ;;  %v11805_v29 = vpop.f32.mrf.mxu0  ;;  %v12348_v17 = vsel %vm2595_vm1, %v12338_v62, %v24500_v9  ;;  %v12353_v62 = vshll.u32 %v24508_v16, 16 }
 0x6cd   : > { %v11934_v59 = vpop.f32.mrf.mxu1 }
 0x6ce   : > { %v11832_v52 = vadd.f32 %v11802_v6, %v11571_v13 }
 0x6cf   : > { %17630 = vmatmul.msk.bf16.gmra.mxu0 %vm9124_vm4, %v20224_v34 }
 0x6d0   : > { %v11961_v36 = vadd.f32 %v11931_v42, %v11832_v52  ;;  %17598 = vmatmul.msk.bf16.gmra.mxu3 %vm9124_vm4, %v12339_v57  ;;  %17694 = vmatmul.msk.bf16.gmra.mxu1 %vm9124_vm4, %v12720_v48  ;;  %v24517_v52 = vld [vmem:[#allocation3 + $0x94] sm:$0xff]  ;;  %v12352_v57 = vrot.slane %v12350_v20, 3  ;;  %v12927_v20 = vld [vmem:[#allocation3 + $0xc0] sm:$0xf] }
 0x6d1   : > { %17726 = vmatmul.msk.bf16.gmra.mxu2 %vm9124_vm4, %v20470_v10  ;;  %v12355_v10 = vrot.slane %v12353_v62, 4  ;;  %v12733_v48 = vshll.u32 %v24517_v52, 16 }
 0x6d2   : > { %v24478_v45 = vadd.f32 %v12180_v50, %v11961_v36 }
 0x6d3   : > { %v11544_v2 = vpop.f32.mrf.mxu3  ;;  %v24522_v51 = vor.u32 %v12355_v10, %v12352_v57 }
 0x6d4   : > { %v11572_v63 = vadd.f32 %v11544_v2, %v24276_v27  ;;  %v12183_v14 = vpop.f32.mrf.mxu2  ;;  %v11807_v25 = vpop.f32.mrf.mxu0  ;;  %v18585_v27 = vld [vmem:[%s25021_s6 + $0x40] sm:$0xff] }
 0x6d5   : > { %v11936_v1 = vpop.f32.mrf.mxu1  ;;  %13460 = vmatpush.bf16.msra.mxu0 %v18585_v27  ;;  %v24529_v27 = vsel %vm2595_vm1, %v24500_v9, %v24522_v51 }
 0x6d6   : > { %v11833_v4 = vadd.f32 %v11805_v29, %v11572_v63  ;;  %v12277_v63 = vunpack.c.l.b16 %v12235_v38 }
 0x6d8   : > { %v11962_v43 = vadd.f32 %v11934_v59, %v11833_v4  ;;  %v12735_v4 = vrot.slane %v12733_v48, 1 }
 0x6da   : > { %v24489_v3 = vadd.f32 %v12183_v14, %v11962_v43 }
 0x6db   : > { %v11546_v56 = vpop.f32.mrf.mxu3 }
 0x6dc   : > { %v11573_v21 = vadd.f32 %v11546_v56, %v24293_v55  ;;  %v12185_v58 = vpop.f32.mrf.mxu2  ;;  %v11810_v6 = vpop.f32.mrf.mxu0  ;;  %v12728_v55 = vsel %vm2858_vm2, %v12723_v60, %v12727_v37  ;;  %v12286_v56 = vpack.c.b16 %v12277_v63, %v12277_v63 }
 0x6dd   : > { %v11939_v42 = vpop.f32.mrf.mxu1 }
 0x6de   : > { %v11834_v0 = vadd.f32 %v11807_v25, %v11573_v21  ;;  %v12729_v25 = vshrl.u32 %v24486_v32, 16  ;;  %v12667_v32 = vunpack.c.l.b16 %v12625_v41 }
 0x6df   : > { %17631 = vmatmul.msk.bf16.gmra.mxu0 %vm9124_vm4, %v20226_v47 }
 0x6e0   : > { %v11963_v11 = vadd.f32 %v11936_v1, %v11834_v0  ;;  %17599 = vmatmul.msk.bf16.gmra.mxu3 %vm9124_vm4, %v12348_v17  ;;  %17695 = vmatmul.msk.bf16.gmra.mxu1 %vm9124_vm4, %v12728_v55  ;;  %v12731_v5 = vor.u32 %v12729_v25, %v12727_v37  ;;  %v12362_v0 = vshll.u32 %v12286_v56, 16  ;;  %v12676_v60 = vpack.c.b16 %v12667_v32, %v12667_v32  ;;  %v12911_v25 = vld [vmem:[#allocation3 + $0x80] sm:$0x8]  ;;  %v20477_v32 = vld [vmem:[#allocation3 + $0x94] sm:$0xff]  }
 0x6e1   : > { %17727 = vmatmul.msk.bf16.gmra.mxu2 %vm9124_vm4, %v20472_v26 }
 0x6e2   : > { %v24512_v13 = vadd.f32 %v12185_v58, %v11963_v11 }
 0x6e3   : > { %v11549_v50 = vpop.f32.mrf.mxu3 }
 0x6e4   : > { %v11574_v23 = vadd.f32 %v11549_v50, %v24309_v35  ;;  %v12188_v29 = vpop.f32.mrf.mxu2  ;;  %v11812_v59 = vpop.f32.mrf.mxu0  ;;  %v12364_v50 = vrot.slane %v12362_v0, 4 }
 0x6e5   : > { %v11941_v61 = vpop.f32.mrf.mxu1 }
 0x6e6   : > { %v11835_v34 = vadd.f32 %v11810_v6, %v11574_v23  ;;  %v12359_v6 = vshrl.u32 %v12286_v56, 16  ;;  %v12741_v23 = vshll.u32 %v12676_v60, 16 }
 0x6e8   : > { %v11964_v36 = vadd.f32 %v11939_v42, %v11835_v34  ;;  %v12361_v55 = vrot.slane %v12359_v6, 3 }
 0x6ea   : > { %v24520_v2 = vadd.f32 %v12188_v29, %v11964_v36  ;;  %v18628_v29 = vld [vmem:[%s25021_s6 + $0x118] sm:$0xff]  ;;  %v12365_v10 = vor.u32 %v12364_v50, %v12361_v55  ;;  %v24556_v36 = vunpack.c.l.b16 %v12927_v20 }
 0x6eb   : > { %v11551_v31 = vpop.f32.mrf.mxu3  ;;  %14735 = vmatpush.bf16.msrb.mxu2 %v18628_v29 }
 0x6ec   : > { %v11575_v35 = vadd.f32 %v11551_v31, %v24326_v12  ;;  %v12190_v14 = vpop.f32.mrf.mxu2  ;;  %v11815_v1 = vpop.f32.mrf.mxu0  ;;  %v12736_v12 = vsel %vm2858_vm2, %v12731_v5, %v12735_v4  ;;  %v19260_v31 = vunpack.c.h.b16 %v24508_v16 }
 0x6ed   : > { %v11944_v43 = vpop.f32.mrf.mxu1 }
 0x6ee   : > { %v11836_v15 = vadd.f32 %v11812_v59, %v11575_v35  ;;  %v18612_v59 = vld [vmem:[%s25021_s6 + $0xd8] sm:$0xff]  ;;  %v12737_v35 = vshrl.u32 %v24517_v52, 16 }
 0x6ef   : > { %17632 = vmatmul.msk.bf16.gmra.mxu0 %vm9124_vm4, %v20227_v28  ;;  %v12495_v28 = vpack.c.b16 %v12277_v63, %v19260_v31 }
 0x6f0   : > { %v11965_v21 = vadd.f32 %v11941_v61, %v11836_v15  ;;  %17600 = vmatmul.msk.bf16.gmra.mxu3 %vm9124_vm4, %v24529_v27  ;;  %17696 = vmatmul.msk.bf16.gmra.mxu1 %vm9124_vm4, %v12736_v12  ;;  %v24554_v61 = vld [vmem:[#allocation3 + $0xb8] sm:$0xff]   ;;  %v12739_v5 = vor.u32 %v12737_v35, %v12735_v4  ;;  %v18577_v4 = vld [vmem:[#allocation3 + $0x84] sm:$0xff] }
 0x6f1   : > { %17728 = vmatmul.msk.bf16.gmra.mxu2 %vm9124_vm4, %v20473_v49  ;;  %14357 = vmatpush.bf16.msrb.mxu0 %v18612_v59  ;;  %v19288_v41 = vunpack.c.h.b16 %v24554_v61  ;;  %v12366_v49 = vsel %vm2595_vm1, %v24522_v51, %v12365_v10  ;;  %v13340_v20 = vshll.u32 %v18577_v4, 16 }
 0x6f2   : > { %v24537_v58 = vadd.f32 %v12190_v14, %v11965_v21  ;;  %v12743_v14 = vrot.slane %v12741_v23, 1  ;;  %v20475_v21 = vld [vmem:[#allocation3 + $0x8c] sm:$0xf0]  }
 0x6f3   : > { %v11554_v37 = vpop.f32.mrf.mxu3  ;;  %v12983_v56 = vpack.c.b16 %v24556_v36, %v19288_v41  ;;  %v20261_v6 = vor.u32 %v20475_v21, %v20260_v22 }
 0x6f4   : > { %v11576_v42 = vadd.f32 %v11554_v37, %v24346_v8  ;;  %v12193_v47 = vpop.f32.mrf.mxu2  ;;  %v11817_v17 = vpop.f32.mrf.mxu0  ;;  %v18616_v8 = vld [vmem:[%s25021_s6 + $0xf8] sm:$0xff]  ;;  %v12744_v52 = vsel %vm2858_vm2, %v12739_v5, %v12743_v14 }
 0x6f5   : > { %v11946_v11 = vpop.f32.mrf.mxu1  ;;  %14486 = vmatpush.bf16.msrb.mxu1 %v18616_v8  ;;  %v13590_v23 = vshll.u32 %v20261_v6, 16 }
 0x6f6   : > { %v11837_v26 = vadd.f32 %v11815_v1, %v11576_v42  ;;  %v24574_v42 = vld [vmem:[#allocation3 + $0x8c] sm:$0xff] }
 0x6f7   : > { %v13345_v29 = vshll.u32 %v24574_v42, 16  ;;  %v13592_v35 = vrot.slane %v13590_v23, 4  ;;  %v18611_v23 = vld [vmem:[%s25021_s6 + $0xd0] sm:$0xff] }
 0x6f8   : > { %v11966_v62 = vadd.f32 %v11944_v43, %v11837_v26  ;;  %v13598_v26 = vshll.u32 %v20477_v32, 16  ;;  %14358 = vmatpush.bf16.msrb.mxu0 %v18611_v23 }
 0x6f9   : > { %v13347_v41 = vrot.slane %v13345_v29, 1  ;;  %v18615_v29 = vld [vmem:[%s25021_s6 + $0xf0] sm:$0xff] }
 0x6fa   : > { %v24552_v34 = vadd.f32 %v12193_v47, %v11966_v62  ;;  %14487 = vmatpush.bf16.msrb.mxu1 %v18615_v29 }
 0x6fb   : > { %v11556_v57 = vpop.f32.mrf.mxu3 }
 0x6fc   : > { %v11577_v48 = vadd.f32 %v11556_v57, %v24363_v40  ;;  %v12195_v38 = vpop.f32.mrf.mxu2  ;;  %v11820_v1 = vpop.f32.mrf.mxu0  ;;  %v13082_v40 = vunpack.c.l.b16 %v12911_v25  ;;  %v13600_v57 = vrot.slane %v13598_v26, 4  ;;  %v13338_v25 = vshrl.u32 %v18577_v4, 16  ;;  %v18607_v4 = vld [vmem:[%s25021_s6 + $0xb0] sm:$0xff] }
 0x6fd   : > { %v11949_v43 = vpop.f32.mrf.mxu1  ;;  %14097 = vmatpush.bf16.msrb.mxu3 %v18607_v4 }
 0x6fe   : > { %v11838_v15 = vadd.f32 %v11817_v17, %v11577_v48  ;;  %v13083_v63 = vpack.c.b16 %v12960_v33, %v13082_v40  ;;  %v13595_v17 = vshrl.u32 %v20477_v32, 16  ;;  %v13587_v33 = vshrl.u32 %v20261_v6, 16  ;;  %v24595_v6 = vld [vmem:[#allocation3 + $0x94] sm:$0xff] }
 0x6ff   : > { %17633 = vmatmul.msk.bf16.gmra.mxu0 %vm9124_vm4, %v12495_v28 }
 0x700   : > { %v11967_v12 = vadd.f32 %v11946_v11, %v11838_v15  ;;  %17601 = vmatmul.msk.bf16.gmra.mxu3 %vm9124_vm4, %v12366_v49  ;;  %17697 = vmatmul.msk.bf16.gmra.mxu1 %vm9124_vm4, %v12744_v52  ;;  %v13093_v55 = vshrl.u32 %v13083_v63, 16  ;;  %v13096_v50 = vshll.u32 %v13083_v63, 16  ;;  %v13597_v8 = vrot.slane %v13595_v17, 3  ;;  %v20479_v63 = vld [vmem:[#allocation3 + $0x9c] sm:$0xff]  }
 0x701   : > { %17729 = vmatmul.msk.bf16.gmra.mxu2 %vm9124_vm4, %v12983_v56  ;;  %v13589_v31 = vrot.slane %v13587_v33, 3  ;;  %v13607_v17 = vshll.u32 %v20479_v63, 16 }
 0x702   : > { %v24572_v37 = vadd.f32 %v12195_v38, %v11967_v12  ;;  %v13095_v10 = vrot.slane %v13093_v55, 3  ;;  %v13098_v48 = vrot.slane %v13096_v50, 4  ;;  %v13342_v38 = vrot.slane %v13340_v20, 1 }
 0x703   : > { %v11559_v0 = vpop.f32.mrf.mxu3  ;;  %v13601_v28 = vor.u32 %v13600_v57, %v13597_v8  ;;  %v13593_v21 = vor.u32 %v13592_v35, %v13589_v31  ;;  %v13353_v50 = vshll.u32 %v24595_v6, 16  ;;  %v13349_v8 = vshrl.u32 %v24574_v42, 16  ;;  %v19746_v42 = vld [vmem:[#allocation3 + $0x98] sm:$0xff]  }
 0x704   : > { %v11578_v47 = vadd.f32 %v11559_v0, %v24381_v39  ;;  %v12198_v60 = vpop.f32.mrf.mxu2  ;;  %v11822_v11 = vpop.f32.mrf.mxu0  ;;  %v13099_v49 = vor.u32 %v13098_v48, %v13095_v10  ;;  %v13343_v56 = vor.u32 %v13342_v38, %v13338_v25 }
 0x705   : > { %v11951_v7 = vpop.f32.mrf.mxu1  ;;  %v13355_v57 = vrot.slane %v13353_v50, 1  ;;  %v13351_v35 = vor.u32 %v13349_v8, %v13347_v41 }
 0x706   : > { %v11839_v62 = vadd.f32 %v11820_v1, %v11578_v47  ;;  %v13108_v12 = vsel %vm2595_vm1, %v13099_v49, %v24500_v9  ;;  %v13348_v52 = vsel %vm2858_vm2, %v13343_v56, %v13347_v41  ;;  %v13119_v56 = vshrl.u32 %v19746_v42, 16 }
 0x708   : > { %v11968_v59 = vadd.f32 %v11949_v43, %v11839_v62 }
 0x70a   : > { %v24578_v39 = vadd.f32 %v12198_v60, %v11968_v59  ;;  %v13604_v60 = vshrl.u32 %v20479_v63, 16  ;;  %v13121_v63 = vrot.slane %v13119_v56, 3 }
 0x70b   : > { %v11561_v14 = vpop.f32.mrf.mxu3 }
 0x70c   : > { %v11579_v1 = vadd.f32 %v11561_v14, %v24389_v54  ;;  %v12200_v15 = vpop.f32.mrf.mxu2  ;;  %v12553_v5 = vpop.f32.mrf.mxu0  ;;  %v13602_v54 = vsel %vm2595_vm1, %v13593_v21, %v13601_v28  ;;  %v13606_v62 = vrot.slane %v13604_v60, 3 }
 0x70d   : > { %v12802_v40 = vpop.f32.mrf.mxu1 }
 0x70e   : > { %v11840_v43 = vadd.f32 %v11822_v11, %v11579_v1  ;;  %v13356_v1 = vsel %vm2858_vm2, %v13351_v35, %v13355_v57 }
 0x70f   : > { %17810 = vmatmul.msk.bf16.vlgmr.msra.gmra.mxu0 %vm9124_vm4, %v13348_v52 }
 0x710   : > { %v11969_v32 = vadd.f32 %v11951_v7, %v11840_v43  ;;  %17746 = vmatmul.msk.bf16.vlgmr.msra.gmra.mxu3 %vm9124_vm4, %v13108_v12  ;;  %17842 = vmatmul.msk.bf16.vlgmr.msra.gmra.mxu1 %vm9124_vm4, %v13602_v54  ;;  %v13609_v7 = vrot.slane %v13607_v17, 4  ;;  %v13122_v43 = vshll.u32 %v19746_v42, 16 }
 0x711   : > { %17874 = vmatmul.msk.bf16.vlgmr.msra.gmra.mxu2 %vm9124_vm4, %v24508_v16  ;;  %v24603_v16 = vld [vmem:[%s25022_s7] ss:$0 sm:$0xff] }
 0x712   : > { %v24593_v9 = vadd.f32 %v12200_v15, %v11969_v32  ;;  %v13610_v38 = vor.u32 %v13609_v7, %v13606_v62  ;;  %v13124_v4 = vrot.slane %v13122_v43, 4 }
 0x713   : > { %v12424_v22 = vpop.f32.mrf.mxu3 }
 0x714   : > { %v12464_v0 = vadd.f32 %v12424_v22, %v24405_v53  ;;  %v24598_v47 = vpop.f32.mrf.mxu2  ;;  %v12555_v26 = vpop.f32.mrf.mxu0  ;;  %v18627_v53 = vld [vmem:[%s25021_s6 + $0x110] sm:$0xff] }
 0x715   : > { %v12804_v55 = vpop.f32.mrf.mxu1  ;;  %14736 = vmatpush.bf16.msrb.mxu2 %v18627_v53 }
 0x716   : > { %v12593_v11 = vadd.f32 %v12553_v5, %v12464_v0  ;;  %v20481_v5 = vld [vmem:[#allocation3 + $0xa4] sm:$0xff]  }
 0x717   : > { %v13613_v12 = vshrl.u32 %v20481_v5, 16 }
 0x718   : > { %v12842_v20 = vadd.f32 %v12802_v40, %v12593_v11  ;;  %v24628_v40 = vld [vmem:[#allocation3 + $0x9c] sm:$0xff] }
 0x719   : > { %v13361_v22 = vshll.u32 %v24628_v40, 16  ;;  %v13615_v60 = vrot.slane %v13613_v12, 3 }
 0x71a   : > { %v12862_v33 = vadd.f32 %v24603_v16, %v12842_v20 }
 0x71b   : > { %v12426_v59 = vpop.f32.mrf.mxu3  ;;  %v13363_v50 = vrot.slane %v13361_v22, 1 }
 0x71c   : > { %v12465_v10 = vadd.f32 %v12426_v59, %v24424_v24  ;;  %v24618_v48 = vpop.f32.mrf.mxu2  ;;  %12878 = vxpose.xlu1.b32.start [1/16] (narrow) %v12862_v33, 8  ;;  %v12558_v31 = vpop.f32.mrf.mxu0  ;;  %v13611_v24 = vsel %vm2595_vm1, %v13601_v28, %v13610_v38  ;;  %v13616_v28 = vshll.u32 %v20481_v5, 16 }
 0x71d   : > { %v12807_v25 = vpop.f32.mrf.mxu1 }
 0x71e   : > { %v12594_v14 = vadd.f32 %v12555_v26, %v12465_v10  ;;  %v13618_v17 = vrot.slane %v13616_v28, 4 }
 0x71f   : > { %17811 = vmatmul.msk.bf16.gmra.mxu0 %vm9124_vm4, %v13356_v1 }
 0x720   : > { %v12843_v15 = vadd.f32 %v12804_v55, %v12594_v14  ;;  %17747 = vmatmul.msk.bf16.gmra.mxu3 %vm9124_vm4, %v24529_v27  ;;  %17843 = vmatmul.msk.bf16.gmra.mxu1 %vm9124_vm4, %v13611_v24  ;;  %v13125_v55 = vor.u32 %v13124_v4, %v13121_v63  ;;  %v13619_v7 = vor.u32 %v13618_v17, %v13615_v60  ;;  %v18614_v63 = vld [vmem:[%s25021_s6 + $0xe8] sm:$0xff] }
 0x721   : > { %17875 = vmatmul.msk.bf16.gmra.mxu2 %vm9124_vm4, %v19746_v42  ;;  %14488 = vmatpush.bf16.msrb.mxu1 %v18614_v63 }
 0x722   : > { %v12863_v41 = vadd.f32 %v24603_v16, %v12843_v15  ;;  %v13126_v59 = vsel %vm2595_vm1, %v24522_v51, %v13125_v55  ;;  %v18606_v51 = vld [vmem:[%s25021_s6 + $0xa8] sm:$0xff] }
 0x723   : > { %v12429_v49 = vpop.f32.mrf.mxu3  ;;  %14098 = vmatpush.bf16.msrb.mxu3 %v18606_v51 }
 0x724   : > { %v12466_v21 = vadd.f32 %v12429_v49, %v24430_v18  ;;  %v24631_v27 = vpop.f32.mrf.mxu2  ;;  %12879 = vxpose.xlu1.b32.cont [2/16] (narrow) %v12863_v41, 8  ;;  %v12560_v52 = vpop.f32.mrf.mxu0  ;;  %v13357_v18 = vshrl.u32 %v24595_v6, 16  ;;  %v24645_v6 = vld [vmem:[#allocation3 + $0xa0] sm:$0xff]  }
 0x725   : > { %v12809_v54 = vpop.f32.mrf.mxu1  ;;  %v13128_v14 = vshrl.u32 %v24645_v6, 16 }
 0x726   : > { %v12595_v32 = vadd.f32 %v12558_v31, %v12466_v21  ;;  %v13359_v53 = vor.u32 %v13357_v18, %v13355_v57  ;;  %v20483_v31 = vld [vmem:[#allocation3 + $0xac] sm:$0xff]  }
 0x727   : > { %v13622_v24 = vshrl.u32 %v20483_v31, 16  ;;  %v13625_v42 = vshll.u32 %v20483_v31, 16  ;;  %v13130_v56 = vrot.slane %v13128_v14, 3  ;;  %v24687_v31 = vld [vmem:[#allocation3 + $0xac] sm:$0xff] }
 0x728   : > { %v12844_v0 = vadd.f32 %v12807_v25, %v12595_v32  ;;  %v13364_v8 = vsel %vm2858_vm2, %v13359_v53, %v13363_v50  ;;  %v13131_v25 = vshll.u32 %v24645_v6, 16 }
 0x729   : > { %v13624_v28 = vrot.slane %v13622_v24, 3 }
 0x72a   : > { %v12864_v26 = vadd.f32 %v24603_v16, %v12844_v0  ;;  %v13133_v43 = vrot.slane %v13131_v25, 4  ;;  %v13365_v0 = vshrl.u32 %v24628_v40, 16 }
 0x72b   : > { %v12431_v11 = vpop.f32.mrf.mxu3 }
 0x72c   : > { %v12467_v20 = vadd.f32 %v12431_v11, %v24439_v46  ;;  %v24637_v62 = vpop.f32.mrf.mxu2  ;;  %12880 = vxpose.xlu1.b32.cont [3/16] (narrow) %v12864_v26, 8  ;;  %v12563_v33 = vpop.f32.mrf.mxu0  ;;  %v13620_v46 = vsel %vm2595_vm1, %v13610_v38, %v13619_v7  ;;  %v24656_v38 = vld [vmem:[#allocation3 + $0xa4] sm:$0xff]  ;;  %v24672_v22 = vor.u32 %v13133_v43, %v13130_v56 }
 0x72d   : > { %v12812_v29 = vpop.f32.mrf.mxu1  ;;  %v13369_v21 = vshll.u32 %v24656_v38, 16 }
 0x72e   : > { %v12596_v23 = vadd.f32 %v12560_v52, %v12467_v20  ;;  %v13627_v52 = vrot.slane %v13625_v42, 4  ;;  %v13367_v20 = vor.u32 %v13365_v0, %v13363_v50 }
 0x72f   : > { %17812 = vmatmul.msk.bf16.gmra.mxu0 %vm9124_vm4, %v13364_v8  ;;  %v13371_v60 = vrot.slane %v13369_v21, 1  ;;  %v20485_v8 = vld [vmem:[#allocation3 + $0xb4] sm:$0xff]  }
 0x730   : > { %v12845_v10 = vadd.f32 %v12809_v54, %v12596_v23  ;;  %17748 = vmatmul.msk.bf16.gmra.mxu3 %vm9124_vm4, %v13126_v59  ;;  %17844 = vmatmul.msk.bf16.gmra.mxu1 %vm9124_vm4, %v13620_v46  ;;  %v18610_v54 = vld [vmem:[%s25021_s6 + $0xc8] sm:$0xff]  ;;  %v13628_v11 = vor.u32 %v13627_v52, %v13624_v28  ;;  %v13135_v23 = vsel %vm2595_vm1, %v13125_v55, %v24672_v22 }
 0x731   : > { %17876 = vmatmul.msk.bf16.gmra.mxu2 %vm9124_vm4, %v24645_v6  ;;  %14359 = vmatpush.bf16.msrb.mxu0 %v18610_v54  ;;  %v19748_v59 = vld [vmem:[#allocation3 + $0xa8] sm:$0xff]  }
 0x732   : > { %v12865_v57 = vadd.f32 %v24603_v16, %v12845_v10  ;;  %v13137_v46 = vshrl.u32 %v19748_v59, 16  ;;  %v13140_v55 = vshll.u32 %v19748_v59, 16 }
 0x733   : > { %v12434_v35 = vpop.f32.mrf.mxu3 }
 0x734   : > { %v12468_v1 = vadd.f32 %v12434_v35, %v24445_v30  ;;  %v24659_v15 = vpop.f32.mrf.mxu2  ;;  %12881 = vxpose.xlu1.b32.cont [4/16] (narrow) %v12865_v57, 8  ;;  %v12565_v5 = vpop.f32.mrf.mxu0  ;;  %v18626_v30 = vld [vmem:[%s25021_s6 + $0x108] sm:$0xff]  ;;  %v13631_v35 = vshrl.u32 %v20485_v8, 16  ;;  %v13139_v24 = vrot.slane %v13137_v46, 3  ;;  %v13142_v42 = vrot.slane %v13140_v55, 4 }
 0x735   : > { %v12814_v49 = vpop.f32.mrf.mxu1  ;;  %14737 = vmatpush.bf16.msrb.mxu2 %v18626_v30 }
 0x736   : > { %v12597_v41 = vadd.f32 %v12563_v33, %v12468_v1 }
 0x738   : > { %v12846_v12 = vadd.f32 %v12812_v29, %v12597_v41  ;;  %v13372_v29 = vsel %vm2858_vm2, %v13367_v20, %v13371_v60 }
 0x73a   : > { %v12866_v32 = vadd.f32 %v24603_v16, %v12846_v12  ;;  %v13143_v12 = vor.u32 %v13142_v42, %v13139_v24  ;;  %v18609_v42 = vld [vmem:[%s25021_s6 + $0xc0] sm:$0xff] }
 0x73b   : > { %v12436_v4 = vpop.f32.mrf.mxu3  ;;  %14360 = vmatpush.bf16.msrb.mxu0 %v18609_v42 }
 0x73c   : > { %v12469_v17 = vadd.f32 %v12436_v4, %v24464_v19  ;;  %v24676_v26 = vpop.f32.mrf.mxu2  ;;  %12882 = vxpose.xlu1.b32.cont [5/16] (narrow) %v12866_v32, 8  ;;  %v12568_v18 = vpop.f32.mrf.mxu0  ;;  %v13629_v19 = vsel %vm2595_vm1, %v13619_v7, %v13628_v11  ;;  %v13634_v7 = vshll.u32 %v20485_v8, 16 }
 0x73d   : > { %v12817_v53 = vpop.f32.mrf.mxu1 }
 0x73e   : > { %v12598_v33 = vadd.f32 %v12565_v5, %v12469_v17  ;;  %v13377_v5 = vshll.u32 %v24687_v31, 16  ;;  %v13636_v56 = vrot.slane %v13634_v7, 4  ;;  %v24700_v17 = vsel %vm2595_vm1, %v24672_v22, %v13143_v12 }
 0x73f   : > { %17813 = vmatmul.msk.bf16.gmra.mxu0 %vm9124_vm4, %v13372_v29 }
 0x740   : > { %v12847_v40 = vadd.f32 %v12814_v49, %v12598_v33  ;;  %17749 = vmatmul.msk.bf16.gmra.mxu3 %vm9124_vm4, %v13135_v23  ;;  %17845 = vmatmul.msk.bf16.gmra.mxu1 %vm9124_vm4, %v13629_v19  ;;  %v13633_v49 = vrot.slane %v13631_v35, 3  ;;  %v13379_v28 = vrot.slane %v13377_v5, 1  ;;  %v20487_v33 = vld [vmem:[#allocation3 + $0xbc] sm:$0xff]   ;;  %v24713_v19 = vld [vmem:[#allocation3 + $0xb4] sm:$0xff] }
 0x741   : > { %17877 = vmatmul.msk.bf16.gmra.mxu2 %vm9124_vm4, %v19748_v59  ;;  %v13640_v8 = vshrl.u32 %v20487_v33, 16  ;;  %v13385_v7 = vshll.u32 %v24713_v19, 16  ;;  %v18613_v5 = vld [vmem:[%s25021_s6 + $0xe0] sm:$0xff] }
 0x742   : > { %v12867_v50 = vadd.f32 %v24603_v16, %v12847_v40  ;;  %v13637_v30 = vor.u32 %v13636_v56, %v13633_v49  ;;  %v13381_v56 = vshrl.u32 %v24687_v31, 16  ;;  %14489 = vmatpush.bf16.msrb.mxu1 %v18613_v5  ;;  %v13285_v5 = vld [vmem:[#allocation3 + $0xc4] sm:$0x1] }
 0x743   : > { %v12439_v10 = vpop.f32.mrf.mxu3 }
 0x744   : > { %v12470_v51 = vadd.f32 %v12439_v10, %v24469_v44  ;;  %v24690_v57 = vpop.f32.mrf.mxu2  ;;  %12883 = vxpose.xlu1.b32.cont [6/16] (narrow) %v12867_v50, 8  ;;  %v12570_v14 = vpop.f32.mrf.mxu0  ;;  %v13373_v44 = vshrl.u32 %v24656_v38, 16  ;;  %v19749_v38 = vld [vmem:[#allocation3 + $0xb0] sm:$0xff]   ;;  %v13643_v50 = vshll.u32 %v20487_v33, 16  ;;  %v13158_v33 = vshll.u32 %v24554_v61, 16 }
 0x745   : > { %v12819_v1 = vpop.f32.mrf.mxu1  ;;  %v13146_v29 = vshrl.u32 %v19749_v38, 16  ;;  %v13149_v40 = vshll.u32 %v19749_v38, 16 }
 0x746   : > { %v12599_v25 = vadd.f32 %v12568_v18, %v12470_v51  ;;  %v13375_v63 = vor.u32 %v13373_v44, %v13371_v60  ;;  %v18605_v60 = vld [vmem:[%s25021_s6 + $0xa0] sm:$0xff] }
 0x747   : > { %14099 = vmatpush.bf16.msrb.mxu3 %v18605_v60  ;;  %v13148_v51 = vrot.slane %v13146_v29, 3  ;;  %v13151_v35 = vrot.slane %v13149_v40, 4  ;;  %v24750_v60 = vld [vmem:[#allocation3 + $0xbc] sm:$0xff] }
 0x748   : > { %v12848_v41 = vadd.f32 %v12817_v53, %v12599_v25  ;;  %v13380_v18 = vsel %vm2858_vm2, %v13375_v63, %v13379_v28  ;;  %v13642_v25 = vrot.slane %v13640_v8, 3  ;;  %v13383_v63 = vor.u32 %v13381_v56, %v13379_v28 }
 0x749   : > { %v24729_v49 = vor.u32 %v13151_v35, %v13148_v51 }
 0x74a   : > { %v12868_v43 = vadd.f32 %v24603_v16, %v12848_v41 }
 0x74b   : > { %v12441_v21 = vpop.f32.mrf.mxu3 }
 0x74c   : > { %v12471_v52 = vadd.f32 %v12441_v21, %v24478_v45  ;;  %v24696_v32 = vpop.f32.mrf.mxu2  ;;  %12884 = vxpose.xlu1.b32.cont [7/16] (narrow) %v12868_v43, 8  ;;  %v12573_v54 = vpop.f32.mrf.mxu0  ;;  %v13638_v45 = vsel %vm2595_vm1, %v13628_v11, %v13637_v30  ;;  %v13387_v43 = vrot.slane %v13385_v7, 1 }
 0x74d   : > { %v12822_v0 = vpop.f32.mrf.mxu1 }
 0x74e   : > { %v12600_v4 = vadd.f32 %v12570_v14, %v12471_v52  ;;  %v13388_v31 = vsel %vm2858_vm2, %v13383_v63, %v13387_v43 }
 0x74f   : > { %17814 = vmatmul.msk.bf16.gmra.mxu0 %vm9124_vm4, %v13380_v18  ;;  %v24737_v18 = vsel %vm2595_vm1, %v13143_v12, %v24729_v49 }
 0x750   : > { %v12849_v20 = vadd.f32 %v12819_v1, %v12600_v4  ;;  %17750 = vmatmul.msk.bf16.gmra.mxu3 %vm9124_vm4, %v24700_v17  ;;  %17846 = vmatmul.msk.bf16.gmra.mxu1 %vm9124_vm4, %v13638_v45  ;;  %v13645_v1 = vrot.slane %v13643_v50, 4  ;;  %v20488_v45 = vld [vmem:[#allocation3 + $0xc4] sm:$0xff]  }
 0x751   : > { %17878 = vmatmul.msk.bf16.gmra.mxu2 %vm9124_vm4, %v19749_v38  ;;  %v13155_v38 = vshrl.u32 %v24554_v61, 16  ;;  %v13652_v29 = vshll.u32 %v20488_v45, 16 }
 0x752   : > { %v12869_v53 = vadd.f32 %v24603_v16, %v12849_v20  ;;  %v13646_v52 = vor.u32 %v13645_v1, %v13642_v25  ;;  %v13389_v25 = vshrl.u32 %v24713_v19, 16 }
 0x753   : > { %v12444_v23 = vpop.f32.mrf.mxu3  ;;  %v13157_v50 = vrot.slane %v13155_v38, 3  ;;  %v13654_v35 = vrot.slane %v13652_v29, 4 }
 0x754   : > { %v12472_v11 = vadd.f32 %v12444_v23, %v24489_v3  ;;  %v24716_v59 = vpop.f32.mrf.mxu2  ;;  %12885 = vxpose.xlu1.b32.cont [8/16] (narrow) %v12869_v53, 8  ;;  %v12575_v10 = vpop.f32.mrf.mxu0  ;;  %v18625_v3 = vld [vmem:[%s25021_s6 + $0x100] sm:$0xff] }
 0x755   : > { %v12824_v55 = vpop.f32.mrf.mxu1  ;;  %14738 = vmatpush.bf16.msrb.mxu2 %v18625_v3 }
 0x756   : > { %v12601_v46 = vadd.f32 %v12573_v54, %v12472_v11 }
 0x758   : > { %v12850_v14 = vadd.f32 %v12822_v0, %v12601_v46  ;;  %v13393_v46 = vshll.u32 %v24750_v60, 16 }
 0x75a   : > { %v12870_v24 = vadd.f32 %v24603_v16, %v12850_v14  ;;  %v13395_v1 = vrot.slane %v13393_v46, 1 }
 0x75b   : > { %v12446_v41 = vpop.f32.mrf.mxu3 }
 0x75c   : > { %v12473_v21 = vadd.f32 %v12446_v41, %v24512_v13  ;;  %v24733_v44 = vpop.f32.mrf.mxu2  ;;  %12886 = vxpose.xlu1.b32.cont [9/16] (narrow) %v12870_v24, 8  ;;  %v12578_v54 = vpop.f32.mrf.mxu0  ;;  %v13647_v13 = vsel %vm2595_vm1, %v13637_v30, %v13646_v52  ;;  %v13649_v30 = vshrl.u32 %v20488_v45, 16 }
 0x75d   : > { %v12827_v0 = vpop.f32.mrf.mxu1 }
 0x75e   : > { %v12602_v4 = vadd.f32 %v12575_v10, %v12473_v21  ;;  %v13160_v10 = vrot.slane %v13158_v33, 4  ;;  %v13651_v51 = vrot.slane %v13649_v30, 3  ;;  %v13391_v21 = vor.u32 %v13389_v25, %v13387_v43 }
 0x75f   : > { %17815 = vmatmul.msk.bf16.gmra.mxu0 %vm9124_vm4, %v13388_v31  ;;  %v13397_v25 = vshrl.u32 %v24750_v60, 16 }
 0x760   : > { %v12851_v20 = vadd.f32 %v12824_v55, %v12602_v4  ;;  %17751 = vmatmul.msk.bf16.gmra.mxu3 %vm9124_vm4, %v24737_v18  ;;  %17847 = vmatmul.msk.bf16.gmra.mxu1 %vm9124_vm4, %v13647_v13  ;;  %v13161_v14 = vor.u32 %v13160_v10, %v13157_v50  ;;  %v13655_v42 = vor.u32 %v13654_v35, %v13651_v51  ;;  %v24772_v13 = vld [vmem:[#allocation3 + $0xc0] sm:$0xff]  }
 0x761   : > { %17879 = vmatmul.msk.bf16.gmra.mxu2 %vm9124_vm4, %v24554_v61  ;;  %v24756_v61 = vld [vmem:[#allocation3 + $0xc8] sm:$0xff]   ;;  %v13091_v4 = vpack.c.b16 %v24556_v36, %v24556_v36 }
 0x762   : > { %v12871_v28 = vadd.f32 %v24603_v16, %v12851_v20  ;;  %v19320_v41 = vunpack.c.h.b16 %v24756_v61  ;;  %v13162_v19 = vsel %vm2595_vm1, %v24729_v49, %v13161_v14  ;;  %v13656_v20 = vsel %vm2595_vm1, %v13646_v52, %v13655_v42 }
 0x763   : > { %v12449_v12 = vpop.f32.mrf.mxu3 }
 0x764   : > { %v12474_v53 = vadd.f32 %v12449_v12, %v24520_v2  ;;  %v24753_v23 = vpop.f32.mrf.mxu2  ;;  %12887 = vxpose.xlu1.b32.cont [10/16] (narrow) %v12871_v28, 8  ;;  %v12580_v40 = vpop.f32.mrf.mxu0  ;;  %v13585_v43 = vpack.c.b16 %v19320_v41, %v19320_v41  ;;  %v13164_v28 = vshrl.u32 %v13091_v4, 16  ;;  %v13167_v12 = vshll.u32 %v13091_v4, 16 }
 0x765   : > { %v12829_v8 = vpop.f32.mrf.mxu1 }
 0x766   : > { %v12603_v11 = vadd.f32 %v12578_v54, %v12474_v53  ;;  %v13658_v52 = vshrl.u32 %v13585_v43, 16  ;;  %v13661_v30 = vshll.u32 %v13585_v43, 16  ;;  %v13169_v50 = vrot.slane %v13167_v12, 4 }
 0x768   : > { %v12852_v55 = vadd.f32 %v12827_v0, %v12603_v11  ;;  %v13396_v0 = vsel %vm2858_vm2, %v13391_v21, %v13395_v1  ;;  %v13663_v51 = vrot.slane %v13661_v30, 4  ;;  %v14157_v21 = vld [vmem:[#allocation3 + $0x98] sm:$0x8] }
 0x76a   : > { %v12872_v7 = vadd.f32 %v24603_v16, %v12852_v55  ;;  %v13660_v55 = vrot.slane %v13658_v52, 3 }
 0x76b   : > { %v12451_v2 = vpop.f32.mrf.mxu3 }
 0x76c   : > { %v12475_v24 = vadd.f32 %v12451_v2, %v24537_v58  ;;  %v24761_v3 = vpop.f32.mrf.mxu2  ;;  %12888 = vxpose.xlu1.b32.cont [11/16] (narrow) %v12872_v7, 8  ;;  %v12583_v56 = vpop.f32.mrf.mxu0  ;;  %v13327_v58 = vunpack.c.l.b16 %v13285_v5  ;;  %v24782_v7 = vld [vmem:[#allocation3 + $0x9c] sm:$0xf] }
 0x76d   : > { %v12832_v63 = vpop.f32.mrf.mxu1  ;;  %v14200_v4 = vunpack.c.l.b16 %v24782_v7 }
 0x76e   : > { %v12604_v54 = vadd.f32 %v12580_v40, %v12475_v24  ;;  %v13336_v38 = vpack.c.b16 %v13327_v58, %v13327_v58 }
 0x76f   : > { %17816 = vmatmul.msk.bf16.gmra.mxu0 %vm9124_vm4, %v13396_v0 }
 0x770   : > { %v12853_v31 = vadd.f32 %v12829_v8, %v12604_v54  ;;  %17752 = vmatmul.msk.bf16.gmra.mxu3 %vm9124_vm4, %v13162_v19  ;;  %17848 = vmatmul.msk.bf16.gmra.mxu1 %vm9124_vm4, %v13656_v20  ;;  %v13166_v8 = vrot.slane %v13164_v28, 3  ;;  %v13401_v10 = vshll.u32 %v13336_v38, 16  ;;  %v14199_v20 = vunpack.c.l.b16 %v14157_v21  ;;  %v24798_v28 = vld [vmem:[#allocation3 + $0x98] sm:$0xff] }
 0x771   : > { %17880 = vmatmul.msk.bf16.gmra.mxu2 %vm9124_vm4, %v24772_v13 }
 0x772   : > { %v12873_v36 = vadd.f32 %v24603_v16, %v12853_v31  ;;  %v13403_v24 = vrot.slane %v13401_v10, 1  ;;  %v14216_v43 = vpack.c.b16 %v14200_v4, %v14199_v20 }
 0x773   : > { %v12454_v45 = vpop.f32.mrf.mxu3 }
 0x774   : > { %v12476_v33 = vadd.f32 %v12454_v45, %v24552_v34  ;;  %v24779_v53 = vpop.f32.mrf.mxu2  ;;  %12889 = vxpose.xlu1.b32.cont [12/16] (narrow) %v12873_v36, 8  ;;  %v12585_v29 = vpop.f32.mrf.mxu0  ;;  %v13170_v34 = vor.u32 %v13169_v50, %v13166_v8  ;;  %v14226_v30 = vshrl.u32 %v14216_v43, 16  ;;  %v13984_v50 = vshll.u32 %v24798_v28, 16 }
 0x775   : > { %v12834_v11 = vpop.f32.mrf.mxu1 }
 0x776   : > { %v12605_v40 = vadd.f32 %v12583_v56, %v12476_v33  ;;  %v13664_v56 = vor.u32 %v13663_v51, %v13660_v55  ;;  %v13171_v58 = vsel %vm2595_vm1, %v13161_v14, %v13170_v34  ;;  %v18617_v14 = vld [vmem:[#allocation3 + $0x9c] sm:$0xff]  ;;  %v24803_v33 = vld [vmem:[#allocation3 + $0xa4] sm:$0xff]  ;;  %v14228_v51 = vrot.slane %v14226_v30, 3 }
 0x777   : > { %v14618_v8 = vshll.u32 %v18617_v14, 16  ;;  %v14616_v21 = vshrl.u32 %v18617_v14, 16  ;;  %v18599_v14 = vld [vmem:[#allocation3 + $0xa0] sm:$0xff] }
 0x778   : > { %v12854_v46 = vadd.f32 %v12832_v63, %v12605_v40  ;;  %v13399_v63 = vor.u32 %v13397_v25, %v13395_v1  ;;  %v18597_v1 = vld [vmem:[#allocation3 + $0x90] sm:$0xff]  ;;  %v13986_v25 = vrot.slane %v13984_v50, 1  ;;  %v13992_v30 = vshll.u32 %v18599_v14, 16 }
 0x779   : > { %v13979_v52 = vshll.u32 %v18597_v1, 16  ;;  %v14620_v7 = vrot.slane %v14618_v8, 1  ;;  %v13977_v34 = vshrl.u32 %v18597_v1, 16  ;;  %v13988_v50 = vshrl.u32 %v24798_v28, 16 }
 0x77a   : > { %v12874_v35 = vadd.f32 %v24603_v16, %v12854_v46  ;;  %v13404_v31 = vsel %vm2858_vm2, %v13399_v63, %v13403_v24  ;;  %v14623_v46 = vshll.u32 %v24803_v33, 16  ;;  %v19323_v24 = vunpack.c.l.b16 %v24645_v6 }
 0x77b   : > { %v12456_v2 = vpop.f32.mrf.mxu3  ;;  %v13981_v55 = vrot.slane %v13979_v52, 1  ;;  %v14621_v20 = vor.u32 %v14620_v7, %v14616_v21 }
 0x77c   : > { %v12477_v5 = vadd.f32 %v12456_v2, %v24572_v37  ;;  %v24786_v41 = vpop.f32.mrf.mxu2  ;;  %12890 = vxpose.xlu1.b32.cont [13/16] (narrow) %v12874_v35, 8  ;;  %v12588_v54 = vpop.f32.mrf.mxu0  ;;  %v13665_v37 = vsel %vm2595_vm1, %v13655_v42, %v13664_v56  ;;  %v14426_v1 = vpack.c.b16 %v19323_v24, %v14200_v4  ;;  %v20299_v24 = vld [vmem:[#allocation3 + $0xa4] sm:$0xff]  }
 0x77d   : > { %v12837_v0 = vpop.f32.mrf.mxu1 }
 0x77e   : > { %v12606_v19 = vadd.f32 %v12585_v29, %v12477_v5  ;;  %v14229_v29 = vshll.u32 %v14216_v43, 16 }
 0x77f   : > { %17817 = vmatmul.msk.bf16.gmra.mxu0 %vm9124_vm4, %v13404_v31 }
 0x780   : > { %v12855_v60 = vadd.f32 %v12834_v11, %v12606_v19  ;;  %17753 = vmatmul.msk.bf16.gmra.mxu3 %vm9124_vm4, %v13171_v58  ;;  %17849 = vmatmul.msk.bf16.gmra.mxu1 %vm9124_vm4, %v13665_v37  ;;  %v13982_v19 = vor.u32 %v13981_v55, %v13977_v34 }
 0x781   : > { %17881 = vmatmul.msk.bf16.gmra.mxu2 %vm9124_vm4, %v24756_v61 }
 0x782   : > { %v12875_v36 = vadd.f32 %v24603_v16, %v12855_v60  ;;  %v13987_v60 = vsel %vm2858_vm2, %v13982_v19, %v13986_v25 }
 0x783   : > { %v12459_v45 = vpop.f32.mrf.mxu3 }
 0x784   : > { %v12478_v12 = vadd.f32 %v12459_v45, %v24578_v39  ;;  %v24801_v38 = vpop.f32.mrf.mxu2  ;;  %12891 = vxpose.xlu1.b32.cont [14/16] (narrow) %v12875_v36, 8  ;;  %v12590_v42 = vpop.f32.mrf.mxu0  ;;  %v14231_v39 = vrot.slane %v14229_v29, 4 }
 0x785   : > { %v12839_v11 = vpop.f32.mrf.mxu1 }
 0x786   : > { %v12607_v40 = vadd.f32 %v12588_v54, %v12478_v12  ;;  %v14625_v54 = vrot.slane %v14623_v46, 1 }
 0x788   : > { %v12856_v10 = vadd.f32 %v12837_v0, %v12607_v40  ;;  %v14232_v0 = vor.u32 %v14231_v39, %v14228_v51  ;;  %v13990_v39 = vor.u32 %v13988_v50, %v13986_v25  ;;  %v18600_v25 = vld [vmem:[#allocation3 + $0xa8] sm:$0xff]  ;;  %v24849_v50 = vld [vmem:[#allocation3 + $0xb0] sm:$0xff] }
 0x78a   : > { %v12876_v35 = vadd.f32 %v24603_v16, %v12856_v10  ;;  %v14241_v37 = vsel %vm2595_vm1, %v14232_v0, %v24672_v22  ;;  %v18619_v22 = vld [vmem:[#allocation3 + $0xac] sm:$0xff]  ;;  %v13994_v10 = vrot.slane %v13992_v30, 1 }
 0x78b   : > { %v12461_v2 = vpop.f32.mrf.mxu3  ;;  %v14631_v40 = vshll.u32 %v18619_v22, 16 }
 0x78c   : > { %v12479_v5 = vadd.f32 %v12461_v2, %v24593_v9  ;;  %v24810_v56 = vpop.f32.mrf.mxu2  ;;  %12892 = vxpose.xlu1.b32.cont [15/16] (narrow) %v12876_v35, 8  ;;  %v13462_v63 = vpop.f32.mrf.mxu0  ;;  %v14626_v9 = vsel %vm2858_vm2, %v14621_v20, %v14625_v54  ;;  %v13995_v34 = vsel %vm2858_vm2, %v13990_v39, %v13994_v10 }
 0x78d   : > { %v13723_v31 = vpop.f32.mrf.mxu1  ;;  %v14633_v55 = vrot.slane %v14631_v40, 1 }
 0x78e   : > { %v12608_v58 = vadd.f32 %v12590_v42, %v12479_v5 }
 0x78f   : > { %17970 = vmatmul.msk.bf16.vlgmr.msrb.gmra.mxu0 %vm9124_vm4, %v14241_v37 }
 0x790   : > { %v12857_v6 = vadd.f32 %v12839_v11, %v12608_v58  ;;  %17938 = vmatmul.msk.bf16.vlgmr.msrb.gmra.mxu3 %vm9124_vm4, %v13987_v60  ;;  %18002 = vmatmul.msk.bf16.vlgmr.msrb.gmra.mxu1 %vm9124_vm4, %v14426_v1  ;;  %v13996_v1 = vshrl.u32 %v18599_v14, 16 }
 0x791   : > { %18066 = vmatmul.msk.bf16.vlgmr.msrb.gmra.mxu2 %vm9124_vm4, %v14626_v9 }
 0x792   : > { %v12877_v43 = vadd.f32 %v24603_v16, %v12857_v6 }
 0x793   : > { %v13229_v36 = vpop.f32.mrf.mxu3 }
 0x794   : > { %v13230_v45 = vadd.f32 %v13229_v36, %v24598_v47  ;;  %v13852_v12 = vpop.f32.mrf.mxu2  ;;  %12893 = vxpose.xlu1.b32.end [16/16] (narrow) %v12877_v43, 8  ;;  %v13464_v4 = vpop.f32.mrf.mxu0  ;;  %v14627_v47 = vshrl.u32 %v24803_v33, 16  ;;  %v14635_v36 = vshrl.u32 %v18619_v22, 16 }
 0x795   : > { %v13725_v52 = vpop.f32.mrf.mxu1 }
 0x796   : > { %v13502_v42 = vadd.f32 %v13462_v63, %v13230_v45  ;;  %v14629_v2 = vor.u32 %v14627_v47, %v14625_v54  ;;  %v18620_v63 = vld [vmem:[#allocation3 + $0xb4] sm:$0xff] }
 0x798   : > { %v13763_v29 = vadd.f32 %v13723_v31, %v13502_v42  ;;  %v14000_v31 = vshll.u32 %v18600_v25, 16 }
 0x79a   : > { %v24822_v11 = vadd.f32 %v13852_v12, %v13763_v29  ;;  %v14002_v6 = vrot.slane %v14000_v31, 1  ;;  %v20301_v29 = vld [vmem:[#allocation3 + $0xac] sm:$0xff]  }
 0x79b   : > { %v13231_v8 = vpop.f32.mrf.mxu3 }
 0x79c   : > { %v13232_v16 = vadd.f32 %v13231_v8, %v24618_v48  ;;  %v13854_v46 = vpop.f32.mrf.mxu2  ;;  %v13467_v51 = vpop.f32.mrf.mxu0  ;;  %v14634_v48 = vsel %vm2858_vm2, %v14629_v2, %v14633_v55 }
 0x79d   : > { %v13728_v7 = vpop.f32.mrf.mxu1 }
 0x79e   : > { %v13503_v35 = vadd.f32 %v13464_v4, %v13232_v16 }
 0x79f   : > { %17971 = vmatmul.msk.bf16.gmra.mxu0 %vm9124_vm4, %v24700_v17  ;;  %v14639_v17 = vshll.u32 %v18620_v63, 16 }
 0x7a0   : > { %v13764_v5 = vadd.f32 %v13725_v52, %v13503_v35  ;;  %17939 = vmatmul.msk.bf16.gmra.mxu3 %vm9124_vm4, %v13995_v34  ;;  %18003 = vmatmul.msk.bf16.gmra.mxu1 %vm9124_vm4, %v20299_v24  ;;  %v14637_v52 = vor.u32 %v14635_v36, %v14633_v55  ;;  %v18621_v55 = vld [vmem:[#allocation3 + $0xbc] sm:$0xff]  ;;  %v14008_v35 = vshll.u32 %v24849_v50, 16  ;;  %v20303_v36 = vld [vmem:[#allocation3 + $0xb4] sm:$0xff]  }
 0x7a1   : > { %18067 = vmatmul.msk.bf16.gmra.mxu2 %vm9124_vm4, %v14634_v48  ;;  %v14641_v45 = vrot.slane %v14639_v17, 1  ;;  %v14647_v24 = vshll.u32 %v18621_v55, 16 }
 0x7a2   : > { %v24834_v28 = vadd.f32 %v13854_v46, %v13764_v5 }
 0x7a3   : > { %v13234_v33 = vpop.f32.mrf.mxu3  ;;  %v14642_v14 = vsel %vm2858_vm2, %v14637_v52, %v14641_v45 }
 0x7a4   : > { %v13235_v21 = vadd.f32 %v13234_v33, %v24631_v27  ;;  %v13857_v54 = vpop.f32.mrf.mxu2  ;;  %v13469_v19 = vpop.f32.mrf.mxu0  ;;  %v13998_v27 = vor.u32 %v13996_v1, %v13994_v10  ;;  %v14004_v33 = vshrl.u32 %v18600_v25, 16 }
 0x7a5   : > { %v13730_v58 = vpop.f32.mrf.mxu1 }
 0x7a6   : > { %v13504_v0 = vadd.f32 %v13467_v51, %v13235_v21  ;;  %v14003_v30 = vsel %vm2858_vm2, %v13998_v27, %v14002_v6  ;;  %v14010_v21 = vrot.slane %v14008_v35, 1 }
 0x7a8   : > { %v13765_v20 = vadd.f32 %v13728_v7, %v13504_v0  ;;  %v14643_v0 = vshrl.u32 %v18620_v63, 16 }
 0x7aa   : > { %v24837_v60 = vadd.f32 %v13857_v54, %v13765_v20  ;;  %v14006_v20 = vor.u32 %v14004_v33, %v14002_v6  ;;  %v14645_v1 = vor.u32 %v14643_v0, %v14641_v45  ;;  %v24866_v6 = vld [vmem:[#allocation3 + $0xb8] sm:$0xff]  ;;  %v14270_v45 = vshrl.u32 %v24772_v13, 16 }
 0x7ab   : > { %v13236_v37 = vpop.f32.mrf.mxu3 }
 0x7ac   : > { %v13237_v9 = vadd.f32 %v13236_v37, %v24637_v62  ;;  %v13859_v43 = vpop.f32.mrf.mxu2  ;;  %v13472_v12 = vpop.f32.mrf.mxu0  ;;  %v19756_v62 = vld [vmem:[#allocation3 + $0xb8] sm:$0xff]  }
 0x7ad   : > { %v13733_v42 = vpop.f32.mrf.mxu1  ;;  %v14261_v10 = vshrl.u32 %v19756_v62, 16  ;;  %v14264_v16 = vshll.u32 %v19756_v62, 16 }
 0x7ae   : > { %v13505_v4 = vadd.f32 %v13469_v19, %v13237_v9  ;;  %v14011_v9 = vsel %vm2858_vm2, %v14006_v20, %v14010_v21 }
 0x7af   : > { %17972 = vmatmul.msk.bf16.gmra.mxu0 %vm9124_vm4, %v24737_v18  ;;  %v14263_v7 = vrot.slane %v14261_v10, 3  ;;  %v14266_v2 = vrot.slane %v14264_v16, 4 }
 0x7b0   : > { %v13766_v40 = vadd.f32 %v13730_v58, %v13505_v4  ;;  %17940 = vmatmul.msk.bf16.gmra.mxu3 %vm9124_vm4, %v14003_v30  ;;  %18004 = vmatmul.msk.bf16.gmra.mxu1 %vm9124_vm4, %v20301_v29  ;;  %v14649_v58 = vrot.slane %v14647_v24, 1 }
 0x7b1   : > { %18068 = vmatmul.msk.bf16.gmra.mxu2 %vm9124_vm4, %v14642_v14  ;;  %v14267_v54 = vor.u32 %v14266_v2, %v14263_v7  ;;  %v14272_v14 = vrot.slane %v14270_v45, 3 }
 0x7b2   : > { %v24847_v22 = vadd.f32 %v13859_v43, %v13766_v40  ;;  %v14016_v40 = vshll.u32 %v24866_v6, 16 }
 0x7b3   : > { %v13239_v8 = vpop.f32.mrf.mxu3  ;;  %v14268_v43 = vsel %vm2595_vm1, %v24729_v49, %v14267_v54  ;;  %v14273_v49 = vshll.u32 %v24772_v13, 16 }
 0x7b4   : > { %v13240_v46 = vadd.f32 %v13239_v8, %v24659_v15  ;;  %v13862_v47 = vpop.f32.mrf.mxu2  ;;  %v13474_v51 = vpop.f32.mrf.mxu0 }
 0x7b5   : > { %v13735_v39 = vpop.f32.mrf.mxu1  ;;  %v14275_v62 = vrot.slane %v14273_v49, 4 }
 0x7b6   : > { %v13506_v18 = vadd.f32 %v13472_v12, %v13240_v46 }
 0x7b7   : > { %v14276_v13 = vor.u32 %v14275_v62, %v14272_v14 }
 0x7b8   : > { %v13767_v34 = vadd.f32 %v13733_v42, %v13506_v18  ;;  %v18622_v42 = vld [vmem:[#allocation3 + $0xc4] sm:$0xff] }
 0x7b9   : > { %v14655_v10 = vshll.u32 %v18622_v42, 16 }
 0x7ba   : > { %v24853_v5 = vadd.f32 %v13862_v47, %v13767_v34  ;;  %v14012_v47 = vshrl.u32 %v24849_v50, 16 }
 0x7bb   : > { %v13241_v48 = vpop.f32.mrf.mxu3  ;;  %v14657_v35 = vrot.slane %v14655_v10, 1 }
 0x7bc   : > { %v13242_v19 = vadd.f32 %v13241_v48, %v24676_v26  ;;  %v13864_v15 = vpop.f32.mrf.mxu2  ;;  %v13477_v31 = vpop.f32.mrf.mxu0  ;;  %v14650_v26 = vsel %vm2858_vm2, %v14645_v1, %v14649_v58  ;;  %v14014_v2 = vor.u32 %v14012_v47, %v14010_v21  ;;  %v24885_v21 = vld [vmem:[#allocation3 + $0xc0] sm:$0xff] }
 0x7bd   : > { %v13738_v37 = vpop.f32.mrf.mxu1 }
 0x7be   : > { %v13507_v17 = vadd.f32 %v13474_v51, %v13242_v19  ;;  %v14018_v51 = vrot.slane %v14016_v40, 1  ;;  %v14277_v19 = vsel %vm2595_vm1, %v14267_v54, %v14276_v13  ;;  %v14282_v54 = vshll.u32 %v24756_v61, 16 }
 0x7bf   : > { %17973 = vmatmul.msk.bf16.gmra.mxu0 %vm9124_vm4, %v14268_v43  ;;  %v14024_v43 = vshll.u32 %v24885_v21, 16 }
 0x7c0   : > { %v13768_v12 = vadd.f32 %v13735_v39, %v13507_v17  ;;  %17941 = vmatmul.msk.bf16.gmra.mxu3 %vm9124_vm4, %v14011_v9  ;;  %18005 = vmatmul.msk.bf16.gmra.mxu1 %vm9124_vm4, %v20303_v36  ;;  %v14651_v39 = vshrl.u32 %v18621_v55, 16  ;;  %v14019_v33 = vsel %vm2858_vm2, %v14014_v2, %v14018_v51  ;;  %v18623_v17 = vld [vmem:[#allocation3 + $0xcc] sm:$0xff] }
 0x7c1   : > { %18069 = vmatmul.msk.bf16.gmra.mxu2 %vm9124_vm4, %v14650_v26 }
 0x7c2   : > { %v24864_v25 = vadd.f32 %v13864_v15, %v13768_v12  ;;  %v14653_v48 = vor.u32 %v14651_v39, %v14649_v58  ;;  %v20305_v15 = vld [vmem:[#allocation3 + $0xbc] sm:$0xff]   ;;  %v14279_v58 = vshrl.u32 %v24756_v61, 16  ;;  %v14284_v12 = vrot.slane %v14282_v54, 4  ;;  %v24906_v39 = vld [vmem:[#allocation3 + $0xc8] sm:$0xff] }
 0x7c3   : > { %v13244_v63 = vpop.f32.mrf.mxu3 }
 0x7c4   : > { %v13245_v27 = vadd.f32 %v13244_v63, %v24690_v57  ;;  %v13867_v4 = vpop.f32.mrf.mxu2  ;;  %v13479_v52 = vpop.f32.mrf.mxu0  ;;  %v14281_v36 = vrot.slane %v14279_v58, 3  ;;  %v14663_v63 = vshll.u32 %v18623_v17, 16 }
 0x7c5   : > { %v13740_v29 = vpop.f32.mrf.mxu1 }
 0x7c6   : > { %v13508_v30 = vadd.f32 %v13477_v31, %v13245_v27  ;;  %v14020_v27 = vshrl.u32 %v24866_v6, 16  ;;  %v14285_v61 = vor.u32 %v14284_v12, %v14281_v36  ;;  %v24900_v6 = vld [vmem:[#allocation3 + $0xd0] sm:$0xff]  }
 0x7c8   : > { %v13769_v8 = vadd.f32 %v13738_v37, %v13508_v30  ;;  %v14659_v30 = vshrl.u32 %v18622_v42, 16  ;;  %v14022_v14 = vor.u32 %v14020_v27, %v14018_v51  ;;  %v14286_v47 = vsel %vm2595_vm1, %v14276_v13, %v14285_v61 }
 0x7c9   : > { %v14288_v13 = vshrl.u32 %v24900_v6, 16 }
 0x7ca   : > { %v24872_v16 = vadd.f32 %v13867_v4, %v13769_v8  ;;  %v14026_v4 = vrot.slane %v14024_v43, 1  ;;  %v14661_v10 = vor.u32 %v14659_v30, %v14657_v35  ;;  %v14563_v43 = vld [vmem:[#allocation3 + $0xdc] sm:$0x1] }
 0x7cb   : > { %v13246_v46 = vpop.f32.mrf.mxu3 }
 0x7cc   : > { %v13247_v57 = vadd.f32 %v13246_v46, %v24696_v32  ;;  %v13869_v18 = vpop.f32.mrf.mxu2  ;;  %v13482_v7 = vpop.f32.mrf.mxu0  ;;  %v14658_v32 = vsel %vm2858_vm2, %v14653_v48, %v14657_v35  ;;  %v14027_v46 = vsel %vm2858_vm2, %v14022_v14, %v14026_v4  ;;  %v14291_v35 = vshll.u32 %v24900_v6, 16 }
 0x7cd   : > { %v13743_v24 = vpop.f32.mrf.mxu1  ;;  %v14605_v14 = vunpack.c.l.b16 %v14563_v43 }
 0x7ce   : > { %v13509_v34 = vadd.f32 %v13479_v52, %v13247_v57  ;;  %v20307_v57 = vld [vmem:[#allocation3 + $0xc4] sm:$0xff]  }
 0x7cf   : > { %17974 = vmatmul.msk.bf16.gmra.mxu0 %vm9124_vm4, %v14277_v19  ;;  %v14173_v19 = vld [vmem:[#allocation3 + $0xd8] sm:$0xf] }
 0x7d0   : > { %v13770_v0 = vadd.f32 %v13740_v29, %v13509_v34  ;;  %17942 = vmatmul.msk.bf16.gmra.mxu3 %vm9124_vm4, %v14019_v33  ;;  %18006 = vmatmul.msk.bf16.gmra.mxu1 %vm9124_vm4, %v20305_v15  ;;  %v14665_v29 = vrot.slane %v14663_v63, 1  ;;  %v18624_v34 = vld [vmem:[#allocation3 + $0xd4] sm:$0xff]  ;;  %v14032_v15 = vshll.u32 %v24906_v39, 16  ;;  %v14215_v54 = vunpack.c.l.b16 %v14173_v19 }
 0x7d1   : > { %18070 = vmatmul.msk.bf16.gmra.mxu2 %vm9124_vm4, %v14658_v32  ;;  %v14293_v32 = vrot.slane %v14291_v35, 4  ;;  %v14671_v58 = vshll.u32 %v18624_v34, 16 }
 0x7d2   : > { %v24883_v50 = vadd.f32 %v13869_v18, %v13770_v0  ;;  %v14290_v0 = vrot.slane %v14288_v13, 3 }
 0x7d3   : > { %v13249_v55 = vpop.f32.mrf.mxu3  ;;  %v14673_v63 = vrot.slane %v14671_v58, 1 }
 0x7d4   : > { %v13250_v31 = vadd.f32 %v13249_v55, %v24716_v59  ;;  %v13872_v20 = vpop.f32.mrf.mxu2  ;;  %v13484_v37 = vpop.f32.mrf.mxu0 }
 0x7d5   : > { %v13745_v9 = vpop.f32.mrf.mxu1 }
 0x7d6   : > { %v13510_v1 = vadd.f32 %v13482_v7, %v13250_v31 }
 0x7d8   : > { %v13771_v26 = vadd.f32 %v13743_v24, %v13510_v1  ;;  %v14028_v1 = vshrl.u32 %v24885_v21, 16  ;;  %v20308_v21 = vld [vmem:[#allocation3 + $0xcc] sm:$0xff]  }
 0x7da   : > { %v24891_v45 = vadd.f32 %v13872_v20, %v13771_v26  ;;  %v14667_v20 = vshrl.u32 %v18623_v17, 16 }
 0x7db   : > { %v13251_v49 = vpop.f32.mrf.mxu3 }
 0x7dc   : > { %v13252_v59 = vadd.f32 %v13251_v49, %v24733_v44  ;;  %v13874_v52 = vpop.f32.mrf.mxu2  ;;  %v13487_v40 = vpop.f32.mrf.mxu0  ;;  %v14666_v44 = vsel %vm2858_vm2, %v14661_v10, %v14665_v29  ;;  %v14669_v26 = vor.u32 %v14667_v20, %v14665_v29  ;;  %v13924_v49 = vld [vmem:[#allocation3 + $0xd0] sm:$0x1] }
 0x7dd   : > { %v13748_v8 = vpop.f32.mrf.mxu1 }
 0x7de   : > { %v13511_v62 = vadd.f32 %v13484_v37, %v13252_v59  ;;  %v14030_v59 = vor.u32 %v14028_v1, %v14026_v4 }
 0x7df   : > { %17975 = vmatmul.msk.bf16.gmra.mxu0 %vm9124_vm4, %v14286_v47  ;;  %v14614_v47 = vpack.c.b16 %v14605_v14, %v14605_v14 }
 0x7e0   : > { %v13772_v18 = vadd.f32 %v13745_v9, %v13511_v62  ;;  %17943 = vmatmul.msk.bf16.gmra.mxu3 %vm9124_vm4, %v14027_v46  ;;  %18007 = vmatmul.msk.bf16.gmra.mxu1 %vm9124_vm4, %v20307_v57  ;;  %v14294_v9 = vor.u32 %v14293_v32, %v14290_v0  ;;  %v19348_v32 = vunpack.c.h.b16 %v24900_v6 }
 0x7e1   : > { %18071 = vmatmul.msk.bf16.gmra.mxu2 %vm9124_vm4, %v14666_v44 }
 0x7e2   : > { %v24904_v42 = vadd.f32 %v13874_v52, %v13772_v18  ;;  %v14224_v52 = vpack.c.b16 %v14215_v54, %v14215_v54  ;;  %v14295_v62 = vsel %vm2595_vm1, %v14285_v61, %v14294_v9 }
 0x7e3   : > { %v13254_v51 = vpop.f32.mrf.mxu3 }
 0x7e4   : > { %v13255_v7 = vadd.f32 %v13254_v51, %v24753_v23  ;;  %v13877_v2 = vpop.f32.mrf.mxu2  ;;  %v13489_v24 = vpop.f32.mrf.mxu0  ;;  %v14034_v23 = vrot.slane %v14032_v15, 1  ;;  %v14297_v4 = vshrl.u32 %v14224_v52, 16  ;;  %v14300_v29 = vshll.u32 %v14224_v52, 16 }
 0x7e5   : > { %v13750_v33 = vpop.f32.mrf.mxu1  ;;  %v14036_v15 = vshrl.u32 %v24906_v39, 16 }
 0x7e6   : > { %v13512_v48 = vadd.f32 %v13487_v40, %v13255_v7  ;;  %v14035_v17 = vsel %vm2858_vm2, %v14030_v59, %v14034_v23  ;;  %v14299_v13 = vrot.slane %v14297_v4, 3  ;;  %v14302_v35 = vrot.slane %v14300_v29, 4 }
 0x7e8   : > { %v13773_v55 = vadd.f32 %v13748_v8, %v13512_v48  ;;  %v13966_v8 = vunpack.c.l.b16 %v13924_v49  ;;  %v14679_v48 = vshll.u32 %v14614_v47, 16  ;;  %v14303_v0 = vor.u32 %v14302_v35, %v14299_v13  ;;  %v24950_v13 = vld [vmem:[%s25022_s7] ss:$0 sm:$0xff] }
 0x7ea   : > { %v24912_v31 = vadd.f32 %v13877_v2, %v13773_v55  ;;  %v13975_v61 = vpack.c.b16 %v13966_v8, %v13966_v8  ;;  %v14681_v20 = vrot.slane %v14679_v48, 1 }
 0x7eb   : > { %v13256_v37 = vpop.f32.mrf.mxu3 }
 0x7ec   : > { %v13257_v36 = vadd.f32 %v13256_v37, %v24761_v3  ;;  %v13879_v12 = vpop.f32.mrf.mxu2  ;;  %v13492_v27 = vpop.f32.mrf.mxu0  ;;  %v14674_v3 = vsel %vm2858_vm2, %v14669_v26, %v14673_v63  ;;  %v14038_v37 = vor.u32 %v14036_v15, %v14034_v23  ;;  %v14433_v26 = vpack.c.b16 %v14215_v54, %v19348_v32 }
 0x7ed   : > { %v13753_v40 = vpop.f32.mrf.mxu1 }
 0x7ee   : > { %v13513_v30 = vadd.f32 %v13489_v24, %v13257_v36  ;;  %v14675_v24 = vshrl.u32 %v18624_v34, 16  ;;  %v14304_v34 = vsel %vm2595_vm1, %v14294_v9, %v14303_v0 }
 0x7ef   : > { %17976 = vmatmul.msk.bf16.gmra.mxu0 %vm9124_vm4, %v14295_v62 }
 0x7f0   : > { %v13774_v10 = vadd.f32 %v13750_v33, %v13513_v30  ;;  %17944 = vmatmul.msk.bf16.gmra.mxu3 %vm9124_vm4, %v14035_v17  ;;  %18008 = vmatmul.msk.bf16.gmra.mxu1 %vm9124_vm4, %v20308_v21  ;;  %v14040_v33 = vshll.u32 %v13975_v61, 16  ;;  %v14677_v58 = vor.u32 %v14675_v24, %v14673_v63 }
 0x7f1   : > { %18072 = vmatmul.msk.bf16.gmra.mxu2 %vm9124_vm4, %v14674_v3 }
 0x7f2   : > { %v24923_v46 = vadd.f32 %v13879_v12, %v13774_v10  ;;  %v14042_v1 = vrot.slane %v14040_v33, 1  ;;  %v14682_v39 = vsel %vm2858_vm2, %v14677_v58, %v14681_v20 }
 0x7f3   : > { %v13259_v57 = vpop.f32.mrf.mxu3 }
 0x7f4   : > { %v13260_v18 = vadd.f32 %v13259_v57, %v24779_v53  ;;  %v13882_v44 = vpop.f32.mrf.mxu2  ;;  %v13494_v51 = vpop.f32.mrf.mxu0  ;;  %v14043_v6 = vsel %vm2858_vm2, %v14038_v37, %v14042_v1 }
 0x7f5   : > { %v13755_v2 = vpop.f32.mrf.mxu1 }
 0x7f6   : > { %v13514_v7 = vadd.f32 %v13492_v27, %v13260_v18 }
 0x7f8   : > { %v13775_v19 = vadd.f32 %v13753_v40, %v13514_v7 }
 0x7fa   : > { %v24928_v55 = vadd.f32 %v13882_v44, %v13775_v19 }
 0x7fb   : > { %v13261_v53 = vpop.f32.mrf.mxu3 }
 0x7fc   : > { %v13262_v43 = vadd.f32 %v13261_v53, %v24786_v41  ;;  %v13884_v36 = vpop.f32.mrf.mxu2  ;;  %v13497_v12 = vpop.f32.mrf.mxu0 }
 0x7fd   : > { %v13758_v27 = vpop.f32.mrf.mxu1 }
 0x7fe   : > { %v13515_v49 = vadd.f32 %v13494_v51, %v13262_v43 }
 0x7ff   : > { %17977 = vmatmul.msk.bf16.gmra.mxu0 %vm9124_vm4, %v14304_v34 }
 0x800   : > { %v13776_v59 = vadd.f32 %v13755_v2, %v13515_v49  ;;  %17945 = vmatmul.msk.bf16.gmra.mxu3 %vm9124_vm4, %v14043_v6  ;;  %18009 = vmatmul.msk.bf16.gmra.mxu1 %vm9124_vm4, %v14433_v26 }
 0x801   : > { %18073 = vmatmul.msk.bf16.gmra.mxu2 %vm9124_vm4, %v14682_v39 }
 0x802   : > { %v24938_v41 = vadd.f32 %v13884_v36, %v13776_v59 }
 0x803   : > { %v13264_v23 = vpop.f32.mrf.mxu3 }
 0x804   : > { %v13265_v54 = vadd.f32 %v13264_v23, %v24801_v38  ;;  %v13887_v9 = vpop.f32.mrf.mxu2  ;;  %v13499_v63 = vpop.f32.mrf.mxu0 }
 0x805   : > { %v13760_v30 = vpop.f32.mrf.mxu1 }
 0x806   : > { %v13516_v52 = vadd.f32 %v13497_v12, %v13265_v54 }
 0x808   : > { %v13777_v40 = vadd.f32 %v13758_v27, %v13516_v52 }
 0x80a   : > { %v24941_v14 = vadd.f32 %v13887_v9, %v13777_v40 }
 0x80b   : > { %v13266_v17 = vpop.f32.mrf.mxu3 }
 0x80c   : > { %v13267_v62 = vadd.f32 %v13266_v17, %v24810_v56  ;;  %v13889_v21 = vpop.f32.mrf.mxu2  ;;  %v14362_v8 = vpop.f32.mrf.mxu0 }
 0x80d   : > { %v14491_v3 = vpop.f32.mrf.mxu1 }
 0x80e   : > { %v13517_v10 = vadd.f32 %v13499_v63, %v13267_v62 }
 0x810   : > { %v13778_v4 = vadd.f32 %v13760_v30, %v13517_v10 }
 0x812   : > { %v24944_v29 = vadd.f32 %v13889_v21, %v13778_v4 }
 0x813   : > { %v14101_v47 = vpop.f32.mrf.mxu3 }
 0x814   : > { %v14141_v38 = vadd.f32 %v14101_v47, %v24822_v11  ;;  %v14740_v57 = vpop.f32.mrf.mxu2  ;;  %v14364_v61 = vpop.f32.mrf.mxu0 }
 0x815   : > { %v14493_v44 = vpop.f32.mrf.mxu1 }
 0x816   : > { %v14402_v18 = vadd.f32 %v14362_v8, %v14141_v38 }
 0x818   : > { %v14531_v51 = vadd.f32 %v14491_v3, %v14402_v18 }
 0x81a   : > { %v14780_v56 = vadd.f32 %v14740_v57, %v14531_v51 }
 0x81b   : > { %v14103_v35 = vpop.f32.mrf.mxu3 }
 0x81c   : > { %v14800_v7 = vadd.f32 %v24950_v13, %v14780_v56  ;;  %v14142_v2 = vadd.f32 %v14103_v35, %v24834_v28  ;;  %v14742_v24 = vpop.f32.mrf.mxu2  ;;  %v14367_v48 = vpop.f32.mrf.mxu0 }
 0x81d   : > { %v14496_v11 = vpop.f32.mrf.mxu1 }
 0x81e   : > { %v14403_v33 = vadd.f32 %v14364_v61, %v14142_v2  ;;  %14816 = vxpose.xlu2.b32.start [1/16] (narrow) %v14800_v7, 8 }
 0x820   : > { %v14532_v19 = vadd.f32 %v14493_v44, %v14403_v33 }
 0x822   : > { %v14781_v15 = vadd.f32 %v14742_v24, %v14532_v19 }
 0x823   : > { %v14106_v0 = vpop.f32.mrf.mxu3 }
 0x824   : > { %v14801_v32 = vadd.f32 %v24950_v13, %v14781_v15  ;;  %v14143_v58 = vadd.f32 %v14106_v0, %v24837_v60  ;;  %v14745_v20 = vpop.f32.mrf.mxu2  ;;  %v14369_v53 = vpop.f32.mrf.mxu0 }
 0x825   : > { %v14498_v1 = vpop.f32.mrf.mxu1 }
 0x826   : > { %v14404_v37 = vadd.f32 %v14367_v48, %v14143_v58  ;;  %14817 = vxpose.xlu2.b32.cont [2/16] (narrow) %v14801_v32, 8 }
 0x828   : > { %v14533_v43 = vadd.f32 %v14496_v11, %v14404_v37 }
 0x82a   : > { %v14782_v36 = vadd.f32 %v14745_v20, %v14533_v43 }
 0x82b   : > { %v14108_v28 = vpop.f32.mrf.mxu3 }
 0x82c   : > { %v14802_v12 = vadd.f32 %v24950_v13, %v14782_v36  ;;  %v14144_v34 = vadd.f32 %v14108_v28, %v24847_v22  ;;  %v14747_v26 = vpop.f32.mrf.mxu2  ;;  %v14372_v49 = vpop.f32.mrf.mxu0 }
 0x82d   : > { %v14501_v39 = vpop.f32.mrf.mxu1 }
 0x82e   : > { %v14405_v27 = vadd.f32 %v14369_v53, %v14144_v34  ;;  %14818 = vxpose.xlu2.b32.cont [3/16] (narrow) %v14802_v12, 8 }
 0x830   : > { %v14534_v6 = vadd.f32 %v14498_v1, %v14405_v27 }
 0x832   : > { %v14783_v59 = vadd.f32 %v14747_v26, %v14534_v6 }
 0x833   : > { %v14111_v60 = vpop.f32.mrf.mxu3 }
 0x834   : > { %v14803_v23 = vadd.f32 %v24950_v13, %v14783_v59  ;;  %v14145_v54 = vadd.f32 %v14111_v60, %v24853_v5  ;;  %v14750_v9 = vpop.f32.mrf.mxu2  ;;  %v14374_v63 = vpop.f32.mrf.mxu0 }
 0x835   : > { %v14503_v30 = vpop.f32.mrf.mxu1 }
 0x836   : > { %v14406_v52 = vadd.f32 %v14372_v49, %v14145_v54  ;;  %14819 = vxpose.xlu2.b32.cont [4/16] (narrow) %v14803_v23, 8 }
 0x838   : > { %v14535_v40 = vadd.f32 %v14501_v39, %v14406_v52 }
 0x83a   : > { %v14784_v17 = vadd.f32 %v14750_v9, %v14535_v40 }
 0x83b   : > { %v14113_v22 = vpop.f32.mrf.mxu3 }
 0x83c   : > { %v14804_v62 = vadd.f32 %v24950_v13, %v14784_v17  ;;  %v14146_v21 = vadd.f32 %v14113_v22, %v24864_v25  ;;  %v14752_v8 = vpop.f32.mrf.mxu2  ;;  %v14377_v10 = vpop.f32.mrf.mxu0 }
 0x83d   : > { %v14506_v4 = vpop.f32.mrf.mxu1 }
 0x83e   : > { %v14407_v3 = vadd.f32 %v14374_v63, %v14146_v21  ;;  %14820 = vxpose.xlu2.b32.cont [5/16] (narrow) %v14804_v62, 8 }
 0x840   : > { %v14536_v47 = vadd.f32 %v14503_v30, %v14407_v3 }
 0x842   : > { %v14785_v38 = vadd.f32 %v14752_v8, %v14536_v47 }
 0x843   : > { %v14116_v5 = vpop.f32.mrf.mxu3 }
 0x844   : > { %v14805_v57 = vadd.f32 %v24950_v13, %v14785_v38  ;;  %v14147_v61 = vadd.f32 %v14116_v5, %v24872_v16  ;;  %v14755_v18 = vpop.f32.mrf.mxu2  ;;  %v14379_v44 = vpop.f32.mrf.mxu0 }
 0x845   : > { %v14508_v56 = vpop.f32.mrf.mxu1 }
 0x846   : > { %v14408_v51 = vadd.f32 %v14377_v10, %v14147_v61  ;;  %14821 = vxpose.xlu2.b32.cont [6/16] (narrow) %v14805_v57, 8 }
 0x848   : > { %v14537_v35 = vadd.f32 %v14506_v4, %v14408_v51 }
 0x84a   : > { %v14786_v7 = vadd.f32 %v14755_v18, %v14537_v35 }
 0x84b   : > { %v14118_v25 = vpop.f32.mrf.mxu3 }
 0x84c   : > { %v14806_v2 = vadd.f32 %v24950_v13, %v14786_v7  ;;  %v14148_v24 = vadd.f32 %v14118_v25, %v24883_v50  ;;  %v14757_v48 = vpop.f32.mrf.mxu2  ;;  %v14382_v33 = vpop.f32.mrf.mxu0 }
 0x84d   : > { %v14511_v19 = vpop.f32.mrf.mxu1 }
 0x84e   : > { %v14409_v11 = vadd.f32 %v14379_v44, %v14148_v24  ;;  %14822 = vxpose.xlu2.b32.cont [7/16] (narrow) %v14806_v2, 8 }
 0x850   : > { %v14538_v15 = vadd.f32 %v14508_v56, %v14409_v11 }
 0x852   : > { %v14787_v0 = vadd.f32 %v14757_v48, %v14538_v15 }
 0x853   : > { %v14121_v16 = vpop.f32.mrf.mxu3 }
 0x854   : > { %v14807_v32 = vadd.f32 %v24950_v13, %v14787_v0  ;;  %v14149_v58 = vadd.f32 %v14121_v16, %v24891_v45  ;;  %v14760_v20 = vpop.f32.mrf.mxu2  ;;  %v14384_v53 = vpop.f32.mrf.mxu0 }
 0x855   : > { %v14513_v1 = vpop.f32.mrf.mxu1 }
 0x856   : > { %v14410_v37 = vadd.f32 %v14382_v33, %v14149_v58  ;;  %14823 = vxpose.xlu2.b32.cont [8/16] (narrow) %v14807_v32, 8 }
 0x858   : > { %v14539_v43 = vadd.f32 %v14511_v19, %v14410_v37 }
 0x85a   : > { %v14788_v36 = vadd.f32 %v14760_v20, %v14539_v43 }
 0x85b   : > { %v14123_v50 = vpop.f32.mrf.mxu3 }
 0x85c   : > { %v14808_v28 = vadd.f32 %v24950_v13, %v14788_v36  ;;  %v14150_v12 = vadd.f32 %v14123_v50, %v24904_v42  ;;  %v14762_v34 = vpop.f32.mrf.mxu2  ;;  %v14387_v26 = vpop.f32.mrf.mxu0 }
 0x85d   : > { %v14516_v27 = vpop.f32.mrf.mxu1  ;;  %v12894_v50 = vpop.trf.xlu1 }
 0x85e   : > { %v14411_v49 = vadd.f32 %v14384_v53, %v14150_v12  ;;  %14824 = vxpose.xlu2.b32.cont [9/16] (narrow) %v14808_v28, 8  ;;  %v10956_v28 = vpop.trf.xlu0  ;;  %12910 = vst [vmem:[%s298_s25 + $0x2] sm:$0x3] %v12894_v50 }
 0x85f   : > { %10972 = vst [vmem:[%s298_s25] sm:$0x3] %v10956_v28 }
 0x860   : > { %v14540_v39 = vadd.f32 %v14513_v1, %v14411_v49 }
 0x862   : > { %v14789_v6 = vadd.f32 %v14762_v34, %v14540_v39 }
 0x863   : > { %v14126_v45 = vpop.f32.mrf.mxu3 }
 0x864   : > { %v14809_v59 = vadd.f32 %v24950_v13, %v14789_v6  ;;  %v14151_v60 = vadd.f32 %v14126_v45, %v24912_v31  ;;  %v14765_v23 = vpop.f32.mrf.mxu2  ;;  %v14389_v54 = vpop.f32.mrf.mxu0 }
 0x865   : > { %v14518_v52 = vpop.f32.mrf.mxu1 }
 0x866   : > { %v14412_v9 = vadd.f32 %v14387_v26, %v14151_v60  ;;  %14825 = vxpose.xlu2.b32.cont [10/16] (narrow) %v14809_v59, 8 }
 0x868   : > { %v14541_v63 = vadd.f32 %v14516_v27, %v14412_v9 }
 0x86a   : > { %v14790_v30 = vadd.f32 %v14765_v23, %v14541_v63 }
 0x86b   : > { %v14128_v42 = vpop.f32.mrf.mxu3 }
 0x86c   : > { %v14810_v40 = vadd.f32 %v24950_v13, %v14790_v30  ;;  %v14152_v17 = vadd.f32 %v14128_v42, %v24923_v46  ;;  %v14767_v22 = vpop.f32.mrf.mxu2  ;;  %v14392_v21 = vpop.f32.mrf.mxu0 }
 0x86d   : > { %v14521_v3 = vpop.f32.mrf.mxu1 }
 0x86e   : > { %v14413_v62 = vadd.f32 %v14389_v54, %v14152_v17  ;;  %14826 = vxpose.xlu2.b32.cont [11/16] (narrow) %v14810_v40, 8 }
 0x870   : > { %v14542_v8 = vadd.f32 %v14518_v52, %v14413_v62 }
 0x872   : > { %v14791_v10 = vadd.f32 %v14767_v22, %v14542_v8 }
 0x873   : > { %v14131_v31 = vpop.f32.mrf.mxu3 }
 0x874   : > { %v14811_v4 = vadd.f32 %v24950_v13, %v14791_v10  ;;  %v14153_v47 = vadd.f32 %v14131_v31, %v24928_v55  ;;  %v14770_v38 = vpop.f32.mrf.mxu2  ;;  %v14394_v61 = vpop.f32.mrf.mxu0 }
 0x875   : > { %v14523_v56 = vpop.f32.mrf.mxu1 }
 0x876   : > { %v14414_v5 = vadd.f32 %v14392_v21, %v14153_v47  ;;  %14827 = vxpose.xlu2.b32.cont [12/16] (narrow) %v14811_v4, 8 }
 0x878   : > { %v14543_v57 = vadd.f32 %v14521_v3, %v14414_v5 }
 0x87a   : > { %v14792_v18 = vadd.f32 %v14770_v38, %v14543_v57 }
 0x87b   : > { %v14133_v44 = vpop.f32.mrf.mxu3 }
 0x87c   : > { %v14812_v46 = vadd.f32 %v24950_v13, %v14792_v18  ;;  %v14154_v51 = vadd.f32 %v14133_v44, %v24938_v41  ;;  %v14772_v35 = vpop.f32.mrf.mxu2  ;;  %v14397_v24 = vpop.f32.mrf.mxu0 }
 0x87d   : > { %v14526_v11 = vpop.f32.mrf.mxu1 }
 0x87e   : > { %v14415_v7 = vadd.f32 %v14394_v61, %v14154_v51  ;;  %14828 = vxpose.xlu2.b32.cont [13/16] (narrow) %v14812_v46, 8 }
 0x880   : > { %v14544_v25 = vadd.f32 %v14523_v56, %v14415_v7 }
 0x882   : > { %v14793_v2 = vadd.f32 %v14772_v35, %v14544_v25 }
 0x883   : > { %v14136_v48 = vpop.f32.mrf.mxu3 }
 0x884   : > { %v14813_v55 = vadd.f32 %v24950_v13, %v14793_v2  ;;  %v14155_v33 = vadd.f32 %v14136_v48, %v24941_v14  ;;  %v14775_v15 = vpop.f32.mrf.mxu2  ;;  %v14399_v20 = vpop.f32.mrf.mxu0 }
 0x885   : > { %v14528_v37 = vpop.f32.mrf.mxu1 }
 0x886   : > { %v14416_v19 = vadd.f32 %v14397_v24, %v14155_v33  ;;  %14829 = vxpose.xlu2.b32.cont [14/16] (narrow) %v14813_v55, 8 }
 0x888   : > { %v14545_v0 = vadd.f32 %v14526_v11, %v14416_v19 }
 0x88a   : > { %v14794_v16 = vadd.f32 %v14775_v15, %v14545_v0 }
 0x88b   : > { %v14138_v41 = vpop.f32.mrf.mxu3 }
 0x88c   : > { %v14814_v32 = vadd.f32 %v24950_v13, %v14794_v16  ;;  %v14156_v58 = vadd.f32 %v14138_v41, %v24944_v29  ;;  %v14777_v43 = vpop.f32.mrf.mxu2 }
 0x88e   : > { %v14417_v53 = vadd.f32 %v14399_v20, %v14156_v58  ;;  %14830 = vxpose.xlu2.b32.cont [15/16] (narrow) %v14814_v32, 8 }
 0x890   : > { %v14546_v1 = vadd.f32 %v14528_v37, %v14417_v53 }
 0x892   : > { %v14795_v14 = vadd.f32 %v14777_v43, %v14546_v1 }
 0x894   : > { %v14815_v36 = vadd.f32 %v24950_v13, %v14795_v14 }
 0x896   : > { %14831 = vxpose.xlu2.b32.end [16/16] (narrow) %v14815_v36, 8 }
 0x8b7   : > { %v14832_v29 = vpop.trf.xlu2 }
 0x8b8   : > { %14848 = vst [vmem:[%s298_s25 + $0x4] sm:$0x3] %v14832_v29 }
 0x8b9   : > { %20583 = shalt.err (!%p20580_p3)
}
 0x8ba   : > { %20492 = dma.vmem_to_hbm [thread:$0]  (%p20715_p5), %s14864_s23, 96, %s14866_s12, %s14850_s18  }
 0x8bb PF: > { %p20498_p4 = scmp.ge.s32.totalorder %s20629_s30, 2  ;;  %s14877_s22 = sand.u32 1, %s20617_s27  }
 0x8bc   : > { %s14878_s25 = scalar_lea.sflag [#allocation5], %s14877_s22 }
 0x8bd   : > { %p20495_p7 = pnand %p20498_p4, %p20719_p6 }
 0x8bf   : > { %p20496_p8 = pneg %p20495_p7 }
 0x8c1   : > { %20601 = dma.done.wait (%p20496_p8), %s14878_s25, 96  }
 0x8c2   : > { %20603 = vsyncadd (%p20496_p8), %s14878_s25, 4294967200  ;;  %p18_p9 = scmp.ge.s32.totalorder %s20702_s11, 4   ;;  %s25026_s27 = smov %s20621_s28 }
 0x8c3   : > { %s25027_s28 = smov %s20625_s29  ;;  %s25028_s29 = smov %s20713_s14 }
 0x8c4   : > { %s25029_s30 = smov %s20702_s11  ;;  %20 = sbr.rel (!%p18_p9) target bundleno = 3 (0x3), region = 105 }
 0x8c9   :  { %14884 = vsyncpa [#allocation5], 1 }
 0x8ca   :  { %14886 = vsyncpa [#allocation5 + $0x1], 1 }

</bundles_post_ra>
